<compile_context>
chip_gen: v5e
topology: v5e:2x2
jax: 0.10.0
libtpu: 0.0.40
codegen_flags: <defaults>
</compile_context>

<pallas_src>
import numpy as np
import jax
import jax.numpy as jnp
from jax.experimental import pallas as pl
from jax.experimental.pallas import tpu as pltpu


_PACK_ORDER = ("A1", "b1", "A2", "b2", "Sr1", "Sc1", "Sr2", "Sc2",
               "Wf1", "bf1", "Wf2", "bf2", "Wf3", "bf3")


# --------------------------------------------------------------------------
# Fused LeNet-5 kernel (one batch tile per grid step).
# --------------------------------------------------------------------------
def _lenet_kernel(x_ref, a1_ref, b1_ref, a2_ref, b2_ref,
                  sr1_ref, sc1_ref, sr2_ref, sc2_ref,
                  wf1_ref, bf1_ref, wf2_ref, bf2_ref, wf3_ref, bf3_ref,
                  out_ref):
    B = x_ref.shape[0]
    f32 = jnp.float32
    bf16 = jnp.bfloat16

    def bdot(a, b):  # (B, M, K) @ (B, K, N) -> (B, M, N), f32 accumulation
        return jax.lax.dot_general(
            a, b, (((2,), (1,)), ((0,), (0,))), preferred_element_type=f32)

    def bcast(w):    # (K, N) -> (B, K, N)
        return jnp.broadcast_to(w, (B,) + w.shape)

    x = x_ref[...]                                          # (B, 32, 32) f32

    # ---- conv1 (1 -> 6, 5x5): 5 band matmuls; output lanes = co*28 + ow ----
    acc1 = jnp.zeros((B, 28, 168), f32)
    for kh in range(5):
        xs = x[:, kh:kh + 28, :].astype(bf16)               # (B, 28, 32)
        acc1 = acc1 + bdot(xs, bcast(a1_ref[kh]))           # (B, 28, 168)
    y1 = jnp.maximum(acc1 + b1_ref[...], 0.0)               # bias + ReLU (f32)

    # ---- fused MaxPool2d(2,2): adjacent max + even-index selection matmuls -
    mh = jnp.maximum(y1[:, :-1, :], y1[:, 1:, :])           # (B, 27, 168)
    mw = jnp.maximum(mh[:, :, :-1], mh[:, :, 1:])           # (B, 27, 167)
    p1 = bdot(bdot(bcast(sr1_ref[...]), mw), bcast(sc1_ref[...]))  # (B,14,84)
    # p1[b, r, ci*14 + c] == pooled conv1 activation [b, ci, r, c]

    # ---- conv2 (6 -> 16, 5x5): 5 band matmuls over (ci, width) -------------
    acc2 = jnp.zeros((B, 10, 160), f32)
    for kh in range(5):
        ps = p1[:, kh:kh + 10, :].astype(bf16)              # (B, 10, 84)
        acc2 = acc2 + bdot(ps, bcast(a2_ref[kh]))           # (B, 10, 160)
    y2 = jnp.maximum(acc2 + b2_ref[...], 0.0)

    # ---- fused MaxPool2d(2,2) -> (B, 5, 80), lanes = co*5 + c --------------
    mh2 = jnp.maximum(y2[:, :-1, :], y2[:, 1:, :])          # (B, 9, 160)
    mw2 = jnp.maximum(mh2[:, :, :-1], mh2[:, :, 1:])        # (B, 9, 159)
    p2 = bdot(bdot(bcast(sr2_ref[...]), mw2), bcast(sc2_ref[...]))  # (B,5,80)

    # ---- fc1 (400 -> 120, padded to 128 lanes), 5 row-slice matmuls --------
    h = jnp.zeros((B, 1, 128), f32)
    for r in range(5):
        h = h + bdot(p2[:, r:r + 1, :].astype(bf16), bcast(wf1_ref[r]))
    h1 = jnp.maximum(h + bf1_ref[...], 0.0)                 # (B, 1, 128)

    # ---- fc2 (120 -> 84, padded to 128 lanes) ------------------------------
    h2 = jnp.maximum(bdot(h1.astype(bf16), bcast(wf2_ref[...])) + bf2_ref[...],
                     0.0)                                   # (B, 1, 128)

    # ---- fc3 (84 -> 10, padded to 128) + fused, stable log_softmax ---------
    logits = bdot(h2.astype(bf16), bcast(wf3_ref[...])) + bf3_ref[...]
    m = jnp.max(logits, axis=-1, keepdims=True)
    e = jnp.exp(logits - m)
    s = jnp.sum(e, axis=-1, keepdims=True)
    out_ref[...] = (logits - m - jnp.log(s)).astype(out_ref.dtype)  # (B,1,128)


# --------------------------------------------------------------------------
# Host-side parameter packing (band matrices, padded FC weights, selections).
# --------------------------------------------------------------------------
def init_lenet_params(key):
    ks = jax.random.split(key, 10)

    def u(k, shape, fan_in):
        lim = 1.0 / float(np.sqrt(fan_in))
        return jax.random.uniform(k, shape, jnp.float32, -lim, lim)

    return dict(
        w1=u(ks[0], (6, 1, 5, 5), 25),   b1=u(ks[1], (6,), 25),
        w2=u(ks[2], (16, 6, 5, 5), 150), b2=u(ks[3], (16,), 150),
        wf1=u(ks[4], (120, 400), 400),   bf1=u(ks[5], (120,), 400),
        wf2=u(ks[6], (84, 120), 120),    bf2=u(ks[7], (84,), 120),
        wf3=u(ks[8], (10, 84), 84),      bf3=u(ks[9], (10,), 84),
    )


def pack_lenet_params(params):
    w1 = np.asarray(params["w1"], np.float32)
    b1 = np.asarray(params["b1"], np.float32)
    w2 = np.asarray(params["w2"], np.float32)
    b2 = np.asarray(params["b2"], np.float32)
    wf1 = np.asarray(params["wf1"], np.float32)
    bf1 = np.asarray(params["bf1"], np.float32)
    wf2 = np.asarray(params["wf2"], np.float32)
    bf2 = np.asarray(params["bf2"], np.float32)
    wf3 = np.asarray(params["wf3"], np.float32)
    bf3 = np.asarray(params["bf3"], np.float32)

    # conv1 band matrices: A1[kh, w, co*28 + ow] = w1[co, 0, kh, w - ow]
    A1 = np.zeros((5, 32, 6 * 28), np.float32)
    for kh in range(5):
        for co in range(6):
            for ow in range(28):
                for kw in range(5):
                    A1[kh, ow + kw, co * 28 + ow] = w1[co, 0, kh, kw]
    b1rep = np.zeros((1, 6 * 28), np.float32)
    for co in range(6):
        b1rep[0, co * 28:(co + 1) * 28] = b1[co]

    # conv2 band matrices: A2[kh, ci*14 + w, co*10 + ow] = w2[co, ci, kh, w - ow]
    A2 = np.zeros((5, 6 * 14, 16 * 10), np.float32)
    for kh in range(5):
        for co in range(16):
            for ci in range(6):
                for ow in range(10):
                    for kw in range(5):
                        A2[kh, ci * 14 + ow + kw, co * 10 + ow] = w2[co, ci, kh, kw]
    b2rep = np.zeros((1, 160), np.float32)
    for co in range(16):
        b2rep[0, co * 10:(co + 1) * 10] = b2[co]

    # 0/1 even-index selection matrices for fused 2x2 max pooling.
    Sr1 = np.zeros((14, 27), np.float32)
    for i in range(14):
        Sr1[i, 2 * i] = 1.0
    Sc1 = np.zeros((167, 84), np.float32)
    for co in range(6):
        for j in range(14):
            Sc1[co * 28 + 2 * j, co * 14 + j] = 1.0
    Sr2 = np.zeros((5, 9), np.float32)
    for i in range(5):
        Sr2[i, 2 * i] = 1.0
    Sc2 = np.zeros((159, 80), np.float32)
    for co in range(16):
        for j in range(5):
            Sc2[co * 10 + 2 * j, co * 5 + j] = 1.0

    # fc1: pooled2 feature (co, i, j) -> PyTorch flat index co*25 + i*5 + j.
    Wf1 = np.zeros((5, 80, 128), np.float32)
    for i in range(5):
        for co in range(16):
            for j in range(5):
                Wf1[i, co * 5 + j, :120] = wf1[:, co * 25 + i * 5 + j]
    bf1p = np.zeros((1, 128), np.float32)
    bf1p[0, :120] = bf1

    Wf2 = np.zeros((128, 128), np.float32)
    Wf2[:120, :84] = wf2.T
    bf2p = np.zeros((1, 128), np.float32)
    bf2p[0, :84] = bf2

    Wf3 = np.zeros((128, 128), np.float32)
    Wf3[:84, :10] = wf3.T
    bf3p = np.full((1, 128), -1e30, np.float32)   # padded logits -> exp() == 0
    bf3p[0, :10] = bf3

    as_bf16 = lambda a: jnp.asarray(a, jnp.bfloat16)
    as_f32 = lambda a: jnp.asarray(a, jnp.float32)
    return dict(
        A1=as_bf16(A1), b1=as_f32(b1rep), A2=as_bf16(A2), b2=as_f32(b2rep),
        Sr1=as_f32(Sr1), Sc1=as_f32(Sc1), Sr2=as_f32(Sr2), Sc2=as_f32(Sc2),
        Wf1=as_bf16(Wf1), bf1=as_f32(bf1p), Wf2=as_bf16(Wf2), bf2=as_f32(bf2p),
        Wf3=as_bf16(Wf3), bf3=as_f32(bf3p),
    )


# --------------------------------------------------------------------------
# Wrapper: one fused pallas_call over batch tiles.
# --------------------------------------------------------------------------
def lenet_forward(x, packed, *, block_b=8):
    n = x.shape[0]
    xin = jnp.asarray(x, jnp.float32).reshape(n, 32, 32)
    n_pad = ((n + block_b - 1) // block_b) * block_b
    if n_pad != n:
        xin = jnp.pad(xin, ((0, n_pad - n), (0, 0), (0, 0)))

    weights = [packed[k] for k in _PACK_ORDER]

    def const_spec(a):
        nd = a.ndim
        return pl.BlockSpec(a.shape, lambda i, _nd=nd: (0,) * _nd)

    out = pl.pallas_call(
        _lenet_kernel,
        grid=(n_pad // block_b,),
        in_specs=[pl.BlockSpec((block_b, 32, 32), lambda i: (i, 0, 0))]
                 + [const_spec(w) for w in weights],
        out_specs=pl.BlockSpec((block_b, 1, 128), lambda i: (i, 0, 0)),
        out_shape=jax.ShapeDtypeStruct((n_pad, 1, 128), jnp.float32),
        compiler_params=pltpu.CompilerParams(
            dimension_semantics=("parallel",)),
    )(xin, *weights)

    # Drop batch padding and the 118 padded class lanes (cheap XLA slice).
    return out.reshape(n_pad, 128)[:n, :10]


if __name__ == "__main__":
    key = jax.random.PRNGKey(0)
    kx, kp = jax.random.split(key)

    params = init_lenet_params(kp)
    packed = pack_lenet_params(params)

    x = jax.random.normal(kx, (8, 1, 32, 32), jnp.float32)  # LeNet-5 32x32 input
    out = jax.jit(lenet_forward)(x, packed)
    jax.block_until_ready(out)

    assert out.shape == (8, 10)
    print("KERNEL_OK")
</pallas_src>

<mosaic_0001>
module attributes {stable_mosaic.version = 11 : i64} {
  func.func @_lenet_kernel(%arg0: i32, %arg1: memref<8x32x32xf32, #tpu.memory_space<vmem>>, %arg2: memref<5x32x168xbf16, #tpu.memory_space<vmem>>, %arg3: memref<1x168xf32, #tpu.memory_space<vmem>>, %arg4: memref<5x84x160xbf16, #tpu.memory_space<vmem>>, %arg5: memref<1x160xf32, #tpu.memory_space<vmem>>, %arg6: memref<14x27xf32, #tpu.memory_space<vmem>>, %arg7: memref<167x84xf32, #tpu.memory_space<vmem>>, %arg8: memref<5x9xf32, #tpu.memory_space<vmem>>, %arg9: memref<159x80xf32, #tpu.memory_space<vmem>>, %arg10: memref<5x80x128xbf16, #tpu.memory_space<vmem>>, %arg11: memref<1x128xf32, #tpu.memory_space<vmem>>, %arg12: memref<128x128xbf16, #tpu.memory_space<vmem>>, %arg13: memref<1x128xf32, #tpu.memory_space<vmem>>, %arg14: memref<128x128xbf16, #tpu.memory_space<vmem>>, %arg15: memref<1x128xf32, #tpu.memory_space<vmem>>, %arg16: memref<8x1x128xf32, #tpu.memory_space<vmem>>) attributes {dimension_semantics = [#tpu.dimension_semantics<parallel>], iteration_bounds = array<i64: 1>, scalar_prefetch = 0 : i64, scratch_operands = 0 : i64, tpu.core_type = #tpu.core_type<tc>, window_params = [{transform_indices = @transform_0, window_bounds = array<i64: 8, 32, 32>}, {pipeline_mode = #tpu.pipeline_mode<synchronous>, transform_indices = @transform_1, window_bounds = array<i64: 5, 32, 168>}, {pipeline_mode = #tpu.pipeline_mode<synchronous>, transform_indices = @transform_2, window_bounds = array<i64: 1, 168>}, {pipeline_mode = #tpu.pipeline_mode<synchronous>, transform_indices = @transform_3, window_bounds = array<i64: 5, 84, 160>}, {pipeline_mode = #tpu.pipeline_mode<synchronous>, transform_indices = @transform_4, window_bounds = array<i64: 1, 160>}, {pipeline_mode = #tpu.pipeline_mode<synchronous>, transform_indices = @transform_5, window_bounds = array<i64: 14, 27>}, {pipeline_mode = #tpu.pipeline_mode<synchronous>, transform_indices = @transform_6, window_bounds = array<i64: 167, 84>}, {pipeline_mode = #tpu.pipeline_mode<synchronous>, transform_indices = @transform_7, window_bounds = array<i64: 5, 9>}, {pipeline_mode = #tpu.pipeline_mode<synchronous>, transform_indices = @transform_8, window_bounds = array<i64: 159, 80>}, {pipeline_mode = #tpu.pipeline_mode<synchronous>, transform_indices = @transform_9, window_bounds = array<i64: 5, 80, 128>}, {pipeline_mode = #tpu.pipeline_mode<synchronous>, transform_indices = @transform_10, window_bounds = array<i64: 1, 128>}, {pipeline_mode = #tpu.pipeline_mode<synchronous>, transform_indices = @transform_11, window_bounds = array<i64: 128, 128>}, {pipeline_mode = #tpu.pipeline_mode<synchronous>, transform_indices = @transform_12, window_bounds = array<i64: 1, 128>}, {pipeline_mode = #tpu.pipeline_mode<synchronous>, transform_indices = @transform_13, window_bounds = array<i64: 128, 128>}, {pipeline_mode = #tpu.pipeline_mode<synchronous>, transform_indices = @transform_14, window_bounds = array<i64: 1, 128>}, {transform_indices = @transform_15, window_bounds = array<i64: 8, 1, 128>}]} {
    %c0 = arith.constant 0 : index
    %c0_0 = arith.constant 0 : index
    %c0_1 = arith.constant 0 : index
    %0 = vector.load %arg1[%c0, %c0_0, %c0_1] : memref<8x32x32xf32, #tpu.memory_space<vmem>>, vector<8x32x32xf32>
    %cst = arith.constant 0.000000e+00 : f32
    %1 = vector.broadcast %cst : f32 to vector<8x28x168xf32>
    %2 = vector.extract_strided_slice %0 {offsets = [0, 0, 0], sizes = [8, 28, 32], strides = [1, 1, 1]} : vector<8x32x32xf32> to vector<8x28x32xf32>
    %3 = arith.truncf %2 : vector<8x28x32xf32> to vector<8x28x32xbf16>
    %c0_2 = arith.constant 0 : index
    %c0_3 = arith.constant 0 : index
    %c0_4 = arith.constant 0 : index
    %4 = vector.load %arg2[%c0_2, %c0_3, %c0_4] : memref<5x32x168xbf16, #tpu.memory_space<vmem>>, vector<1x32x168xbf16>
    %5 = vector.shape_cast %4 : vector<1x32x168xbf16> to vector<32x168xbf16>
    %6 = vector.shape_cast %5 : vector<32x168xbf16> to vector<1x32x168xbf16>
    %7 = vector.broadcast %6 : vector<1x32x168xbf16> to vector<8x32x168xbf16>
    %cst_5 = arith.constant dense<0.000000e+00> : vector<8x28x168xf32>
    %8 = tpu.matmul %3, %7, %cst_5 {dimension_numbers = #tpu.dot_dimension_numbers<[2], [1], [1], [2], [0, 0, 0, 1, 1, 2], [0], [0]>} : vector<8x28x32xbf16>, vector<8x32x168xbf16>, vector<8x28x168xf32> -> vector<8x28x168xf32>
    %9 = arith.addf %1, %8 : vector<8x28x168xf32>
    %10 = vector.extract_strided_slice %0 {offsets = [0, 1, 0], sizes = [8, 28, 32], strides = [1, 1, 1]} : vector<8x32x32xf32> to vector<8x28x32xf32>
    %11 = arith.truncf %10 : vector<8x28x32xf32> to vector<8x28x32xbf16>
    %c1 = arith.constant 1 : index
    %c0_6 = arith.constant 0 : index
    %c0_7 = arith.constant 0 : index
    %12 = vector.load %arg2[%c1, %c0_6, %c0_7] : memref<5x32x168xbf16, #tpu.memory_space<vmem>>, vector<1x32x168xbf16>
    %13 = vector.shape_cast %12 : vector<1x32x168xbf16> to vector<32x168xbf16>
    %14 = vector.shape_cast %13 : vector<32x168xbf16> to vector<1x32x168xbf16>
    %15 = vector.broadcast %14 : vector<1x32x168xbf16> to vector<8x32x168xbf16>
    %cst_8 = arith.constant dense<0.000000e+00> : vector<8x28x168xf32>
    %16 = tpu.matmul %11, %15, %cst_8 {dimension_numbers = #tpu.dot_dimension_numbers<[2], [1], [1], [2], [0, 0, 0, 1, 1, 2], [0], [0]>} : vector<8x28x32xbf16>, vector<8x32x168xbf16>, vector<8x28x168xf32> -> vector<8x28x168xf32>
    %17 = arith.addf %9, %16 : vector<8x28x168xf32>
    %18 = vector.extract_strided_slice %0 {offsets = [0, 2, 0], sizes = [8, 28, 32], strides = [1, 1, 1]} : vector<8x32x32xf32> to vector<8x28x32xf32>
    %19 = arith.truncf %18 : vector<8x28x32xf32> to vector<8x28x32xbf16>
    %c2 = arith.constant 2 : index
    %c0_9 = arith.constant 0 : index
    %c0_10 = arith.constant 0 : index
    %20 = vector.load %arg2[%c2, %c0_9, %c0_10] : memref<5x32x168xbf16, #tpu.memory_space<vmem>>, vector<1x32x168xbf16>
    %21 = vector.shape_cast %20 : vector<1x32x168xbf16> to vector<32x168xbf16>
    %22 = vector.shape_cast %21 : vector<32x168xbf16> to vector<1x32x168xbf16>
    %23 = vector.broadcast %22 : vector<1x32x168xbf16> to vector<8x32x168xbf16>
    %cst_11 = arith.constant dense<0.000000e+00> : vector<8x28x168xf32>
    %24 = tpu.matmul %19, %23, %cst_11 {dimension_numbers = #tpu.dot_dimension_numbers<[2], [1], [1], [2], [0, 0, 0, 1, 1, 2], [0], [0]>} : vector<8x28x32xbf16>, vector<8x32x168xbf16>, vector<8x28x168xf32> -> vector<8x28x168xf32>
    %25 = arith.addf %17, %24 : vector<8x28x168xf32>
    %26 = vector.extract_strided_slice %0 {offsets = [0, 3, 0], sizes = [8, 28, 32], strides = [1, 1, 1]} : vector<8x32x32xf32> to vector<8x28x32xf32>
    %27 = arith.truncf %26 : vector<8x28x32xf32> to vector<8x28x32xbf16>
    %c3 = arith.constant 3 : index
    %c0_12 = arith.constant 0 : index
    %c0_13 = arith.constant 0 : index
    %28 = vector.load %arg2[%c3, %c0_12, %c0_13] : memref<5x32x168xbf16, #tpu.memory_space<vmem>>, vector<1x32x168xbf16>
    %29 = vector.shape_cast %28 : vector<1x32x168xbf16> to vector<32x168xbf16>
    %30 = vector.shape_cast %29 : vector<32x168xbf16> to vector<1x32x168xbf16>
    %31 = vector.broadcast %30 : vector<1x32x168xbf16> to vector<8x32x168xbf16>
    %cst_14 = arith.constant dense<0.000000e+00> : vector<8x28x168xf32>
    %32 = tpu.matmul %27, %31, %cst_14 {dimension_numbers = #tpu.dot_dimension_numbers<[2], [1], [1], [2], [0, 0, 0, 1, 1, 2], [0], [0]>} : vector<8x28x32xbf16>, vector<8x32x168xbf16>, vector<8x28x168xf32> -> vector<8x28x168xf32>
    %33 = arith.addf %25, %32 : vector<8x28x168xf32>
    %34 = vector.extract_strided_slice %0 {offsets = [0, 4, 0], sizes = [8, 28, 32], strides = [1, 1, 1]} : vector<8x32x32xf32> to vector<8x28x32xf32>
    %35 = arith.truncf %34 : vector<8x28x32xf32> to vector<8x28x32xbf16>
    %c4 = arith.constant 4 : index
    %c0_15 = arith.constant 0 : index
    %c0_16 = arith.constant 0 : index
    %36 = vector.load %arg2[%c4, %c0_15, %c0_16] : memref<5x32x168xbf16, #tpu.memory_space<vmem>>, vector<1x32x168xbf16>
    %37 = vector.shape_cast %36 : vector<1x32x168xbf16> to vector<32x168xbf16>
    %38 = vector.shape_cast %37 : vector<32x168xbf16> to vector<1x32x168xbf16>
    %39 = vector.broadcast %38 : vector<1x32x168xbf16> to vector<8x32x168xbf16>
    %cst_17 = arith.constant dense<0.000000e+00> : vector<8x28x168xf32>
    %40 = tpu.matmul %35, %39, %cst_17 {dimension_numbers = #tpu.dot_dimension_numbers<[2], [1], [1], [2], [0, 0, 0, 1, 1, 2], [0], [0]>} : vector<8x28x32xbf16>, vector<8x32x168xbf16>, vector<8x28x168xf32> -> vector<8x28x168xf32>
    %41 = arith.addf %33, %40 : vector<8x28x168xf32>
    %c0_18 = arith.constant 0 : index
    %c0_19 = arith.constant 0 : index
    %42 = vector.load %arg3[%c0_18, %c0_19] : memref<1x168xf32, #tpu.memory_space<vmem>>, vector<1x168xf32>
    %43 = vector.shape_cast %42 : vector<1x168xf32> to vector<1x1x168xf32>
    %44 = vector.broadcast %43 : vector<1x1x168xf32> to vector<8x28x168xf32>
    %45 = arith.addf %41, %44 : vector<8x28x168xf32>
    %cst_20 = arith.constant 0.000000e+00 : f32
    %46 = vector.broadcast %cst_20 : f32 to vector<8x28x168xf32>
    %47 = arith.maximumf %45, %46 : vector<8x28x168xf32>
    %48 = vector.extract_strided_slice %47 {offsets = [0, 0, 0], sizes = [8, 27, 168], strides = [1, 1, 1]} : vector<8x28x168xf32> to vector<8x27x168xf32>
    %49 = vector.extract_strided_slice %47 {offsets = [0, 1, 0], sizes = [8, 27, 168], strides = [1, 1, 1]} : vector<8x28x168xf32> to vector<8x27x168xf32>
    %50 = arith.maximumf %48, %49 : vector<8x27x168xf32>
    %51 = vector.extract_strided_slice %50 {offsets = [0, 0, 0], sizes = [8, 27, 167], strides = [1, 1, 1]} : vector<8x27x168xf32> to vector<8x27x167xf32>
    %52 = vector.extract_strided_slice %50 {offsets = [0, 0, 1], sizes = [8, 27, 167], strides = [1, 1, 1]} : vector<8x27x168xf32> to vector<8x27x167xf32>
    %53 = arith.maximumf %51, %52 : vector<8x27x167xf32>
    %c0_21 = arith.constant 0 : index
    %c0_22 = arith.constant 0 : index
    %54 = vector.load %arg6[%c0_21, %c0_22] : memref<14x27xf32, #tpu.memory_space<vmem>>, vector<14x27xf32>
    %55 = vector.shape_cast %54 : vector<14x27xf32> to vector<1x14x27xf32>
    %56 = vector.broadcast %55 : vector<1x14x27xf32> to vector<8x14x27xf32>
    %cst_23 = arith.constant dense<0.000000e+00> : vector<8x14x167xf32>
    %57 = tpu.matmul %56, %53, %cst_23 {dimension_numbers = #tpu.dot_dimension_numbers<[2], [1], [1], [2], [0, 0, 0, 1, 1, 2], [0], [0]>} : vector<8x14x27xf32>, vector<8x27x167xf32>, vector<8x14x167xf32> -> vector<8x14x167xf32>
    %c0_24 = arith.constant 0 : index
    %c0_25 = arith.constant 0 : index
    %58 = vector.load %arg7[%c0_24, %c0_25] : memref<167x84xf32, #tpu.memory_space<vmem>>, vector<167x84xf32>
    %59 = vector.shape_cast %58 : vector<167x84xf32> to vector<1x167x84xf32>
    %60 = vector.broadcast %59 : vector<1x167x84xf32> to vector<8x167x84xf32>
    %cst_26 = arith.constant dense<0.000000e+00> : vector<8x14x84xf32>
    %61 = tpu.matmul %57, %60, %cst_26 {dimension_numbers = #tpu.dot_dimension_numbers<[2], [1], [1], [2], [0, 0, 0, 1, 1, 2], [0], [0]>} : vector<8x14x167xf32>, vector<8x167x84xf32>, vector<8x14x84xf32> -> vector<8x14x84xf32>
    %cst_27 = arith.constant 0.000000e+00 : f32
    %62 = vector.broadcast %cst_27 : f32 to vector<8x10x160xf32>
    %63 = vector.extract_strided_slice %61 {offsets = [0, 0, 0], sizes = [8, 10, 84], strides = [1, 1, 1]} : vector<8x14x84xf32> to vector<8x10x84xf32>
    %64 = arith.truncf %63 : vector<8x10x84xf32> to vector<8x10x84xbf16>
    %c0_28 = arith.constant 0 : index
    %c0_29 = arith.constant 0 : index
    %c0_30 = arith.constant 0 : index
    %65 = vector.load %arg4[%c0_28, %c0_29, %c0_30] : memref<5x84x160xbf16, #tpu.memory_space<vmem>>, vector<1x84x160xbf16>
    %66 = vector.shape_cast %65 : vector<1x84x160xbf16> to vector<84x160xbf16>
    %67 = vector.shape_cast %66 : vector<84x160xbf16> to vector<1x84x160xbf16>
    %68 = vector.broadcast %67 : vector<1x84x160xbf16> to vector<8x84x160xbf16>
    %cst_31 = arith.constant dense<0.000000e+00> : vector<8x10x160xf32>
    %69 = tpu.matmul %64, %68, %cst_31 {dimension_numbers = #tpu.dot_dimension_numbers<[2], [1], [1], [2], [0, 0, 0, 1, 1, 2], [0], [0]>} : vector<8x10x84xbf16>, vector<8x84x160xbf16>, vector<8x10x160xf32> -> vector<8x10x160xf32>
    %70 = arith.addf %62, %69 : vector<8x10x160xf32>
    %71 = vector.extract_strided_slice %61 {offsets = [0, 1, 0], sizes = [8, 10, 84], strides = [1, 1, 1]} : vector<8x14x84xf32> to vector<8x10x84xf32>
    %72 = arith.truncf %71 : vector<8x10x84xf32> to vector<8x10x84xbf16>
    %c1_32 = arith.constant 1 : index
    %c0_33 = arith.constant 0 : index
    %c0_34 = arith.constant 0 : index
    %73 = vector.load %arg4[%c1_32, %c0_33, %c0_34] : memref<5x84x160xbf16, #tpu.memory_space<vmem>>, vector<1x84x160xbf16>
    %74 = vector.shape_cast %73 : vector<1x84x160xbf16> to vector<84x160xbf16>
    %75 = vector.shape_cast %74 : vector<84x160xbf16> to vector<1x84x160xbf16>
    %76 = vector.broadcast %75 : vector<1x84x160xbf16> to vector<8x84x160xbf16>
    %cst_35 = arith.constant dense<0.000000e+00> : vector<8x10x160xf32>
    %77 = tpu.matmul %72, %76, %cst_35 {dimension_numbers = #tpu.dot_dimension_numbers<[2], [1], [1], [2], [0, 0, 0, 1, 1, 2], [0], [0]>} : vector<8x10x84xbf16>, vector<8x84x160xbf16>, vector<8x10x160xf32> -> vector<8x10x160xf32>
    %78 = arith.addf %70, %77 : vector<8x10x160xf32>
    %79 = vector.extract_strided_slice %61 {offsets = [0, 2, 0], sizes = [8, 10, 84], strides = [1, 1, 1]} : vector<8x14x84xf32> to vector<8x10x84xf32>
    %80 = arith.truncf %79 : vector<8x10x84xf32> to vector<8x10x84xbf16>
    %c2_36 = arith.constant 2 : index
    %c0_37 = arith.constant 0 : index
    %c0_38 = arith.constant 0 : index
    %81 = vector.load %arg4[%c2_36, %c0_37, %c0_38] : memref<5x84x160xbf16, #tpu.memory_space<vmem>>, vector<1x84x160xbf16>
    %82 = vector.shape_cast %81 : vector<1x84x160xbf16> to vector<84x160xbf16>
    %83 = vector.shape_cast %82 : vector<84x160xbf16> to vector<1x84x160xbf16>
    %84 = vector.broadcast %83 : vector<1x84x160xbf16> to vector<8x84x160xbf16>
    %cst_39 = arith.constant dense<0.000000e+00> : vector<8x10x160xf32>
    %85 = tpu.matmul %80, %84, %cst_39 {dimension_numbers = #tpu.dot_dimension_numbers<[2], [1], [1], [2], [0, 0, 0, 1, 1, 2], [0], [0]>} : vector<8x10x84xbf16>, vector<8x84x160xbf16>, vector<8x10x160xf32> -> vector<8x10x160xf32>
    %86 = arith.addf %78, %85 : vector<8x10x160xf32>
    %87 = vector.extract_strided_slice %61 {offsets = [0, 3, 0], sizes = [8, 10, 84], strides = [1, 1, 1]} : vector<8x14x84xf32> to vector<8x10x84xf32>
    %88 = arith.truncf %87 : vector<8x10x84xf32> to vector<8x10x84xbf16>
    %c3_40 = arith.constant 3 : index
    %c0_41 = arith.constant 0 : index
    %c0_42 = arith.constant 0 : index
    %89 = vector.load %arg4[%c3_40, %c0_41, %c0_42] : memref<5x84x160xbf16, #tpu.memory_space<vmem>>, vector<1x84x160xbf16>
    %90 = vector.shape_cast %89 : vector<1x84x160xbf16> to vector<84x160xbf16>
    %91 = vector.shape_cast %90 : vector<84x160xbf16> to vector<1x84x160xbf16>
    %92 = vector.broadcast %91 : vector<1x84x160xbf16> to vector<8x84x160xbf16>
    %cst_43 = arith.constant dense<0.000000e+00> : vector<8x10x160xf32>
    %93 = tpu.matmul %88, %92, %cst_43 {dimension_numbers = #tpu.dot_dimension_numbers<[2], [1], [1], [2], [0, 0, 0, 1, 1, 2], [0], [0]>} : vector<8x10x84xbf16>, vector<8x84x160xbf16>, vector<8x10x160xf32> -> vector<8x10x160xf32>
    %94 = arith.addf %86, %93 : vector<8x10x160xf32>
    %95 = vector.extract_strided_slice %61 {offsets = [0, 4, 0], sizes = [8, 10, 84], strides = [1, 1, 1]} : vector<8x14x84xf32> to vector<8x10x84xf32>
    %96 = arith.truncf %95 : vector<8x10x84xf32> to vector<8x10x84xbf16>
    %c4_44 = arith.constant 4 : index
    %c0_45 = arith.constant 0 : index
    %c0_46 = arith.constant 0 : index
    %97 = vector.load %arg4[%c4_44, %c0_45, %c0_46] : memref<5x84x160xbf16, #tpu.memory_space<vmem>>, vector<1x84x160xbf16>
    %98 = vector.shape_cast %97 : vector<1x84x160xbf16> to vector<84x160xbf16>
    %99 = vector.shape_cast %98 : vector<84x160xbf16> to vector<1x84x160xbf16>
    %100 = vector.broadcast %99 : vector<1x84x160xbf16> to vector<8x84x160xbf16>
    %cst_47 = arith.constant dense<0.000000e+00> : vector<8x10x160xf32>
    %101 = tpu.matmul %96, %100, %cst_47 {dimension_numbers = #tpu.dot_dimension_numbers<[2], [1], [1], [2], [0, 0, 0, 1, 1, 2], [0], [0]>} : vector<8x10x84xbf16>, vector<8x84x160xbf16>, vector<8x10x160xf32> -> vector<8x10x160xf32>
    %102 = arith.addf %94, %101 : vector<8x10x160xf32>
    %c0_48 = arith.constant 0 : index
    %c0_49 = arith.constant 0 : index
    %103 = vector.load %arg5[%c0_48, %c0_49] : memref<1x160xf32, #tpu.memory_space<vmem>>, vector<1x160xf32>
    %104 = vector.shape_cast %103 : vector<1x160xf32> to vector<1x1x160xf32>
    %105 = vector.broadcast %104 : vector<1x1x160xf32> to vector<8x10x160xf32>
    %106 = arith.addf %102, %105 : vector<8x10x160xf32>
    %cst_50 = arith.constant 0.000000e+00 : f32
    %107 = vector.broadcast %cst_50 : f32 to vector<8x10x160xf32>
    %108 = arith.maximumf %106, %107 : vector<8x10x160xf32>
    %109 = vector.extract_strided_slice %108 {offsets = [0, 0, 0], sizes = [8, 9, 160], strides = [1, 1, 1]} : vector<8x10x160xf32> to vector<8x9x160xf32>
    %110 = vector.extract_strided_slice %108 {offsets = [0, 1, 0], sizes = [8, 9, 160], strides = [1, 1, 1]} : vector<8x10x160xf32> to vector<8x9x160xf32>
    %111 = arith.maximumf %109, %110 : vector<8x9x160xf32>
    %112 = vector.extract_strided_slice %111 {offsets = [0, 0, 0], sizes = [8, 9, 159], strides = [1, 1, 1]} : vector<8x9x160xf32> to vector<8x9x159xf32>
    %113 = vector.extract_strided_slice %111 {offsets = [0, 0, 1], sizes = [8, 9, 159], strides = [1, 1, 1]} : vector<8x9x160xf32> to vector<8x9x159xf32>
    %114 = arith.maximumf %112, %113 : vector<8x9x159xf32>
    %c0_51 = arith.constant 0 : index
    %c0_52 = arith.constant 0 : index
    %115 = vector.load %arg8[%c0_51, %c0_52] : memref<5x9xf32, #tpu.memory_space<vmem>>, vector<5x9xf32>
    %116 = vector.shape_cast %115 : vector<5x9xf32> to vector<1x5x9xf32>
    %117 = vector.broadcast %116 : vector<1x5x9xf32> to vector<8x5x9xf32>
    %cst_53 = arith.constant dense<0.000000e+00> : vector<8x5x159xf32>
    %118 = tpu.matmul %117, %114, %cst_53 {dimension_numbers = #tpu.dot_dimension_numbers<[2], [1], [1], [2], [0, 0, 0, 1, 1, 2], [0], [0]>} : vector<8x5x9xf32>, vector<8x9x159xf32>, vector<8x5x159xf32> -> vector<8x5x159xf32>
    %c0_54 = arith.constant 0 : index
    %c0_55 = arith.constant 0 : index
    %119 = vector.load %arg9[%c0_54, %c0_55] : memref<159x80xf32, #tpu.memory_space<vmem>>, vector<159x80xf32>
    %120 = vector.shape_cast %119 : vector<159x80xf32> to vector<1x159x80xf32>
    %121 = vector.broadcast %120 : vector<1x159x80xf32> to vector<8x159x80xf32>
    %cst_56 = arith.constant dense<0.000000e+00> : vector<8x5x80xf32>
    %122 = tpu.matmul %118, %121, %cst_56 {dimension_numbers = #tpu.dot_dimension_numbers<[2], [1], [1], [2], [0, 0, 0, 1, 1, 2], [0], [0]>} : vector<8x5x159xf32>, vector<8x159x80xf32>, vector<8x5x80xf32> -> vector<8x5x80xf32>
    %cst_57 = arith.constant 0.000000e+00 : f32
    %123 = vector.broadcast %cst_57 : f32 to vector<8x1x128xf32>
    %124 = vector.extract_strided_slice %122 {offsets = [0, 0, 0], sizes = [8, 1, 80], strides = [1, 1, 1]} : vector<8x5x80xf32> to vector<8x1x80xf32>
    %125 = arith.truncf %124 : vector<8x1x80xf32> to vector<8x1x80xbf16>
    %c0_58 = arith.constant 0 : index
    %c0_59 = arith.constant 0 : index
    %c0_60 = arith.constant 0 : index
    %126 = vector.load %arg10[%c0_58, %c0_59, %c0_60] : memref<5x80x128xbf16, #tpu.memory_space<vmem>>, vector<1x80x128xbf16>
    %127 = vector.shape_cast %126 : vector<1x80x128xbf16> to vector<80x128xbf16>
    %128 = vector.shape_cast %127 : vector<80x128xbf16> to vector<1x80x128xbf16>
    %129 = vector.broadcast %128 : vector<1x80x128xbf16> to vector<8x80x128xbf16>
    %cst_61 = arith.constant dense<0.000000e+00> : vector<8x1x128xf32>
    %130 = tpu.matmul %125, %129, %cst_61 {dimension_numbers = #tpu.dot_dimension_numbers<[2], [1], [1], [2], [0, 0, 0, 1, 1, 2], [0], [0]>} : vector<8x1x80xbf16>, vector<8x80x128xbf16>, vector<8x1x128xf32> -> vector<8x1x128xf32>
    %131 = arith.addf %123, %130 : vector<8x1x128xf32>
    %132 = vector.extract_strided_slice %122 {offsets = [0, 1, 0], sizes = [8, 1, 80], strides = [1, 1, 1]} : vector<8x5x80xf32> to vector<8x1x80xf32>
    %133 = arith.truncf %132 : vector<8x1x80xf32> to vector<8x1x80xbf16>
    %c1_62 = arith.constant 1 : index
    %c0_63 = arith.constant 0 : index
    %c0_64 = arith.constant 0 : index
    %134 = vector.load %arg10[%c1_62, %c0_63, %c0_64] : memref<5x80x128xbf16, #tpu.memory_space<vmem>>, vector<1x80x128xbf16>
    %135 = vector.shape_cast %134 : vector<1x80x128xbf16> to vector<80x128xbf16>
    %136 = vector.shape_cast %135 : vector<80x128xbf16> to vector<1x80x128xbf16>
    %137 = vector.broadcast %136 : vector<1x80x128xbf16> to vector<8x80x128xbf16>
    %cst_65 = arith.constant dense<0.000000e+00> : vector<8x1x128xf32>
    %138 = tpu.matmul %133, %137, %cst_65 {dimension_numbers = #tpu.dot_dimension_numbers<[2], [1], [1], [2], [0, 0, 0, 1, 1, 2], [0], [0]>} : vector<8x1x80xbf16>, vector<8x80x128xbf16>, vector<8x1x128xf32> -> vector<8x1x128xf32>
    %139 = arith.addf %131, %138 : vector<8x1x128xf32>
    %140 = vector.extract_strided_slice %122 {offsets = [0, 2, 0], sizes = [8, 1, 80], strides = [1, 1, 1]} : vector<8x5x80xf32> to vector<8x1x80xf32>
    %141 = arith.truncf %140 : vector<8x1x80xf32> to vector<8x1x80xbf16>
    %c2_66 = arith.constant 2 : index
    %c0_67 = arith.constant 0 : index
    %c0_68 = arith.constant 0 : index
    %142 = vector.load %arg10[%c2_66, %c0_67, %c0_68] : memref<5x80x128xbf16, #tpu.memory_space<vmem>>, vector<1x80x128xbf16>
    %143 = vector.shape_cast %142 : vector<1x80x128xbf16> to vector<80x128xbf16>
    %144 = vector.shape_cast %143 : vector<80x128xbf16> to vector<1x80x128xbf16>
    %145 = vector.broadcast %144 : vector<1x80x128xbf16> to vector<8x80x128xbf16>
    %cst_69 = arith.constant dense<0.000000e+00> : vector<8x1x128xf32>
    %146 = tpu.matmul %141, %145, %cst_69 {dimension_numbers = #tpu.dot_dimension_numbers<[2], [1], [1], [2], [0, 0, 0, 1, 1, 2], [0], [0]>} : vector<8x1x80xbf16>, vector<8x80x128xbf16>, vector<8x1x128xf32> -> vector<8x1x128xf32>
    %147 = arith.addf %139, %146 : vector<8x1x128xf32>
    %148 = vector.extract_strided_slice %122 {offsets = [0, 3, 0], sizes = [8, 1, 80], strides = [1, 1, 1]} : vector<8x5x80xf32> to vector<8x1x80xf32>
    %149 = arith.truncf %148 : vector<8x1x80xf32> to vector<8x1x80xbf16>
    %c3_70 = arith.constant 3 : index
    %c0_71 = arith.constant 0 : index
    %c0_72 = arith.constant 0 : index
    %150 = vector.load %arg10[%c3_70, %c0_71, %c0_72] : memref<5x80x128xbf16, #tpu.memory_space<vmem>>, vector<1x80x128xbf16>
    %151 = vector.shape_cast %150 : vector<1x80x128xbf16> to vector<80x128xbf16>
    %152 = vector.shape_cast %151 : vector<80x128xbf16> to vector<1x80x128xbf16>
    %153 = vector.broadcast %152 : vector<1x80x128xbf16> to vector<8x80x128xbf16>
    %cst_73 = arith.constant dense<0.000000e+00> : vector<8x1x128xf32>
    %154 = tpu.matmul %149, %153, %cst_73 {dimension_numbers = #tpu.dot_dimension_numbers<[2], [1], [1], [2], [0, 0, 0, 1, 1, 2], [0], [0]>} : vector<8x1x80xbf16>, vector<8x80x128xbf16>, vector<8x1x128xf32> -> vector<8x1x128xf32>
    %155 = arith.addf %147, %154 : vector<8x1x128xf32>
    %156 = vector.extract_strided_slice %122 {offsets = [0, 4, 0], sizes = [8, 1, 80], strides = [1, 1, 1]} : vector<8x5x80xf32> to vector<8x1x80xf32>
    %157 = arith.truncf %156 : vector<8x1x80xf32> to vector<8x1x80xbf16>
    %c4_74 = arith.constant 4 : index
    %c0_75 = arith.constant 0 : index
    %c0_76 = arith.constant 0 : index
    %158 = vector.load %arg10[%c4_74, %c0_75, %c0_76] : memref<5x80x128xbf16, #tpu.memory_space<vmem>>, vector<1x80x128xbf16>
    %159 = vector.shape_cast %158 : vector<1x80x128xbf16> to vector<80x128xbf16>
    %160 = vector.shape_cast %159 : vector<80x128xbf16> to vector<1x80x128xbf16>
    %161 = vector.broadcast %160 : vector<1x80x128xbf16> to vector<8x80x128xbf16>
    %cst_77 = arith.constant dense<0.000000e+00> : vector<8x1x128xf32>
    %162 = tpu.matmul %157, %161, %cst_77 {dimension_numbers = #tpu.dot_dimension_numbers<[2], [1], [1], [2], [0, 0, 0, 1, 1, 2], [0], [0]>} : vector<8x1x80xbf16>, vector<8x80x128xbf16>, vector<8x1x128xf32> -> vector<8x1x128xf32>
    %163 = arith.addf %155, %162 : vector<8x1x128xf32>
    %c0_78 = arith.constant 0 : index
    %c0_79 = arith.constant 0 : index
    %164 = vector.load %arg11[%c0_78, %c0_79] : memref<1x128xf32, #tpu.memory_space<vmem>>, vector<1x128xf32>
    %165 = vector.shape_cast %164 : vector<1x128xf32> to vector<1x1x128xf32>
    %166 = vector.broadcast %165 : vector<1x1x128xf32> to vector<8x1x128xf32>
    %167 = arith.addf %163, %166 : vector<8x1x128xf32>
    %cst_80 = arith.constant 0.000000e+00 : f32
    %168 = vector.broadcast %cst_80 : f32 to vector<8x1x128xf32>
    %169 = arith.maximumf %167, %168 : vector<8x1x128xf32>
    %170 = arith.truncf %169 : vector<8x1x128xf32> to vector<8x1x128xbf16>
    %c0_81 = arith.constant 0 : index
    %c0_82 = arith.constant 0 : index
    %171 = vector.load %arg12[%c0_81, %c0_82] : memref<128x128xbf16, #tpu.memory_space<vmem>>, vector<128x128xbf16>
    %172 = vector.shape_cast %171 : vector<128x128xbf16> to vector<1x128x128xbf16>
    %173 = vector.broadcast %172 : vector<1x128x128xbf16> to vector<8x128x128xbf16>
    %cst_83 = arith.constant dense<0.000000e+00> : vector<8x1x128xf32>
    %174 = tpu.matmul %170, %173, %cst_83 {dimension_numbers = #tpu.dot_dimension_numbers<[2], [1], [1], [2], [0, 0, 0, 1, 1, 2], [0], [0]>} : vector<8x1x128xbf16>, vector<8x128x128xbf16>, vector<8x1x128xf32> -> vector<8x1x128xf32>
    %c0_84 = arith.constant 0 : index
    %c0_85 = arith.constant 0 : index
    %175 = vector.load %arg13[%c0_84, %c0_85] : memref<1x128xf32, #tpu.memory_space<vmem>>, vector<1x128xf32>
    %176 = vector.shape_cast %175 : vector<1x128xf32> to vector<1x1x128xf32>
    %177 = vector.broadcast %176 : vector<1x1x128xf32> to vector<8x1x128xf32>
    %178 = arith.addf %174, %177 : vector<8x1x128xf32>
    %cst_86 = arith.constant 0.000000e+00 : f32
    %179 = vector.broadcast %cst_86 : f32 to vector<8x1x128xf32>
    %180 = arith.maximumf %178, %179 : vector<8x1x128xf32>
    %181 = arith.truncf %180 : vector<8x1x128xf32> to vector<8x1x128xbf16>
    %c0_87 = arith.constant 0 : index
    %c0_88 = arith.constant 0 : index
    %182 = vector.load %arg14[%c0_87, %c0_88] : memref<128x128xbf16, #tpu.memory_space<vmem>>, vector<128x128xbf16>
    %183 = vector.shape_cast %182 : vector<128x128xbf16> to vector<1x128x128xbf16>
    %184 = vector.broadcast %183 : vector<1x128x128xbf16> to vector<8x128x128xbf16>
    %cst_89 = arith.constant dense<0.000000e+00> : vector<8x1x128xf32>
    %185 = tpu.matmul %181, %184, %cst_89 {dimension_numbers = #tpu.dot_dimension_numbers<[2], [1], [1], [2], [0, 0, 0, 1, 1, 2], [0], [0]>} : vector<8x1x128xbf16>, vector<8x128x128xbf16>, vector<8x1x128xf32> -> vector<8x1x128xf32>
    %c0_90 = arith.constant 0 : index
    %c0_91 = arith.constant 0 : index
    %186 = vector.load %arg15[%c0_90, %c0_91] : memref<1x128xf32, #tpu.memory_space<vmem>>, vector<1x128xf32>
    %187 = vector.shape_cast %186 : vector<1x128xf32> to vector<1x1x128xf32>
    %188 = vector.broadcast %187 : vector<1x1x128xf32> to vector<8x1x128xf32>
    %189 = arith.addf %185, %188 : vector<8x1x128xf32>
    %cst_92 = arith.constant dense<0xFF800000> : vector<8x1xf32>
    %190 = vector.multi_reduction <maximumf>, %189, %cst_92 [2] : vector<8x1x128xf32> to vector<8x1xf32>
    %191 = vector.shape_cast %190 : vector<8x1xf32> to vector<8x1x1xf32>
    %192 = vector.broadcast %191 : vector<8x1x1xf32> to vector<8x1x128xf32>
    %193 = arith.subf %189, %192 : vector<8x1x128xf32>
    %194 = math.exp %193 : vector<8x1x128xf32>
    %cst_93 = arith.constant dense<0.000000e+00> : vector<8x1xf32>
    %195 = vector.multi_reduction <add>, %194, %cst_93 [2] : vector<8x1x128xf32> to vector<8x1xf32>
    %196 = vector.shape_cast %195 : vector<8x1xf32> to vector<8x1x1xf32>
    %197 = vector.broadcast %191 : vector<8x1x1xf32> to vector<8x1x128xf32>
    %198 = arith.subf %189, %197 : vector<8x1x128xf32>
    %199 = math.log %196 : vector<8x1x1xf32>
    %200 = vector.broadcast %199 : vector<8x1x1xf32> to vector<8x1x128xf32>
    %201 = arith.subf %198, %200 : vector<8x1x128xf32>
    %c0_94 = arith.constant 0 : index
    %c0_95 = arith.constant 0 : index
    %c0_96 = arith.constant 0 : index
    %202 = vector.load %arg16[%c0_94, %c0_95, %c0_96] : memref<8x1x128xf32, #tpu.memory_space<vmem>>, vector<8x1x128xf32>
    tpu.vector_store %arg16[%c0_94, %c0_95, %c0_96], %201 {strides = array<i32>} : memref<8x1x128xf32, #tpu.memory_space<vmem>>, vector<8x1x128xf32>,
    return
  }
  func.func @transform_0(%arg0: i32) -> (i32, i32, i32) {
    %c0_i32 = arith.constant 0 : i32
    %c0_i32_0 = arith.constant 0 : i32
    %c0_i32_1 = arith.constant 0 : i32
    return %arg0, %c0_i32, %c0_i32_0 : i32, i32, i32
  }
  func.func @transform_1(%arg0: i32) -> (i32, i32, i32) {
    %c0_i32 = arith.constant 0 : i32
    %c0_i32_0 = arith.constant 0 : i32
    %c0_i32_1 = arith.constant 0 : i32
    %c0_i32_2 = arith.constant 0 : i32
    return %c0_i32, %c0_i32_0, %c0_i32_1 : i32, i32, i32
  }
  func.func @transform_2(%arg0: i32) -> (i32, i32) {
    %c0_i32 = arith.constant 0 : i32
    %c0_i32_0 = arith.constant 0 : i32
    %c0_i32_1 = arith.constant 0 : i32
    return %c0_i32, %c0_i32_0 : i32, i32
  }
  func.func @transform_3(%arg0: i32) -> (i32, i32, i32) {
    %c0_i32 = arith.constant 0 : i32
    %c0_i32_0 = arith.constant 0 : i32
    %c0_i32_1 = arith.constant 0 : i32
    %c0_i32_2 = arith.constant 0 : i32
    return %c0_i32, %c0_i32_0, %c0_i32_1 : i32, i32, i32
  }
  func.func @transform_4(%arg0: i32) -> (i32, i32) {
    %c0_i32 = arith.constant 0 : i32
    %c0_i32_0 = arith.constant 0 : i32
    %c0_i32_1 = arith.constant 0 : i32
    return %c0_i32, %c0_i32_0 : i32, i32
  }
  func.func @transform_5(%arg0: i32) -> (i32, i32) {
    %c0_i32 = arith.constant 0 : i32
    %c0_i32_0 = arith.constant 0 : i32
    %c0_i32_1 = arith.constant 0 : i32
    return %c0_i32, %c0_i32_0 : i32, i32
  }
  func.func @transform_6(%arg0: i32) -> (i32, i32) {
    %c0_i32 = arith.constant 0 : i32
    %c0_i32_0 = arith.constant 0 : i32
    %c0_i32_1 = arith.constant 0 : i32
    return %c0_i32, %c0_i32_0 : i32, i32
  }
  func.func @transform_7(%arg0: i32) -> (i32, i32) {
    %c0_i32 = arith.constant 0 : i32
    %c0_i32_0 = arith.constant 0 : i32
    %c0_i32_1 = arith.constant 0 : i32
    return %c0_i32, %c0_i32_0 : i32, i32
  }
  func.func @transform_8(%arg0: i32) -> (i32, i32) {
    %c0_i32 = arith.constant 0 : i32
    %c0_i32_0 = arith.constant 0 : i32
    %c0_i32_1 = arith.constant 0 : i32
    return %c0_i32, %c0_i32_0 : i32, i32
  }
  func.func @transform_9(%arg0: i32) -> (i32, i32, i32) {
    %c0_i32 = arith.constant 0 : i32
    %c0_i32_0 = arith.constant 0 : i32
    %c0_i32_1 = arith.constant 0 : i32
    %c0_i32_2 = arith.constant 0 : i32
    return %c0_i32, %c0_i32_0, %c0_i32_1 : i32, i32, i32
  }
  func.func @transform_10(%arg0: i32) -> (i32, i32) {
    %c0_i32 = arith.constant 0 : i32
    %c0_i32_0 = arith.constant 0 : i32
    %c0_i32_1 = arith.constant 0 : i32
    return %c0_i32, %c0_i32_0 : i32, i32
  }
  func.func @transform_11(%arg0: i32) -> (i32, i32) {
    %c0_i32 = arith.constant 0 : i32
    %c0_i32_0 = arith.constant 0 : i32
    %c0_i32_1 = arith.constant 0 : i32
    return %c0_i32, %c0_i32_0 : i32, i32
  }
  func.func @transform_12(%arg0: i32) -> (i32, i32) {
    %c0_i32 = arith.constant 0 : i32
    %c0_i32_0 = arith.constant 0 : i32
    %c0_i32_1 = arith.constant 0 : i32
    return %c0_i32, %c0_i32_0 : i32, i32
  }
  func.func @transform_13(%arg0: i32) -> (i32, i32) {
    %c0_i32 = arith.constant 0 : i32
    %c0_i32_0 = arith.constant 0 : i32
    %c0_i32_1 = arith.constant 0 : i32
    return %c0_i32, %c0_i32_0 : i32, i32
  }
  func.func @transform_14(%arg0: i32) -> (i32, i32) {
    %c0_i32 = arith.constant 0 : i32
    %c0_i32_0 = arith.constant 0 : i32
    %c0_i32_1 = arith.constant 0 : i32
    return %c0_i32, %c0_i32_0 : i32, i32
  }
  func.func @transform_15(%arg0: i32) -> (i32, i32, i32) {
    %c0_i32 = arith.constant 0 : i32
    %c0_i32_0 = arith.constant 0 : i32
    %c0_i32_1 = arith.constant 0 : i32
    return %arg0, %c0_i32, %c0_i32_0 : i32, i32, i32
  }
}

</mosaic_0001>

<bundles_post_ra>
// kernel: lenet_forward.1
= control target key start
LH: loop header
LB: loop body
LE: loop exit
PB: predicated region body
PF: predicated region fallthrough
CT: control target
= control target key end

     0   :  { %20 = vsyncpa [#allocation3], 0  ;;  %s15677_s0 = inlined_call_operand.vmem [shape: f32[8,32,32], index: 0, kind: input, shape index: {}]   ;;  %s15678_s1 = inlined_call_operand.vmem [shape: bf16[5,32,168], index: 1, kind: input, shape index: {}]   ;;  %s15679_s2 = inlined_call_operand.hbm [shape: f32[1,168], index: 2, kind: input, shape index: {}]   ;;  %s15680_s3 = inlined_call_operand.vmem [shape: bf16[5,84,160], index: 3, kind: input, shape index: {}]   ;;  %s15681_s4 = inlined_call_operand.hbm [shape: f32[1,160], index: 4, kind: input, shape index: {}]   ;;  %s15682_s5 = inlined_call_operand.hbm [shape: f32[14,27], index: 5, kind: input, shape index: {}]   ;;  %s15683_s6 = inlined_call_operand.vmem [shape: f32[167,84], index: 6, kind: input, shape index: {}]   ;;  %s15684_s7 = inlined_call_operand.hbm [shape: f32[5,9], index: 7, kind: input, shape index: {}]   ;;  %s15685_s8 = inlined_call_operand.hbm [shape: f32[159,80], index: 8, kind: input, shape index: {}]   ;;  %s15686_s9 = inlined_call_operand.vmem [shape: bf16[5,80,128], index: 9, kind: input, shape index: {}]   ;;  %s15687_s10 = inlined_call_operand.hbm [shape: f32[1,128], index: 10, kind: input, shape index: {}]   ;;  %s15688_s11 = inlined_call_operand.vmem [shape: bf16[128,128], index: 11, kind: input, shape index: {}]   ;;  %s15689_s12 = inlined_call_operand.hbm [shape: f32[1,128], index: 12, kind: input, shape index: {}]   ;;  %s15690_s13 = inlined_call_operand.hbm [shape: bf16[128,128], index: 13, kind: input, shape index: {}]   ;;  %s15691_s14 = inlined_call_operand.hbm [shape: f32[1,128], index: 14, kind: input, shape index: {}]   ;;  %s15692_s15 = inlined_call_operand.hbm [shape: f32[8,1,128], index: 15, kind: output, shape index: {}]  }
   0x1   :  { %21 = vsyncpa [#allocation6], 0 }
   0x2   :  { %22 = vsyncpa [#allocation9], 0 }
   0x3   :  { %23 = vsyncpa [#allocation12], 0 }
   0x4   :  { %24 = vsyncpa [#allocation15], 0  ;;  %s48_s20 = sshll.u32 %s15681_s4, 4  ;;  %s49_s20 = int_to_ptr.hbm [resolvable:$true] %s48_s20 }
   0x5   :  { %25 = vsyncpa [#allocation4], 0  ;;  %s10220_s21 = smov [#allocation5]   ;;  %s74_s25 = sshll.u32 %s15684_s7, 4  ;;  %s75_s25 = int_to_ptr.hbm [resolvable:$true] %s74_s25 }
   0x6   :  { %s50_s22 = sshll.u32 %s10220_s21, 4  ;;  %s10221_s26 = smov [#allocation8]   ;;  %s51_s22 = int_to_ptr.vmem [resolvable:$true] %s50_s22 }
   0x7   :  { %53 = dma.hbm_to_vmem [thread:$0]  %s49_s20, 32, %s51_s22, [#allocation6]  }
   0x8   :  { %s76_s27 = sshll.u32 %s10221_s26, 4  ;;  %s100_s30 = sshll.u32 %s15687_s10, 4  ;;  %s77_s27 = int_to_ptr.vmem [resolvable:$true] %s76_s27  ;;  %s101_s30 = int_to_ptr.hbm [resolvable:$true] %s100_s30 }
   0x9   :  { %79 = dma.hbm_to_vmem [thread:$0]  %s75_s25, 128, %s77_s27, [#allocation9]  }
   0xa   :  { %s123_s17 = sshll.u32 %s15690_s13, 4  ;;  %s10222_s18 = smov [#allocation11]   ;;  %s124_s17 = int_to_ptr.hbm [resolvable:$true] %s123_s17 }
   0xb   :  { %s102_s19 = sshll.u32 %s10222_s18, 4  ;;  %s10223_s7 = smov [#allocation14]   ;;  %s103_s19 = int_to_ptr.vmem [resolvable:$true] %s102_s19 }
   0xc   :  { %105 = dma.hbm_to_vmem [thread:$0]  %s101_s30, 16, %s103_s19, [#allocation12]  }
   0xd   :  { %s125_s20 = sshll.u32 %s10223_s7, 4  ;;  %s10224_s21 = smov 64   ;;  %s126_s20 = int_to_ptr.vmem [resolvable:$true] %s125_s20 }
   0xe   :  { %s10225_s22 = smov 4   ;;  %s35_s24 = sshll.u32 %s15679_s2, 4  ;;  %s36_s24 = int_to_ptr.hbm [resolvable:$true] %s35_s24 }
   0xf   :  { %131 = dma.hbm_to_vmem [thread:$0]  %s124_s17, 1024, %s126_s20, [#allocation15], %s10224_s21, %s10224_s21, %s10225_s22  }
  0x10   :  { %s10226_s25 = smov [#allocation2]   ;;  %s58_s28 = sshll.u32 %s15682_s5, 4  ;;  %s59_s28 = int_to_ptr.hbm [resolvable:$true] %s58_s28 }
  0x11   :  { %s37_s26 = sshll.u32 %s10226_s25, 4  ;;  %s10227_s29 = smov [#allocation7]   ;;  %s38_s26 = int_to_ptr.vmem [resolvable:$true] %s37_s26 }
  0x12   :  { %40 = dma.hbm_to_vmem [thread:$0]  %s36_s24, 32, %s38_s26, [#allocation3]  }
  0x13   :  { %s60_s30 = sshll.u32 %s10227_s29, 4  ;;  %s10228_s4 = smov 128   ;;  %s61_s30 = int_to_ptr.vmem [resolvable:$true] %s60_s30 }
  0x14   :  { %s10229_s16 = smov 8   ;;  %s84_s2 = sshll.u32 %s15685_s8, 4  ;;  %s85_s2 = int_to_ptr.hbm [resolvable:$true] %s84_s2 }
  0x15   :  { %66 = dma.hbm_to_vmem [thread:$0]  %s59_s28, 256, %s61_s30, [#allocation6], %s10228_s4, %s10228_s4, %s10229_s16  }
  0x16   :  { %s10230_s19 = smov [#allocation10]   ;;  %s113_s5 = sshll.u32 %s15689_s12, 4  ;;  %s114_s5 = int_to_ptr.hbm [resolvable:$true] %s113_s5 }
  0x17   :  { %s86_s7 = sshll.u32 %s10230_s19, 4  ;;  %s10231_s22 = smov [#allocation13]   ;;  %s87_s7 = int_to_ptr.vmem [resolvable:$true] %s86_s7 }
  0x18   :  { %92 = dma.hbm_to_vmem [thread:$0]  %s85_s2, 2560, %s87_s7, [#allocation9], %s10228_s4, %s10228_s4, %s10229_s16  }
  0x19   :  { %s115_s23 = sshll.u32 %s10231_s22, 4  ;;  %s137_s25 = sshll.u32 %s15691_s14, 4  ;;  %s116_s23 = int_to_ptr.vmem [resolvable:$true] %s115_s23  ;;  %s138_s25 = int_to_ptr.hbm [resolvable:$true] %s137_s25 }
  0x1a   :  { %118 = dma.hbm_to_vmem [thread:$0]  %s114_s5, 16, %s116_s23, [#allocation12]  }
  0x1b   :  { %s10232_s8 = smov [#allocation16]  }
  0x1c   :  { %s139_s26 = sshll.u32 %s10232_s8, 4  ;;  %s140_s26 = int_to_ptr.vmem [resolvable:$true] %s139_s26 }
  0x1d   :  { %142 = dma.hbm_to_vmem [thread:$0]  %s138_s25, 16, %s140_s26, [#allocation15]  }
  0x1e   :  { %10208 = dma.done.wait [#allocation3], 32  }
  0x1f   :  { %10209 = vsyncadd [#allocation3], 4294967264 }
  0x20   :  { %10210 = dma.done.wait [#allocation6], 288  }
  0x21   :  { %10211 = vsyncadd [#allocation6], 4294967008 }
  0x22   :  { %10212 = dma.done.wait [#allocation9], 2688  }
  0x23   :  { %10213 = vsyncadd [#allocation9], 4294964608 }
  0x24   :  { %10214 = dma.done.wait [#allocation12], 32  }
  0x25   :  { %10215 = vsyncadd [#allocation12], 4294967264 }
  0x26   :  { %10216 = dma.done.wait [#allocation15], 1040  }
  0x27   :  { %10217 = vsyncadd [#allocation15], 4294966256  ;;  %v8719_v0 = vld [vmem:[%s15678_s1 + $0x30] sm:$0xf]  ;;  %v9656_v1 = vld [vmem:[%s15678_s1 + $0x34] sm:$0xf0] }
  0x28   :  { %v9655_v2 = vld [vmem:[%s15678_s1 + $0x34] sm:$0xf]  ;;  %v10353_v3 = vor.u32 %v9656_v1, %v8719_v0  ;;  %v8721_v4 = vld [vmem:[%s15678_s1 + $0x38] sm:$0xf0]  ;;  %v8711_v5 = vld [vmem:[%s15678_s1 + $0x20] sm:$0xf] }
  0x29   :  { %v9654_v6 = vld [vmem:[%s15678_s1 + $0x24] sm:$0xf0]  ;;  %v10364_v7 = vor.u32 %v9655_v2, %v8721_v4  ;;  %v9653_v8 = vld [vmem:[%s15678_s1 + $0x24] sm:$0xf]  ;;  %v8713_v9 = vld [vmem:[%s15678_s1 + $0x28] sm:$0xf0] }
  0x2a   :  { %v180_v10 = vld [vmem:[%s15677_s0] sm:$0xff]  ;;  %312 = vmatpush.bf16.msra.mxu0 %v10353_v3  ;;  %381 = vmatpush.bf16.msra.mxu2 %v10353_v3  ;;  %v10377_v11 = vor.u32 %v9654_v6, %v8711_v5  ;;  %v10379_v12 = vor.u32 %v9653_v8, %v8713_v9  ;;  %v181_v13 = vld [vmem:[%s15677_s0 + $0x8] sm:$0xff]  ;;  %v182_v14 = vld [vmem:[%s15677_s0 + $0x10] sm:$0xff]  ;;  %vm263_vm0 = vsmask.f32 7424  ;;  %vm299_vm1 = vcmask 261120  }
  0x2b   :  { %v183_v15 = vld [vmem:[%s15677_s0 + $0x18] sm:$0xff]  ;;  %v212_v16 = vpack.c.bf16 %v180_v10, %v180_v10  ;;  %331 = vmatpush.bf16.msra.mxu1 %v10364_v7  ;;  %400 = vmatpush.bf16.msra.mxu3 %v10364_v7  ;;  %v213_v17 = vpack.c.bf16 %v181_v13, %v181_v13  ;;  %v214_v18 = vpack.c.bf16 %v182_v14, %v182_v14  ;;  %v184_v20 = vld [vmem:[%s15677_s0 + $0x20] sm:$0xff]  ;;  %v185_v21 = vld [vmem:[%s15677_s0 + $0x28] sm:$0xff]  ;;  %vm1188_vm2 = vcmask 1046528   ;;  %s8688_s12 = sshll.u32 %s15692_s15, 4  ;;  %s10235_s13 = smov 16   ;;  %s8689_s12 = int_to_ptr.hbm [resolvable:$true] %s8688_s12 }
  0x2c   :  { %v215_v19 = vpack.c.bf16 %v183_v15, %v183_v15  ;;  %v186_v22 = vld [vmem:[%s15677_s0 + $0x30] sm:$0xff]  ;;  %v187_v24 = vld [vmem:[%s15677_s0 + $0x38] sm:$0xff]  ;;  %v216_v25 = vpack.c.bf16 %v184_v20, %v184_v20  ;;  %v217_v26 = vpack.c.bf16 %v185_v21, %v185_v21  ;;  %v188_v9 = vld [vmem:[%s15677_s0 + $0x40] sm:$0xff]  ;;  %vm1654_vm3 = vsmask.f32 6400  ;;  %s10236_s14 = smov 1  }
  0x2d   :  { %v257_v23 = vunpack.c.l.b16 %v212_v16  ;;  %v218_v27 = vpack.c.bf16 %v186_v22, %v186_v22  ;;  %v258_v28 = vunpack.c.l.b16 %v213_v17  ;;  %v259_v29 = vunpack.c.l.b16 %v214_v18  ;;  %v190_v0 = vld [vmem:[%s15677_s0 + $0x50] sm:$0xff]  ;;  %v191_v1 = vld [vmem:[%s15677_s0 + $0x58] sm:$0xff]  ;;  %v189_v10 = vld [vmem:[%s15677_s0 + $0x48] sm:$0xff] }
  0x2e   :  { %v260_v30 = vunpack.c.l.b16 %v215_v19  ;;  %v219_v31 = vpack.c.bf16 %v187_v24, %v187_v24  ;;  %313 = vmatpush.bf16.msra.mxu0 %v10377_v11  ;;  %382 = vmatpush.bf16.msra.mxu2 %v10377_v11  ;;  %v348_v32 = vunpack.c.l.b16 %v216_v25  ;;  %v349_v33 = vunpack.c.l.b16 %v217_v26  ;;  %v194_v5 = vld [vmem:[%s15677_s0 + $0x70] sm:$0xff]  ;;  %v195_v6 = vld [vmem:[%s15677_s0 + $0x78] sm:$0xff]  ;;  %v192_v16 = vld [vmem:[%s15677_s0 + $0x60] sm:$0xff] }
  0x2f   :  { %v350_v34 = vunpack.c.l.b16 %v218_v27  ;;  %332 = vmatpush.bf16.msra.mxu1 %v10379_v12  ;;  %401 = vmatpush.bf16.msra.mxu3 %v10379_v12  ;;  %v10408_v35 = vpack.c.b16 %v258_v28, %v257_v23  ;;  %v222_v13 = vpack.c.bf16 %v190_v0, %v190_v0  ;;  %v223_v14 = vpack.c.bf16 %v191_v1, %v191_v1  ;;  %v193_v17 = vld [vmem:[%s15677_s0 + $0x68] sm:$0xff] }
  0x30   :  { %v10410_v36 = vpack.c.b16 %v260_v30, %v259_v29  ;;  %v351_v37 = vunpack.c.l.b16 %v219_v31  ;;  %v10412_v38 = vpack.c.b16 %v349_v33, %v348_v32  ;;  %v226_v18 = vpack.c.bf16 %v194_v5, %v194_v5 }
  0x31   :  { %15763 = vst [vmem:[#allocation24_spill] sm:$0xff] %v10408_v35  ;;  %v265_v39 = vshrl.u32 %v10408_v35, 16  ;;  %v267_v40 = vshll.u32 %v10408_v35, 16  ;;  %v227_v19 = vpack.c.bf16 %v195_v6, %v195_v6  ;;  %v220_v20 = vpack.c.bf16 %v188_v9, %v188_v9  ;;  %v198_v9 = vld [vmem:[%s15677_s0 + $0x90] sm:$0xff] }
  0x32   :  { %15764 = vst [vmem:[#allocation25_spill] sm:$0xff] %v10410_v36  ;;  %450 = vmatpush.bf16.msrb.mxu0 %v10353_v3  ;;  %v272_v41 = vshll.u32 %v10410_v36, 16  ;;  %v10419_v42 = vpack.c.b16 %v351_v37, %v350_v34  ;;  %519 = vmatpush.bf16.msrb.mxu2 %v10353_v3  ;;  %v355_v43 = vshrl.u32 %v10412_v38, 16  ;;  %v357_v44 = vshll.u32 %v10412_v38, 16 }
  0x33   :  { %15765 = vst [vmem:[#allocation26_spill] sm:$0xff] %v10412_v38  ;;  %469 = vmatpush.bf16.msrb.mxu1 %v10364_v7  ;;  %538 = vmatpush.bf16.msrb.mxu3 %v10364_v7  ;;  %v276_v45 = vshrl.u32 %v10410_v36, 16  ;;  %v269_v46 = vrot.slane %v267_v40, 1  ;;  %v10428_v48 = vrot.slane %v265_v39, 1  ;;  %v10430_v49 = vrot.slane %v267_v40, 2 }
  0x34   :  { %15766 = vst [vmem:[#allocation27_spill] sm:$0xff] %v10419_v42  ;;  %v10426_v47 = vrot.slane %v272_v41, 1  ;;  %v1659_v50 = vrot.slane %v272_v41, 2  ;;  %v359_v51 = vrot.slane %v357_v44, 1  ;;  %v362_v52 = vshll.u32 %v10419_v42, 16 }
  0x35   :  { %v10433_v53 = vrot.slane %v355_v43, 1  ;;  %v270_v54 = vor.u32 %v269_v46, %v265_v39  ;;  %v10439_v56 = vrot.slane %v357_v44, 2  ;;  %v1658_v59 = vrot.slane %v276_v45, 1 }
  0x36   :  { %451 = vmatpush.bf16.msrb.mxu0 %v10377_v11  ;;  %520 = vmatpush.bf16.msrb.mxu2 %v10377_v11  ;;  %v360_v57 = vor.u32 %v359_v51, %v355_v43  ;;  %v364_v58 = vrot.slane %v362_v52, 1  ;;  %v1730_v62 = vrot.slane %v362_v52, 2  ;;  %v366_v63 = vshrl.u32 %v10419_v42, 16 }
  0x37   :  { %470 = vmatpush.bf16.msrb.mxu1 %v10379_v12  ;;  %539 = vmatpush.bf16.msrb.mxu3 %v10379_v12  ;;  %v275_v60 = vsel %vm263_vm0, %v270_v54, %v10426_v47  ;;  %v10459_v4 = vor.u32 %v1659_v50, %v1658_v59  ;;  %v221_v21 = vpack.c.bf16 %v189_v10, %v189_v10  ;;  %v419_v22 = vunpack.c.l.b16 %v222_v13  ;;  %v199_v10 = vld [vmem:[%s15677_s0 + $0x98] sm:$0xff]  ;;  %v202_v13 = vld [vmem:[%s15677_s0 + $0xb0] sm:$0xff] }
  0x38   :  { %8725 = vmatmul.msk.bf16.vlgmr.msra.gmra.mxu0 %vm299_vm1, %v275_v60  ;;  %8727 = vmatmul.msk.bf16.vlgmr.msra.gmra.mxu1 %vm299_vm1, %v275_v60  ;;  %v365_v2 = vsel %vm263_vm0, %v360_v57, %v364_v58  ;;  %v1729_v8 = vrot.slane %v366_v63, 1  ;;  %v420_v23 = vunpack.c.l.b16 %v223_v14  ;;  %v224_v24 = vpack.c.bf16 %v192_v16, %v192_v16  ;;  %v203_v14 = vld [vmem:[%s15677_s0 + $0xb8] sm:$0xff]  ;;  %v196_v16 = vld [vmem:[%s15677_s0 + $0x80] sm:$0xff] }
  0x39   :  { %8729 = vmatmul.msk.bf16.vlgmr.msra.gmra.mxu2 %vm299_vm1, %v365_v2  ;;  %8731 = vmatmul.msk.bf16.vlgmr.msra.gmra.mxu3 %vm299_vm1, %v365_v2  ;;  %v225_v25 = vpack.c.bf16 %v193_v17, %v193_v17  ;;  %v488_v26 = vunpack.c.l.b16 %v226_v18  ;;  %v489_v27 = vunpack.c.l.b16 %v227_v19  ;;  %v417_v28 = vunpack.c.l.b16 %v220_v20  ;;  %v197_v17 = vld [vmem:[%s15677_s0 + $0x88] sm:$0xff]  ;;  %v200_v20 = vld [vmem:[%s15677_s0 + $0xa0] sm:$0xff] }
  0x3a   :  { %588 = vmatpush.bf16.msra.mxu0 %v10353_v3  ;;  %v10477_v15 = vor.u32 %v1730_v62, %v1729_v8  ;;  %657 = vmatpush.bf16.msra.mxu2 %v10353_v3  ;;  %v418_v29 = vunpack.c.l.b16 %v221_v21  ;;  %v10491_v30 = vpack.c.b16 %v420_v23, %v419_v22  ;;  %v486_v31 = vunpack.c.l.b16 %v224_v24  ;;  %v201_v21 = vld [vmem:[%s15677_s0 + $0xa8] sm:$0xff] }
  0x3b   :  { %607 = vmatpush.bf16.msra.mxu1 %v10364_v7  ;;  %676 = vmatpush.bf16.msra.mxu3 %v10364_v7  ;;  %v487_v32 = vunpack.c.l.b16 %v225_v25  ;;  %v10493_v33 = vpack.c.b16 %v489_v27, %v488_v26  ;;  %v278_v34 = vor.u32 %v276_v45, %v10426_v47  ;;  %v368_v37 = vor.u32 %v366_v63, %v364_v58 }
  0x3c   :  { %15767 = vst [vmem:[#allocation28_spill] sm:$0xff] %v10491_v30  ;;  %v10498_v39 = vpack.c.b16 %v418_v29, %v417_v28  ;;  %v431_v40 = vshll.u32 %v10491_v30, 16  ;;  %v435_v43 = vshrl.u32 %v10491_v30, 16  ;;  %v230_v18 = vpack.c.bf16 %v198_v9, %v198_v9 }
  0x3d   :  { %15768 = vst [vmem:[#allocation29_spill] sm:$0xff] %v10493_v33  ;;  %v10501_v41 = vpack.c.b16 %v487_v32, %v486_v31  ;;  %v500_v44 = vshll.u32 %v10493_v33, 16  ;;  %v504_v46 = vshrl.u32 %v10493_v33, 16  ;;  %v231_v19 = vpack.c.bf16 %v199_v10, %v199_v10 }
  0x3e   :  { %589 = vmatpush.bf16.msra.mxu0 %v10377_v11  ;;  %658 = vmatpush.bf16.msra.mxu2 %v10377_v11  ;;  %15769 = vst [vmem:[#allocation30_spill] sm:$0xff] %v10498_v39  ;;  %v1780_v45 = vrot.slane %v435_v43, 1  ;;  %v1781_v47 = vrot.slane %v431_v40, 2  ;;  %v15703_v50 = vshll.u32 %v10498_v39, 16  ;;  %v15704_v59 = vshrl.u32 %v10498_v39, 16 }
  0x3f   :  { %608 = vmatpush.bf16.msra.mxu1 %v10379_v12  ;;  %677 = vmatpush.bf16.msra.mxu3 %v10379_v12  ;;  %v1831_v51 = vrot.slane %v504_v46, 1  ;;  %v1832_v52 = vrot.slane %v500_v44, 2  ;;  %v15701_v54 = vshll.u32 %v10501_v41, 16  ;;  %v15702_v62 = vshrl.u32 %v10501_v41, 16 }
  0x40   :  { %v10514_v57 = vor.u32 %v1781_v47, %v1780_v45  ;;  %v428_v60 = vrot.slane %v15703_v50, 1  ;;  %v433_v1 = vrot.slane %v431_v40, 1  ;;  %v502_v5 = vrot.slane %v500_v44, 1 }
  0x41   :  { %v10516_v58 = vor.u32 %v1832_v52, %v1831_v51  ;;  %v497_v63 = vrot.slane %v15701_v54, 1  ;;  %v234_v22 = vpack.c.bf16 %v202_v13, %v202_v13  ;;  %v235_v23 = vpack.c.bf16 %v203_v14, %v203_v14 }
  0x42   :  { %v429_v0 = vor.u32 %v428_v60, %v15704_v59  ;;  %v228_v24 = vpack.c.bf16 %v196_v16, %v196_v16  ;;  %v229_v25 = vpack.c.bf16 %v197_v17, %v197_v17  ;;  %v557_v26 = vunpack.c.l.b16 %v230_v18 }
  0x43   :  { %v498_v2 = vor.u32 %v497_v63, %v15702_v62  ;;  %v558_v27 = vunpack.c.l.b16 %v231_v19  ;;  %v232_v28 = vpack.c.bf16 %v200_v20, %v200_v20  ;;  %v233_v29 = vpack.c.bf16 %v201_v21, %v201_v21 }
  0x44   :  { %v434_v6 = vsel %vm263_vm0, %v429_v0, %v433_v1  ;;  %v626_v31 = vunpack.c.l.b16 %v234_v22  ;;  %v627_v32 = vunpack.c.l.b16 %v235_v23  ;;  %v437_v45 = vor.u32 %v435_v43, %v433_v1  ;;  %v206_v22 = vld [vmem:[%s15677_s0 + $0xd0] sm:$0xff]  ;;  %v207_v23 = vld [vmem:[%s15677_s0 + $0xd8] sm:$0xff] }
  0x45   :  { %v503_v8 = vsel %vm263_vm0, %v498_v2, %v502_v5  ;;  %v625_v40 = vunpack.c.l.b16 %v233_v29  ;;  %v506_v47 = vor.u32 %v504_v46, %v502_v5  ;;  %v239_v29 = vpack.c.bf16 %v207_v23, %v207_v23 }
  0x46   :  { %v10568_v44 = vpack.c.b16 %v627_v32, %v626_v31  ;;  %v208_v31 = vld [vmem:[%s15677_s0 + $0xe0] sm:$0xff]  ;;  %v209_v32 = vld [vmem:[%s15677_s0 + $0xe8] sm:$0xff]  ;;  %vm2152_vm4 = vcmask 1045504   ;;  %vm3244_vm5 = vcmask 1039360   ;;  %vm3414_vm6 = vcmask 1042432  }
  0x47   :  { %vm3407_vm7 = vcmask 220160   ;;  %vm3852_vm8 = vcmask 318464   ;;  %vm4382_vm9 = vcmask 1041408   ;;  %vm4378_vm10 = vcmask 687104  }
  0x48   :  { %8726 = vmatmul.msk.bf16.gmra.mxu0 %vm299_vm1, %v278_v34  ;;  %8728 = vmatmul.msk.bf16.gmra.mxu1 %vm299_vm1, %v278_v34  ;;  %v555_v34 = vunpack.c.l.b16 %v228_v24  ;;  %15771 = vst [vmem:[#allocation32_spill] sm:$0xff] %v10568_v44  ;;  %v642_v63 = vshrl.u32 %v10568_v44, 16  ;;  %v210_v24 = vld [vmem:[%s15677_s0 + $0xf0] sm:$0xff]  ;;  %vm6513_vm11 = vcmask 1040384   ;;  %vm6509_vm12 = vcmask 72704  }
  0x49   :  { %8730 = vmatmul.msk.bf16.gmra.mxu2 %vm299_vm1, %v368_v37  ;;  %8732 = vmatmul.msk.bf16.gmra.mxu3 %vm299_vm1, %v368_v37  ;;  %v10566_v37 = vpack.c.b16 %v558_v27, %v557_v26  ;;  %v204_v26 = vld [vmem:[%s15677_s0 + $0xc0] sm:$0xff]  ;;  %v205_v27 = vld [vmem:[%s15677_s0 + $0xc8] sm:$0xff]  ;;  %vm6902_vm13 = vcmask 252928   ;;  %vm7315_vm14 = vcmask 654336  }
  0x4a   :  { %v1933_v46 = vrot.slane %v642_v63, 1 }
  0x4b   :  { %15770 = vst [vmem:[#allocation31_spill] sm:$0xff] %v10566_v37  ;;  %v569_v52 = vshll.u32 %v10566_v37, 16 }
  0x4d   :  { %v1883_v2 = vrot.slane %v569_v52, 2  ;;  %v571_v17 = vrot.slane %v569_v52, 1  ;;  %v240_v52 = vpack.c.bf16 %v208_v31, %v208_v31  ;;  %v9652_v31 = vld [vmem:[%s15678_s1 + $0x14] sm:$0xf0] }
  0x58   :  { %8733 = vmatmul.msk.bf16.vlgmr.msrb.gmra.mxu0 %vm299_vm1, %v434_v6  ;;  %8735 = vmatmul.msk.bf16.vlgmr.msrb.gmra.mxu1 %vm299_vm1, %v434_v6 }
  0x59   :  { %8737 = vmatmul.msk.bf16.vlgmr.msrb.gmra.mxu2 %vm299_vm1, %v503_v8  ;;  %8739 = vmatmul.msk.bf16.vlgmr.msrb.gmra.mxu3 %vm299_vm1, %v503_v8 }
  0x5a   :  { %726 = vmatpush.bf16.msrb.mxu0 %v10353_v3  ;;  %745 = vmatpush.bf16.msrb.mxu1 %v10364_v7 }
  0x5b   :  { %795 = vmatpush.bf16.msrb.mxu2 %v10353_v3  ;;  %814 = vmatpush.bf16.msrb.mxu3 %v10364_v7  ;;  %v556_v3 = vunpack.c.l.b16 %v229_v25  ;;  %v624_v7 = vunpack.c.l.b16 %v232_v28  ;;  %v211_v25 = vld [vmem:[%s15677_s0 + $0xf8] sm:$0xff]  ;;  %v238_v28 = vpack.c.bf16 %v206_v22, %v206_v22 }
  0x5d   :  { %v10572_v51 = vpack.c.b16 %v556_v3, %v555_v34  ;;  %v10575_v60 = vpack.c.b16 %v625_v40, %v624_v7  ;;  %v242_v34 = vpack.c.bf16 %v210_v24, %v210_v24  ;;  %v243_v3 = vpack.c.bf16 %v211_v25, %v211_v25 }
  0x5e   :  { %727 = vmatpush.bf16.msrb.mxu0 %v10377_v11  ;;  %746 = vmatpush.bf16.msrb.mxu1 %v10379_v12  ;;  %v236_v7 = vpack.c.bf16 %v204_v26, %v204_v26  ;;  %v237_v40 = vpack.c.bf16 %v205_v27, %v205_v27 }
  0x5f   :  { %796 = vmatpush.bf16.msrb.mxu2 %v10377_v11  ;;  %815 = vmatpush.bf16.msrb.mxu3 %v10379_v12  ;;  %15772 = vst [vmem:[#allocation33_spill] sm:$0xff] %v10575_v60  ;;  %v573_v11 = vshrl.u32 %v10566_v37, 16  ;;  %v638_v12 = vshll.u32 %v10568_v44, 16  ;;  %v15698_v43 = vshll.u32 %v10572_v51, 16  ;;  %v15697_v5 = vshll.u32 %v10575_v60, 16 }
  0x60   :  { %v15700_v9 = vshrl.u32 %v10572_v51, 16  ;;  %v15699_v13 = vshrl.u32 %v10575_v60, 16 }
  0x61   :  { %v1882_v0 = vrot.slane %v573_v11, 1  ;;  %v1934_v1 = vrot.slane %v638_v12, 2  ;;  %v566_v10 = vrot.slane %v15698_v43, 1  ;;  %v635_v14 = vrot.slane %v15697_v5, 1 }
  0x62   :  { %v640_v19 = vrot.slane %v638_v12, 1  ;;  %v241_v12 = vpack.c.bf16 %v209_v32, %v209_v32 }
  0x63   :  { %v10586_v6 = vor.u32 %v1883_v2, %v1882_v0  ;;  %v10588_v8 = vor.u32 %v1934_v1, %v1933_v46  ;;  %v567_v16 = vor.u32 %v566_v10, %v15700_v9  ;;  %v636_v18 = vor.u32 %v635_v14, %v15699_v13 }
  0x64   :  { %v764_v0 = vunpack.c.l.b16 %v242_v34  ;;  %v765_v2 = vunpack.c.l.b16 %v243_v3  ;;  %v693_v46 = vunpack.c.l.b16 %v236_v7  ;;  %v694_v1 = vunpack.c.l.b16 %v237_v40  ;;  %v9651_v7 = vld [vmem:[%s15678_s1 + $0x14] sm:$0xf]  ;;  %v8769_v40 = vld [vmem:[%s15678_s1 + $0x18] sm:$0xf0] }
  0x65   :  { %15773 = vst [vmem:[#allocation34_spill] sm:$0xff] %v10586_v6  ;;  %v572_v20 = vsel %vm263_vm0, %v567_v16, %v571_v17  ;;  %v641_v21 = vsel %vm263_vm0, %v636_v18, %v640_v19  ;;  %v762_v14 = vunpack.c.l.b16 %v240_v52  ;;  %v763_v16 = vunpack.c.l.b16 %v241_v12 }
  0x66   :  { %15774 = vst [vmem:[#allocation35_spill] sm:$0xff] %v10588_v8  ;;  %v10632_v18 = vpack.c.b16 %v765_v2, %v764_v0  ;;  %v644_v22 = vor.u32 %v642_v63, %v640_v19 }
  0x67   :  { %v10637_v24 = vpack.c.b16 %v763_v16, %v762_v14 }
  0x68   :  { %8734 = vmatmul.msk.bf16.gmra.mxu0 %vm299_vm1, %v437_v45  ;;  %8736 = vmatmul.msk.bf16.gmra.mxu1 %vm299_vm1, %v437_v45  ;;  %v695_v45 = vunpack.c.l.b16 %v238_v28  ;;  %15776 = vst [vmem:[#allocation37_spill] sm:$0xff] %v10632_v18  ;;  %v776_v26 = vshll.u32 %v10632_v18, 16  ;;  %v780_v27 = vshrl.u32 %v10632_v18, 16 }
  0x69   :  { %8738 = vmatmul.msk.bf16.gmra.mxu2 %vm299_vm1, %v506_v47  ;;  %8740 = vmatmul.msk.bf16.gmra.mxu3 %vm299_vm1, %v506_v47  ;;  %v696_v47 = vunpack.c.l.b16 %v239_v29  ;;  %15778 = vst [vmem:[#allocation39_spill] sm:$0xff] %v10637_v24  ;;  %v8767_v29 = vld [vmem:[%s15678_s1 + $0x10] sm:$0xf]  ;;  %v15693_v32 = vshll.u32 %v10637_v24, 16  ;;  %v15695_v0 = vshrl.u32 %v10637_v24, 16 }
  0x6a   :  { %v2035_v63 = vrot.slane %v780_v27, 1  ;;  %v2036_v19 = vrot.slane %v776_v26, 2  ;;  %v10656_v3 = vor.u32 %v9652_v31, %v8767_v29  ;;  %v778_v16 = vrot.slane %v776_v26, 1 }
  0x6b   :  { %v10630_v10 = vpack.c.b16 %v696_v47, %v695_v45  ;;  %v10666_v47 = vor.u32 %v9651_v7, %v8769_v40  ;;  %v773_v2 = vrot.slane %v15693_v32, 1 }
  0x6c   :  { %v10664_v45 = vor.u32 %v2036_v19, %v2035_v63  ;;  %v782_v31 = vor.u32 %v780_v27, %v778_v16 }
  0x6d   :  { %15775 = vst [vmem:[#allocation36_spill] sm:$0xff] %v10630_v10  ;;  %v707_v23 = vshll.u32 %v10630_v10, 16  ;;  %v711_v25 = vshrl.u32 %v10630_v10, 16  ;;  %v774_v14 = vor.u32 %v773_v2, %v15695_v0 }
  0x6e   :  { %15780 = vst [vmem:[#allocation41_spill] sm:$0xff] %v10664_v45 }
  0x6f   :  { %v779_v19 = vsel %vm263_vm0, %v774_v14, %v778_v16 }
  0x78   :  { %8741 = vmatmul.msk.bf16.vlgmr.msra.gmra.mxu0 %vm299_vm1, %v572_v20  ;;  %8743 = vmatmul.msk.bf16.vlgmr.msra.gmra.mxu1 %vm299_vm1, %v572_v20  ;;  %v575_v20 = vor.u32 %v573_v11, %v571_v17  ;;  %v1984_v11 = vrot.slane %v711_v25, 1  ;;  %v1985_v17 = vrot.slane %v707_v23, 2 }
  0x79   :  { %8745 = vmatmul.msk.bf16.vlgmr.msra.gmra.mxu2 %vm299_vm1, %v641_v21  ;;  %8747 = vmatmul.msk.bf16.vlgmr.msra.gmra.mxu3 %vm299_vm1, %v641_v21  ;;  %v10634_v21 = vpack.c.b16 %v694_v1, %v693_v46  ;;  %v709_v1 = vrot.slane %v707_v23, 1  ;;  %v8761_v23 = vld [vmem:[%s15678_s1 + $0x8] sm:$0xf0] }
  0x7a   :  { %v10654_v34 = vor.u32 %v1985_v17, %v1984_v11  ;;  %857 = vmatpush.bf16.msra.mxu0 %v10656_v3  ;;  %899 = vmatpush.bf16.msra.mxu2 %v10656_v3  ;;  %v9649_v11 = vld [vmem:[%s15678_s1 + $0x4] sm:$0xf] }
  0x7b   :  { %15777 = vst [vmem:[#allocation38_spill] sm:$0xff] %v10634_v21  ;;  %v15694_v28 = vshll.u32 %v10634_v21, 16  ;;  %v15696_v52 = vshrl.u32 %v10634_v21, 16  ;;  %876 = vmatpush.bf16.msra.mxu1 %v10666_v47  ;;  %918 = vmatpush.bf16.msra.mxu3 %v10666_v47  ;;  %v10697_v63 = vor.u32 %v9649_v11, %v8761_v23  ;;  %v713_v29 = vor.u32 %v711_v25, %v709_v1 }
  0x7c   :  { %15779 = vst [vmem:[#allocation40_spill] sm:$0xff] %v10654_v34 }
  0x7d   :  { %v704_v12 = vrot.slane %v15694_v28, 1 }
  0x7f   :  { %v705_v46 = vor.u32 %v704_v12, %v15696_v52  ;;  %877 = vmatpush.bf16.msra.mxu1 %v10697_v63  ;;  %919 = vmatpush.bf16.msra.mxu3 %v10697_v63 }
  0x81   :  { %v710_v26 = vsel %vm263_vm0, %v705_v46, %v709_v1 }
  0x88   :  { %8742 = vmatmul.msk.bf16.gmra.mxu0 %vm299_vm1, %v575_v20  ;;  %8744 = vmatmul.msk.bf16.gmra.mxu1 %vm299_vm1, %v575_v20  ;;  %v8759_v20 = vld [vmem:[%s15678_s1] sm:$0xf] }
  0x89   :  { %8746 = vmatmul.msk.bf16.gmra.mxu2 %vm299_vm1, %v644_v22  ;;  %8748 = vmatmul.msk.bf16.gmra.mxu3 %vm299_vm1, %v644_v22  ;;  %v9650_v22 = vld [vmem:[%s15678_s1 + $0x4] sm:$0xf0] }
  0x8a   :  { %v10691_v17 = vor.u32 %v9650_v22, %v8759_v20 }
  0x8c   :  { %858 = vmatpush.bf16.msra.mxu0 %v10691_v17  ;;  %900 = vmatpush.bf16.msra.mxu2 %v10691_v17 }
  0x98   :  { %8749 = vmatmul.msk.bf16.vlgmr.msrb.gmra.mxu0 %vm299_vm1, %v710_v26  ;;  %8751 = vmatmul.msk.bf16.vlgmr.msrb.gmra.mxu1 %vm299_vm1, %v710_v26 }
  0x99   :  { %8753 = vmatmul.msk.bf16.vlgmr.msrb.gmra.mxu2 %vm299_vm1, %v779_v19  ;;  %8755 = vmatmul.msk.bf16.vlgmr.msrb.gmra.mxu3 %vm299_vm1, %v779_v19 }
  0x9a   :  { %941 = vmatpush.bf16.msrb.mxu0 %v10656_v3  ;;  %960 = vmatpush.bf16.msrb.mxu1 %v10666_v47 }
  0x9b   :  { %983 = vmatpush.bf16.msrb.mxu2 %v10656_v3  ;;  %1002 = vmatpush.bf16.msrb.mxu3 %v10666_v47 }
  0x9e   :  { %942 = vmatpush.bf16.msrb.mxu0 %v10691_v17  ;;  %961 = vmatpush.bf16.msrb.mxu1 %v10697_v63 }
  0x9f   :  { %984 = vmatpush.bf16.msrb.mxu2 %v10691_v17  ;;  %1003 = vmatpush.bf16.msrb.mxu3 %v10697_v63 }
  0xa8   :  { %8750 = vmatmul.msk.bf16.gmra.mxu0 %vm299_vm1, %v713_v29  ;;  %8752 = vmatmul.msk.bf16.gmra.mxu1 %vm299_vm1, %v713_v29 }
  0xa9   :  { %8754 = vmatmul.msk.bf16.gmra.mxu2 %vm299_vm1, %v782_v31  ;;  %8756 = vmatmul.msk.bf16.gmra.mxu3 %vm299_vm1, %v782_v31 }
  0xb5   :  { %v10720_v7 = vpop.f32.mrf.mxu0  ;;  %v10722_v40 = vpop.f32.mrf.mxu1 }
  0xb8   :  { %8773 = vmatmul.msk.bf16.vlgmr.msra.gmra.mxu0 %vm299_vm1, %v10408_v35  ;;  %8775 = vmatmul.msk.bf16.vlgmr.msra.gmra.mxu1 %vm299_vm1, %v10408_v35 }
  0xb9   :  { %8777 = vmatmul.msk.bf16.vlgmr.msra.gmra.mxu2 %vm299_vm1, %v10412_v38  ;;  %8779 = vmatmul.msk.bf16.vlgmr.msra.gmra.mxu3 %vm299_vm1, %v10412_v38 }
  0xba   :  { %1025 = vmatpush.bf16.msra.mxu0 %v10656_v3  ;;  %1044 = vmatpush.bf16.msra.mxu1 %v10666_v47 }
  0xbb   :  { %1067 = vmatpush.bf16.msra.mxu2 %v10656_v3  ;;  %1086 = vmatpush.bf16.msra.mxu3 %v10666_v47 }
  0xbc   :  { %v10736_v25 = vpop.f32.mrf.mxu2  ;;  %v10738_v27 = vpop.f32.mrf.mxu3 }
  0xbd   :  { %v10740_v12 = vpop.f32.mrf.mxu0  ;;  %v10742_v2 = vpop.f32.mrf.mxu1 }
  0xbe   :  { %1026 = vmatpush.bf16.msra.mxu0 %v10691_v17  ;;  %1045 = vmatpush.bf16.msra.mxu1 %v10697_v63 }
  0xbf   :  { %1068 = vmatpush.bf16.msra.mxu2 %v10691_v17  ;;  %1087 = vmatpush.bf16.msra.mxu3 %v10697_v63 }
  0xc4   :  { %v10748_v46 = vpop.f32.mrf.mxu2  ;;  %v10750_v1 = vpop.f32.mrf.mxu3 }
  0xc5   :  { %v10752_v14 = vpop.f32.mrf.mxu0  ;;  %v10754_v16 = vpop.f32.mrf.mxu1 }
  0xc8   :  { %8774 = vmatmul.msk.bf16.gmra.mxu0 %vm299_vm1, %v10410_v36  ;;  %8776 = vmatmul.msk.bf16.gmra.mxu1 %vm299_vm1, %v10410_v36 }
  0xc9   :  { %8778 = vmatmul.msk.bf16.gmra.mxu2 %vm299_vm1, %v10419_v42  ;;  %8780 = vmatmul.msk.bf16.gmra.mxu3 %vm299_vm1, %v10419_v42 }
  0xcc   :  { %v10764_v20 = vpop.f32.mrf.mxu2  ;;  %v10766_v22 = vpop.f32.mrf.mxu3 }
  0xcd   :  { %v10768_v11 = vpop.f32.mrf.mxu0  ;;  %v10770_v23 = vpop.f32.mrf.mxu1 }
  0xd4   :  { %v10772_v26 = vpop.f32.mrf.mxu2  ;;  %v10774_v19 = vpop.f32.mrf.mxu3 }
  0xd5   :  { %v10776_v29 = vpop.f32.mrf.mxu0  ;;  %v10778_v31 = vpop.f32.mrf.mxu1 }
  0xd6   :  { %15781 = vst [vmem:[#allocation42_spill] sm:$0xff] %v10776_v29 }
  0xd7   :  { %15782 = vst [vmem:[#allocation43_spill] sm:$0xff] %v10778_v31 }
  0xd8   :  { %8781 = vmatmul.msk.bf16.vlgmr.msrb.gmra.mxu0 %vm299_vm1, %v10498_v39  ;;  %8783 = vmatmul.msk.bf16.vlgmr.msrb.gmra.mxu1 %vm299_vm1, %v10498_v39 }
  0xd9   :  { %8785 = vmatmul.msk.bf16.vlgmr.msrb.gmra.mxu2 %vm299_vm1, %v10501_v41  ;;  %8787 = vmatmul.msk.bf16.vlgmr.msrb.gmra.mxu3 %vm299_vm1, %v10501_v41 }
  0xda   :  { %1109 = vmatpush.bf16.msrb.mxu0 %v10656_v3  ;;  %1128 = vmatpush.bf16.msrb.mxu1 %v10666_v47 }
  0xdb   :  { %1151 = vmatpush.bf16.msrb.mxu2 %v10656_v3  ;;  %1170 = vmatpush.bf16.msrb.mxu3 %v10666_v47 }
  0xdc   :  { %v10792_v32 = vpop.f32.mrf.mxu2  ;;  %v10794_v28 = vpop.f32.mrf.mxu3 }
  0xdd   :  { %15783 = vst [vmem:[#allocation44_spill] sm:$0xff] %v10792_v32  ;;  %v10796_v0 = vpop.f32.mrf.mxu0  ;;  %v10798_v52 = vpop.f32.mrf.mxu1 }
  0xde   :  { %15784 = vst [vmem:[#allocation45_spill] sm:$0xff] %v10794_v28  ;;  %1110 = vmatpush.bf16.msrb.mxu0 %v10691_v17  ;;  %1129 = vmatpush.bf16.msrb.mxu1 %v10697_v63  ;;  %v1350_v28 = vrot.slane %v10501_v41, 1 }
  0xdf   :  { %15785 = vst [vmem:[#allocation46_spill] sm:$0xff] %v10796_v0  ;;  %1152 = vmatpush.bf16.msrb.mxu2 %v10691_v17  ;;  %1171 = vmatpush.bf16.msrb.mxu3 %v10697_v63  ;;  %v1304_v0 = vrot.slane %v10491_v30, 1 }
  0xe0   :  { %15786 = vst [vmem:[#allocation47_spill] sm:$0xff] %v10798_v52  ;;  %v1303_v52 = vrot.slane %v10498_v39, 1 }
  0xe2   :  { %v1305_v31 = vsel %vm1188_vm2, %v1303_v52, %v1304_v0 }
  0xe4   :  { %v10804_v5 = vpop.f32.mrf.mxu2  ;;  %v10806_v3 = vpop.f32.mrf.mxu3 }
  0xe5   :  { %15787 = vst [vmem:[#allocation48_spill] sm:$0xff] %v10804_v5  ;;  %v10808_v47 = vpop.f32.mrf.mxu0  ;;  %v10810_v43 = vpop.f32.mrf.mxu1 }
  0xe6   :  { %15788 = vst [vmem:[#allocation49_spill] sm:$0xff] %v10806_v3 }
  0xe7   :  { %15789 = vst [vmem:[#allocation50_spill] sm:$0xff] %v10808_v47 }
  0xe8   :  { %15790 = vst [vmem:[#allocation51_spill] sm:$0xff] %v10810_v43  ;;  %8782 = vmatmul.msk.bf16.gmra.mxu0 %vm299_vm1, %v10491_v30  ;;  %8784 = vmatmul.msk.bf16.gmra.mxu1 %vm299_vm1, %v10491_v30 }
  0xe9   :  { %8786 = vmatmul.msk.bf16.gmra.mxu2 %vm299_vm1, %v10493_v33  ;;  %8788 = vmatmul.msk.bf16.gmra.mxu3 %vm299_vm1, %v10493_v33 }
  0xec   :  { %v10820_v17 = vpop.f32.mrf.mxu2  ;;  %v10822_v63 = vpop.f32.mrf.mxu3 }
  0xed   :  { %15791 = vst [vmem:[#allocation52_spill] sm:$0xff] %v10820_v17  ;;  %v10824_v13 = vpop.f32.mrf.mxu0  ;;  %v10826_v9 = vpop.f32.mrf.mxu1 }
  0xee   :  { %15792 = vst [vmem:[#allocation53_spill] sm:$0xff] %v10822_v63 }
  0xef   :  { %15793 = vst [vmem:[#allocation54_spill] sm:$0xff] %v10824_v13 }
  0xf0   :  { %15794 = vst [vmem:[#allocation55_spill] sm:$0xff] %v10826_v9  ;;  %v8813_v9 = vld [vmem:[%s15678_s1 + $0x48] sm:$0xf0] }
  0xf4   :  { %v10828_v54 = vpop.f32.mrf.mxu2  ;;  %v10830_v62 = vpop.f32.mrf.mxu3 }
  0xf5   :  { %15795 = vst [vmem:[#allocation56_spill] sm:$0xff] %v10828_v54  ;;  %v10832_v50 = vpop.f32.mrf.mxu0  ;;  %v10834_v59 = vpop.f32.mrf.mxu1 }
  0xf6   :  { %15796 = vst [vmem:[#allocation57_spill] sm:$0xff] %v10830_v62 }
  0xf7   :  { %15797 = vst [vmem:[#allocation58_spill] sm:$0xff] %v10832_v50 }
  0xf8   :  { %15798 = vst [vmem:[#allocation59_spill] sm:$0xff] %v10834_v59  ;;  %8789 = vmatmul.msk.bf16.vlgmr.msra.gmra.mxu0 %vm299_vm1, %v10572_v51  ;;  %8791 = vmatmul.msk.bf16.vlgmr.msra.gmra.mxu1 %vm299_vm1, %v10572_v51 }
  0xf9   :  { %8793 = vmatmul.msk.bf16.vlgmr.msra.gmra.mxu2 %vm299_vm1, %v10575_v60  ;;  %8795 = vmatmul.msk.bf16.vlgmr.msra.gmra.mxu3 %vm299_vm1, %v10575_v60 }
  0xfc   :  { %v10844_v61 = vpop.f32.mrf.mxu2  ;;  %v10846_v55 = vpop.f32.mrf.mxu3 }
  0xfd   :  { %15799 = vst [vmem:[#allocation60_spill] sm:$0xff] %v10844_v61  ;;  %v10848_v45 = vpop.f32.mrf.mxu0  ;;  %v10850_v34 = vpop.f32.mrf.mxu1 }
  0xfe   :  { %15800 = vst [vmem:[#allocation61_spill] sm:$0xff] %v10846_v55  ;;  %v9659_v55 = vld [vmem:[%s15678_s1 + $0x54] sm:$0xf] }
  0xff   :  { %15801 = vst [vmem:[#allocation62_spill] sm:$0xff] %v10848_v45  ;;  %v9660_v45 = vld [vmem:[%s15678_s1 + $0x54] sm:$0xf0] }
 0x100   :  { %15802 = vst [vmem:[#allocation63_spill] sm:$0xff] %v10850_v34 }
 0x104   :  { %v10852_v59 = vpop.f32.mrf.mxu2  ;;  %v10854_v50 = vpop.f32.mrf.mxu3 }
 0x105   :  { %15803 = vst [vmem:[#allocation64_spill] sm:$0xff] %v10852_v59  ;;  %v10856_v62 = vpop.f32.mrf.mxu0  ;;  %v10858_v54 = vpop.f32.mrf.mxu1 }
 0x106   :  { %15804 = vst [vmem:[#allocation65_spill] sm:$0xff] %v10854_v50 }
 0x107   :  { %15805 = vst [vmem:[#allocation66_spill] sm:$0xff] %v10856_v62 }
 0x108   :  { %15806 = vst [vmem:[#allocation67_spill] sm:$0xff] %v10858_v54  ;;  %8790 = vmatmul.msk.bf16.gmra.mxu0 %vm299_vm1, %v10566_v37  ;;  %8792 = vmatmul.msk.bf16.gmra.mxu1 %vm299_vm1, %v10566_v37  ;;  %v8819_v54 = vld [vmem:[%s15678_s1 + $0x50] sm:$0xf] }
 0x109   :  { %8794 = vmatmul.msk.bf16.gmra.mxu2 %vm299_vm1, %v10568_v44  ;;  %8796 = vmatmul.msk.bf16.gmra.mxu3 %vm299_vm1, %v10568_v44  ;;  %v10885_v61 = vor.u32 %v9660_v45, %v8819_v54  ;;  %v9658_v54 = vld [vmem:[%s15678_s1 + $0x44] sm:$0xf0] }
 0x10b   :  { %1224 = vmatpush.bf16.msra.mxu0 %v10885_v61  ;;  %1271 = vmatpush.bf16.msra.mxu2 %v10885_v61 }
 0x10c   :  { %v10868_v34 = vpop.f32.mrf.mxu2  ;;  %v10870_v59 = vpop.f32.mrf.mxu3 }
 0x10d   :  { %15807 = vst [vmem:[#allocation68_spill] sm:$0xff] %v10868_v34  ;;  %v10872_v50 = vpop.f32.mrf.mxu0  ;;  %v10874_v62 = vpop.f32.mrf.mxu1 }
 0x10e   :  { %15808 = vst [vmem:[#allocation69_spill] sm:$0xff] %v10870_v59 }
 0x10f   :  { %15809 = vst [vmem:[#allocation70_spill] sm:$0xff] %v10872_v50  ;;  %v8821_v50 = vld [vmem:[%s15678_s1 + $0x58] sm:$0xf0] }
 0x110   :  { %15810 = vst [vmem:[#allocation71_spill] sm:$0xff] %v10874_v62  ;;  %v10890_v59 = vor.u32 %v9659_v55, %v8821_v50  ;;  %v8811_v62 = vld [vmem:[%s15678_s1 + $0x40] sm:$0xf]  ;;  %v9657_v55 = vld [vmem:[%s15678_s1 + $0x44] sm:$0xf] }
 0x111   :  { %v10909_v34 = vor.u32 %v9658_v54, %v8811_v62  ;;  %v10918_v17 = vor.u32 %v9657_v55, %v8813_v9 }
 0x112   :  { %1243 = vmatpush.bf16.msra.mxu1 %v10890_v59  ;;  %1290 = vmatpush.bf16.msra.mxu3 %v10890_v59 }
 0x113   :  { %1225 = vmatpush.bf16.msra.mxu0 %v10909_v34  ;;  %1272 = vmatpush.bf16.msra.mxu2 %v10909_v34 }
 0x114   :  { %v10905_v50 = vpop.f32.mrf.mxu2  ;;  %v10907_v45 = vpop.f32.mrf.mxu3 }
 0x115   :  { %15811 = vst [vmem:[#allocation72_spill] sm:$0xff] %v10905_v50  ;;  %v10914_v13 = vpop.f32.mrf.mxu0  ;;  %v10916_v63 = vpop.f32.mrf.mxu1  ;;  %v1257_v50 = vrot.slane %v10419_v42, 1 }
 0x116   :  { %15812 = vst [vmem:[#allocation73_spill] sm:$0xff] %v10907_v45  ;;  %1244 = vmatpush.bf16.msra.mxu1 %v10918_v17  ;;  %1291 = vmatpush.bf16.msra.mxu3 %v10918_v17 }
 0x117   :  { %15813 = vst [vmem:[#allocation74_spill] sm:$0xff] %v10914_v13 }
 0x118   :  { %15814 = vst [vmem:[#allocation75_spill] sm:$0xff] %v10916_v63  ;;  %8797 = vmatmul.msk.bf16.vlgmr.msrb.gmra.mxu0 %vm299_vm1, %v10634_v21  ;;  %8799 = vmatmul.msk.bf16.vlgmr.msrb.gmra.mxu1 %vm299_vm1, %v10634_v21 }
 0x119   :  { %8801 = vmatmul.msk.bf16.vlgmr.msrb.gmra.mxu2 %vm299_vm1, %v10637_v24  ;;  %8803 = vmatmul.msk.bf16.vlgmr.msrb.gmra.mxu3 %vm299_vm1, %v10637_v24 }
 0x11a   :  { %1318 = vmatpush.bf16.msrb.mxu0 %v10885_v61  ;;  %1337 = vmatpush.bf16.msrb.mxu1 %v10890_v59 }
 0x11b   :  { %1365 = vmatpush.bf16.msrb.mxu2 %v10885_v61  ;;  %1384 = vmatpush.bf16.msrb.mxu3 %v10890_v59 }
 0x11c   :  { %v10936_v62 = vpop.f32.mrf.mxu2  ;;  %v10938_v9 = vpop.f32.mrf.mxu3 }
 0x11d   :  { %15815 = vst [vmem:[#allocation76_spill] sm:$0xff] %v10936_v62  ;;  %v10940_v54 = vpop.f32.mrf.mxu0  ;;  %v10942_v55 = vpop.f32.mrf.mxu1 }
 0x11e   :  { %15816 = vst [vmem:[#allocation77_spill] sm:$0xff] %v10938_v9  ;;  %1319 = vmatpush.bf16.msrb.mxu0 %v10909_v34  ;;  %1338 = vmatpush.bf16.msrb.mxu1 %v10918_v17  ;;  %v1256_v9 = vrot.slane %v10412_v38, 1 }
 0x11f   :  { %15817 = vst [vmem:[#allocation78_spill] sm:$0xff] %v10940_v54  ;;  %1366 = vmatpush.bf16.msrb.mxu2 %v10909_v34  ;;  %1385 = vmatpush.bf16.msrb.mxu3 %v10918_v17  ;;  %v1190_v54 = vrot.slane %v10410_v36, 1 }
 0x120   :  { %15818 = vst [vmem:[#allocation79_spill] sm:$0xff] %v10942_v55 }
 0x124   :  { %v10948_v63 = vpop.f32.mrf.mxu2  ;;  %v10950_v13 = vpop.f32.mrf.mxu3 }
 0x125   :  { %15819 = vst [vmem:[#allocation80_spill] sm:$0xff] %v10948_v63  ;;  %v10952_v45 = vpop.f32.mrf.mxu0  ;;  %v10954_v62 = vpop.f32.mrf.mxu1 }
 0x126   :  { %15820 = vst [vmem:[#allocation81_spill] sm:$0xff] %v10950_v13 }
 0x127   :  { %15821 = vst [vmem:[#allocation82_spill] sm:$0xff] %v10952_v45 }
 0x128   :  { %15822 = vst [vmem:[#allocation83_spill] sm:$0xff] %v10954_v62  ;;  %8798 = vmatmul.msk.bf16.gmra.mxu0 %vm299_vm1, %v10630_v10  ;;  %8800 = vmatmul.msk.bf16.gmra.mxu1 %vm299_vm1, %v10630_v10  ;;  %v1189_v62 = vrot.slane %v10408_v35, 1 }
 0x129   :  { %8802 = vmatmul.msk.bf16.gmra.mxu2 %vm299_vm1, %v10632_v18  ;;  %8804 = vmatmul.msk.bf16.gmra.mxu3 %vm299_vm1, %v10632_v18 }
 0x12c   :  { %v10964_v55 = vpop.f32.mrf.mxu2  ;;  %v10966_v63 = vpop.f32.mrf.mxu3 }
 0x12d   :  { %15823 = vst [vmem:[#allocation84_spill] sm:$0xff] %v10964_v55  ;;  %v10968_v13 = vpop.f32.mrf.mxu0  ;;  %v10970_v45 = vpop.f32.mrf.mxu1 }
 0x12e   :  { %15824 = vst [vmem:[#allocation85_spill] sm:$0xff] %v10966_v63 }
 0x12f   :  { %15825 = vst [vmem:[#allocation86_spill] sm:$0xff] %v10968_v13  ;;  %v1191_v13 = vsel %vm1188_vm2, %v1189_v62, %v1190_v54 }
 0x130   :  { %15826 = vst [vmem:[#allocation87_spill] sm:$0xff] %v10970_v45  ;;  %v1258_v45 = vsel %vm1188_vm2, %v1256_v9, %v1257_v50 }
 0x134   :  { %v10976_v43 = vpop.f32.mrf.mxu2  ;;  %v10978_v47 = vpop.f32.mrf.mxu3 }
 0x135   :  { %15827 = vst [vmem:[#allocation88_spill] sm:$0xff] %v10976_v43  ;;  %v10980_v55 = vpop.f32.mrf.mxu0  ;;  %v10982_v63 = vpop.f32.mrf.mxu1 }
 0x136   :  { %15828 = vst [vmem:[#allocation89_spill] sm:$0xff] %v10978_v47 }
 0x138   :  { %8825 = vmatmul.msk.bf16.vlgmr.msra.gmra.mxu0 %vm299_vm1, %v1191_v13  ;;  %8827 = vmatmul.msk.bf16.vlgmr.msra.gmra.mxu1 %vm299_vm1, %v1191_v13 }
 0x139   :  { %8829 = vmatmul.msk.bf16.vlgmr.msra.gmra.mxu2 %vm299_vm1, %v1258_v45  ;;  %8831 = vmatmul.msk.bf16.vlgmr.msra.gmra.mxu3 %vm299_vm1, %v1258_v45 }
 0x13a   :  { %1412 = vmatpush.bf16.msra.mxu0 %v10885_v61  ;;  %1431 = vmatpush.bf16.msra.mxu1 %v10890_v59 }
 0x13b   :  { %1459 = vmatpush.bf16.msra.mxu2 %v10885_v61  ;;  %1478 = vmatpush.bf16.msra.mxu3 %v10890_v59 }
 0x13c   :  { %v10994_v47 = vpop.f32.mrf.mxu2  ;;  %v10996_v62 = vpop.f32.mrf.mxu3 }
 0x13d   :  { %v10998_v9 = vpop.f32.mrf.mxu0  ;;  %v11000_v43 = vpop.f32.mrf.mxu1 }
 0x13e   :  { %1413 = vmatpush.bf16.msra.mxu0 %v10909_v34  ;;  %1432 = vmatpush.bf16.msra.mxu1 %v10918_v17 }
 0x13f   :  { %1460 = vmatpush.bf16.msra.mxu2 %v10909_v34  ;;  %1479 = vmatpush.bf16.msra.mxu3 %v10918_v17 }
 0x144   :  { %v11006_v13 = vpop.f32.mrf.mxu2  ;;  %v11008_v45 = vpop.f32.mrf.mxu3 }
 0x145   :  { %v11010_v42 = vpop.f32.mrf.mxu0  ;;  %v11012_v38 = vpop.f32.mrf.mxu1 }
 0x148   :  { %8826 = vmatmul.msk.bf16.gmra.mxu0 %vm299_vm1, %v1190_v54  ;;  %8828 = vmatmul.msk.bf16.gmra.mxu1 %vm299_vm1, %v1190_v54  ;;  %v1351_v54 = vrot.slane %v10493_v33, 1 }
 0x149   :  { %8830 = vmatmul.msk.bf16.gmra.mxu2 %vm299_vm1, %v1257_v50  ;;  %8832 = vmatmul.msk.bf16.gmra.mxu3 %vm299_vm1, %v1257_v50 }
 0x14a   :  { %v1352_v29 = vsel %vm1188_vm2, %v1350_v28, %v1351_v54 }
 0x14c   :  { %v11018_v36 = vpop.f32.mrf.mxu2  ;;  %v11020_v35 = vpop.f32.mrf.mxu3 }
 0x14d   :  { %v11022_v3 = vpop.f32.mrf.mxu0  ;;  %v11024_v5 = vpop.f32.mrf.mxu1 }
 0x154   :  { %v11030_v32 = vpop.f32.mrf.mxu2  ;;  %v11032_v8 = vpop.f32.mrf.mxu3 }
 0x155   :  { %v11034_v50 = vpop.f32.mrf.mxu0  ;;  %v11036_v6 = vpop.f32.mrf.mxu1 }
 0x158   :  { %8833 = vmatmul.msk.bf16.vlgmr.msrb.gmra.mxu0 %vm299_vm1, %v1305_v31  ;;  %8835 = vmatmul.msk.bf16.vlgmr.msrb.gmra.mxu1 %vm299_vm1, %v1305_v31 }
 0x159   :  { %8837 = vmatmul.msk.bf16.vlgmr.msrb.gmra.mxu2 %vm299_vm1, %v1352_v29  ;;  %8839 = vmatmul.msk.bf16.vlgmr.msrb.gmra.mxu3 %vm299_vm1, %v1352_v29 }
 0x15a   :  { %1506 = vmatpush.bf16.msrb.mxu0 %v10885_v61  ;;  %1525 = vmatpush.bf16.msrb.mxu1 %v10890_v59 }
 0x15b   :  { %1553 = vmatpush.bf16.msrb.mxu2 %v10885_v61  ;;  %1572 = vmatpush.bf16.msrb.mxu3 %v10890_v59 }
 0x15c   :  { %v11048_v33 = vpop.f32.mrf.mxu2  ;;  %v11050_v52 = vpop.f32.mrf.mxu3 }
 0x15d   :  { %15829 = vst [vmem:[#allocation90_spill] sm:$0xff] %v11048_v33  ;;  %v11052_v28 = vpop.f32.mrf.mxu0  ;;  %v11054_v30 = vpop.f32.mrf.mxu1 }
 0x15e   :  { %15830 = vst [vmem:[#allocation91_spill] sm:$0xff] %v11050_v52  ;;  %1507 = vmatpush.bf16.msrb.mxu0 %v10909_v34  ;;  %1526 = vmatpush.bf16.msrb.mxu1 %v10918_v17 }
 0x15f   :  { %15831 = vst [vmem:[#allocation92_spill] sm:$0xff] %v11052_v28  ;;  %1554 = vmatpush.bf16.msrb.mxu2 %v10909_v34  ;;  %1573 = vmatpush.bf16.msrb.mxu3 %v10918_v17 }
 0x160   :  { %15832 = vst [vmem:[#allocation93_spill] sm:$0xff] %v11054_v30 }
 0x164   :  { %v11060_v29 = vpop.f32.mrf.mxu2  ;;  %v11062_v61 = vpop.f32.mrf.mxu3 }
 0x165   :  { %15833 = vst [vmem:[#allocation94_spill] sm:$0xff] %v11060_v29  ;;  %v11064_v59 = vpop.f32.mrf.mxu0  ;;  %v11066_v31 = vpop.f32.mrf.mxu1 }
 0x166   :  { %15834 = vst [vmem:[#allocation95_spill] sm:$0xff] %v11062_v61  ;;  %v1444_v61 = vrot.slane %v10575_v60, 1 }
 0x167   :  { %15835 = vst [vmem:[#allocation96_spill] sm:$0xff] %v11064_v59  ;;  %v1397_v59 = vrot.slane %v10572_v51, 1 }
 0x168   :  { %15836 = vst [vmem:[#allocation97_spill] sm:$0xff] %v11066_v31  ;;  %8834 = vmatmul.msk.bf16.gmra.mxu0 %vm299_vm1, %v1304_v0  ;;  %8836 = vmatmul.msk.bf16.gmra.mxu1 %vm299_vm1, %v1304_v0  ;;  %v1398_v31 = vrot.slane %v10566_v37, 1  ;;  %v1445_v0 = vrot.slane %v10568_v44, 1 }
 0x169   :  { %8838 = vmatmul.msk.bf16.gmra.mxu2 %vm299_vm1, %v1351_v54  ;;  %8840 = vmatmul.msk.bf16.gmra.mxu3 %vm299_vm1, %v1351_v54 }
 0x16c   :  { %v11072_v30 = vpop.f32.mrf.mxu2  ;;  %v11074_v34 = vpop.f32.mrf.mxu3 }
 0x16d   :  { %15837 = vst [vmem:[#allocation98_spill] sm:$0xff] %v11072_v30  ;;  %v11076_v17 = vpop.f32.mrf.mxu0  ;;  %v11078_v29 = vpop.f32.mrf.mxu1 }
 0x16e   :  { %15838 = vst [vmem:[#allocation99_spill] sm:$0xff] %v11074_v34 }
 0x16f   :  { %15839 = vst [vmem:[#allocation100_spill] sm:$0xff] %v11076_v17  ;;  %v1399_v17 = vsel %vm1188_vm2, %v1397_v59, %v1398_v31 }
 0x170   :  { %15840 = vst [vmem:[#allocation101_spill] sm:$0xff] %v11078_v29  ;;  %v1446_v29 = vsel %vm1188_vm2, %v1444_v61, %v1445_v0 }
 0x174   :  { %v11084_v28 = vpop.f32.mrf.mxu2  ;;  %v11086_v52 = vpop.f32.mrf.mxu3 }
 0x175   :  { %15841 = vst [vmem:[#allocation102_spill] sm:$0xff] %v11084_v28  ;;  %v11088_v54 = vpop.f32.mrf.mxu0  ;;  %v11090_v30 = vpop.f32.mrf.mxu1 }
 0x176   :  { %15842 = vst [vmem:[#allocation103_spill] sm:$0xff] %v11086_v52 }
 0x177   :  { %15843 = vst [vmem:[#allocation104_spill] sm:$0xff] %v11088_v54 }
 0x178   :  { %15844 = vst [vmem:[#allocation105_spill] sm:$0xff] %v11090_v30  ;;  %8841 = vmatmul.msk.bf16.vlgmr.msra.gmra.mxu0 %vm299_vm1, %v1399_v17  ;;  %8843 = vmatmul.msk.bf16.vlgmr.msra.gmra.mxu1 %vm299_vm1, %v1399_v17 }
 0x179   :  { %8845 = vmatmul.msk.bf16.vlgmr.msra.gmra.mxu2 %vm299_vm1, %v1446_v29  ;;  %8847 = vmatmul.msk.bf16.vlgmr.msra.gmra.mxu3 %vm299_vm1, %v1446_v29 }
 0x17c   :  { %v11098_v44 = vpop.f32.mrf.mxu2  ;;  %v11100_v37 = vpop.f32.mrf.mxu3 }
 0x17d   :  { %15845 = vst [vmem:[#allocation106_spill] sm:$0xff] %v11098_v44  ;;  %v11102_v52 = vpop.f32.mrf.mxu0  ;;  %v11104_v54 = vpop.f32.mrf.mxu1 }
 0x17e   :  { %15846 = vst [vmem:[#allocation107_spill] sm:$0xff] %v11100_v37  ;;  %v8865_v37 = vld [vmem:[%s15678_s1 + $0x68] sm:$0xf0] }
 0x17f   :  { %15847 = vst [vmem:[#allocation108_spill] sm:$0xff] %v11102_v52  ;;  %v1539_v52 = vrot.slane %v10632_v18, 1 }
 0x180   :  { %15848 = vst [vmem:[#allocation109_spill] sm:$0xff] %v11104_v54 }
 0x184   :  { %v11106_v30 = vpop.f32.mrf.mxu2  ;;  %v11108_v59 = vpop.f32.mrf.mxu3 }
 0x185   :  { %15849 = vst [vmem:[#allocation110_spill] sm:$0xff] %v11106_v30  ;;  %v11110_v61 = vpop.f32.mrf.mxu0  ;;  %v11112_v28 = vpop.f32.mrf.mxu1 }
 0x186   :  { %15850 = vst [vmem:[#allocation111_spill] sm:$0xff] %v11108_v59  ;;  %v1538_v59 = vrot.slane %v10637_v24, 1 }
 0x187   :  { %15851 = vst [vmem:[#allocation112_spill] sm:$0xff] %v11110_v61 }
 0x188   :  { %15852 = vst [vmem:[#allocation113_spill] sm:$0xff] %v11112_v28  ;;  %8842 = vmatmul.msk.bf16.gmra.mxu0 %vm299_vm1, %v1398_v31  ;;  %8844 = vmatmul.msk.bf16.gmra.mxu1 %vm299_vm1, %v1398_v31  ;;  %v8871_v28 = vld [vmem:[%s15678_s1 + $0x70] sm:$0xf]  ;;  %v9664_v31 = vld [vmem:[%s15678_s1 + $0x74] sm:$0xf0]  ;;  %v1540_v33 = vsel %vm1188_vm2, %v1538_v59, %v1539_v52 }
 0x189   :  { %8846 = vmatmul.msk.bf16.gmra.mxu2 %vm299_vm1, %v1445_v0  ;;  %8848 = vmatmul.msk.bf16.gmra.mxu3 %vm299_vm1, %v1445_v0  ;;  %v9663_v0 = vld [vmem:[%s15678_s1 + $0x74] sm:$0xf]  ;;  %v11135_v61 = vor.u32 %v9664_v31, %v8871_v28  ;;  %v8863_v28 = vld [vmem:[%s15678_s1 + $0x60] sm:$0xf]  ;;  %v9661_v31 = vld [vmem:[%s15678_s1 + $0x64] sm:$0xf] }
 0x18a   :  { %v11173_v34 = vor.u32 %v9661_v31, %v8865_v37 }
 0x18b   :  { %1694 = vmatpush.bf16.msra.mxu0 %v11135_v61  ;;  %1745 = vmatpush.bf16.msra.mxu2 %v11135_v61 }
 0x18c   :  { %v11118_v29 = vpop.f32.mrf.mxu2  ;;  %v11120_v17 = vpop.f32.mrf.mxu3 }
 0x18d   :  { %15853 = vst [vmem:[#allocation114_spill] sm:$0xff] %v11118_v29  ;;  %v11122_v54 = vpop.f32.mrf.mxu0  ;;  %v11124_v30 = vpop.f32.mrf.mxu1  ;;  %v1492_v29 = vrot.slane %v10630_v10, 1 }
 0x18e   :  { %15854 = vst [vmem:[#allocation115_spill] sm:$0xff] %v11120_v17 }
 0x18f   :  { %15855 = vst [vmem:[#allocation116_spill] sm:$0xff] %v11122_v54  ;;  %v8873_v54 = vld [vmem:[%s15678_s1 + $0x78] sm:$0xf0] }
 0x190   :  { %15856 = vst [vmem:[#allocation117_spill] sm:$0xff] %v11124_v30  ;;  %v11140_v17 = vor.u32 %v9663_v0, %v8873_v54  ;;  %v1491_v30 = vrot.slane %v10634_v21, 1  ;;  %v9662_v54 = vld [vmem:[%s15678_s1 + $0x64] sm:$0xf0] }
 0x191   :  { %v11163_v18 = vor.u32 %v9662_v54, %v8863_v28  ;;  %v15859_v28 = vor.u32 %v10430_v49, %v10428_v48 }
 0x192   :  { %1713 = vmatpush.bf16.msra.mxu1 %v11140_v17  ;;  %1764 = vmatpush.bf16.msra.mxu3 %v11140_v17  ;;  %v1493_v21 = vsel %vm1188_vm2, %v1491_v30, %v1492_v29  ;;  %v15860_v30 = vor.u32 %v10439_v56, %v10433_v53 }
 0x193   :  { %1695 = vmatpush.bf16.msra.mxu0 %v11163_v18  ;;  %1746 = vmatpush.bf16.msra.mxu2 %v11163_v18  ;;  %v1661_v54 = vsel %vm1654_vm3, %v15859_v28, %v10459_v4 }
 0x194   :  { %v11159_v0 = vpop.f32.mrf.mxu2  ;;  %v11161_v10 = vpop.f32.mrf.mxu3  ;;  %v1732_v37 = vsel %vm1654_vm3, %v15860_v30, %v10477_v15 }
 0x195   :  { %v11168_v44 = vpop.f32.mrf.mxu0  ;;  %v11170_v24 = vpop.f32.mrf.mxu1 }
 0x196   :  { %15857 = vst [vmem:[#allocation118_spill] sm:$0xff] %v11168_v44  ;;  %1714 = vmatpush.bf16.msra.mxu1 %v11173_v34  ;;  %1765 = vmatpush.bf16.msra.mxu3 %v11173_v34 }
 0x197   :  { %15858 = vst [vmem:[#allocation119_spill] sm:$0xff] %v11170_v24 }
 0x198   :  { %8849 = vmatmul.msk.bf16.vlgmr.msrb.gmra.mxu0 %vm299_vm1, %v1493_v21  ;;  %8851 = vmatmul.msk.bf16.vlgmr.msrb.gmra.mxu1 %vm299_vm1, %v1493_v21 }
 0x199   :  { %8853 = vmatmul.msk.bf16.vlgmr.msrb.gmra.mxu2 %vm299_vm1, %v1540_v33  ;;  %8855 = vmatmul.msk.bf16.vlgmr.msrb.gmra.mxu3 %vm299_vm1, %v1540_v33 }
 0x19a   :  { %1796 = vmatpush.bf16.msrb.mxu0 %v11135_v61  ;;  %1815 = vmatpush.bf16.msrb.mxu1 %v11140_v17 }
 0x19b   :  { %1847 = vmatpush.bf16.msrb.mxu2 %v11135_v61  ;;  %1866 = vmatpush.bf16.msrb.mxu3 %v11140_v17 }
 0x19c   :  { %v11198_v48 = vpop.f32.mrf.mxu2  ;;  %v11200_v49 = vpop.f32.mrf.mxu3 }
 0x19d   :  { %15861 = vst [vmem:[#allocation120_spill] sm:$0xff] %v11198_v48  ;;  %v11202_v21 = vpop.f32.mrf.mxu0  ;;  %v11204_v53 = vpop.f32.mrf.mxu1  ;;  %v15876_v48 = vshll.u32 %v10501_v41, 16 }
 0x19e   :  { %15862 = vst [vmem:[#allocation121_spill] sm:$0xff] %v11200_v49  ;;  %1797 = vmatpush.bf16.msrb.mxu0 %v11163_v18  ;;  %1816 = vmatpush.bf16.msrb.mxu1 %v11173_v34 }
 0x19f   :  { %15863 = vst [vmem:[#allocation122_spill] sm:$0xff] %v11202_v21  ;;  %1848 = vmatpush.bf16.msrb.mxu2 %v11163_v18  ;;  %1867 = vmatpush.bf16.msrb.mxu3 %v11173_v34 }
 0x1a0   :  { %15864 = vst [vmem:[#allocation123_spill] sm:$0xff] %v11204_v53 }
 0x1a4   :  { %v11210_v56 = vpop.f32.mrf.mxu2  ;;  %v11212_v33 = vpop.f32.mrf.mxu3 }
 0x1a5   :  { %15865 = vst [vmem:[#allocation124_spill] sm:$0xff] %v11210_v56  ;;  %v11214_v59 = vpop.f32.mrf.mxu0  ;;  %v11216_v31 = vpop.f32.mrf.mxu1 }
 0x1a6   :  { %15866 = vst [vmem:[#allocation125_spill] sm:$0xff] %v11212_v33 }
 0x1a7   :  { %15867 = vst [vmem:[#allocation126_spill] sm:$0xff] %v11214_v59  ;;  %v15873_v59 = vshrl.u32 %v10498_v39, 16 }
 0x1a8   :  { %15868 = vst [vmem:[#allocation127_spill] sm:$0xff] %v11216_v31  ;;  %8850 = vmatmul.msk.bf16.gmra.mxu0 %vm299_vm1, %v1492_v29  ;;  %8852 = vmatmul.msk.bf16.gmra.mxu1 %vm299_vm1, %v1492_v29  ;;  %v15874_v31 = vshll.u32 %v10498_v39, 16  ;;  %v15875_v29 = vshrl.u32 %v10501_v41, 16 }
 0x1a9   :  { %8854 = vmatmul.msk.bf16.gmra.mxu2 %vm299_vm1, %v1539_v52  ;;  %8856 = vmatmul.msk.bf16.gmra.mxu3 %vm299_vm1, %v1539_v52  ;;  %v1777_v33 = vrot.slane %v15873_v59, 1  ;;  %v1829_v52 = vrot.slane %v15876_v48, 2 }
 0x1aa   :  { %v1778_v21 = vrot.slane %v15874_v31, 2  ;;  %v1828_v49 = vrot.slane %v15875_v29, 1 }
 0x1ac   :  { %v11222_v28 = vpop.f32.mrf.mxu2  ;;  %v11224_v30 = vpop.f32.mrf.mxu3  ;;  %v1779_v29 = vor.u32 %v1778_v21, %v1777_v33  ;;  %v1830_v44 = vor.u32 %v1829_v52, %v1828_v49 }
 0x1ad   :  { %15869 = vst [vmem:[#allocation128_spill] sm:$0xff] %v11222_v28  ;;  %v11226_v53 = vpop.f32.mrf.mxu0  ;;  %v11228_v56 = vpop.f32.mrf.mxu1  ;;  %v861_v28 = vadd.f32 %v10980_v55, %v10720_v7  ;;  %v882_v55 = vadd.f32 %v11000_v43, %v10742_v2  ;;  %v905_v43 = vadd.f32 %v11006_v13, %v10748_v46  ;;  %v866_v2 = vadd.f32 %v11010_v42, %v10752_v14 }
 0x1ae   :  { %15870 = vst [vmem:[#allocation129_spill] sm:$0xff] %v11224_v30  ;;  %v11254_v7 = vsel %vm1654_vm3, %v1779_v29, %v10514_v57  ;;  %v927_v42 = vadd.f32 %v11020_v35, %v10766_v22  ;;  %v887_v14 = vadd.f32 %v11024_v5, %v10770_v23  ;;  %v15877_v35 = vshrl.u32 %v10572_v51, 16 }
 0x1af   :  { %15871 = vst [vmem:[#allocation130_spill] sm:$0xff] %v11226_v53  ;;  %v880_v53 = vadd.f32 %v10982_v63, %v10722_v40  ;;  %v11258_v40 = vsel %vm1654_vm3, %v1830_v44, %v10516_v58  ;;  %v922_v63 = vadd.f32 %v10996_v62, %v10738_v27  ;;  %v863_v44 = vadd.f32 %v10998_v9, %v10740_v12 }
 0x1b0   :  { %15872 = vst [vmem:[#allocation131_spill] sm:$0xff] %v11228_v56  ;;  %v924_v12 = vadd.f32 %v11008_v45, %v10750_v1  ;;  %v885_v62 = vadd.f32 %v11012_v38, %v10754_v16  ;;  %v908_v38 = vadd.f32 %v11018_v36, %v10764_v20  ;;  %v868_v1 = vadd.f32 %v11022_v3, %v10768_v11  ;;  %v15879_v3 = vld [vmem:[#allocation42_spill] sm:$0xff] }
 0x1b1   :  { %v1879_v20 = vrot.slane %v15877_v35, 1  ;;  %v15878_v22 = vshrl.u32 %v10575_v60, 16  ;;  %v910_v5 = vadd.f32 %v11030_v32, %v10772_v26  ;;  %v929_v23 = vadd.f32 %v11032_v8, %v10774_v19 }
 0x1b3   :  { %v1930_v11 = vrot.slane %v15878_v22, 1  ;;  %v15892_v22 = vld [vmem:[#allocation93_spill] sm:$0xff] }
 0x1b4   :  { %v11242_v30 = vpop.f32.mrf.mxu2  ;;  %v11244_v56 = vpop.f32.mrf.mxu3 }
 0x1b5   :  { %v1227_v59 = vpop.f32.mrf.mxu0  ;;  %v1246_v24 = vpop.f32.mrf.mxu1 }
 0x1b6   :  { %v11246_v39 = vadd.f32 %v1227_v59, %v861_v28  ;;  %v11248_v31 = vadd.f32 %v1246_v24, %v880_v53  ;;  %v903_v24 = vadd.f32 %v10994_v47, %v10736_v25 }
 0x1b8   :  { %8877 = vmatmul.msk.bf16.vlgmr.msra.gmra.mxu0 %vm299_vm1, %v1661_v54  ;;  %8879 = vmatmul.msk.bf16.vlgmr.msra.gmra.mxu1 %vm299_vm1, %v1661_v54 }
 0x1b9   :  { %8881 = vmatmul.msk.bf16.vlgmr.msra.gmra.mxu2 %vm299_vm1, %v1732_v37  ;;  %8883 = vmatmul.msk.bf16.vlgmr.msra.gmra.mxu3 %vm299_vm1, %v1732_v37 }
 0x1ba   :  { %1898 = vmatpush.bf16.msra.mxu0 %v11135_v61  ;;  %1917 = vmatpush.bf16.msra.mxu1 %v11140_v17 }
 0x1bb   :  { %1949 = vmatpush.bf16.msra.mxu2 %v11135_v61  ;;  %1968 = vmatpush.bf16.msra.mxu3 %v11140_v17 }
 0x1bc   :  { %v1274_v54 = vpop.f32.mrf.mxu2  ;;  %v1293_v37 = vpop.f32.mrf.mxu3 }
 0x1bd   :  { %v11274_v48 = vadd.f32 %v1274_v54, %v903_v24  ;;  %v11276_v49 = vadd.f32 %v1293_v37, %v922_v63  ;;  %v1229_v25 = vpop.f32.mrf.mxu0  ;;  %v1248_v47 = vpop.f32.mrf.mxu1 }
 0x1be   :  { %v11278_v21 = vadd.f32 %v1229_v25, %v863_v44  ;;  %v11280_v27 = vadd.f32 %v1248_v47, %v882_v55  ;;  %1899 = vmatpush.bf16.msra.mxu0 %v11163_v18  ;;  %1918 = vmatpush.bf16.msra.mxu1 %v11173_v34  ;;  %v945_v44 = vadd.f32 %v11034_v50, %v15879_v3  ;;  %v15880_v55 = vld [vmem:[#allocation43_spill] sm:$0xff]  ;;  %v15881_v47 = vshll.u32 %v10572_v51, 16 }
 0x1bf   :  { %1950 = vmatpush.bf16.msra.mxu2 %v11163_v18  ;;  %1969 = vmatpush.bf16.msra.mxu3 %v11173_v34  ;;  %v964_v54 = vadd.f32 %v11036_v6, %v15880_v55 }
 0x1c4   :  { %v1276_v9 = vpop.f32.mrf.mxu2  ;;  %v1295_v53 = vpop.f32.mrf.mxu3 }
 0x1c5   :  { %v11294_v33 = vadd.f32 %v1276_v9, %v905_v43  ;;  %v11296_v28 = vadd.f32 %v1295_v53, %v924_v12  ;;  %v1232_v52 = vpop.f32.mrf.mxu0  ;;  %v1251_v59 = vpop.f32.mrf.mxu1  ;;  %v1880_v43 = vrot.slane %v15881_v47, 2  ;;  %v15882_v12 = vshll.u32 %v10575_v60, 16  ;;  %v15883_v53 = vld [vmem:[#allocation34_spill] sm:$0xff]  ;;  %v15895_v47 = vld [vmem:[#allocation49_spill] sm:$0xff]  ;;  %v15944_v60 = vld [vmem:[#allocation67_spill] sm:$0xff] }
 0x1c6   :  { %v11298_v29 = vadd.f32 %v1232_v52, %v866_v2  ;;  %v11300_v46 = vadd.f32 %v1251_v59, %v885_v62  ;;  %v15884_v59 = vld [vmem:[#allocation35_spill] sm:$0xff] }
 0x1c7   :  { %v1931_v2 = vrot.slane %v15882_v12, 2  ;;  %v1881_v9 = vor.u32 %v1880_v43, %v1879_v20  ;;  %v15891_v20 = vld [vmem:[#allocation47_spill] sm:$0xff] }
 0x1c8   :  { %8878 = vmatmul.msk.bf16.gmra.mxu0 %vm299_vm1, %v10459_v4  ;;  %8880 = vmatmul.msk.bf16.gmra.mxu1 %vm299_vm1, %v10459_v4  ;;  %v15896_v43 = vld [vmem:[#allocation95_spill] sm:$0xff] }
 0x1c9   :  { %8882 = vmatmul.msk.bf16.gmra.mxu2 %vm299_vm1, %v10477_v15  ;;  %8884 = vmatmul.msk.bf16.gmra.mxu3 %vm299_vm1, %v10477_v15  ;;  %v1932_v6 = vor.u32 %v1931_v2, %v1930_v11  ;;  %v11356_v52 = vsel %vm1654_vm3, %v1881_v9, %v15883_v53  ;;  %v1008_v12 = vadd.f32 %v15896_v43, %v15895_v47  ;;  %v15897_v2 = vld [vmem:[#allocation50_spill] sm:$0xff]  ;;  %v15899_v9 = vld [vmem:[#allocation51_spill] sm:$0xff] }
 0x1cc   :  { %v1279_v16 = vpop.f32.mrf.mxu2  ;;  %v1298_v4 = vpop.f32.mrf.mxu3 }
 0x1cd   :  { %v11318_v13 = vadd.f32 %v1279_v16, %v908_v38  ;;  %v11320_v45 = vadd.f32 %v1298_v4, %v927_v42  ;;  %v1234_v24 = vpop.f32.mrf.mxu0  ;;  %v1253_v15 = vpop.f32.mrf.mxu1  ;;  %v11360_v38 = vsel %vm1654_vm3, %v1932_v6, %v15884_v59  ;;  %v15885_v42 = vld [vmem:[#allocation44_spill] sm:$0xff]  ;;  %v15888_v16 = vld [vmem:[#allocation91_spill] sm:$0xff]  ;;  %v15900_v6 = vld [vmem:[#allocation97_spill] sm:$0xff] }
 0x1ce   :  { %v11322_v63 = vadd.f32 %v1234_v24, %v868_v1  ;;  %v11324_v36 = vadd.f32 %v1253_v15, %v887_v14  ;;  %v15887_v14 = vld [vmem:[#allocation45_spill] sm:$0xff]  ;;  %v15889_v24 = vld [vmem:[#allocation46_spill] sm:$0xff]  ;;  %v15890_v15 = vld [vmem:[#allocation92_spill] sm:$0xff] }
 0x1cf   :  { %v1006_v4 = vadd.f32 %v15888_v16, %v15887_v14  ;;  %v947_v35 = vadd.f32 %v15890_v15, %v15889_v24  ;;  %v15901_v15 = vld [vmem:[#allocation52_spill] sm:$0xff] }
 0x1d4   :  { %v1281_v37 = vpop.f32.mrf.mxu2  ;;  %v1300_v25 = vpop.f32.mrf.mxu3 }
 0x1d5   :  { %v11342_v62 = vadd.f32 %v1281_v37, %v910_v5  ;;  %v11344_v32 = vadd.f32 %v1300_v25, %v929_v23  ;;  %v1321_v26 = vpop.f32.mrf.mxu0  ;;  %v1340_v8 = vpop.f32.mrf.mxu1 }
 0x1d6   :  { %v11346_v19 = vadd.f32 %v1321_v26, %v945_v44  ;;  %v11348_v50 = vadd.f32 %v1340_v8, %v964_v54  ;;  %v15898_v26 = vld [vmem:[#allocation96_spill] sm:$0xff] }
 0x1d7   :  { %v950_v8 = vadd.f32 %v15898_v26, %v15897_v2 }
 0x1d8   :  { %8885 = vmatmul.msk.bf16.vlgmr.msrb.gmra.mxu0 %vm299_vm1, %v11254_v7  ;;  %8887 = vmatmul.msk.bf16.vlgmr.msrb.gmra.mxu1 %vm299_vm1, %v11254_v7  ;;  %v15886_v7 = vld [vmem:[#allocation90_spill] sm:$0xff] }
 0x1d9   :  { %8889 = vmatmul.msk.bf16.vlgmr.msrb.gmra.mxu2 %vm299_vm1, %v11258_v40  ;;  %8891 = vmatmul.msk.bf16.vlgmr.msrb.gmra.mxu3 %vm299_vm1, %v11258_v40  ;;  %v987_v1 = vadd.f32 %v15886_v7, %v15885_v42  ;;  %v966_v40 = vadd.f32 %v15892_v22, %v15891_v20  ;;  %v969_v42 = vadd.f32 %v15900_v6, %v15899_v9  ;;  %v15903_v22 = vld [vmem:[#allocation53_spill] sm:$0xff]  ;;  %v15909_v9 = vld [vmem:[#allocation38_spill] sm:$0xff] }
 0x1da   :  { %2000 = vmatpush.bf16.msrb.mxu0 %v11135_v61  ;;  %2019 = vmatpush.bf16.msrb.mxu1 %v11140_v17  ;;  %v15910_v6 = vshrl.u32 %v15909_v9, 16 }
 0x1db   :  { %2051 = vmatpush.bf16.msrb.mxu2 %v11135_v61  ;;  %2070 = vmatpush.bf16.msrb.mxu3 %v11140_v17  ;;  %v15893_v61 = vld [vmem:[#allocation48_spill] sm:$0xff]  ;;  %v15894_v17 = vld [vmem:[#allocation94_spill] sm:$0xff] }
 0x1dc   :  { %v1368_v11 = vpop.f32.mrf.mxu2  ;;  %v1387_v5 = vpop.f32.mrf.mxu3  ;;  %v989_v25 = vadd.f32 %v15894_v17, %v15893_v61  ;;  %v15907_v61 = vld [vmem:[#allocation55_spill] sm:$0xff]  ;;  %v15908_v17 = vld [vmem:[#allocation101_spill] sm:$0xff] }
 0x1dd   :  { %v11378_v23 = vadd.f32 %v1368_v11, %v987_v1  ;;  %v11380_v3 = vadd.f32 %v1387_v5, %v1006_v4  ;;  %v1323_v44 = vpop.f32.mrf.mxu0  ;;  %v1342_v55 = vpop.f32.mrf.mxu1  ;;  %v15905_v5 = vld [vmem:[#allocation54_spill] sm:$0xff] }
 0x1de   :  { %v11382_v54 = vadd.f32 %v1323_v44, %v947_v35  ;;  %v11384_v37 = vadd.f32 %v1342_v55, %v966_v40  ;;  %2001 = vmatpush.bf16.msrb.mxu0 %v11163_v18  ;;  %2020 = vmatpush.bf16.msrb.mxu1 %v11173_v34  ;;  %v15902_v35 = vld [vmem:[#allocation98_spill] sm:$0xff]  ;;  %v15904_v40 = vld [vmem:[#allocation99_spill] sm:$0xff]  ;;  %v15906_v44 = vld [vmem:[#allocation100_spill] sm:$0xff] }
 0x1df   :  { %2052 = vmatpush.bf16.msrb.mxu2 %v11163_v18  ;;  %2071 = vmatpush.bf16.msrb.mxu3 %v11173_v34  ;;  %v992_v20 = vadd.f32 %v15902_v35, %v15901_v15  ;;  %v1011_v11 = vadd.f32 %v15904_v40, %v15903_v22  ;;  %v952_v55 = vadd.f32 %v15906_v44, %v15905_v5  ;;  %v15914_v15 = vld [vmem:[#allocation102_spill] sm:$0xff]  ;;  %v15915_v22 = vld [vmem:[#allocation57_spill] sm:$0xff]  ;;  %v15918_v5 = vld [vmem:[#allocation104_spill] sm:$0xff] }
 0x1e4   :  { %v1370_v7 = vpop.f32.mrf.mxu2  ;;  %v1389_v1 = vpop.f32.mrf.mxu3 }
 0x1e5   :  { %v11398_v14 = vadd.f32 %v1370_v7, %v989_v25  ;;  %v11400_v16 = vadd.f32 %v1389_v1, %v1008_v12  ;;  %v1326_v18 = vpop.f32.mrf.mxu0  ;;  %v1345_v34 = vpop.f32.mrf.mxu1  ;;  %v971_v25 = vadd.f32 %v15908_v17, %v15907_v61  ;;  %v15911_v7 = vld [vmem:[#allocation39_spill] sm:$0xff] }
 0x1e6   :  { %v11402_v4 = vadd.f32 %v1326_v18, %v950_v8  ;;  %v11404_v24 = vadd.f32 %v1345_v34, %v969_v42  ;;  %v1981_v42 = vrot.slane %v15910_v6, 1  ;;  %v15912_v1 = vshrl.u32 %v15911_v7, 16  ;;  %v15913_v34 = vld [vmem:[#allocation56_spill] sm:$0xff]  ;;  %v15919_v61 = vld [vmem:[#allocation59_spill] sm:$0xff] }
 0x1e7   :  { %v994_v35 = vadd.f32 %v15914_v15, %v15913_v34 }
 0x1e8   :  { %8886 = vmatmul.msk.bf16.gmra.mxu0 %vm299_vm1, %v10514_v57  ;;  %8888 = vmatmul.msk.bf16.gmra.mxu1 %vm299_vm1, %v10514_v57  ;;  %v2032_v18 = vrot.slane %v15912_v1, 1 }
 0x1e9   :  { %8890 = vmatmul.msk.bf16.gmra.mxu2 %vm299_vm1, %v10516_v58  ;;  %8892 = vmatmul.msk.bf16.gmra.mxu3 %vm299_vm1, %v10516_v58 }
 0x1ec   :  { %v1373_v47 = vpop.f32.mrf.mxu2  ;;  %v1392_v57 = vpop.f32.mrf.mxu3 }
 0x1ed   :  { %v11422_v43 = vadd.f32 %v1373_v47, %v992_v20  ;;  %v11424_v12 = vadd.f32 %v1392_v57, %v1011_v11  ;;  %v1328_v2 = vpop.f32.mrf.mxu0  ;;  %v1347_v58 = vpop.f32.mrf.mxu1  ;;  %v15916_v20 = vld [vmem:[#allocation103_spill] sm:$0xff]  ;;  %v15917_v11 = vld [vmem:[#allocation58_spill] sm:$0xff]  ;;  %v15921_v57 = vshll.u32 %v15909_v9, 16 }
 0x1ee   :  { %v11426_v26 = vadd.f32 %v1328_v2, %v952_v55  ;;  %v11428_v8 = vadd.f32 %v1347_v58, %v971_v25  ;;  %v1013_v40 = vadd.f32 %v15916_v20, %v15915_v22  ;;  %v1029_v44 = vadd.f32 %v15918_v5, %v15917_v11  ;;  %v15920_v55 = vld [vmem:[#allocation105_spill] sm:$0xff] }
 0x1ef   :  { %v1048_v17 = vadd.f32 %v15920_v55, %v15919_v61  ;;  %v1982_v2 = vrot.slane %v15921_v57, 2  ;;  %v15922_v58 = vshll.u32 %v15911_v7, 16  ;;  %v15927_v55 = vld [vmem:[#allocation40_spill] sm:$0xff]  ;;  %v15933_v57 = vld [vmem:[#allocation62_spill] sm:$0xff] }
 0x1f1   :  { %v2033_v6 = vrot.slane %v15922_v58, 2  ;;  %v1983_v5 = vor.u32 %v1982_v2, %v1981_v42  ;;  %v15929_v42 = vld [vmem:[#allocation60_spill] sm:$0xff] }
 0x1f2   :  { %v15934_v2 = vld [vmem:[#allocation108_spill] sm:$0xff] }
 0x1f3   :  { %v2034_v61 = vor.u32 %v2033_v6, %v2032_v18  ;;  %v15930_v18 = vld [vmem:[#allocation106_spill] sm:$0xff]  ;;  %v1031_v58 = vadd.f32 %v15934_v2, %v15933_v57  ;;  %v15935_v6 = vld [vmem:[#allocation63_spill] sm:$0xff] }
 0x1f4   :  { %v1375_v25 = vpop.f32.mrf.mxu2  ;;  %v1394_v47 = vpop.f32.mrf.mxu3  ;;  %v15941_v57 = vld [vmem:[#allocation111_spill] sm:$0xff] }
 0x1f5   :  { %v11446_v1 = vadd.f32 %v1375_v25, %v994_v35  ;;  %v11448_v34 = vadd.f32 %v1394_v47, %v1013_v40  ;;  %v1415_v15 = vpop.f32.mrf.mxu0  ;;  %v1434_v22 = vpop.f32.mrf.mxu1  ;;  %v11460_v35 = vsel %vm1654_vm3, %v1983_v5, %v15927_v55  ;;  %v15928_v40 = vld [vmem:[#allocation41_spill] sm:$0xff]  ;;  %v15932_v47 = vld [vmem:[#allocation107_spill] sm:$0xff] }
 0x1f6   :  { %v11450_v20 = vadd.f32 %v1415_v15, %v1029_v44  ;;  %v11452_v11 = vadd.f32 %v1434_v22, %v1048_v17  ;;  %v11464_v25 = vsel %vm1654_vm3, %v2034_v61, %v15928_v40  ;;  %v1071_v44 = vadd.f32 %v15930_v18, %v15929_v42  ;;  %v15931_v17 = vld [vmem:[#allocation61_spill] sm:$0xff]  ;;  %v15938_v18 = vld [vmem:[#allocation64_spill] sm:$0xff] }
 0x1f7   :  { %15923 = vst [vmem:[#allocation42_spill] sm:$0xff] %v11446_v1  ;;  %v15936_v15 = vld [vmem:[#allocation109_spill] sm:$0xff]  ;;  %v15942_v1 = vld [vmem:[#allocation66_spill] sm:$0xff] }
 0x1f8   :  { %15924 = vst [vmem:[#allocation43_spill] sm:$0xff] %v11448_v34  ;;  %8893 = vmatmul.msk.bf16.vlgmr.msra.gmra.mxu0 %vm299_vm1, %v11356_v52  ;;  %8895 = vmatmul.msk.bf16.vlgmr.msra.gmra.mxu1 %vm299_vm1, %v11356_v52  ;;  %v1090_v52 = vadd.f32 %v15932_v47, %v15931_v17  ;;  %v1050_v22 = vadd.f32 %v15936_v15, %v15935_v6  ;;  %v15939_v17 = vld [vmem:[#allocation110_spill] sm:$0xff]  ;;  %v15940_v34 = vld [vmem:[#allocation65_spill] sm:$0xff]  ;;  %v15943_v6 = vld [vmem:[#allocation112_spill] sm:$0xff] }
 0x1f9   :  { %15925 = vst [vmem:[#allocation34_spill] sm:$0xff] %v11450_v20  ;;  %8897 = vmatmul.msk.bf16.vlgmr.msra.gmra.mxu2 %vm299_vm1, %v11360_v38  ;;  %8899 = vmatmul.msk.bf16.vlgmr.msra.gmra.mxu3 %vm299_vm1, %v11360_v38  ;;  %v1073_v47 = vadd.f32 %v15939_v17, %v15938_v18  ;;  %v1092_v2 = vadd.f32 %v15941_v57, %v15940_v34  ;;  %v15952_v17 = vld [vmem:[#allocation69_spill] sm:$0xff] }
 0x1fa   :  { %15926 = vst [vmem:[#allocation35_spill] sm:$0xff] %v11452_v11  ;;  %v1034_v15 = vadd.f32 %v15943_v6, %v15942_v1  ;;  %v15951_v1 = vld [vmem:[#allocation114_spill] sm:$0xff]  ;;  %v15955_v6 = vld [vmem:[#allocation116_spill] sm:$0xff] }
 0x1fc   :  { %v1462_v5 = vpop.f32.mrf.mxu2  ;;  %v1481_v61 = vpop.f32.mrf.mxu3 }
 0x1fd   :  { %v11478_v11 = vadd.f32 %v1462_v5, %v1071_v44  ;;  %v11480_v20 = vadd.f32 %v1481_v61, %v1090_v52  ;;  %v1417_v7 = vpop.f32.mrf.mxu0  ;;  %v1436_v38 = vpop.f32.mrf.mxu1  ;;  %v15945_v44 = vld [vmem:[#allocation113_spill] sm:$0xff] }
 0x1fe   :  { %v11482_v9 = vadd.f32 %v1417_v7, %v1031_v58  ;;  %v11484_v42 = vadd.f32 %v1436_v38, %v1050_v22  ;;  %v1053_v5 = vadd.f32 %v15945_v44, %v15944_v60  ;;  %v15950_v60 = vld [vmem:[#allocation68_spill] sm:$0xff]  ;;  %v15956_v44 = vld [vmem:[#allocation71_spill] sm:$0xff] }
 0x1ff   :  { %15937 = vst [vmem:[#allocation44_spill] sm:$0xff] %v11480_v20  ;;  %v1076_v34 = vadd.f32 %v15951_v1, %v15950_v60  ;;  %v8923_v1 = vld [vmem:[%s15678_s1 + $0x90] sm:$0xf] }
 0x204   :  { %v1464_v52 = vpop.f32.mrf.mxu2  ;;  %v1483_v61 = vpop.f32.mrf.mxu3 }
 0x205   :  { %v11494_v20 = vadd.f32 %v1464_v52, %v1073_v47  ;;  %v11496_v7 = vadd.f32 %v1483_v61, %v1092_v2  ;;  %v1420_v58 = vpop.f32.mrf.mxu0  ;;  %v1439_v22 = vpop.f32.mrf.mxu1  ;;  %v15953_v47 = vld [vmem:[#allocation115_spill] sm:$0xff]  ;;  %v15954_v2 = vld [vmem:[#allocation70_spill] sm:$0xff] }
 0x206   :  { %v11498_v38 = vadd.f32 %v1420_v58, %v1034_v15  ;;  %v11500_v18 = vadd.f32 %v1439_v22, %v1053_v5  ;;  %v1095_v57 = vadd.f32 %v15953_v47, %v15952_v17  ;;  %v1036_v15 = vadd.f32 %v15955_v6, %v15954_v2  ;;  %v15957_v5 = vld [vmem:[#allocation117_spill] sm:$0xff]  ;;  %v15962_v2 = vld [vmem:[#allocation72_spill] sm:$0xff] }
 0x207   :  { %15946 = vst [vmem:[#allocation90_spill] sm:$0xff] %v11494_v20  ;;  %v1055_v52 = vadd.f32 %v15957_v5, %v15956_v44  ;;  %v9668_v17 = vld [vmem:[%s15678_s1 + $0x94] sm:$0xf0]  ;;  %v1078_v6 = vadd.f32 %v11159_v0, %v15962_v2  ;;  %v8915_v5 = vld [vmem:[%s15678_s1 + $0x80] sm:$0xf] }
 0x208   :  { %15947 = vst [vmem:[#allocation45_spill] sm:$0xff] %v11496_v7  ;;  %8894 = vmatmul.msk.bf16.gmra.mxu0 %vm299_vm1, %v15883_v53  ;;  %8896 = vmatmul.msk.bf16.gmra.mxu1 %vm299_vm1, %v15883_v53  ;;  %v11535_v47 = vor.u32 %v9668_v17, %v8923_v1  ;;  %v15966_v17 = vld [vmem:[#allocation75_spill] sm:$0xff] }
 0x209   :  { %15948 = vst [vmem:[#allocation91_spill] sm:$0xff] %v11498_v38  ;;  %8898 = vmatmul.msk.bf16.gmra.mxu2 %vm299_vm1, %v15884_v59  ;;  %8900 = vmatmul.msk.bf16.gmra.mxu3 %vm299_vm1, %v15884_v59  ;;  %v15967_v0 = vld [vmem:[#allocation119_spill] sm:$0xff] }
 0x20a   :  { %15949 = vst [vmem:[#allocation46_spill] sm:$0xff] %v11500_v18  ;;  %2188 = vmatpush.bf16.msra.mxu0 %v11535_v47  ;;  %2235 = vmatpush.bf16.msra.mxu2 %v11535_v47 }
 0x20c   :  { %v1467_v61 = vpop.f32.mrf.mxu2  ;;  %v1486_v53 = vpop.f32.mrf.mxu3 }
 0x20d   :  { %v11518_v58 = vadd.f32 %v1467_v61, %v1076_v34  ;;  %v11520_v22 = vadd.f32 %v1486_v53, %v1095_v57  ;;  %v1422_v18 = vpop.f32.mrf.mxu0  ;;  %v1441_v59 = vpop.f32.mrf.mxu1  ;;  %v9667_v34 = vld [vmem:[%s15678_s1 + $0x94] sm:$0xf]  ;;  %v9665_v61 = vld [vmem:[%s15678_s1 + $0x84] sm:$0xf]  ;;  %v15964_v53 = vld [vmem:[#allocation74_spill] sm:$0xff] }
 0x20e   :  { %v11522_v38 = vadd.f32 %v1422_v18, %v1036_v15  ;;  %v11524_v60 = vadd.f32 %v1441_v59, %v1055_v52  ;;  %v8925_v18 = vld [vmem:[%s15678_s1 + $0x98] sm:$0xf0]  ;;  %v15963_v15 = vld [vmem:[#allocation73_spill] sm:$0xff]  ;;  %v9666_v52 = vld [vmem:[%s15678_s1 + $0x84] sm:$0xf0] }
 0x20f   :  { %15958 = vst [vmem:[#allocation92_spill] sm:$0xff] %v11518_v58  ;;  %v11540_v57 = vor.u32 %v9667_v34, %v8925_v18  ;;  %v1097_v44 = vadd.f32 %v11161_v10, %v15963_v15  ;;  %v15965_v59 = vld [vmem:[#allocation118_spill] sm:$0xff]  ;;  %v1132_v34 = vadd.f32 %v15967_v0, %v15966_v17  ;;  %v11563_v2 = vor.u32 %v9666_v52, %v8915_v5  ;;  %v8917_v15 = vld [vmem:[%s15678_s1 + $0x88] sm:$0xf0]  ;;  %v15975_v5 = vld [vmem:[#allocation121_spill] sm:$0xff]  ;;  %s10233_s1 = smov 127  }
 0x210   :  { %15959 = vst [vmem:[#allocation47_spill] sm:$0xff] %v11520_v22  ;;  %v1113_v1 = vadd.f32 %v15965_v59, %v15964_v53  ;;  %v11572_v7 = vor.u32 %v9665_v61, %v8917_v15  ;;  %v15977_v61 = vld [vmem:[#allocation122_spill] sm:$0xff]  ;;  %v15978_v17 = vld [vmem:[#allocation79_spill] sm:$0xff] }
 0x211   :  { %15960 = vst [vmem:[#allocation93_spill] sm:$0xff] %v11522_v38  ;;  %2207 = vmatpush.bf16.msra.mxu1 %v11540_v57  ;;  %2254 = vmatpush.bf16.msra.mxu3 %v11540_v57  ;;  %v15979_v0 = vld [vmem:[#allocation123_spill] sm:$0xff] }
 0x212   :  { %15961 = vst [vmem:[#allocation48_spill] sm:$0xff] %v11524_v60  ;;  %2189 = vmatpush.bf16.msra.mxu0 %v11563_v2  ;;  %2236 = vmatpush.bf16.msra.mxu2 %v11563_v2 }
 0x214   :  { %v1469_v18 = vpop.f32.mrf.mxu2  ;;  %v1488_v10 = vpop.f32.mrf.mxu3 }
 0x215   :  { %v11568_v60 = vadd.f32 %v1469_v18, %v1078_v6  ;;  %v11570_v38 = vadd.f32 %v1488_v10, %v1097_v44  ;;  %v1509_v22 = vpop.f32.mrf.mxu0  ;;  %v1528_v58 = vpop.f32.mrf.mxu1  ;;  %2208 = vmatpush.bf16.msra.mxu1 %v11572_v7  ;;  %2255 = vmatpush.bf16.msra.mxu3 %v11572_v7  ;;  %v15974_v44 = vld [vmem:[#allocation77_spill] sm:$0xff] }
 0x216   :  { %v11574_v53 = vadd.f32 %v1509_v22, %v1113_v1  ;;  %v11576_v59 = vadd.f32 %v1528_v58, %v1132_v34  ;;  %v15972_v58 = vld [vmem:[#allocation76_spill] sm:$0xff]  ;;  %v1174_v52 = vadd.f32 %v15975_v5, %v15974_v44 }
 0x217   :  { %15968 = vst [vmem:[#allocation94_spill] sm:$0xff] %v11568_v60  ;;  %v15973_v22 = vld [vmem:[#allocation120_spill] sm:$0xff] }
 0x218   :  { %15969 = vst [vmem:[#allocation49_spill] sm:$0xff] %v11570_v38  ;;  %8901 = vmatmul.msk.bf16.vlgmr.msrb.gmra.mxu0 %vm299_vm1, %v11460_v35  ;;  %8903 = vmatmul.msk.bf16.vlgmr.msrb.gmra.mxu1 %vm299_vm1, %v11460_v35  ;;  %v1155_v6 = vadd.f32 %v15973_v22, %v15972_v58  ;;  %v15976_v35 = vld [vmem:[#allocation78_spill] sm:$0xff]  ;;  %v15984_v5 = vld [vmem:[#allocation80_spill] sm:$0xff] }
 0x219   :  { %15970 = vst [vmem:[#allocation95_spill] sm:$0xff] %v11574_v53  ;;  %8905 = vmatmul.msk.bf16.vlgmr.msrb.gmra.mxu2 %vm299_vm1, %v11464_v25  ;;  %8907 = vmatmul.msk.bf16.vlgmr.msrb.gmra.mxu3 %vm299_vm1, %v11464_v25  ;;  %v1115_v1 = vadd.f32 %v15977_v61, %v15976_v35  ;;  %v1134_v25 = vadd.f32 %v15979_v0, %v15978_v17  ;;  %v15985_v35 = vld [vmem:[#allocation124_spill] sm:$0xff]  ;;  %v15986_v61 = vld [vmem:[#allocation81_spill] sm:$0xff]  ;;  %v15988_v0 = vld [vmem:[#allocation82_spill] sm:$0xff] }
 0x21a   :  { %15971 = vst [vmem:[#allocation50_spill] sm:$0xff] %v11576_v59  ;;  %2282 = vmatpush.bf16.msrb.mxu0 %v11535_v47  ;;  %2301 = vmatpush.bf16.msrb.mxu1 %v11540_v57 }
 0x21b   :  { %2329 = vmatpush.bf16.msrb.mxu2 %v11535_v47  ;;  %2348 = vmatpush.bf16.msrb.mxu3 %v11540_v57 }
 0x21c   :  { %v1556_v34 = vpop.f32.mrf.mxu2  ;;  %v1575_v18 = vpop.f32.mrf.mxu3 }
 0x21d   :  { %v11602_v10 = vadd.f32 %v1556_v34, %v1155_v6  ;;  %v11604_v15 = vadd.f32 %v1575_v18, %v1174_v52  ;;  %v1511_v58 = vpop.f32.mrf.mxu0  ;;  %v1530_v22 = vpop.f32.mrf.mxu1  ;;  %v1157_v6 = vadd.f32 %v15985_v35, %v15984_v5  ;;  %v15987_v52 = vld [vmem:[#allocation125_spill] sm:$0xff]  ;;  %v15989_v34 = vld [vmem:[#allocation126_spill] sm:$0xff]  ;;  %v15990_v18 = vld [vmem:[#allocation83_spill] sm:$0xff] }
 0x21e   :  { %v11606_v59 = vadd.f32 %v1511_v58, %v1115_v1  ;;  %v11608_v44 = vadd.f32 %v1530_v22, %v1134_v25  ;;  %2283 = vmatpush.bf16.msrb.mxu0 %v11563_v2  ;;  %2302 = vmatpush.bf16.msrb.mxu1 %v11572_v7  ;;  %v1176_v17 = vadd.f32 %v15987_v52, %v15986_v61  ;;  %v15991_v25 = vld [vmem:[#allocation127_spill] sm:$0xff]  ;;  %v15997_v35 = vld [vmem:[#allocation128_spill] sm:$0xff]  ;;  %v15998_v61 = vld [vmem:[#allocation85_spill] sm:$0xff] }
 0x21f   :  { %15980 = vst [vmem:[#allocation96_spill] sm:$0xff] %v11602_v10  ;;  %2330 = vmatpush.bf16.msrb.mxu2 %v11563_v2  ;;  %2349 = vmatpush.bf16.msrb.mxu3 %v11572_v7  ;;  %v1118_v1 = vadd.f32 %v15989_v34, %v15988_v0  ;;  %v1137_v58 = vadd.f32 %v15991_v25, %v15990_v18  ;;  %v16002_v34 = vld [vmem:[#allocation87_spill] sm:$0xff] }
 0x220   :  { %15981 = vst [vmem:[#allocation51_spill] sm:$0xff] %v11604_v15 }
 0x221   :  { %15982 = vst [vmem:[#allocation97_spill] sm:$0xff] %v11606_v59 }
 0x222   :  { %15983 = vst [vmem:[#allocation52_spill] sm:$0xff] %v11608_v44 }
 0x224   :  { %v1558_v22 = vpop.f32.mrf.mxu2  ;;  %v1577_v44 = vpop.f32.mrf.mxu3 }
 0x225   :  { %v11622_v59 = vadd.f32 %v1558_v22, %v1157_v6  ;;  %v11624_v15 = vadd.f32 %v1577_v44, %v1176_v17  ;;  %v1514_v10 = vpop.f32.mrf.mxu0  ;;  %v1533_v53 = vpop.f32.mrf.mxu1  ;;  %v15996_v44 = vld [vmem:[#allocation84_spill] sm:$0xff]  ;;  %v16001_v17 = vld [vmem:[#allocation130_spill] sm:$0xff] }
 0x226   :  { %v11626_v38 = vadd.f32 %v1514_v10, %v1118_v1  ;;  %v11628_v5 = vadd.f32 %v1533_v53, %v1137_v58  ;;  %v1160_v6 = vadd.f32 %v15997_v35, %v15996_v44  ;;  %v15999_v10 = vld [vmem:[#allocation129_spill] sm:$0xff]  ;;  %v16000_v53 = vld [vmem:[#allocation86_spill] sm:$0xff]  ;;  %v16003_v1 = vld [vmem:[#allocation131_spill] sm:$0xff] }
 0x227   :  { %15992 = vst [vmem:[#allocation98_spill] sm:$0xff] %v11622_v59  ;;  %v1179_v52 = vadd.f32 %v15999_v10, %v15998_v61  ;;  %v1120_v0 = vadd.f32 %v16001_v17, %v16000_v53  ;;  %v1139_v18 = vadd.f32 %v16003_v1, %v16002_v34  ;;  %v16008_v35 = vld [vmem:[#allocation24_spill] sm:$0xff]  ;;  %v16009_v10 = vld [vmem:[#allocation25_spill] sm:$0xff]  ;;  %v16010_v53 = vld [vmem:[#allocation26_spill] sm:$0xff] }
 0x228   :  { %15993 = vst [vmem:[#allocation53_spill] sm:$0xff] %v11624_v15  ;;  %8902 = vmatmul.msk.bf16.gmra.mxu0 %vm299_vm1, %v15927_v55  ;;  %8904 = vmatmul.msk.bf16.gmra.mxu1 %vm299_vm1, %v15927_v55  ;;  %v2153_v61 = vrot.slane %v16008_v35, 2  ;;  %v2154_v15 = vrot.slane %v16009_v10, 2  ;;  %v2220_v17 = vrot.slane %v16010_v53, 2  ;;  %v16011_v34 = vld [vmem:[#allocation27_spill] sm:$0xff]  ;;  %v16012_v59 = vld [vmem:[#allocation88_spill] sm:$0xff] }
 0x229   :  { %15994 = vst [vmem:[#allocation99_spill] sm:$0xff] %v11626_v38  ;;  %8906 = vmatmul.msk.bf16.gmra.mxu2 %vm299_vm1, %v15928_v40  ;;  %8908 = vmatmul.msk.bf16.gmra.mxu3 %vm299_vm1, %v15928_v40  ;;  %v2221_v1 = vrot.slane %v16011_v34, 2 }
 0x22a   :  { %15995 = vst [vmem:[#allocation54_spill] sm:$0xff] %v11628_v5  ;;  %v2155_v10 = vsel %vm2152_vm4, %v2153_v61, %v2154_v15 }
 0x22c   :  { %v1561_v25 = vpop.f32.mrf.mxu2  ;;  %v1580_v55 = vpop.f32.mrf.mxu3 }
 0x22d   :  { %v11646_v58 = vadd.f32 %v1561_v25, %v1160_v6  ;;  %v11648_v22 = vadd.f32 %v1580_v55, %v1179_v52  ;;  %v1516_v5 = vpop.f32.mrf.mxu0  ;;  %v1535_v40 = vpop.f32.mrf.mxu1  ;;  %v1162_v6 = vadd.f32 %v11242_v30, %v16012_v59  ;;  %v16013_v52 = vld [vmem:[#allocation89_spill] sm:$0xff]  ;;  %v2222_v30 = vsel %vm2152_vm4, %v2220_v17, %v2221_v1 }
 0x22e   :  { %v11650_v38 = vadd.f32 %v1516_v5, %v1120_v0  ;;  %v11652_v44 = vadd.f32 %v1535_v40, %v1139_v18  ;;  %v1181_v25 = vadd.f32 %v11244_v56, %v16013_v52 }
 0x22f   :  { %16004 = vst [vmem:[#allocation100_spill] sm:$0xff] %v11646_v58 }
 0x230   :  { %16005 = vst [vmem:[#allocation55_spill] sm:$0xff] %v11648_v22 }
 0x231   :  { %16006 = vst [vmem:[#allocation101_spill] sm:$0xff] %v11650_v38 }
 0x232   :  { %16007 = vst [vmem:[#allocation56_spill] sm:$0xff] %v11652_v44 }
 0x234   :  { %v1563_v55 = vpop.f32.mrf.mxu2  ;;  %v1582_v5 = vpop.f32.mrf.mxu3 }
 0x235   :  { %v11662_v0 = vadd.f32 %v1563_v55, %v1162_v6  ;;  %v11664_v18 = vadd.f32 %v1582_v5, %v1181_v25  ;;  %v1697_v40 = vpop.f32.mrf.mxu0  ;;  %v1716_v35 = vpop.f32.mrf.mxu1 }
 0x236   :  { %v11668_v53 = vadd.f32 %v1697_v40, %v11246_v39  ;;  %v11671_v34 = vadd.f32 %v1716_v35, %v11248_v31 }
 0x237   :  { %16014 = vst [vmem:[#allocation102_spill] sm:$0xff] %v11662_v0  ;;  %v16035_v0 = vld [vmem:[#allocation37_spill] sm:$0xff] }
 0x238   :  { %16015 = vst [vmem:[#allocation57_spill] sm:$0xff] %v11664_v18  ;;  %8929 = vmatmul.msk.bf16.vlgmr.msra.gmra.mxu0 %vm299_vm1, %v2155_v10  ;;  %8931 = vmatmul.msk.bf16.vlgmr.msra.gmra.mxu1 %vm299_vm1, %v2155_v10 }
 0x239   :  { %8933 = vmatmul.msk.bf16.vlgmr.msra.gmra.mxu2 %vm299_vm1, %v2222_v30  ;;  %8935 = vmatmul.msk.bf16.vlgmr.msra.gmra.mxu3 %vm299_vm1, %v2222_v30 }
 0x23a   :  { %2376 = vmatpush.bf16.msra.mxu0 %v11535_v47  ;;  %2395 = vmatpush.bf16.msra.mxu1 %v11540_v57 }
 0x23b   :  { %2423 = vmatpush.bf16.msra.mxu2 %v11535_v47  ;;  %2442 = vmatpush.bf16.msra.mxu3 %v11540_v57 }
 0x23c   :  { %v1748_v39 = vpop.f32.mrf.mxu2  ;;  %v1767_v56 = vpop.f32.mrf.mxu3 }
 0x23d   :  { %v11683_v31 = vadd.f32 %v1748_v39, %v11274_v48  ;;  %v11686_v59 = vadd.f32 %v1767_v56, %v11276_v49  ;;  %v1699_v61 = vpop.f32.mrf.mxu0  ;;  %v1718_v17 = vpop.f32.mrf.mxu1 }
 0x23e   :  { %v11689_v6 = vadd.f32 %v1699_v61, %v11278_v21  ;;  %v11692_v52 = vadd.f32 %v1718_v17, %v11280_v27  ;;  %2377 = vmatpush.bf16.msra.mxu0 %v11563_v2  ;;  %2396 = vmatpush.bf16.msra.mxu1 %v11572_v7  ;;  %v16017_v61 = vld [vmem:[#allocation28_spill] sm:$0xff]  ;;  %v2314_v17 = vrot.slane %v10501_v41, 2 }
 0x23f   :  { %2424 = vmatpush.bf16.msra.mxu2 %v11563_v2  ;;  %2443 = vmatpush.bf16.msra.mxu3 %v11572_v7 }
 0x244   :  { %v1750_v48 = vpop.f32.mrf.mxu2  ;;  %v1769_v25 = vpop.f32.mrf.mxu3 }
 0x245   :  { %v11699_v49 = vadd.f32 %v1750_v48, %v11294_v33  ;;  %v11702_v55 = vadd.f32 %v1769_v25, %v11296_v28  ;;  %v1702_v21 = vpop.f32.mrf.mxu0  ;;  %v1721_v5 = vpop.f32.mrf.mxu1  ;;  %v16018_v48 = vld [vmem:[#allocation29_spill] sm:$0xff] }
 0x246   :  { %v11705_v27 = vadd.f32 %v1702_v21, %v11298_v29  ;;  %v11708_v40 = vadd.f32 %v1721_v5, %v11300_v46 }
 0x248   :  { %8930 = vmatmul.msk.bf16.gmra.mxu0 %vm299_vm1, %v2154_v15  ;;  %8932 = vmatmul.msk.bf16.gmra.mxu1 %vm299_vm1, %v2154_v15  ;;  %v16016_v15 = vld [vmem:[#allocation30_spill] sm:$0xff] }
 0x249   :  { %8934 = vmatmul.msk.bf16.gmra.mxu2 %vm299_vm1, %v2221_v1  ;;  %8936 = vmatmul.msk.bf16.gmra.mxu3 %vm299_vm1, %v2221_v1  ;;  %v2267_v56 = vrot.slane %v16016_v15, 2  ;;  %v2268_v1 = vrot.slane %v16017_v61, 2 }
 0x24c   :  { %v1753_v33 = vpop.f32.mrf.mxu2  ;;  %v1772_v35 = vpop.f32.mrf.mxu3 }
 0x24d   :  { %v11715_v28 = vadd.f32 %v1753_v33, %v11318_v13  ;;  %v11718_v10 = vadd.f32 %v1772_v35, %v11320_v45  ;;  %v1704_v29 = vpop.f32.mrf.mxu0  ;;  %v1723_v30 = vpop.f32.mrf.mxu1  ;;  %v2315_v13 = vrot.slane %v16018_v48, 2 }
 0x24e   :  { %v11721_v46 = vadd.f32 %v1704_v29, %v11322_v63  ;;  %v11724_v39 = vadd.f32 %v1723_v30, %v11324_v36  ;;  %v2269_v36 = vsel %vm2152_vm4, %v2267_v56, %v2268_v1 }
 0x24f   :  { %v2316_v41 = vsel %vm2152_vm4, %v2314_v17, %v2315_v13 }
 0x254   :  { %v1755_v25 = vpop.f32.mrf.mxu2  ;;  %v1774_v21 = vpop.f32.mrf.mxu3 }
 0x255   :  { %v11731_v45 = vadd.f32 %v1755_v25, %v11342_v62  ;;  %v11734_v5 = vadd.f32 %v1774_v21, %v11344_v32  ;;  %v1799_v63 = vpop.f32.mrf.mxu0  ;;  %v1818_v33 = vpop.f32.mrf.mxu1 }
 0x256   :  { %v11738_v35 = vadd.f32 %v1799_v63, %v11346_v19  ;;  %v11741_v29 = vadd.f32 %v1818_v33, %v11348_v50  ;;  %v16019_v63 = vld [vmem:[#allocation31_spill] sm:$0xff]  ;;  %v16020_v33 = vld [vmem:[#allocation33_spill] sm:$0xff] }
 0x258   :  { %8937 = vmatmul.msk.bf16.vlgmr.msrb.gmra.mxu0 %vm299_vm1, %v2269_v36  ;;  %8939 = vmatmul.msk.bf16.vlgmr.msrb.gmra.mxu1 %vm299_vm1, %v2269_v36  ;;  %v2408_v36 = vrot.slane %v16020_v33, 2 }
 0x259   :  { %8941 = vmatmul.msk.bf16.vlgmr.msrb.gmra.mxu2 %vm299_vm1, %v2316_v41  ;;  %8943 = vmatmul.msk.bf16.vlgmr.msrb.gmra.mxu3 %vm299_vm1, %v2316_v41  ;;  %v16021_v41 = vld [vmem:[#allocation32_spill] sm:$0xff] }
 0x25a   :  { %2470 = vmatpush.bf16.msrb.mxu0 %v11535_v47  ;;  %2489 = vmatpush.bf16.msrb.mxu1 %v11540_v57 }
 0x25b   :  { %2517 = vmatpush.bf16.msrb.mxu2 %v11535_v47  ;;  %2536 = vmatpush.bf16.msrb.mxu3 %v11540_v57 }
 0x25c   :  { %v1850_v62 = vpop.f32.mrf.mxu2  ;;  %v1869_v32 = vpop.f32.mrf.mxu3 }
 0x25d   :  { %v11753_v19 = vadd.f32 %v1850_v62, %v11378_v23  ;;  %v11756_v50 = vadd.f32 %v1869_v32, %v11380_v3  ;;  %v1801_v30 = vpop.f32.mrf.mxu0  ;;  %v1820_v15 = vpop.f32.mrf.mxu1 }
 0x25e   :  { %v11759_v56 = vadd.f32 %v1801_v30, %v11382_v54  ;;  %v11762_v61 = vadd.f32 %v1820_v15, %v11384_v37  ;;  %2471 = vmatpush.bf16.msrb.mxu0 %v11563_v2  ;;  %2490 = vmatpush.bf16.msrb.mxu1 %v11572_v7  ;;  %v16023_v15 = vld [vmem:[#allocation43_spill] sm:$0xff] }
 0x25f   :  { %2518 = vmatpush.bf16.msrb.mxu2 %v11563_v2  ;;  %2537 = vmatpush.bf16.msrb.mxu3 %v11572_v7 }
 0x264   :  { %v1852_v23 = vpop.f32.mrf.mxu2  ;;  %v1871_v47 = vpop.f32.mrf.mxu3 }
 0x265   :  { %v11769_v3 = vadd.f32 %v1852_v23, %v11398_v14  ;;  %v11772_v57 = vadd.f32 %v1871_v47, %v11400_v16  ;;  %v1804_v54 = vpop.f32.mrf.mxu0  ;;  %v1823_v17 = vpop.f32.mrf.mxu1 }
 0x266   :  { %v11775_v37 = vadd.f32 %v1804_v54, %v11402_v4  ;;  %v11778_v48 = vadd.f32 %v1823_v17, %v11404_v24 }
 0x268   :  { %8938 = vmatmul.msk.bf16.gmra.mxu0 %vm299_vm1, %v2268_v1  ;;  %8940 = vmatmul.msk.bf16.gmra.mxu1 %vm299_vm1, %v2268_v1  ;;  %v2361_v1 = vrot.slane %v10572_v51, 2 }
 0x269   :  { %8942 = vmatmul.msk.bf16.gmra.mxu2 %vm299_vm1, %v2315_v13  ;;  %8944 = vmatmul.msk.bf16.gmra.mxu3 %vm299_vm1, %v2315_v13  ;;  %v2362_v13 = vrot.slane %v16019_v63, 2 }
 0x26b   :  { %v2363_v51 = vsel %vm2152_vm4, %v2361_v1, %v2362_v13 }
 0x26c   :  { %v1855_v14 = vpop.f32.mrf.mxu2  ;;  %v1874_v7 = vpop.f32.mrf.mxu3 }
 0x26d   :  { %v11785_v16 = vadd.f32 %v1855_v14, %v11422_v43  ;;  %v11788_v2 = vadd.f32 %v1874_v7, %v11424_v12  ;;  %v1806_v4 = vpop.f32.mrf.mxu0  ;;  %v1825_v25 = vpop.f32.mrf.mxu1  ;;  %v2409_v43 = vrot.slane %v16021_v41, 2  ;;  %v16022_v12 = vld [vmem:[#allocation42_spill] sm:$0xff] }
 0x26e   :  { %v11791_v24 = vadd.f32 %v1806_v4, %v11426_v26  ;;  %v11794_v21 = vadd.f32 %v1825_v25, %v11428_v8 }
 0x26f   :  { %v2410_v47 = vsel %vm2152_vm4, %v2408_v36, %v2409_v43 }
 0x274   :  { %v1857_v62 = vpop.f32.mrf.mxu2  ;;  %v1876_v32 = vpop.f32.mrf.mxu3 }
 0x275   :  { %v11801_v30 = vadd.f32 %v1857_v62, %v16022_v12  ;;  %v11804_v23 = vadd.f32 %v1876_v32, %v16023_v15  ;;  %v11806_v26 = vpop.f32.mrf.mxu0  ;;  %v11808_v8 = vpop.f32.mrf.mxu1  ;;  %v16032_v32 = vld [vmem:[#allocation38_spill] sm:$0xff]  ;;  %v16033_v15 = vld [vmem:[#allocation36_spill] sm:$0xff] }
 0x276   :  { %v2455_v12 = vrot.slane %v16032_v32, 2 }
 0x278   :  { %8945 = vmatmul.msk.bf16.vlgmr.msra.gmra.mxu0 %vm299_vm1, %v2363_v51  ;;  %8947 = vmatmul.msk.bf16.vlgmr.msra.gmra.mxu1 %vm299_vm1, %v2363_v51  ;;  %v2456_v51 = vrot.slane %v16033_v15, 2 }
 0x279   :  { %8949 = vmatmul.msk.bf16.vlgmr.msra.gmra.mxu2 %vm299_vm1, %v2410_v47  ;;  %8951 = vmatmul.msk.bf16.vlgmr.msra.gmra.mxu3 %vm299_vm1, %v2410_v47  ;;  %v16034_v47 = vld [vmem:[#allocation39_spill] sm:$0xff] }
 0x27a   :  { %v2502_v18 = vrot.slane %v16034_v47, 2  ;;  %v2457_v58 = vsel %vm2152_vm4, %v2455_v12, %v2456_v51 }
 0x27c   :  { %v11816_v54 = vpop.f32.mrf.mxu2  ;;  %v11818_v17 = vpop.f32.mrf.mxu3 }
 0x27d   :  { %v11820_v14 = vpop.f32.mrf.mxu0  ;;  %v11822_v7 = vpop.f32.mrf.mxu1 }
 0x284   :  { %v11824_v4 = vpop.f32.mrf.mxu2  ;;  %v11826_v25 = vpop.f32.mrf.mxu3 }
 0x285   :  { %16024 = vst [vmem:[#allocation103_spill] sm:$0xff] %v11824_v4  ;;  %v11828_v1 = vpop.f32.mrf.mxu0  ;;  %v11830_v63 = vpop.f32.mrf.mxu1 }
 0x286   :  { %16025 = vst [vmem:[#allocation58_spill] sm:$0xff] %v11826_v25 }
 0x287   :  { %16026 = vst [vmem:[#allocation104_spill] sm:$0xff] %v11828_v1 }
 0x288   :  { %16027 = vst [vmem:[#allocation59_spill] sm:$0xff] %v11830_v63  ;;  %8946 = vmatmul.msk.bf16.gmra.mxu0 %vm299_vm1, %v2362_v13  ;;  %8948 = vmatmul.msk.bf16.gmra.mxu1 %vm299_vm1, %v2362_v13  ;;  %v2503_v13 = vrot.slane %v16035_v0, 2 }
 0x289   :  { %8950 = vmatmul.msk.bf16.gmra.mxu2 %vm299_vm1, %v2409_v43  ;;  %8952 = vmatmul.msk.bf16.gmra.mxu3 %vm299_vm1, %v2409_v43 }
 0x28a   :  { %v2504_v60 = vsel %vm2152_vm4, %v2502_v18, %v2503_v13 }
 0x28c   :  { %v11836_v33 = vpop.f32.mrf.mxu2  ;;  %v11838_v36 = vpop.f32.mrf.mxu3 }
 0x28d   :  { %16028 = vst [vmem:[#allocation105_spill] sm:$0xff] %v11836_v33  ;;  %v11840_v41 = vpop.f32.mrf.mxu0  ;;  %v11842_v62 = vpop.f32.mrf.mxu1 }
 0x28e   :  { %16029 = vst [vmem:[#allocation40_spill] sm:$0xff] %v11838_v36 }
 0x28f   :  { %16030 = vst [vmem:[#allocation41_spill] sm:$0xff] %v11840_v41 }
 0x290   :  { %16031 = vst [vmem:[#allocation60_spill] sm:$0xff] %v11842_v62 }
 0x294   :  { %v11848_v44 = vpop.f32.mrf.mxu2  ;;  %v11850_v38 = vpop.f32.mrf.mxu3 }
 0x295   :  { %16036 = vst [vmem:[#allocation106_spill] sm:$0xff] %v11848_v44  ;;  %v11852_v43 = vpop.f32.mrf.mxu0  ;;  %v11854_v22 = vpop.f32.mrf.mxu1 }
 0x296   :  { %16037 = vst [vmem:[#allocation61_spill] sm:$0xff] %v11850_v38 }
 0x297   :  { %16038 = vst [vmem:[#allocation107_spill] sm:$0xff] %v11852_v43 }
 0x298   :  { %16039 = vst [vmem:[#allocation62_spill] sm:$0xff] %v11854_v22  ;;  %8953 = vmatmul.msk.bf16.vlgmr.msrb.gmra.mxu0 %vm299_vm1, %v2457_v58  ;;  %8955 = vmatmul.msk.bf16.vlgmr.msrb.gmra.mxu1 %vm299_vm1, %v2457_v58 }
 0x299   :  { %8957 = vmatmul.msk.bf16.vlgmr.msrb.gmra.mxu2 %vm299_vm1, %v2504_v60  ;;  %8959 = vmatmul.msk.bf16.vlgmr.msrb.gmra.mxu3 %vm299_vm1, %v2504_v60 }
 0x29c   :  { %v11862_v0 = vpop.f32.mrf.mxu2  ;;  %v11864_v32 = vpop.f32.mrf.mxu3 }
 0x29d   :  { %16040 = vst [vmem:[#allocation108_spill] sm:$0xff] %v11862_v0  ;;  %v11866_v15 = vpop.f32.mrf.mxu0  ;;  %v11868_v47 = vpop.f32.mrf.mxu1 }
 0x29e   :  { %16041 = vst [vmem:[#allocation63_spill] sm:$0xff] %v11864_v32 }
 0x29f   :  { %16042 = vst [vmem:[#allocation109_spill] sm:$0xff] %v11866_v15  ;;  %v2613_v15 = vld [vmem:[#allocation2] sm:$0x3] }
 0x2a0   :  { %16043 = vst [vmem:[#allocation64_spill] sm:$0xff] %v11868_v47  ;;  %v11895_v0 = vperm.slane %v2613_v15, 0 }
 0x2a4   :  { %v11870_v22 = vpop.f32.mrf.mxu2  ;;  %v11872_v12 = vpop.f32.mrf.mxu3 }
 0x2a5   :  { %16044 = vst [vmem:[#allocation110_spill] sm:$0xff] %v11870_v22  ;;  %v11874_v18 = vpop.f32.mrf.mxu0  ;;  %v11876_v43 = vpop.f32.mrf.mxu1 }
 0x2a6   :  { %16045 = vst [vmem:[#allocation65_spill] sm:$0xff] %v11872_v12 }
 0x2a7   :  { %16046 = vst [vmem:[#allocation111_spill] sm:$0xff] %v11874_v18 }
 0x2a8   :  { %16047 = vst [vmem:[#allocation66_spill] sm:$0xff] %v11876_v43  ;;  %8954 = vmatmul.msk.bf16.gmra.mxu0 %vm299_vm1, %v2456_v51  ;;  %8956 = vmatmul.msk.bf16.gmra.mxu1 %vm299_vm1, %v2456_v51 }
 0x2a9   :  { %8958 = vmatmul.msk.bf16.gmra.mxu2 %vm299_vm1, %v2503_v13  ;;  %8960 = vmatmul.msk.bf16.gmra.mxu3 %vm299_vm1, %v2503_v13 }
 0x2ac   :  { %v11882_v60 = vpop.f32.mrf.mxu2  ;;  %v11884_v58 = vpop.f32.mrf.mxu3 }
 0x2ad   :  { %16048 = vst [vmem:[#allocation112_spill] sm:$0xff] %v11882_v60  ;;  %v11886_v47 = vpop.f32.mrf.mxu0  ;;  %v11888_v22 = vpop.f32.mrf.mxu1  ;;  %v11898_v60 = vperm.slane %v2613_v15, 1 }
 0x2ae   :  { %16049 = vst [vmem:[#allocation67_spill] sm:$0xff] %v11884_v58 }
 0x2af   :  { %16050 = vst [vmem:[#allocation113_spill] sm:$0xff] %v11886_v47 }
 0x2b0   :  { %16051 = vst [vmem:[#allocation68_spill] sm:$0xff] %v11888_v22 }
 0x2b4   :  { %v11890_v12 = vpop.f32.mrf.mxu2  ;;  %v11892_v18 = vpop.f32.mrf.mxu3 }
 0x2b5   :  { %16052 = vst [vmem:[#allocation114_spill] sm:$0xff] %v11890_v12  ;;  %v2191_v43 = vpop.f32.mrf.mxu0  ;;  %v2210_v32 = vpop.f32.mrf.mxu1 }
 0x2b6   :  { %16053 = vst [vmem:[#allocation69_spill] sm:$0xff] %v11892_v18  ;;  %v2549_v51 = vadd.f32 %v2191_v43, %v11668_v53  ;;  %v2550_v13 = vadd.f32 %v2210_v32, %v11671_v34 }
 0x2b8   :  { %v2619_v58 = vadd.f32 %v11895_v0, %v2549_v51  ;;  %v2620_v47 = vadd.f32 %v11898_v60, %v2550_v13 }
 0x2ba   :  { %v2683_v41 = vmax.f32 %v2619_v58, 0.0  ;;  %v2684_v34 = vmax.f32 %v2620_v47, 0.0 }
 0x2bc   :  { %v2238_v22 = vpop.f32.mrf.mxu2  ;;  %v2257_v38 = vpop.f32.mrf.mxu3 }
 0x2bd   :  { %v2557_v12 = vadd.f32 %v2238_v22, %v11683_v31  ;;  %v2558_v18 = vadd.f32 %v2257_v38, %v11686_v59  ;;  %v2193_v44 = vpop.f32.mrf.mxu0  ;;  %v2212_v62 = vpop.f32.mrf.mxu1  ;;  %v2812_v31 = vrot.slane %v2683_v41, 1  ;;  %v2815_v38 = vrot.slane %v2684_v34, 1 }
 0x2be   :  { %v2551_v53 = vadd.f32 %v2193_v44, %v11689_v6  ;;  %v2552_v43 = vadd.f32 %v2212_v62, %v11692_v52 }
 0x2bf   :  { %v2627_v51 = vadd.f32 %v11895_v0, %v2557_v12  ;;  %v2628_v13 = vadd.f32 %v11898_v60, %v2558_v18 }
 0x2c0   :  { %v2621_v32 = vadd.f32 %v11895_v0, %v2551_v53  ;;  %v2622_v15 = vadd.f32 %v11898_v60, %v2552_v43 }
 0x2c1   :  { %v2691_v6 = vmax.f32 %v2627_v51, 0.0  ;;  %v2692_v52 = vmax.f32 %v2628_v13, 0.0 }
 0x2c2   :  { %v2685_v36 = vmax.f32 %v2621_v32, 0.0  ;;  %v2686_v22 = vmax.f32 %v2622_v15, 0.0 }
 0x2c4   :  { %v2813_v59 = vrot.slane %v2685_v36, 1  ;;  %v2816_v33 = vrot.slane %v2686_v22, 1  ;;  %v2240_v63 = vpop.f32.mrf.mxu2  ;;  %v2259_v44 = vpop.f32.mrf.mxu3 }
 0x2c5   :  { %v2559_v62 = vadd.f32 %v2240_v63, %v11699_v49  ;;  %v2560_v47 = vadd.f32 %v2259_v44, %v11702_v55  ;;  %v2196_v58 = vpop.f32.mrf.mxu0  ;;  %v2215_v53 = vpop.f32.mrf.mxu1  ;;  %v2826_v44 = vrot.slane %v2691_v6, 1 }
 0x2c6   :  { %v2553_v12 = vadd.f32 %v2196_v58, %v11705_v27  ;;  %v2554_v18 = vadd.f32 %v2215_v53, %v11708_v40  ;;  %v2814_v43 = vsel %vm1188_vm2, %v2812_v31, %v2813_v59  ;;  %v2817_v32 = vsel %vm1188_vm2, %v2815_v38, %v2816_v33 }
 0x2c7   :  { %v11917_v15 = vadd.f32 %v11895_v0, %v2559_v62  ;;  %v11920_v51 = vadd.f32 %v11898_v60, %v2560_v47  ;;  %v11922_v13 = vmax.f32 %v2683_v41, %v2814_v43  ;;  %v11924_v49 = vmax.f32 %v2684_v34, %v2817_v32 }
 0x2c8   :  { %v11927_v55 = vadd.f32 %v11895_v0, %v2553_v12  ;;  %v11930_v27 = vadd.f32 %v11898_v60, %v2554_v18  ;;  %v2829_v62 = vrot.slane %v2692_v52, 1 }
 0x2c9   :  { %v2693_v40 = vmax.f32 %v11917_v15, 0.0  ;;  %v2694_v63 = vmax.f32 %v11920_v51, 0.0 }
 0x2ca   :  { %v2687_v31 = vmax.f32 %v11927_v55, 0.0  ;;  %v15727_v38 = vmax.f32 %v11930_v27, 0.0 }
 0x2cb   :  { %v2827_v41 = vrot.slane %v2693_v40, 1  ;;  %v2830_v47 = vrot.slane %v2694_v63, 1 }
 0x2cc   :  { %v2818_v34 = vrot.slane %v2687_v31, 1  ;;  %v2820_v58 = vrot.slane %v15727_v38, 1  ;;  %v2243_v53 = vpop.f32.mrf.mxu2  ;;  %v2262_v12 = vpop.f32.mrf.mxu3 }
 0x2cd   :  { %v2561_v18 = vadd.f32 %v2243_v53, %v11715_v28  ;;  %v2562_v43 = vadd.f32 %v2262_v12, %v11718_v10  ;;  %v2198_v32 = vpop.f32.mrf.mxu0  ;;  %v2217_v15 = vpop.f32.mrf.mxu1  ;;  %v2828_v51 = vsel %vm1188_vm2, %v2826_v44, %v2827_v41  ;;  %v2831_v55 = vsel %vm1188_vm2, %v2829_v62, %v2830_v47 }
 0x2ce   :  { %v2555_v1 = vadd.f32 %v2198_v32, %v11721_v46  ;;  %v2556_v25 = vadd.f32 %v2217_v15, %v11724_v39  ;;  %v11944_v4 = vmax.f32 %v2691_v6, %v2828_v51  ;;  %v11946_v20 = vmax.f32 %v2692_v52, %v2831_v55 }
 0x2cf   :  { %v11949_v38 = vadd.f32 %v11895_v0, %v2561_v18  ;;  %v11952_v28 = vadd.f32 %v11898_v60, %v2562_v43  ;;  %v2819_v10 = vsel %vm1188_vm2, %v2813_v59, %v2818_v34  ;;  %v2821_v44 = vsel %vm1188_vm2, %v2816_v33, %v2820_v58 }
 0x2d0   :  { %v2625_v62 = vadd.f32 %v11895_v0, %v2555_v1  ;;  %v2626_v46 = vadd.f32 %v11898_v60, %v2556_v25  ;;  %v9781_v39 = vpack.i.bf16 %v11946_v20, %v11944_v4  ;;  %v11960_v6 = vmax.f32 %v2685_v36, %v2819_v10 }
 0x2d1   :  { %v2695_v52 = vmax.f32 %v11949_v38, 0.0  ;;  %v2696_v53 = vmax.f32 %v11952_v28, 0.0  ;;  %v11964_v12 = vmax.f32 %v2686_v22, %v2821_v44 }
 0x2d2   :  { %v2690_v18 = vmax.f32 %v2626_v46, 0.0  ;;  %9782 = vrot.lane.b32.xlu0 %v9781_v39, %s10233_s1  ;;  %v9786_v1 = vpack.i.bf16 %v11922_v13, %v11960_v6  ;;  %v2689_v33 = vmax.f32 %v2625_v62, 0.0 }
 0x2d3   :  { %v2832_v25 = vrot.slane %v2695_v52, 1  ;;  %v2834_v59 = vrot.slane %v2696_v53, 1 }
 0x2d4   :  { %v2245_v43 = vpop.f32.mrf.mxu2  ;;  %v2264_v32 = vpop.f32.mrf.mxu3  ;;  %9787 = vrot.lane.b32.xlu2 %v9786_v1, %s10233_s1  ;;  %v2822_v36 = vrot.slane %v2689_v33, 1  ;;  %v2824_v38 = vrot.slane %v2690_v18, 1 }
 0x2d5   :  { %v2563_v15 = vadd.f32 %v2245_v43, %v11731_v45  ;;  %v2564_v22 = vadd.f32 %v2264_v32, %v11734_v5  ;;  %v2285_v51 = vpop.f32.mrf.mxu0  ;;  %v2304_v55 = vpop.f32.mrf.mxu1  ;;  %v2833_v28 = vsel %vm1188_vm2, %v2827_v41, %v2832_v25  ;;  %v2835_v10 = vsel %vm1188_vm2, %v2830_v47, %v2834_v59 }
 0x2d6   :  { %v2565_v44 = vadd.f32 %v2285_v51, %v11738_v35  ;;  %v2566_v62 = vadd.f32 %v2304_v55, %v11741_v29  ;;  %v11976_v46 = vmax.f32 %v2689_v33, %v2822_v36  ;;  %v11978_v39 = vmax.f32 %v2690_v18, %v2824_v38 }
 0x2d7   :  { %v2633_v1 = vadd.f32 %v11895_v0, %v2563_v15  ;;  %v11982_v45 = vadd.f32 %v11898_v60, %v2564_v22  ;;  %v11984_v5 = vmax.f32 %v2693_v40, %v2833_v28  ;;  %v11986_v43 = vmax.f32 %v2694_v63, %v2835_v10 }
 0x2d8   :  { %3128 = vrot.lane.b32.xlu1 %v11976_v46, %s10233_s1  ;;  %v2823_v35 = vsel %vm1188_vm2, %v2818_v34, %v2822_v36  ;;  %v2825_v29 = vsel %vm1188_vm2, %v2820_v58, %v2824_v38  ;;  %v16054_v63 = vmax.f32 %v11930_v27, 0.0  ;;  %v2635_v34 = vadd.f32 %v11895_v0, %v2565_v44 }
 0x2d9   :  { %v2697_v41 = vmax.f32 %v2633_v1, 0.0  ;;  %v2698_v47 = vmax.f32 %v11982_v45, 0.0  ;;  %v11993_v18 = vmax.f32 %v2687_v31, %v2823_v35  ;;  %v9791_v40 = vpack.i.bf16 %v11986_v43, %v11984_v5 }
 0x2da   :  { %3130 = vrot.lane.b32.xlu0 %v11978_v39, %s10233_s1  ;;  %v12001_v33 = vmax.f32 %v16054_v63, %v2825_v29  ;;  %v2636_v58 = vadd.f32 %v11898_v60, %v2566_v62  ;;  %v2699_v45 = vmax.f32 %v2635_v34, 0.0 }
 0x2db   :  { %v2838_v32 = vrot.slane %v2698_v47, 1  ;;  %v2836_v36 = vrot.slane %v2697_v41, 1  ;;  %v9801_v27 = vpack.i.bf16 %v11924_v49, %v11993_v18 }
 0x2dc   :  { %v2332_v38 = vpop.f32.mrf.mxu2  ;;  %v2351_v15 = vpop.f32.mrf.mxu3  ;;  %9792 = vrot.lane.b32.xlu2 %v9791_v40, %s10233_s1  ;;  %v2700_v35 = vmax.f32 %v2636_v58, 0.0 }
 0x2dd   :  { %v2573_v31 = vadd.f32 %v2332_v38, %v11753_v19  ;;  %v2574_v22 = vadd.f32 %v2351_v15, %v11756_v50  ;;  %v2287_v51 = vpop.f32.mrf.mxu0  ;;  %v2306_v55 = vpop.f32.mrf.mxu1  ;;  %v2837_v28 = vsel %vm1188_vm2, %v2832_v25, %v2836_v36  ;;  %v2839_v62 = vsel %vm1188_vm2, %v2834_v59, %v2838_v32 }
 0x2de   :  { %v2567_v10 = vadd.f32 %v2287_v51, %v11759_v56  ;;  %v2568_v44 = vadd.f32 %v2306_v55, %v11762_v61  ;;  %v12014_v1 = vmax.f32 %v2695_v52, %v2837_v28  ;;  %v12016_v19 = vmax.f32 %v2696_v53, %v2839_v62 }
 0x2df   :  { %v2643_v50 = vadd.f32 %v11895_v0, %v2573_v31  ;;  %v9796_v56 = vpack.i.bf16 %v11964_v12, %v12001_v33  ;;  %v2644_v61 = vadd.f32 %v11898_v60, %v2574_v22  ;;  %v12032_v25 = vmax.f32 %v2697_v41, %v2836_v36 }
 0x2e0   :  { %v12020_v29 = vadd.f32 %v11895_v0, %v2567_v10  ;;  %v12023_v40 = vadd.f32 %v11898_v60, %v2568_v44  ;;  %9802 = vrot.lane.b32.xlu1 %v9801_v27, %s10233_s1  ;;  %v2840_v59 = vrot.slane %v2699_v45, 1  ;;  %v2843_v63 = vrot.slane %v2700_v35, 1 }
 0x2e1   :  { %v2707_v34 = vmax.f32 %v2643_v50, 0.0  ;;  %v2708_v22 = vmax.f32 %v2644_v61, 0.0  ;;  %v9806_v36 = vpack.i.bf16 %v12016_v19, %v12014_v1 }
 0x2e2   :  { %v2701_v52 = vmax.f32 %v12020_v29, 0.0  ;;  %v15730_v53 = vmax.f32 %v12023_v40, 0.0  ;;  %9797 = vrot.lane.b32.xlu0 %v9796_v56, %s10233_s1 }
 0x2e4   :  { %v2841_v58 = vrot.slane %v2701_v52, 1  ;;  %v2844_v38 = vrot.slane %v15730_v53, 1  ;;  %v2334_v15 = vpop.f32.mrf.mxu2  ;;  %v2353_v31 = vpop.f32.mrf.mxu3  ;;  %3144 = vrot.lane.b32.xlu2 %v12032_v25, %s10233_s1 }
 0x2e5   :  { %v2575_v51 = vadd.f32 %v2334_v15, %v11769_v3  ;;  %v2576_v55 = vadd.f32 %v2353_v31, %v11772_v57  ;;  %v2290_v27 = vpop.f32.mrf.mxu0  ;;  %v2309_v41 = vpop.f32.mrf.mxu1  ;;  %v2857_v15 = vrot.slane %v2708_v22, 1 }
 0x2e6   :  { %v2569_v28 = vadd.f32 %v2290_v27, %v11775_v37  ;;  %v2570_v10 = vadd.f32 %v2309_v41, %v11778_v48  ;;  %v2842_v44 = vsel %vm1188_vm2, %v2840_v59, %v2841_v58  ;;  %v2845_v62 = vsel %vm1188_vm2, %v2843_v63, %v2844_v38 }
 0x2e7   :  { %v12047_v50 = vadd.f32 %v11895_v0, %v2575_v51  ;;  %v12050_v3 = vadd.f32 %v11898_v60, %v2576_v55  ;;  %v12052_v57 = vmax.f32 %v2699_v45, %v2842_v44  ;;  %v12054_v29 = vmax.f32 %v2700_v35, %v2845_v62 }
 0x2e8   :  { %v12057_v56 = vadd.f32 %v11895_v0, %v2569_v28  ;;  %v12060_v37 = vadd.f32 %v11898_v60, %v2570_v10  ;;  %9807 = vrot.lane.b32.xlu1 %v9806_v36, %s10233_s1  ;;  %v12063_v48 = vmax.f32 %v2698_v47, %v2838_v32  ;;  %v2854_v35 = vrot.slane %v2707_v34, 1 }
 0x2e9   :  { %16055 = vst [vmem:[#allocation115_spill] sm:$0xff] %v12052_v57  ;;  %v2709_v61 = vmax.f32 %v12047_v50, 0.0  ;;  %v2710_v59 = vmax.f32 %v12050_v3, 0.0  ;;  %v9811_v41 = vpack.i.bf16 %v12054_v29, %v12052_v57 }
 0x2ea   :  { %16056 = vst [vmem:[#allocation70_spill] sm:$0xff] %v12054_v29  ;;  %v15728_v63 = vmax.f32 %v12057_v56, 0.0  ;;  %v15729_v45 = vmax.f32 %v12060_v37, 0.0  ;;  %3146 = vrot.lane.b32.xlu0 %v12063_v48, %s10233_s1 }
 0x2eb   :  { %v2855_v31 = vrot.slane %v2709_v61, 1  ;;  %v2858_v51 = vrot.slane %v2710_v59, 1 }
 0x2ec   :  { %v2846_v55 = vrot.slane %v15728_v63, 1  ;;  %v2848_v47 = vrot.slane %v15729_v45, 1  ;;  %v2337_v32 = vpop.f32.mrf.mxu2  ;;  %v2356_v27 = vpop.f32.mrf.mxu3 }
 0x2ed   :  { %v2577_v36 = vadd.f32 %v2337_v32, %v11785_v16  ;;  %v2578_v28 = vadd.f32 %v2356_v27, %v11788_v2  ;;  %v2292_v10 = vpop.f32.mrf.mxu0  ;;  %v2311_v44 = vpop.f32.mrf.mxu1  ;;  %v2856_v62 = vsel %vm1188_vm2, %v2854_v35, %v2855_v31  ;;  %v2859_v50 = vsel %vm1188_vm2, %v2857_v15, %v2858_v51 }
 0x2ee   :  { %v2571_v3 = vadd.f32 %v2292_v10, %v11791_v24  ;;  %v2572_v63 = vadd.f32 %v2311_v44, %v11794_v21  ;;  %v12083_v45 = vmax.f32 %v2707_v34, %v2856_v62  ;;  %v12085_v53 = vmax.f32 %v2708_v22, %v2859_v50 }
 0x2ef   :  { %v12088_v57 = vadd.f32 %v11895_v0, %v2577_v36  ;;  %v12091_v16 = vadd.f32 %v11898_v60, %v2578_v28  ;;  %v2847_v2 = vsel %vm1188_vm2, %v2841_v58, %v2846_v55  ;;  %v2849_v35 = vsel %vm1188_vm2, %v2844_v38, %v2848_v47 }
 0x2f0   :  { %16057 = vst [vmem:[#allocation116_spill] sm:$0xff] %v12083_v45  ;;  %v2641_v15 = vadd.f32 %v11895_v0, %v2571_v3  ;;  %v12097_v24 = vadd.f32 %v11898_v60, %v2572_v63  ;;  %9812 = vrot.lane.b32.xlu1 %v9811_v41, %s10233_s1  ;;  %v9816_v21 = vpack.i.bf16 %v12085_v53, %v12083_v45  ;;  %v16060_v58 = vmax.f32 %v12023_v40, 0.0 }
 0x2f1   :  { %16058 = vst [vmem:[#allocation71_spill] sm:$0xff] %v12085_v53  ;;  %v12102_v34 = vmax.f32 %v2701_v52, %v2847_v2  ;;  %v2711_v22 = vmax.f32 %v12088_v57, 0.0  ;;  %v2712_v32 = vmax.f32 %v12091_v16, 0.0  ;;  %v16061_v52 = vld [vmem:[#allocation34_spill] sm:$0xff] }
 0x2f2   :  { %v12108_v27 = vmax.f32 %v16060_v58, %v2849_v35  ;;  %v2705_v38 = vmax.f32 %v2641_v15, 0.0  ;;  %v2706_v36 = vmax.f32 %v12097_v24, 0.0  ;;  %9817 = vrot.lane.b32.xlu2 %v9816_v21, %s10233_s1  ;;  %v2115_v10 = vadd.f32 %v11806_v26, %v16061_v52  ;;  %v16062_v24 = vld [vmem:[#allocation35_spill] sm:$0xff] }
 0x2f3   :  { %16059 = vst [vmem:[#allocation117_spill] sm:$0xff] %v12102_v34  ;;  %v2860_v63 = vrot.slane %v2711_v22, 1  ;;  %v2862_v41 = vrot.slane %v2712_v32, 1  ;;  %v2116_v21 = vadd.f32 %v11808_v8, %v16062_v24 }
 0x2f4   :  { %v9821_v28 = vpack.i.bf16 %v12108_v27, %v12102_v34  ;;  %v2852_v57 = vrot.slane %v2706_v36, 1  ;;  %v2339_v44 = vpop.f32.mrf.mxu2  ;;  %v2358_v62 = vpop.f32.mrf.mxu3  ;;  %v2850_v50 = vrot.slane %v2705_v38, 1 }
 0x2f5   :  { %v2579_v40 = vadd.f32 %v2339_v44, %v11801_v30  ;;  %v2580_v3 = vadd.f32 %v2358_v62, %v11804_v23  ;;  %v2379_v16 = vpop.f32.mrf.mxu0  ;;  %v2398_v2 = vpop.f32.mrf.mxu1  ;;  %v2861_v35 = vsel %vm1188_vm2, %v2855_v31, %v2860_v63  ;;  %v2863_v15 = vsel %vm1188_vm2, %v2858_v51, %v2862_v41 }
 0x2f6   :  { %9822 = vrot.lane.b32.xlu0 %v9821_v28, %s10233_s1  ;;  %v12123_v26 = vmax.f32 %v2709_v61, %v2861_v35  ;;  %v12125_v58 = vmax.f32 %v2710_v59, %v2863_v15  ;;  %v2581_v23 = vadd.f32 %v2379_v16, %v2115_v10  ;;  %v2851_v28 = vsel %vm1188_vm2, %v2846_v55, %v2850_v50  ;;  %v16067_v10 = vld [vmem:[#allocation44_spill] sm:$0xff] }
 0x2f7   :  { %v12128_v52 = vadd.f32 %v11895_v0, %v2579_v40  ;;  %v2650_v30 = vadd.f32 %v11898_v60, %v2580_v3  ;;  %v2582_v44 = vadd.f32 %v2398_v2, %v2116_v21  ;;  %v2853_v51 = vsel %vm1188_vm2, %v2848_v47, %v2852_v57 }
 0x2f8   :  { %16063 = vst [vmem:[#allocation72_spill] sm:$0xff] %v12123_v26  ;;  %v9826_v31 = vpack.i.bf16 %v12125_v58, %v12123_v26  ;;  %v16065_v59 = vmax.f32 %v12057_v56, 0.0  ;;  %v16066_v40 = vmax.f32 %v12060_v37, 0.0  ;;  %v2123_v55 = vadd.f32 %v11816_v54, %v11478_v11 }
 0x2f9   :  { %16064 = vst [vmem:[#allocation73_spill] sm:$0xff] %v12125_v58  ;;  %v2713_v8 = vmax.f32 %v12128_v52, 0.0  ;;  %v2714_v61 = vmax.f32 %v2650_v30, 0.0  ;;  %v2124_v3 = vadd.f32 %v11818_v17, %v16067_v10  ;;  %v12149_v47 = vmax.f32 %v2705_v38, %v2850_v50  ;;  %v16069_v10 = vld [vmem:[#allocation90_spill] sm:$0xff] }
 0x2fa   :  { %v12138_v62 = vmax.f32 %v16065_v59, %v2851_v28  ;;  %v12142_v35 = vmax.f32 %v16066_v40, %v2853_v51  ;;  %9827 = vrot.lane.b32.xlu1 %v9826_v31, %s10233_s1  ;;  %v2651_v2 = vadd.f32 %v11895_v0, %v2581_v23  ;;  %v2117_v15 = vadd.f32 %v11820_v14, %v11482_v9 }
 0x2fb   :  { %v2864_v16 = vrot.slane %v2713_v8, 1  ;;  %v2866_v56 = vrot.slane %v2714_v61, 1  ;;  %v2118_v11 = vadd.f32 %v11822_v7, %v11484_v42  ;;  %v2652_v54 = vadd.f32 %v11898_v60, %v2582_v44 }
 0x2fc   :  { %v9831_v37 = vpack.i.bf16 %v12142_v35, %v12138_v62  ;;  %v2426_v17 = vpop.f32.mrf.mxu2  ;;  %v2445_v38 = vpop.f32.mrf.mxu3  ;;  %v2715_v7 = vmax.f32 %v2651_v2, 0.0  ;;  %v12176_v40 = vmax.f32 %v2706_v36, %v2852_v57  ;;  %v16072_v2 = vld [vmem:[#allocation58_spill] sm:$0xff]  ;;  %v16074_v36 = vld [vmem:[#allocation104_spill] sm:$0xff] }
 0x2fd   :  { %v2589_v50 = vadd.f32 %v2426_v17, %v2123_v55  ;;  %v2590_v24 = vadd.f32 %v2445_v38, %v2124_v3  ;;  %v2381_v21 = vpop.f32.mrf.mxu0  ;;  %v2400_v30 = vpop.f32.mrf.mxu1  ;;  %v2865_v23 = vsel %vm1188_vm2, %v2860_v63, %v2864_v16  ;;  %v2867_v14 = vsel %vm1188_vm2, %v2862_v41, %v2866_v56  ;;  %v16070_v41 = vld [vmem:[#allocation103_spill] sm:$0xff]  ;;  %v16071_v3 = vld [vmem:[#allocation45_spill] sm:$0xff] }
 0x2fe   :  { %3160 = vrot.lane.b32.xlu0 %v12149_v47, %s10233_s1  ;;  %9832 = vrot.lane.b32.xlu2 %v9831_v37, %s10233_s1  ;;  %v2583_v28 = vadd.f32 %v2381_v21, %v2117_v15  ;;  %v2584_v9 = vadd.f32 %v2400_v30, %v2118_v11  ;;  %v12166_v42 = vmax.f32 %v2711_v22, %v2865_v23  ;;  %v2716_v31 = vmax.f32 %v2652_v54, 0.0  ;;  %v16073_v11 = vld [vmem:[#allocation91_spill] sm:$0xff]  ;;  %v16075_v54 = vld [vmem:[#allocation46_spill] sm:$0xff] }
 0x2ff   :  { %v12168_v44 = vmax.f32 %v2712_v32, %v2867_v14  ;;  %v2659_v63 = vadd.f32 %v11895_v0, %v2589_v50  ;;  %v2660_v55 = vadd.f32 %v11898_v60, %v2590_v24  ;;  %v2125_v22 = vadd.f32 %v16070_v41, %v16069_v10  ;;  %v16076_v17 = vld [vmem:[#allocation59_spill] sm:$0xff] }
 0x300   :  { %16068 = vst [vmem:[#allocation74_spill] sm:$0xff] %v12166_v42  ;;  %v12171_v51 = vadd.f32 %v11895_v0, %v2583_v28  ;;  %v12174_v59 = vadd.f32 %v11898_v60, %v2584_v9  ;;  %v2126_v32 = vadd.f32 %v16072_v2, %v16071_v3  ;;  %v2119_v57 = vadd.f32 %v16074_v36, %v16073_v11 }
 0x301   :  { %v2120_v38 = vadd.f32 %v16076_v17, %v16075_v54  ;;  %v9836_v50 = vpack.i.bf16 %v12168_v44, %v12166_v42  ;;  %v12194_v24 = vmax.f32 %v2714_v61, %v2866_v56  ;;  %v2868_v21 = vrot.slane %v2715_v7, 1 }
 0x302   :  { %v15733_v37 = vmax.f32 %v12171_v51, 0.0  ;;  %v15732_v15 = vmax.f32 %v12174_v59, 0.0  ;;  %3162 = vrot.lane.b32.xlu1 %v12176_v40, %s10233_s1  ;;  %v2871_v30 = vrot.slane %v2716_v31, 1  ;;  %v2723_v10 = vmax.f32 %v2659_v63, 0.0 }
 0x303   :  { %v2724_v41 = vmax.f32 %v2660_v55, 0.0 }
 0x304   :  { %v2869_v23 = vrot.slane %v15733_v37, 1  ;;  %v2872_v28 = vrot.slane %v15732_v15, 1  ;;  %v2428_v9 = vpop.f32.mrf.mxu2  ;;  %v2447_v14 = vpop.f32.mrf.mxu3  ;;  %v2882_v52 = vrot.slane %v2723_v10, 1 }
 0x305   :  { %v2591_v3 = vadd.f32 %v2428_v9, %v2125_v22  ;;  %v2592_v2 = vadd.f32 %v2447_v14, %v2126_v32  ;;  %v2384_v61 = vpop.f32.mrf.mxu0  ;;  %v2403_v56 = vpop.f32.mrf.mxu1  ;;  %v16080_v9 = vld [vmem:[#allocation105_spill] sm:$0xff]  ;;  %v16081_v14 = vld [vmem:[#allocation47_spill] sm:$0xff] }
 0x306   :  { %9837 = vrot.lane.b32.xlu0 %v9836_v50, %s10233_s1  ;;  %3178 = vrot.lane.b32.xlu2 %v12194_v24, %s10233_s1  ;;  %v2585_v11 = vadd.f32 %v2384_v61, %v2119_v57  ;;  %v2586_v36 = vadd.f32 %v2403_v56, %v2120_v38  ;;  %v2870_v54 = vsel %vm1188_vm2, %v2868_v21, %v2869_v23 }
 0x307   :  { %v2873_v17 = vsel %vm1188_vm2, %v2871_v30, %v2872_v28  ;;  %v12206_v15 = vadd.f32 %v11895_v0, %v2591_v3  ;;  %v12209_v63 = vadd.f32 %v11898_v60, %v2592_v2  ;;  %v12211_v55 = vmax.f32 %v2715_v7, %v2870_v54  ;;  %v16079_v30 = vld [vmem:[#allocation92_spill] sm:$0xff] }
 0x308   :  { %v12213_v22 = vmax.f32 %v2716_v31, %v2873_v17  ;;  %v12216_v32 = vadd.f32 %v11895_v0, %v2585_v11  ;;  %v12219_v57 = vadd.f32 %v11898_v60, %v2586_v36  ;;  %v12223_v38 = vmax.f32 %v2713_v8, %v2864_v16  ;;  %v16082_v31 = vld [vmem:[#allocation40_spill] sm:$0xff]  ;;  %v16084_v11 = vld [vmem:[#allocation41_spill] sm:$0xff] }
 0x309   :  { %16077 = vst [vmem:[#allocation118_spill] sm:$0xff] %v12211_v55  ;;  %v2725_v50 = vmax.f32 %v12206_v15, 0.0  ;;  %v2726_v21 = vmax.f32 %v12209_v63, 0.0  ;;  %v2127_v7 = vadd.f32 %v16080_v9, %v16079_v30  ;;  %v2128_v3 = vadd.f32 %v16082_v31, %v16081_v14  ;;  %v16083_v15 = vld [vmem:[#allocation93_spill] sm:$0xff]  ;;  %v16085_v54 = vld [vmem:[#allocation48_spill] sm:$0xff] }
 0x30a   :  { %16078 = vst [vmem:[#allocation75_spill] sm:$0xff] %v12223_v38  ;;  %v15741_v2 = vmax.f32 %v12216_v32, 0.0  ;;  %v15740_v61 = vmax.f32 %v12219_v57, 0.0  ;;  %3176 = vrot.lane.b32.xlu1 %v12223_v38, %s10233_s1  ;;  %v2885_v8 = vrot.slane %v2724_v41, 1  ;;  %v2121_v36 = vadd.f32 %v16084_v11, %v16083_v15  ;;  %v16086_v17 = vld [vmem:[#allocation60_spill] sm:$0xff] }
 0x30b   :  { %v2883_v16 = vrot.slane %v2725_v50, 1  ;;  %v2886_v56 = vrot.slane %v2726_v21, 1  ;;  %v2122_v63 = vadd.f32 %v16086_v17, %v16085_v54 }
 0x30c   :  { %v2874_v30 = vrot.slane %v15741_v2, 1  ;;  %v2876_v9 = vrot.slane %v15740_v61, 1  ;;  %v2431_v14 = vpop.f32.mrf.mxu2  ;;  %v2450_v31 = vpop.f32.mrf.mxu3 }
 0x30d   :  { %v2593_v37 = vadd.f32 %v2431_v14, %v2127_v7  ;;  %v2594_v45 = vadd.f32 %v2450_v31, %v2128_v3  ;;  %v2386_v26 = vpop.f32.mrf.mxu0  ;;  %v2405_v42 = vpop.f32.mrf.mxu1  ;;  %v2884_v38 = vsel %vm1188_vm2, %v2882_v52, %v2883_v16  ;;  %v2887_v53 = vsel %vm1188_vm2, %v2885_v8, %v2886_v56  ;;  %v16095_v14 = vld [vmem:[#allocation49_spill] sm:$0xff] }
 0x30e   :  { %v2587_v15 = vadd.f32 %v2386_v26, %v2121_v36  ;;  %v2588_v11 = vadd.f32 %v2405_v42, %v2122_v63  ;;  %v12245_v58 = vmax.f32 %v2723_v10, %v2884_v38  ;;  %v12247_v54 = vmax.f32 %v2724_v41, %v2887_v53  ;;  %v16093_v38 = vld [vmem:[#allocation94_spill] sm:$0xff] }
 0x30f   :  { %v12250_v17 = vadd.f32 %v11895_v0, %v2593_v37  ;;  %v12253_v61 = vadd.f32 %v11898_v60, %v2594_v45  ;;  %v2875_v7 = vsel %vm1188_vm2, %v2869_v23, %v2874_v30  ;;  %v2877_v3 = vsel %vm1188_vm2, %v2872_v28, %v2876_v9  ;;  %v16094_v36 = vld [vmem:[#allocation106_spill] sm:$0xff] }
 0x310   :  { %16087 = vst [vmem:[#allocation119_spill] sm:$0xff] %v12245_v58  ;;  %v2657_v52 = vadd.f32 %v11895_v0, %v2587_v15  ;;  %v12259_v8 = vadd.f32 %v11898_v60, %v2588_v11  ;;  %v9841_v26 = vpack.i.bf16 %v12247_v54, %v12245_v58  ;;  %v16089_v53 = vmax.f32 %v12171_v51, 0.0  ;;  %v16096_v51 = vld [vmem:[#allocation61_spill] sm:$0xff] }
 0x311   :  { %16088 = vst [vmem:[#allocation76_spill] sm:$0xff] %v12247_v54  ;;  %v2727_v37 = vmax.f32 %v12250_v17, 0.0  ;;  %v2728_v45 = vmax.f32 %v12253_v61, 0.0  ;;  %v16091_v23 = vmax.f32 %v12174_v59, 0.0  ;;  %v2129_v63 = vadd.f32 %v16094_v36, %v16093_v38  ;;  %v16097_v17 = vld [vmem:[#allocation95_spill] sm:$0xff] }
 0x312   :  { %v12265_v42 = vmax.f32 %v16089_v53, %v2875_v7  ;;  %v2721_v28 = vmax.f32 %v2657_v52, 0.0  ;;  %v15745_v41 = vmax.f32 %v12259_v8, 0.0  ;;  %9842 = vrot.lane.b32.xlu0 %v9841_v26, %s10233_s1  ;;  %v2130_v31 = vadd.f32 %v16096_v51, %v16095_v14  ;;  %v16098_v7 = vld [vmem:[#allocation107_spill] sm:$0xff]  ;;  %v16099_v14 = vld [vmem:[#allocation50_spill] sm:$0xff] }
 0x313   :  { %v12271_v10 = vmax.f32 %v16091_v23, %v2877_v3  ;;  %v2888_v15 = vrot.slane %v2727_v37, 1  ;;  %v2890_v11 = vrot.slane %v2728_v45, 1  ;;  %v2131_v61 = vadd.f32 %v16098_v7, %v16097_v17  ;;  %v16100_v51 = vld [vmem:[#allocation62_spill] sm:$0xff] }
 0x314   :  { %16090 = vst [vmem:[#allocation120_spill] sm:$0xff] %v12265_v42  ;;  %v2880_v59 = vrot.slane %v15745_v41, 1  ;;  %v2433_v3 = vpop.f32.mrf.mxu2  ;;  %v2452_v52 = vpop.f32.mrf.mxu3  ;;  %v2878_v53 = vrot.slane %v2721_v28, 1  ;;  %v2132_v54 = vadd.f32 %v16100_v51, %v16099_v14  ;;  %v16113_v14 = vld [vmem:[#allocation109_spill] sm:$0xff] }
 0x315   :  { %16092 = vst [vmem:[#allocation77_spill] sm:$0xff] %v12271_v10  ;;  %v2595_v23 = vadd.f32 %v2433_v3, %v2129_v63  ;;  %v2596_v2 = vadd.f32 %v2452_v52, %v2130_v31  ;;  %v2473_v26 = vpop.f32.mrf.mxu0  ;;  %v2492_v58 = vpop.f32.mrf.mxu1  ;;  %v2889_v38 = vsel %vm1188_vm2, %v2883_v16, %v2888_v15  ;;  %v2891_v36 = vsel %vm1188_vm2, %v2886_v56, %v2890_v11 }
 0x316   :  { %v12287_v29 = vmax.f32 %v2721_v28, %v2878_v53  ;;  %v12289_v17 = vmax.f32 %v2725_v50, %v2889_v38  ;;  %v2597_v63 = vadd.f32 %v2473_v26, %v2131_v61  ;;  %v12295_v31 = vmax.f32 %v2726_v21, %v2891_v36  ;;  %v16106_v21 = vld [vmem:[#allocation96_spill] sm:$0xff]  ;;  %v16112_v36 = vld [vmem:[#allocation97_spill] sm:$0xff] }
 0x317   :  { %v12292_v7 = vadd.f32 %v11895_v0, %v2595_v23  ;;  %v2666_v41 = vadd.f32 %v11898_v60, %v2596_v2  ;;  %v2598_v3 = vadd.f32 %v2492_v58, %v2132_v54  ;;  %v2879_v16 = vsel %vm1188_vm2, %v2874_v30, %v2878_v53  ;;  %v16107_v61 = vld [vmem:[#allocation108_spill] sm:$0xff]  ;;  %v16110_v30 = vld [vmem:[#allocation51_spill] sm:$0xff] }
 0x318   :  { %16101 = vst [vmem:[#allocation121_spill] sm:$0xff] %v12287_v29  ;;  %3192 = vrot.lane.b32.xlu1 %v12287_v29, %s10233_s1  ;;  %v2881_v56 = vsel %vm1188_vm2, %v2876_v9, %v2880_v59  ;;  %v9846_v52 = vpack.i.bf16 %v12295_v31, %v12289_v17  ;;  %v16104_v23 = vmax.f32 %v12216_v32, 0.0  ;;  %v2139_v58 = vadd.f32 %v16107_v61, %v16106_v21  ;;  %v16111_v53 = vld [vmem:[#allocation63_spill] sm:$0xff] }
 0x319   :  { %16102 = vst [vmem:[#allocation78_spill] sm:$0xff] %v12289_v17  ;;  %v15746_v28 = vmax.f32 %v12292_v7, 0.0  ;;  %v2730_v50 = vmax.f32 %v2666_v41, 0.0  ;;  %v16108_v54 = vmax.f32 %v12219_v57, 0.0  ;;  %v2140_v9 = vadd.f32 %v16111_v53, %v16110_v30 }
 0x31a   :  { %16103 = vst [vmem:[#allocation122_spill] sm:$0xff] %v12295_v31  ;;  %v12306_v2 = vmax.f32 %v16104_v23, %v2879_v16  ;;  %v2667_v38 = vadd.f32 %v11895_v0, %v2597_v63  ;;  %9847 = vrot.lane.b32.xlu2 %v9846_v52, %s10233_s1  ;;  %v2133_v51 = vadd.f32 %v16113_v14, %v16112_v36  ;;  %v16114_v16 = vld [vmem:[#allocation52_spill] sm:$0xff] }
 0x31b   :  { %v12312_v26 = vmax.f32 %v16108_v54, %v2881_v56  ;;  %v12318_v41 = vrot.slane %v15746_v28, 1  ;;  %v2894_v32 = vrot.slane %v2730_v50, 1  ;;  %v16115_v23 = vld [vmem:[#allocation64_spill] sm:$0xff]  ;;  %v2668_v56 = vadd.f32 %v11898_v60, %v2598_v3 }
 0x31c   :  { %16105 = vst [vmem:[#allocation79_spill] sm:$0xff] %v12306_v2  ;;  %v2134_v57 = vadd.f32 %v16115_v23, %v16114_v16  ;;  %v2520_v21 = vpop.f32.mrf.mxu2  ;;  %v2539_v61 = vpop.f32.mrf.mxu3  ;;  %v2731_v16 = vmax.f32 %v2667_v38, 0.0  ;;  %v16121_v38 = vld [vmem:[#allocation98_spill] sm:$0xff] }
 0x31d   :  { %16109 = vst [vmem:[#allocation123_spill] sm:$0xff] %v12312_v26  ;;  %v2605_v54 = vadd.f32 %v2520_v21, %v2139_v58  ;;  %v2606_v30 = vadd.f32 %v2539_v61, %v2140_v9  ;;  %v2475_v53 = vpop.f32.mrf.mxu0  ;;  %v2494_v28 = vpop.f32.mrf.mxu1  ;;  %v12327_v17 = vmax.f32 %v2730_v50, %v2894_v32  ;;  %v2893_v63 = vsel %vm1188_vm2, %v2888_v15, %v12318_v41  ;;  %v16125_v61 = vld [vmem:[#allocation99_spill] sm:$0xff] }
 0x31e   :  { %v2599_v52 = vadd.f32 %v2475_v53, %v2133_v51  ;;  %v2600_v31 = vadd.f32 %v2494_v28, %v2134_v57  ;;  %v2895_v36 = vsel %vm1188_vm2, %v2890_v11, %v2894_v32  ;;  %v12332_v14 = vmax.f32 %v2727_v37, %v2893_v63  ;;  %v16122_v32 = vld [vmem:[#allocation110_spill] sm:$0xff]  ;;  %v16123_v57 = vld [vmem:[#allocation53_spill] sm:$0xff] }
 0x31f   :  { %16116 = vst [vmem:[#allocation80_spill] sm:$0xff] %v12327_v17  ;;  %3210 = vrot.lane.b32.xlu0 %v12327_v17, %s10233_s1  ;;  %v12336_v3 = vmax.f32 %v2728_v45, %v2895_v36  ;;  %v2732_v58 = vmax.f32 %v2668_v56, 0.0  ;;  %v12345_v15 = vadd.f32 %v11895_v0, %v2605_v54  ;;  %v12348_v11 = vadd.f32 %v11898_v60, %v2606_v30  ;;  %v16124_v56 = vld [vmem:[#allocation65_spill] sm:$0xff]  ;;  %v16126_v54 = vld [vmem:[#allocation111_spill] sm:$0xff]  ;;  %v16127_v53 = vld [vmem:[#allocation54_spill] sm:$0xff] }
 0x320   :  { %16117 = vst [vmem:[#allocation124_spill] sm:$0xff] %v12332_v14  ;;  %v12339_v9 = vadd.f32 %v11895_v0, %v2599_v52  ;;  %v12342_v50 = vadd.f32 %v11898_v60, %v2600_v31  ;;  %v16119_v28 = vmax.f32 %v12259_v8, 0.0  ;;  %v2141_v51 = vadd.f32 %v16122_v32, %v16121_v38  ;;  %v16128_v63 = vld [vmem:[#allocation66_spill] sm:$0xff] }
 0x321   :  { %16118 = vst [vmem:[#allocation81_spill] sm:$0xff] %v12336_v3  ;;  %v9856_v37 = vpack.i.bf16 %v12336_v3, %v12332_v14  ;;  %v2142_v21 = vadd.f32 %v16124_v56, %v16123_v57  ;;  %v2135_v30 = vadd.f32 %v16126_v54, %v16125_v61  ;;  %v2136_v52 = vadd.f32 %v16128_v63, %v16127_v53 }
 0x322   :  { %v12354_v45 = vmax.f32 %v16119_v28, %v2880_v59  ;;  %v15751_v23 = vmax.f32 %v12339_v9, 0.0  ;;  %v15753_v31 = vmax.f32 %v12342_v50, 0.0  ;;  %v2896_v36 = vrot.slane %v2731_v16, 1 }
 0x323   :  { %9857 = vrot.lane.b32.xlu1 %v9856_v37, %s10233_s1  ;;  %v2899_v8 = vrot.slane %v2732_v58, 1  ;;  %v9851_v57 = vpack.i.bf16 %v12312_v26, %v12306_v2  ;;  %v2739_v56 = vmax.f32 %v12345_v15, 0.0  ;;  %v2740_v61 = vmax.f32 %v12348_v11, 0.0 }
 0x324   :  { %16120 = vst [vmem:[#allocation125_spill] sm:$0xff] %v12354_v45  ;;  %3194 = vrot.lane.b32.xlu2 %v12354_v45, %s10233_s1  ;;  %v2897_v59 = vrot.slane %v15751_v23, 1  ;;  %v2900_v28 = vrot.slane %v15753_v31, 1  ;;  %v2522_v38 = vpop.f32.mrf.mxu2  ;;  %v2541_v32 = vpop.f32.mrf.mxu3 }
 0x325   :  { %v2607_v37 = vadd.f32 %v2522_v38, %v2141_v51  ;;  %v2608_v54 = vadd.f32 %v2541_v32, %v2142_v21  ;;  %v2478_v53 = vpop.f32.mrf.mxu0  ;;  %v2497_v63 = vpop.f32.mrf.mxu1  ;;  %v16134_v38 = vld [vmem:[#allocation67_spill] sm:$0xff] }
 0x326   :  { %v2601_v14 = vadd.f32 %v2478_v53, %v2135_v30  ;;  %v2602_v3 = vadd.f32 %v2497_v63, %v2136_v52  ;;  %v2901_v23 = vsel %vm1188_vm2, %v2899_v8, %v2900_v28  ;;  %v2898_v17 = vsel %vm1188_vm2, %v2896_v36, %v2897_v59  ;;  %v16137_v63 = vld [vmem:[#allocation56_spill] sm:$0xff] }
 0x327   :  { %v12380_v31 = vadd.f32 %v11895_v0, %v2607_v37  ;;  %v12383_v29 = vadd.f32 %v11898_v60, %v2608_v54  ;;  %9852 = vrot.lane.b32.xlu0 %v9851_v57, %s10233_s1  ;;  %v12386_v15 = vmax.f32 %v2732_v58, %v2901_v23  ;;  %v12388_v11 = vmax.f32 %v2731_v16, %v2898_v17  ;;  %v16131_v17 = vld [vmem:[#allocation100_spill] sm:$0xff] }
 0x328   :  { %v12391_v51 = vadd.f32 %v11895_v0, %v2601_v14  ;;  %v12394_v21 = vadd.f32 %v11898_v60, %v2602_v3  ;;  %v9861_v36 = vpack.i.bf16 %v12271_v10, %v12265_v42  ;;  %v16129_v8 = vmax.f32 %v12292_v7, 0.0  ;;  %v16132_v16 = vld [vmem:[#allocation112_spill] sm:$0xff]  ;;  %v16133_v14 = vld [vmem:[#allocation55_spill] sm:$0xff]  ;;  %v16135_v7 = vld [vmem:[#allocation101_spill] sm:$0xff] }
 0x329   :  { %v2741_v30 = vmax.f32 %v12380_v31, 0.0  ;;  %v2742_v52 = vmax.f32 %v12383_v29, 0.0  ;;  %v2143_v23 = vadd.f32 %v16132_v16, %v16131_v17  ;;  %v2144_v32 = vadd.f32 %v16134_v38, %v16133_v14 }
 0x32a   :  { %v12403_v58 = vmax.f32 %v16129_v8, %v12318_v41  ;;  %v2735_v3 = vmax.f32 %v12391_v51, 0.0  ;;  %v2736_v31 = vmax.f32 %v12394_v21, 0.0  ;;  %v2910_v57 = vrot.slane %v2739_v56, 1  ;;  %v16136_v41 = vld [vmem:[#allocation113_spill] sm:$0xff]  ;;  %v16138_v8 = vld [vmem:[#allocation68_spill] sm:$0xff] }
 0x32b   :  { %v2913_v29 = vrot.slane %v2740_v61, 1  ;;  %v2911_v37 = vrot.slane %v2741_v30, 1  ;;  %v2914_v54 = vrot.slane %v2742_v52, 1  ;;  %9862 = vrot.lane.b32.xlu1 %v9861_v36, %s10233_s1  ;;  %v2137_v53 = vadd.f32 %v16136_v41, %v16135_v7 }
 0x32c   :  { %16130 = vst [vmem:[#allocation82_spill] sm:$0xff] %v12403_v58  ;;  %3208 = vrot.lane.b32.xlu2 %v12403_v58, %s10233_s1  ;;  %v2138_v17 = vadd.f32 %v16138_v8, %v16137_v63  ;;  %v2902_v16 = vrot.slane %v2735_v3, 1  ;;  %v2904_v14 = vrot.slane %v2736_v31, 1  ;;  %v2525_v51 = vpop.f32.mrf.mxu2  ;;  %v2544_v38 = vpop.f32.mrf.mxu3 }
 0x32d   :  { %v2609_v21 = vadd.f32 %v2525_v51, %v2143_v23  ;;  %v2610_v42 = vadd.f32 %v2544_v38, %v2144_v32  ;;  %v2480_v10 = vpop.f32.mrf.mxu0  ;;  %v2499_v2 = vpop.f32.mrf.mxu1  ;;  %v2915_v26 = vsel %vm1188_vm2, %v2913_v29, %v2914_v54  ;;  %v2912_v36 = vsel %vm1188_vm2, %v2910_v57, %v2911_v37  ;;  %v16143_v38 = vld [vmem:[#allocation57_spill] sm:$0xff] }
 0x32e   :  { %v2603_v45 = vadd.f32 %v2480_v10, %v2137_v53  ;;  %v2604_v58 = vadd.f32 %v2499_v2, %v2138_v17  ;;  %v12420_v34 = vmax.f32 %v2740_v61, %v2915_v26  ;;  %v2905_v7 = vsel %vm1188_vm2, %v2900_v28, %v2904_v14  ;;  %v16142_v17 = vld [vmem:[#allocation114_spill] sm:$0xff] }
 0x32f   :  { %v2679_v41 = vadd.f32 %v11895_v0, %v2609_v21  ;;  %v2680_v63 = vadd.f32 %v11898_v60, %v2610_v42  ;;  %v9866_v32 = vpack.i.bf16 %v12213_v22, %v12211_v55  ;;  %v16139_v57 = vmax.f32 %v12342_v50, 0.0  ;;  %v16144_v50 = vld [vmem:[#allocation69_spill] sm:$0xff] }
 0x330   :  { %v12426_v8 = vadd.f32 %v11895_v0, %v2603_v45  ;;  %v2674_v23 = vadd.f32 %v11898_v60, %v2604_v58  ;;  %v12435_v61 = vmax.f32 %v2739_v56, %v2912_v36  ;;  %v2903_v28 = vsel %vm1188_vm2, %v2897_v59, %v2902_v16  ;;  %v16141_v58 = vld [vmem:[#allocation102_spill] sm:$0xff] }
 0x331   :  { %v12433_v10 = vmax.f32 %v16139_v57, %v2905_v7  ;;  %v2743_v2 = vmax.f32 %v2679_v41, 0.0  ;;  %v2744_v26 = vmax.f32 %v2680_v63, 0.0  ;;  %v16140_v45 = vmax.f32 %v12339_v9, 0.0  ;;  %v12447_v63 = vpop.permute.xlu2 %9787 }
 0x332   :  { %v2737_v42 = vmax.f32 %v12426_v8, 0.0  ;;  %v2738_v29 = vmax.f32 %v2674_v23, 0.0  ;;  %v2145_v51 = vadd.f32 %v16142_v17, %v16141_v58  ;;  %v2146_v21 = vadd.f32 %v16144_v50, %v16143_v38 }
 0x333   :  { %v12441_v53 = vmax.f32 %v16140_v45, %v2903_v28  ;;  %v2916_v7 = vrot.slane %v2743_v2, 1  ;;  %v2918_v41 = vrot.slane %v2744_v26, 1 }
 0x334   :  { %9867 = vrot.lane.b32.xlu2 %v9866_v32, %s10233_s1  ;;  %v2906_v59 = vrot.slane %v2737_v42, 1  ;;  %v2908_v56 = vrot.slane %v2738_v29, 1  ;;  %v2527_v36 = vpop.f32.mrf.mxu2  ;;  %v2546_v8 = vpop.f32.mrf.mxu3 }
 0x335   :  { %v2611_v23 = vadd.f32 %v2527_v36, %v2145_v51  ;;  %v2612_v9 = vadd.f32 %v2546_v8, %v2146_v21  ;;  %v2919_v57 = vsel %vm1188_vm2, %v2914_v54, %v2918_v41  ;;  %v2917_v28 = vsel %vm1188_vm2, %v2911_v37, %v2916_v7 }
 0x336   :  { %v12452_v45 = vmax.f32 %v2742_v52, %v2919_v57  ;;  %v2909_v58 = vsel %vm1188_vm2, %v2904_v14, %v2908_v56  ;;  %v12455_v17 = vmax.f32 %v2741_v30, %v2917_v28  ;;  %v2907_v55 = vsel %vm1188_vm2, %v2902_v16, %v2906_v59 }
 0x337   :  { %v2681_v38 = vadd.f32 %v11895_v0, %v2611_v23  ;;  %v2682_v32 = vadd.f32 %v11898_v60, %v2612_v9  ;;  %v12459_v50 = vmax.f32 %v2736_v31, %v2909_v58  ;;  %v12462_v36 = vmax.f32 %v2735_v3, %v2907_v55 }
 0x338   :  { %v9886_v58 = vpack.i.bf16 %v12433_v10, %v12435_v61 }
 0x339   :  { %v2745_v51 = vmax.f32 %v2681_v38, 0.0  ;;  %v2746_v21 = vmax.f32 %v2682_v32, 0.0  ;;  %v12464_v52 = vpop.permute.xlu2 %9792  ;;  %v12508_v38 = vmax.f32 %v2737_v42, %v2906_v59 }
 0x33b   :  { %v2920_v54 = vrot.slane %v2745_v51, 1  ;;  %v2922_v37 = vrot.slane %v2746_v21, 1 }
 0x33d   :  { %v12466_v8 = vmax.f32 %v2746_v21, %v2922_v37  ;;  %v12468_v30 = vmax.f32 %v2745_v51, %v2920_v54  ;;  %v2923_v0 = vsel %vm1188_vm2, %v2918_v41, %v2922_v37  ;;  %v2921_v60 = vsel %vm1188_vm2, %v2916_v7, %v2920_v54 }
 0x33e   :  { %v12472_v31 = vmax.f32 %v2744_v26, %v2923_v0  ;;  %v12474_v14 = vmax.f32 %v2743_v2, %v2921_v60  ;;  %v9876_v2 = vpack.i.bf16 %v12459_v50, %v12455_v17  ;;  %v12491_v7 = vmax.f32 %v2738_v29, %v2908_v56 }
 0x33f   :  { %3242 = vrot.lane.b32.xlu0 %v12466_v8, %s10233_s1  ;;  %3240 = vrot.lane.b32.xlu2 %v12468_v30, %s10233_s1  ;;  %v9891_v29 = vpack.i.bf16 %v12462_v36, %v12386_v15  ;;  %v9789_v51 = vunpack.i.l.bf16 %v12447_v63  ;;  %v9896_v0 = vpack.i.bf16 %v12388_v11, %v12441_v53  ;;  %v9790_v60 = vunpack.i.h.bf16 %v12447_v63 }
 0x340   :  { %v9871_v55 = vpack.i.bf16 %v12452_v45, %v12472_v31  ;;  %v9881_v16 = vpack.i.bf16 %v12474_v14, %v12420_v34  ;;  %v9795_v63 = vunpack.i.h.bf16 %v12464_v52 }
 0x341   :  { %v3145_v26 = vpop.permute.xlu2 %3144 }
 0x342   :  { %9872 = vrot.lane.b32.xlu1 %v9871_v55, %s10233_s1 }
 0x344   :  { %v12483_v3 = vpop.permute.xlu0 %9782 }
 0x347   :  { %9882 = vrot.lane.b32.xlu0 %v9881_v16, %s10233_s1  ;;  %9877 = vrot.lane.b32.xlu2 %v9876_v2, %s10233_s1 }
 0x34a   :  { %3226 = vrot.lane.b32.xlu1 %v12491_v7, %s10233_s1  ;;  %v3129_v41 = vpop.permute.xlu1 %3128 }
 0x34c   :  { %v3131_v23 = vpop.permute.xlu0 %3130  ;;  %v12502_v56 = vpop.permute.xlu2 %9817 }
 0x34d   :  { %v3248_v9 = vsel %vm3244_vm5, %v3129_v41, %v3131_v23  ;;  %v3348_v57 = vmax.f32 %v11978_v39, %v3131_v23 }
 0x34e   :  { %v3347_v28 = vmax.f32 %v11976_v46, %v3248_v9 }
 0x34f   :  { %8964 = vmatpush.msk.msra.mxu1 %vm3414_vm6, %v3348_v57  ;;  %9760 = vmatpush.msk.msra.mxu2 %vm3414_vm6, %v3348_v57 }
 0x350   :  { %9887 = vrot.lane.b32.xlu0 %v9886_v58, %s10233_s1  ;;  %9892 = vrot.lane.b32.xlu2 %v9891_v29, %s10233_s1  ;;  %v12530_v29 = vld [vmem:[#allocation7 + $0x8] sm:$0x3f] }
 0x351   :  { %8961 = vmatpush.msk.msra.mxu0 %vm3414_vm6, %v3347_v28 }
 0x352   :  { %3224 = vrot.lane.b32.xlu1 %v12508_v38, %s10233_s1  ;;  %v9803_v46 = vpop.permute.xlu1 %9802 }
 0x353   :  { %v9804_v39 = vunpack.i.l.bf16 %v9803_v46  ;;  %v9805_v21 = vunpack.i.h.bf16 %v9803_v46 }
 0x354   :  { %v9798_v32 = vpop.permute.xlu0 %9797 }
 0x355   :  { %v9800_v54 = vunpack.i.h.bf16 %v9798_v32  ;;  %v9799_v37 = vunpack.i.l.bf16 %v9798_v32  ;;  %v3245_v23 = vsel %vm3244_vm5, %v9790_v60, %v9805_v21  ;;  %v3342_v28 = vmax.f32 %v11924_v49, %v9805_v21 }
 0x357   :  { %v3346_v42 = vmax.f32 %v12001_v33, %v9799_v37  ;;  %v3247_v55 = vsel %vm3244_vm5, %v9804_v39, %v9799_v37  ;;  %v3246_v16 = vsel %vm3244_vm5, %v9789_v51, %v9800_v54  ;;  %v3344_v41 = vmax.f32 %v11964_v12, %v9800_v54  ;;  %v12542_v54 = vld [vmem:[#allocation7] sm:$0xff] }
 0x358   :  { %v12518_v59 = vpop.permute.xlu2 %9832  ;;  %9897 = vrot.lane.b32.xlu0 %v9896_v0, %s10233_s1  ;;  %v3345_v2 = vmax.f32 %v11993_v18, %v3247_v55  ;;  %v9794_v33 = vunpack.i.l.bf16 %v12464_v52  ;;  %v3343_v57 = vmax.f32 %v11960_v6, %v3246_v16  ;;  %v9785_v12 = vunpack.i.h.bf16 %v12483_v3 }
 0x359   :  { %3457 = vmatpush.msra.mxu1 %v3346_v42  ;;  %9761 = vmatpush.msra.mxu2 %v3346_v42  ;;  %v3341_v39 = vmax.f32 %v11922_v13, %v3245_v23  ;;  %v9784_v52 = vunpack.i.l.bf16 %v12483_v3 }
 0x35a   :  { %3434 = vmatpush.msra.mxu0 %v3345_v2  ;;  %v9808_v9 = vpop.permute.xlu1 %9807  ;;  %v3350_v37 = vmax.f32 %v11946_v20, %v9785_v12 }
 0x35b   :  { %3458 = vmatpush.msra.mxu1 %v3344_v41  ;;  %9762 = vmatpush.msra.mxu2 %v3344_v41  ;;  %v9810_v58 = vunpack.i.h.bf16 %v9808_v9  ;;  %v9809_v18 = vunpack.i.l.bf16 %v9808_v9  ;;  %v3249_v3 = vsel %vm3244_vm5, %v9784_v52, %v9785_v12 }
 0x35c   :  { %v3147_v46 = vpop.permute.xlu0 %3146  ;;  %3435 = vmatpush.msra.mxu0 %v3343_v57  ;;  %v3349_v60 = vmax.f32 %v11944_v4, %v3249_v3  ;;  %v9835_v4 = vunpack.i.h.bf16 %v12518_v59  ;;  %v16149_v3 = vld [vmem:[#allocation71_spill] sm:$0xff] }
 0x35d   :  { %v3354_v32 = vmax.f32 %v12016_v19, %v9810_v58  ;;  %v3252_v6 = vsel %vm3244_vm5, %v3145_v26, %v3147_v46  ;;  %v3356_v49 = vmax.f32 %v12063_v48, %v3147_v46  ;;  %3459 = vmatpush.msra.mxu1 %v3342_v28  ;;  %9763 = vmatpush.msra.mxu2 %v3342_v28 }
 0x35e   :  { %v3355_v51 = vmax.f32 %v12032_v25, %v3252_v6  ;;  %3436 = vmatpush.msra.mxu0 %v3341_v39  ;;  %v3251_v21 = vsel %vm3244_vm5, %v9809_v18, %v9810_v58  ;;  %8966 = vmatmul.msk.f32.vlgmr.msra.gmra.mxu2 %vm3407_vm7, %v12530_v29  ;;  %v3250_v19 = vsel %vm3244_vm5, %v9794_v33, %v9795_v63  ;;  %v9820_v39 = vunpack.i.h.bf16 %v12502_v56 }
 0x35f   :  { %8970 = vmatpush.msk.msra.mxu3 %vm3414_vm6, %v3356_v49  ;;  %v3353_v13 = vmax.f32 %v12014_v1, %v3251_v21  ;;  %8962 = vmatmul.msk.f32.vlgmr.msra.gmra.mxu0 %vm3407_vm7, %v12542_v54  ;;  %v3352_v25 = vmax.f32 %v11986_v43, %v9795_v63  ;;  %v3351_v1 = vmax.f32 %v11984_v5, %v3250_v19  ;;  %v16146_v49 = vld [vmem:[#allocation70_spill] sm:$0xff]  ;;  %v16147_v21 = vld [vmem:[#allocation73_spill] sm:$0xff] }
 0x360   :  { %8967 = vmatpush.msk.msrb.mxu2 %vm3414_vm6, %v3355_v51  ;;  %8965 = vmatmul.msk.f32.vlgmr.msra.gmra.mxu1 %vm3407_vm7, %v12542_v54  ;;  %v3179_v48 = vpop.permute.xlu2 %3178  ;;  %v3362_v28 = vmax.f32 %v12142_v35, %v9835_v4 }
 0x361   :  { %3509 = vmatpush.msra.mxu3 %v3354_v32  ;;  %v3372_v0 = vmax.f32 %v12194_v24, %v3179_v48  ;;  %v9834_v24 = vunpack.i.l.bf16 %v12518_v59  ;;  %v16145_v32 = vld [vmem:[#allocation117_spill] sm:$0xff] }
 0x362   :  { %3486 = vmatpush.msrb.mxu2 %v3353_v13  ;;  %v9813_v26 = vpop.permute.xlu1 %9812 }
 0x363   :  { %3510 = vmatpush.msra.mxu3 %v3352_v25  ;;  %v3255_v2 = vsel %vm3244_vm5, %v9834_v24, %v9835_v4  ;;  %v9815_v41 = vunpack.i.h.bf16 %v9813_v26  ;;  %v9814_v23 = vunpack.i.l.bf16 %v9813_v26  ;;  %v16148_v25 = vld [vmem:[#allocation115_spill] sm:$0xff]  ;;  %v3366_v26 = vmax.f32 %v16149_v3, %v9820_v39 }
 0x364   :  { %3487 = vmatpush.msrb.mxu2 %v3351_v1  ;;  %v3361_v46 = vmax.f32 %v12138_v62, %v3255_v2 }
 0x365   :  { %3511 = vmatpush.msra.mxu3 %v3350_v37  ;;  %v3358_v51 = vmax.f32 %v16146_v49, %v9815_v41  ;;  %v9819_v37 = vunpack.i.l.bf16 %v12502_v56  ;;  %v16152_v56 = vld [vmem:[#allocation74_spill] sm:$0xff] }
 0x366   :  { %3488 = vmatpush.msrb.mxu2 %v3349_v60  ;;  %8971 = vmatmul.msk.f32.vlgmr.msra.gmra.mxu3 %vm3407_vm7, %v12542_v54 }
 0x367   :  { %8982 = vmatpush.msk.msrb.mxu3 %vm3414_vm6, %v3372_v0  ;;  %8968 = vmatmul.msk.f32.vlgmr.msrb.gmra.mxu2 %vm3407_vm7, %v12542_v54  ;;  %v16150_v0 = vld [vmem:[#allocation75_spill] sm:$0xff]  ;;  %v3257_v24 = vsel %vm3244_vm5, %v9819_v37, %v9820_v39 }
 0x368   :  { %v9823_v43 = vpop.permute.xlu0 %9822  ;;  %8963 = vmatmul.msk.f32.gmra.mxu0 %vm3407_vm7, %v12530_v29 }
 0x369   :  { %v9825_v42 = vunpack.i.h.bf16 %v9823_v43  ;;  %v9824_v55 = vunpack.i.l.bf16 %v9823_v43  ;;  %v16151_v43 = vld [vmem:[#allocation125_spill] sm:$0xff] }
 0x36b   :  { %v3254_v59 = vsel %vm3244_vm5, %v9824_v55, %v9825_v42 }
 0x36c   :  { %v9828_v20 = vpop.permute.xlu1 %9827  ;;  %v3359_v6 = vmax.f32 %v16145_v32, %v3254_v59 }
 0x36d   :  { %v9830_v18 = vunpack.i.h.bf16 %v9828_v20  ;;  %v9829_v19 = vunpack.i.l.bf16 %v9828_v20 }
 0x36e   :  { %8972 = vmatmul.msk.f32.gmra.mxu3 %vm3407_vm7, %v12530_v29 }
 0x36f   :  { %8969 = vmatmul.msk.f32.gmra.mxu2 %vm3407_vm7, %v12530_v29  ;;  %v3368_v13 = vmax.f32 %v16147_v21, %v9830_v18 }
 0x370   :  { %v3161_v5 = vpop.permute.xlu0 %3160 }
 0x374   :  { %v3163_v16 = vpop.permute.xlu1 %3162  ;;  %v12574_v9 = vpop.permute.xlu2 %9847 }
 0x375   :  { %v3256_v63 = vsel %vm3244_vm5, %v3161_v5, %v3163_v16  ;;  %v3364_v33 = vmax.f32 %v12176_v40, %v3163_v16  ;;  %v3360_v40 = vmax.f32 %v12108_v27, %v9825_v42  ;;  %v16153_v42 = vld [vmem:[#allocation72_spill] sm:$0xff] }
 0x376   :  { %v3363_v57 = vmax.f32 %v12149_v47, %v3256_v63  ;;  %v3253_v47 = vsel %vm3244_vm5, %v9814_v23, %v9815_v41  ;;  %v16154_v16 = vld [vmem:[#allocation116_spill] sm:$0xff] }
 0x377   :  { %8976 = vmatpush.msk.msrb.mxu1 %vm3414_vm6, %v3364_v33  ;;  %v3357_v27 = vmax.f32 %v16148_v25, %v3253_v47  ;;  %v3365_v2 = vmax.f32 %v16154_v16, %v3257_v24  ;;  %v16155_v33 = vld [vmem:[#allocation121_spill] sm:$0xff]  ;;  %v9849_v47 = vunpack.i.l.bf16 %v12574_v9 }
 0x378   :  { %v9838_v58 = vpop.permute.xlu0 %9837  ;;  %8973 = vmatpush.msk.msrb.mxu0 %vm3414_vm6, %v3363_v57 }
 0x379   :  { %v9840_v12 = vunpack.i.h.bf16 %v9838_v58  ;;  %3561 = vmatpush.msrb.mxu1 %v3362_v28  ;;  %v9839_v52 = vunpack.i.l.bf16 %v9838_v58 }
 0x37a   :  { %3538 = vmatpush.msrb.mxu0 %v3361_v46  ;;  %v16157_v46 = vld [vmem:[#allocation82_spill] sm:$0xff] }
 0x37b   :  { %v3370_v35 = vmax.f32 %v12168_v44, %v9840_v12  ;;  %3562 = vmatpush.msrb.mxu1 %v3360_v40  ;;  %v3259_v20 = vsel %vm3244_vm5, %v9839_v52, %v9840_v12  ;;  %v9850_v40 = vunpack.i.h.bf16 %v12574_v9  ;;  %v16160_v9 = vld [vmem:[#allocation122_spill] sm:$0xff] }
 0x37c   :  { %v3177_v62 = vpop.permute.xlu1 %3176  ;;  %3539 = vmatpush.msrb.mxu0 %v3359_v6  ;;  %v3369_v4 = vmax.f32 %v16152_v56, %v3259_v20  ;;  %v16163_v56 = vld [vmem:[#allocation123_spill] sm:$0xff] }
 0x37d   :  { %3613 = vmatpush.msrb.mxu3 %v3370_v35  ;;  %v3260_v1 = vsel %vm3244_vm5, %v3177_v62, %v3179_v48  ;;  %3563 = vmatpush.msrb.mxu1 %v3358_v51  ;;  %v3258_v48 = vsel %vm3244_vm5, %v9829_v19, %v9830_v18  ;;  %v16156_v18 = vld [vmem:[#allocation80_spill] sm:$0xff]  ;;  %v16158_v51 = vld [vmem:[#allocation81_spill] sm:$0xff]  ;;  %v3266_v19 = vsel %vm3244_vm5, %v9849_v47, %v9850_v40 }
 0x37e   :  { %v3195_v44 = vpop.permute.xlu2 %3194  ;;  %v3371_v60 = vmax.f32 %v16150_v0, %v3260_v1  ;;  %3540 = vmatpush.msrb.mxu0 %v3357_v27  ;;  %8977 = vmatmul.msk.f32.vlgmr.msrb.gmra.mxu1 %vm3407_vm7, %v12542_v54  ;;  %v3367_v55 = vmax.f32 %v16153_v42, %v3258_v48  ;;  %v16159_v27 = vld [vmem:[#allocation124_spill] sm:$0xff] }
 0x37f   :  { %v3380_v5 = vmax.f32 %v16151_v43, %v3195_v44  ;;  %3614 = vmatpush.msrb.mxu3 %v3368_v13  ;;  %8974 = vmatmul.msk.f32.vlgmr.msrb.gmra.mxu0 %vm3407_vm7, %v12542_v54  ;;  %v16161_v0 = vld [vmem:[#allocation76_spill] sm:$0xff]  ;;  %v16162_v43 = vld [vmem:[#allocation78_spill] sm:$0xff] }
 0x380   :  { %8979 = vmatpush.msk.msra.mxu2 %vm3414_vm6, %v3371_v60 }
 0x381   :  { %3615 = vmatpush.msrb.mxu3 %v3366_v26  ;;  %8988 = vmatpush.msk.msra.mxu1 %vm3414_vm6, %v3380_v5  ;;  %v3384_v26 = vmax.f32 %v16160_v9, %v9850_v40  ;;  %v3383_v5 = vmax.f32 %v16162_v43, %v3266_v19 }
 0x382   :  { %8983 = vmatmul.msk.f32.vlgmr.msrb.gmra.mxu3 %vm3407_vm7, %v12542_v54  ;;  %3590 = vmatpush.msra.mxu2 %v3369_v4 }
 0x384   :  { %3591 = vmatpush.msra.mxu2 %v3367_v55  ;;  %v9843_v41 = vpop.permute.xlu0 %9842  ;;  %v16164_v55 = vld [vmem:[#allocation119_spill] sm:$0xff] }
 0x385   :  { %v9845_v52 = vunpack.i.h.bf16 %v9843_v41  ;;  %v9844_v32 = vunpack.i.l.bf16 %v9843_v41 }
 0x386   :  { %3592 = vmatpush.msra.mxu2 %v3365_v2  ;;  %8978 = vmatmul.msk.f32.gmra.mxu1 %vm3407_vm7, %v12530_v29  ;;  %v3209_v28 = vpop.permute.xlu2 %3208  ;;  %v16165_v2 = vld [vmem:[#allocation79_spill] sm:$0xff] }
 0x387   :  { %8980 = vmatmul.msk.f32.vlgmr.msra.gmra.mxu2 %vm3407_vm7, %v12542_v54  ;;  %8975 = vmatmul.msk.f32.gmra.mxu0 %vm3407_vm7, %v12530_v29  ;;  %v3265_v37 = vsel %vm3244_vm5, %v9844_v32, %v9845_v52  ;;  %v3382_v60 = vmax.f32 %v16161_v0, %v9845_v52 }
 0x388   :  { %v3381_v16 = vmax.f32 %v16164_v55, %v3265_v37  ;;  %v12716_v55 = vld [vmem:[%s15683_s6 + $0x98] sm:$0xff] }
 0x38a   :  { %8984 = vmatmul.msk.f32.gmra.mxu3 %vm3407_vm7, %v12530_v29  ;;  %v3193_v23 = vpop.permute.xlu1 %3192 }
 0x38b   :  { %v3264_v63 = vsel %vm3244_vm5, %v3193_v23, %v3195_v44 }
 0x38c   :  { %v3379_v57 = vmax.f32 %v16155_v33, %v3264_v63  ;;  %v16166_v33 = vld [vmem:[#allocation77_spill] sm:$0xff] }
 0x38e   :  { %8985 = vmatpush.msk.msra.mxu0 %vm3414_vm6, %v3379_v57  ;;  %v9868_v62 = vpop.permute.xlu2 %9867 }
 0x38f   :  { %8981 = vmatmul.msk.f32.gmra.mxu2 %vm3407_vm7, %v12530_v29  ;;  %v9870_v20 = vunpack.i.h.bf16 %v9868_v62  ;;  %v9869_v48 = vunpack.i.l.bf16 %v9868_v62 }
 0x391   :  { %v3211_v58 = vpop.permute.xlu0 %3210 }
 0x392   :  { %v3268_v59 = vsel %vm3244_vm5, %v3209_v28, %v3211_v58  ;;  %v3388_v12 = vmax.f32 %v16156_v18, %v3211_v58  ;;  %v3261_v58 = vsel %vm3244_vm5, %v9869_v48, %v9870_v20 }
 0x393   :  { %v3387_v39 = vmax.f32 %v16157_v46, %v3268_v59  ;;  %v16167_v59 = vld [vmem:[#allocation120_spill] sm:$0xff]  ;;  %v16168_v46 = vld [vmem:[#allocation118_spill] sm:$0xff] }
 0x394   :  { %8994 = vmatpush.msk.msra.mxu3 %vm3414_vm6, %v3388_v12  ;;  %v3374_v12 = vmax.f32 %v12213_v22, %v9870_v20 }
 0x395   :  { %v9858_v35 = vpop.permute.xlu1 %9857  ;;  %8991 = vmatpush.msk.msrb.mxu2 %vm3414_vm6, %v3387_v39  ;;  %v3373_v39 = vmax.f32 %v16168_v46, %v3261_v58  ;;  %v12781_v58 = vld [vmem:[%s15683_s6 + $0x48] sm:$0xff] }
 0x396   :  { %v9860_v6 = vunpack.i.h.bf16 %v9858_v35  ;;  %v9859_v49 = vunpack.i.l.bf16 %v9858_v35 }
 0x398   :  { %v3386_v21 = vmax.f32 %v16158_v51, %v9860_v6  ;;  %v3267_v13 = vsel %vm3244_vm5, %v9859_v49, %v9860_v6 }
 0x399   :  { %v9853_v25 = vpop.permute.xlu0 %9852  ;;  %v3385_v3 = vmax.f32 %v16159_v27, %v3267_v13  ;;  %v3241_v40 = vpop.permute.xlu2 %3240 }
 0x39a   :  { %v9855_v1 = vunpack.i.h.bf16 %v9853_v25  ;;  %v9854_v44 = vunpack.i.l.bf16 %v9853_v25  ;;  %3717 = vmatpush.msra.mxu3 %v3386_v21 }
 0x39b   :  { %3694 = vmatpush.msrb.mxu2 %v3385_v3 }
 0x39c   :  { %v3378_v4 = vmax.f32 %v16163_v56, %v9855_v1  ;;  %3718 = vmatpush.msra.mxu3 %v3384_v26  ;;  %v3263_v24 = vsel %vm3244_vm5, %v9854_v44, %v9855_v1 }
 0x39d   :  { %v9863_v42 = vpop.permute.xlu1 %9862  ;;  %3695 = vmatpush.msrb.mxu2 %v3383_v5  ;;  %v3377_v41 = vmax.f32 %v16165_v2, %v3263_v24 }
 0x39e   :  { %v9865_v23 = vunpack.i.h.bf16 %v9863_v42  ;;  %v9864_v63 = vunpack.i.l.bf16 %v9863_v42  ;;  %3719 = vmatpush.msra.mxu3 %v3382_v60  ;;  %3665 = vmatpush.msra.mxu1 %v3378_v4  ;;  %v12709_v42 = vld [vmem:[%s15683_s6 + $0x70] sm:$0xff] }
 0x39f   :  { %3696 = vmatpush.msrb.mxu2 %v3381_v16  ;;  %3642 = vmatpush.msra.mxu0 %v3377_v41 }
 0x3a0   :  { %v3376_v57 = vmax.f32 %v16166_v33, %v9865_v23  ;;  %8992 = vmatmul.msk.f32.vlgmr.msrb.gmra.mxu2 %vm3407_vm7, %v12542_v54  ;;  %v3262_v28 = vsel %vm3244_vm5, %v9864_v63, %v9865_v23  ;;  %8995 = vmatmul.msk.f32.vlgmr.msra.gmra.mxu3 %vm3407_vm7, %v12542_v54  ;;  %v12727_v23 = vld [vmem:[%s15683_s6 + $0x68] sm:$0xff]  ;;  %v12733_v63 = vld [vmem:[%s15683_s6 + $0x90] sm:$0xff] }
 0x3a1   :  { %v3375_v18 = vmax.f32 %v16167_v59, %v3262_v28  ;;  %v9878_v32 = vpop.permute.xlu2 %9877  ;;  %v12767_v28 = vld [vmem:[%s15683_s6 + $0x80] sm:$0xff] }
 0x3a2   :  { %3666 = vmatpush.msra.mxu1 %v3376_v57  ;;  %v9879_v62 = vunpack.i.l.bf16 %v9878_v32  ;;  %v12751_v57 = vld [vmem:[%s15683_s6 + $0x88] sm:$0xff]  ;;  %v12790_v59 = vld [vmem:[%s15683_s6 + $0x40] sm:$0xff] }
 0x3a3   :  { %3643 = vmatpush.msra.mxu0 %v3375_v18  ;;  %v12802_v18 = vld [vmem:[%s15683_s6 + $0x38] sm:$0xff] }
 0x3a4   :  { %3667 = vmatpush.msra.mxu1 %v3374_v12  ;;  %v12810_v12 = vld [vmem:[%s15683_s6 + $0x30] sm:$0xff] }
 0x3a5   :  { %3644 = vmatpush.msra.mxu0 %v3373_v39  ;;  %8989 = vmatmul.msk.f32.vlgmr.msra.gmra.mxu1 %vm3407_vm7, %v12542_v54  ;;  %v12828_v39 = vld [vmem:[%s15683_s6 + $0x20] sm:$0xff] }
 0x3a6   :  { %8986 = vmatmul.msk.f32.vlgmr.msra.gmra.mxu0 %vm3407_vm7, %v12542_v54 }
 0x3a8   :  { %8993 = vmatmul.msk.f32.gmra.mxu2 %vm3407_vm7, %v12530_v29  ;;  %8996 = vmatmul.msk.f32.gmra.mxu3 %vm3407_vm7, %v12530_v29 }
 0x3aa   :  { %v9893_v44 = vpop.permute.xlu2 %9892 }
 0x3ab   :  { %v9894_v60 = vunpack.i.l.bf16 %v9893_v44 }
 0x3ad   :  { %8990 = vmatmul.msk.f32.gmra.mxu1 %vm3407_vm7, %v12530_v29  ;;  %v3390_v4 = vmax.f32 %v12386_v15, %v9894_v60  ;;  %v12701_v15 = vld [vmem:[%s15683_s6 + $0xa0] sm:$0x7f] }
 0x3ae   :  { %8987 = vmatmul.msk.f32.gmra.mxu0 %vm3407_vm7, %v12530_v29 }
 0x3b1   :  { %v3243_v22 = vpop.permute.xlu0 %3242 }
 0x3b2   :  { %v3276_v47 = vsel %vm3244_vm5, %v3241_v40, %v3243_v22  ;;  %v3404_v35 = vmax.f32 %v12466_v8, %v3243_v22  ;;  %v9880_v8 = vunpack.i.h.bf16 %v9878_v32  ;;  %v12837_v22 = vld [vmem:[%s15683_s6 + $0x18] sm:$0xff]  ;;  %v12862_v32 = vld [vmem:[%s15683_s6] sm:$0xff] }
 0x3b3   :  { %v3403_v52 = vmax.f32 %v12468_v30, %v3276_v47  ;;  %v12846_v47 = vld [vmem:[%s15683_s6 + $0x10] sm:$0xff] }
 0x3b4   :  { %v9873_v6 = vpop.permute.xlu1 %9872  ;;  %9006 = vmatpush.msk.msrb.mxu3 %vm3414_vm6, %v3404_v35  ;;  %v12854_v35 = vld [vmem:[%s15683_s6 + $0x8] sm:$0xff] }
 0x3b5   :  { %v9875_v49 = vunpack.i.h.bf16 %v9873_v6  ;;  %v9874_v51 = vunpack.i.l.bf16 %v9873_v6  ;;  %9003 = vmatpush.msk.msra.mxu2 %vm3414_vm6, %v3403_v52 }
 0x3b7   :  { %v3402_v21 = vmax.f32 %v12472_v31, %v9874_v51  ;;  %v3400_v13 = vmax.f32 %v12452_v45, %v9875_v49  ;;  %v3274_v26 = vsel %vm3244_vm5, %v9879_v62, %v9875_v49  ;;  %v3394_v45 = vmax.f32 %v12459_v50, %v9880_v8 }
 0x3b8   :  { %v3399_v37 = vmax.f32 %v12455_v17, %v3274_v26 }
 0x3b9   :  { %v9883_v19 = vpop.permute.xlu0 %9882  ;;  %3821 = vmatpush.msrb.mxu3 %v3402_v21 }
 0x3ba   :  { %v9885_v25 = vunpack.i.h.bf16 %v9883_v19  ;;  %v9884_v27 = vunpack.i.l.bf16 %v9883_v19 }
 0x3bb   :  { %3822 = vmatpush.msrb.mxu3 %v3400_v13 }
 0x3bc   :  { %v3398_v30 = vmax.f32 %v12420_v34, %v9884_v27  ;;  %v3227_v3 = vpop.permute.xlu1 %3226  ;;  %v3275_v9 = vsel %vm3244_vm5, %v9885_v25, %v9874_v51  ;;  %v9895_v34 = vunpack.i.h.bf16 %v9893_v44 }
 0x3bd   :  { %v3396_v1 = vmax.f32 %v12491_v7, %v3227_v3  ;;  %v3401_v31 = vmax.f32 %v12474_v14, %v3275_v9 }
 0x3be   :  { %3823 = vmatpush.msrb.mxu3 %v3398_v30  ;;  %v3271_v48 = vsel %vm3244_vm5, %v9895_v34, %v9880_v8 }
 0x3bf   :  { %9000 = vmatpush.msk.msrb.mxu1 %vm3414_vm6, %v3396_v1  ;;  %3798 = vmatpush.msra.mxu2 %v3401_v31  ;;  %v3393_v24 = vmax.f32 %v12462_v36, %v3271_v48  ;;  %v9070_v48 = vld [vmem:[%s15680_s3 + $0x88] sm:$0xf] }
 0x3c0   :  { %9007 = vmatmul.msk.f32.vlgmr.msrb.gmra.mxu3 %vm3407_vm7, %v12542_v54 }
 0x3c1   :  { %3769 = vmatpush.msrb.mxu1 %v3394_v45  ;;  %3799 = vmatpush.msra.mxu2 %v3399_v37 }
 0x3c2   :  { %v9888_v0 = vpop.permute.xlu0 %9887  ;;  %9012 = vmatpush.msk.msra.mxu3 %vm1188_vm2, %v12701_v15 }
 0x3c3   :  { %v9890_v7 = vunpack.i.h.bf16 %v9888_v0  ;;  %v9889_v43 = vunpack.i.l.bf16 %v9888_v0 }
 0x3c4   :  { %v3225_v14 = vpop.permute.xlu1 %3224  ;;  %3949 = vmatpush.msra.mxu3 %v12716_v55 }
 0x3c5   :  { %v3392_v5 = vmax.f32 %v12433_v10, %v9890_v7  ;;  %v3272_v50 = vsel %vm3244_vm5, %v3225_v14, %v3227_v3  ;;  %v3273_v20 = vsel %vm3244_vm5, %v9889_v43, %v9884_v27  ;;  %v9078_v14 = vld [vmem:[%s15680_s3 + $0x98] sm:$0xf] }
 0x3c6   :  { %v3395_v17 = vmax.f32 %v12508_v38, %v3272_v50  ;;  %v3397_v56 = vmax.f32 %v12435_v61, %v3273_v20  ;;  %v12696_v61 = vld [vmem:[%s15683_s6 + $0x78] sm:$0xff]  ;;  %3950 = vmatpush.msra.mxu3 %v12733_v63 }
 0x3c7   :  { %3770 = vmatpush.msrb.mxu1 %v3392_v5  ;;  %v9688_v5 = vld [vmem:[%s15680_s3 + $0x9c] sm:$0xf0] }
 0x3c8   :  { %3800 = vmatpush.msra.mxu2 %v3397_v56  ;;  %8997 = vmatpush.msk.msrb.mxu0 %vm3414_vm6, %v3395_v17  ;;  %v13013_v20 = vor.u32 %v9688_v5, %v9078_v14  ;;  %v9686_v17 = vld [vmem:[%s15680_s3 + $0x8c] sm:$0xf0] }
 0x3c9   :  { %3771 = vmatpush.msrb.mxu1 %v3390_v4  ;;  %9004 = vmatmul.msk.f32.vlgmr.msra.gmra.mxu2 %vm3407_vm7, %v12542_v54  ;;  %v13024_v4 = vor.u32 %v9686_v17, %v9070_v48 }
 0x3ca   :  { %v9898_v10 = vpop.permute.xlu0 %9897  ;;  %3746 = vmatpush.msrb.mxu0 %v3393_v24  ;;  %9008 = vmatmul.msk.f32.gmra.mxu3 %vm3407_vm7, %v12530_v29 }
 0x3cb   :  { %v9900_v36 = vunpack.i.h.bf16 %v9898_v10  ;;  %v9899_v38 = vunpack.i.l.bf16 %v9898_v10  ;;  %9001 = vmatmul.msk.f32.vlgmr.msrb.gmra.mxu1 %vm3407_vm7, %v12542_v54  ;;  %3914 = vmatpush.msrb.mxu2 %v12696_v61 }
 0x3cc   :  { %9009 = vmatpush.msk.msra.mxu1 %vm1188_vm2, %v12701_v15  ;;  %3951 = vmatpush.msra.mxu3 %v12751_v57 }
 0x3cd   :  { %v3270_v16 = vsel %vm3244_vm5, %v9899_v38, %v9890_v7  ;;  %v3269_v2 = vsel %vm3244_vm5, %v9900_v36, %v9894_v60  ;;  %3915 = vmatpush.msrb.mxu2 %v12709_v42  ;;  %v9043_v60 = vld [vmem:[%s15680_s3 + $0xa8] sm:$0x33]  ;;  %v9062_v36 = vld [vmem:[%s15680_s3 + $0x78] sm:$0xf]  ;;  %v9684_v38 = vld [vmem:[%s15680_s3 + $0x7c] sm:$0xf0] }
 0x3ce   :  { %v3391_v41 = vmax.f32 %v12441_v53, %v3270_v16  ;;  %3897 = vmatpush.msra.mxu1 %v12716_v55  ;;  %v3389_v33 = vmax.f32 %v12388_v11, %v3269_v2  ;;  %v12744_v53 = vld [vmem:[%s15683_s6 + $0x60] sm:$0xff]  ;;  %v12760_v11 = vld [vmem:[%s15683_s6 + $0x58] sm:$0xff]  ;;  %3952 = vmatpush.msra.mxu3 %v12767_v28  ;;  %v4354_v7 = vunpack.c.l.b16 %v9043_v60 }
 0x3cf   :  { %3916 = vmatpush.msrb.mxu2 %v12727_v23 }
 0x3d0   :  { %3747 = vmatpush.msrb.mxu0 %v3391_v41  ;;  %3898 = vmatpush.msra.mxu1 %v12733_v63  ;;  %v4366_v43 = vpack.c.b16 %v4354_v7, %v4354_v7 }
 0x3d1   :  { %9005 = vmatmul.msk.f32.gmra.mxu2 %vm3407_vm7, %v12530_v29  ;;  %9015 = vmatpush.msk.msrb.mxu3 %vm1188_vm2, %v12701_v15 }
 0x3d2   :  { %3748 = vmatpush.msrb.mxu0 %v3389_v33  ;;  %3917 = vmatpush.msrb.mxu2 %v12744_v53  ;;  %v13010_v50 = vsel %vm4382_vm9, %v4366_v43, 0  ;;  %v9687_v33 = vld [vmem:[%s15680_s3 + $0x9c] sm:$0xf] }
 0x3d3   :  { %8998 = vmatmul.msk.f32.vlgmr.msrb.gmra.mxu0 %vm3407_vm7, %v12542_v54  ;;  %9002 = vmatmul.msk.f32.gmra.mxu1 %vm3407_vm7, %v12530_v29  ;;  %v12772_v54 = vld [vmem:[%s15683_s6 + $0x50] sm:$0xff] }
 0x3d4   :  { %3862 = vmatpush.msra.mxu0 %v12696_v61  ;;  %3918 = vmatpush.msrb.mxu2 %v12760_v11 }
 0x3d5   :  { %3899 = vmatpush.msra.mxu1 %v12751_v57  ;;  %4001 = vmatpush.msrb.mxu3 %v12716_v55 }
 0x3d6   :  { %3863 = vmatpush.msra.mxu0 %v12709_v42  ;;  %3919 = vmatpush.msrb.mxu2 %v12772_v54 }
 0x3d7   :  { %3900 = vmatpush.msra.mxu1 %v12767_v28  ;;  %4002 = vmatpush.msrb.mxu3 %v12733_v63 }
 0x3d8   :  { %3864 = vmatpush.msra.mxu0 %v12727_v23  ;;  %3920 = vmatpush.msrb.mxu2 %v12781_v58 }
 0x3d9   :  { %3966 = vmatpush.msrb.mxu1 %v12696_v61  ;;  %4003 = vmatpush.msrb.mxu3 %v12751_v57 }
 0x3da   :  { %3865 = vmatpush.msra.mxu0 %v12744_v53  ;;  %3921 = vmatpush.msrb.mxu2 %v12790_v59 }
 0x3db   :  { %8999 = vmatmul.msk.f32.gmra.mxu0 %vm3407_vm7, %v12530_v29  ;;  %3967 = vmatpush.msrb.mxu1 %v12709_v42  ;;  %v12819_v29 = vld [vmem:[%s15683_s6 + $0x28] sm:$0xff] }
 0x3dc   :  { %3866 = vmatpush.msra.mxu0 %v12760_v11  ;;  %3922 = vmatpush.msrb.mxu2 %v12802_v18  ;;  %v3438_v52 = vpop.f32.mrf.mxu0 }
 0x3dd   :  { %v3461_v46 = vpop.f32.mrf.mxu1  ;;  %3968 = vmatpush.msrb.mxu1 %v12727_v23  ;;  %4004 = vmatpush.msrb.mxu3 %v12767_v28 }
 0x3de   :  { %3867 = vmatpush.msra.mxu0 %v12772_v54  ;;  %3923 = vmatpush.msrb.mxu2 %v12810_v12 }
 0x3df   :  { %9010 = vmatmul.msk.f32.vlgmr.msra.gmra.mxu1 %vm3852_vm8, %v3461_v46 }
 0x3e0   :  { %3868 = vmatpush.msra.mxu0 %v12781_v58  ;;  %3924 = vmatpush.msrb.mxu2 %v12819_v29 }
 0x3e1   :  { %v3464_v40 = vpop.f32.mrf.mxu2  ;;  %3969 = vmatpush.msrb.mxu1 %v12744_v53 }
 0x3e2   :  { %3869 = vmatpush.msra.mxu0 %v12790_v59  ;;  %3925 = vmatpush.msrb.mxu2 %v12828_v39 }
 0x3e3   :  { %3970 = vmatpush.msrb.mxu1 %v12760_v11 }
 0x3e4   :  { %3870 = vmatpush.msra.mxu0 %v12802_v18  ;;  %3926 = vmatpush.msrb.mxu2 %v12837_v22 }
 0x3e5   :  { %3971 = vmatpush.msrb.mxu1 %v12772_v54  ;;  %v3441_v13 = vpop.f32.mrf.mxu0 }
 0x3e6   :  { %3871 = vmatpush.msra.mxu0 %v12810_v12  ;;  %3927 = vmatpush.msrb.mxu2 %v12846_v47 }
 0x3e7   :  { %9011 = vmatmul.msk.f32.gmra.mxu1 %vm3852_vm8, %v3464_v40  ;;  %v9064_v40 = vld [vmem:[%s15680_s3 + $0x80] sm:$0xf0] }
 0x3e8   :  { %3872 = vmatpush.msra.mxu0 %v12819_v29  ;;  %3928 = vmatpush.msrb.mxu2 %v12854_v35 }
 0x3e9   :  { %3972 = vmatpush.msrb.mxu1 %v12781_v58  ;;  %v3513_v49 = vpop.f32.mrf.mxu3 }
 0x3ea   :  { %3873 = vmatpush.msra.mxu0 %v12828_v39  ;;  %v3490_v6 = vpop.f32.mrf.mxu2  ;;  %3929 = vmatpush.msrb.mxu2 %v12862_v32 }
 0x3eb   :  { %3930 = vmatmul.f32.vlgmr.msrb.gmra.mxu2 %v3490_v6  ;;  %9013 = vmatmul.msk.f32.vlgmr.msra.gmra.mxu3 %vm3852_vm8, %v3513_v49  ;;  %v9048_v6 = vld [vmem:[%s15680_s3 + $0x60] sm:$0xf0] }
 0x3ec   :  { %3874 = vmatpush.msra.mxu0 %v12837_v22  ;;  %9018 = vmatpush.msk.msra.mxu2 %vm1188_vm2, %v12701_v15 }
 0x3ed   :  { %3973 = vmatpush.msrb.mxu1 %v12790_v59  ;;  %4070 = vmatpush.msra.mxu3 %v12696_v61 }
 0x3ee   :  { %3875 = vmatpush.msra.mxu0 %v12846_v47  ;;  %4053 = vmatpush.msra.mxu2 %v12716_v55 }
 0x3ef   :  { %3974 = vmatpush.msrb.mxu1 %v12802_v18  ;;  %4071 = vmatpush.msra.mxu3 %v12709_v42 }
 0x3f0   :  { %3876 = vmatpush.msra.mxu0 %v12854_v35  ;;  %4054 = vmatpush.msra.mxu2 %v12733_v63 }
 0x3f1   :  { %3975 = vmatpush.msrb.mxu1 %v12810_v12  ;;  %4072 = vmatpush.msra.mxu3 %v12727_v23  ;;  %v3516_v21 = vpop.f32.mrf.mxu3 }
 0x3f2   :  { %3877 = vmatpush.msra.mxu0 %v12862_v32  ;;  %v3493_v51 = vpop.f32.mrf.mxu2  ;;  %4055 = vmatpush.msra.mxu2 %v12751_v57 }
 0x3f3   :  { %3878 = vmatmul.f32.vlgmr.msra.gmra.mxu0 %v3438_v52  ;;  %3933 = vmatmul.f32.gmra.mxu2 %v3493_v51 }
 0x3f4   :  { %4018 = vmatpush.msrb.mxu0 %v12696_v61  ;;  %9014 = vmatmul.msk.f32.gmra.mxu3 %vm3852_vm8, %v3516_v21 }
 0x3f5   :  { %4056 = vmatpush.msra.mxu2 %v12767_v28  ;;  %3976 = vmatpush.msrb.mxu1 %v12819_v29 }
 0x3f6   :  { %4019 = vmatpush.msrb.mxu0 %v12709_v42  ;;  %4073 = vmatpush.msra.mxu3 %v12744_v53 }
 0x3f7   :  { %4122 = vmatpush.msrb.mxu2 %v12696_v61  ;;  %3977 = vmatpush.msrb.mxu1 %v12828_v39 }
 0x3f8   :  { %4020 = vmatpush.msrb.mxu0 %v12727_v23  ;;  %4074 = vmatpush.msra.mxu3 %v12760_v11 }
 0x3f9   :  { %4123 = vmatpush.msrb.mxu2 %v12709_v42  ;;  %3978 = vmatpush.msrb.mxu1 %v12837_v22 }
 0x3fa   :  { %4021 = vmatpush.msrb.mxu0 %v12744_v53  ;;  %4075 = vmatpush.msra.mxu3 %v12772_v54 }
 0x3fb   :  { %4124 = vmatpush.msrb.mxu2 %v12727_v23  ;;  %3881 = vmatmul.f32.gmra.mxu0 %v3441_v13  ;;  %v3565_v19 = vpop.f32.mrf.mxu1 }
 0x3fc   :  { %3979 = vmatpush.msrb.mxu1 %v12846_v47  ;;  %4022 = vmatpush.msrb.mxu0 %v12760_v11  ;;  %v3542_v62 = vpop.f32.mrf.mxu0 }
 0x3fd   :  { %4125 = vmatpush.msrb.mxu2 %v12744_v53  ;;  %9016 = vmatmul.msk.f32.vlgmr.msrb.gmra.mxu3 %vm3852_vm8, %v3565_v19 }
 0x3fe   :  { %3980 = vmatpush.msrb.mxu1 %v12854_v35  ;;  %4023 = vmatpush.msrb.mxu0 %v12772_v54 }
 0x3ff   :  { %4126 = vmatpush.msrb.mxu2 %v12760_v11  ;;  %4076 = vmatpush.msra.mxu3 %v12781_v58 }
 0x400   :  { %3981 = vmatpush.msrb.mxu1 %v12862_v32  ;;  %4024 = vmatpush.msrb.mxu0 %v12781_v58 }
 0x401   :  { %4127 = vmatpush.msrb.mxu2 %v12772_v54  ;;  %3982 = vmatmul.f32.vlgmr.msrb.gmra.mxu1 %v3542_v62 }
 0x402   :  { %4025 = vmatpush.msrb.mxu0 %v12790_v59  ;;  %4077 = vmatpush.msra.mxu3 %v12790_v59 }
 0x403   :  { %4128 = vmatpush.msrb.mxu2 %v12781_v58  ;;  %9021 = vmatpush.msk.msra.mxu1 %vm1188_vm2, %v12701_v15  ;;  %v3568_v27 = vpop.f32.mrf.mxu1 }
 0x404   :  { %4026 = vmatpush.msrb.mxu0 %v12802_v18  ;;  %4078 = vmatpush.msra.mxu3 %v12802_v18  ;;  %v3545_v8 = vpop.f32.mrf.mxu0 }
 0x405   :  { %v3617_v25 = vpop.f32.mrf.mxu3  ;;  %4129 = vmatpush.msrb.mxu2 %v12790_v59  ;;  %9017 = vmatmul.msk.f32.gmra.mxu3 %vm3852_vm8, %v3568_v27 }
 0x406   :  { %9019 = vmatmul.msk.f32.vlgmr.msra.gmra.mxu2 %vm3852_vm8, %v3617_v25  ;;  %4027 = vmatpush.msrb.mxu0 %v12810_v12 }
 0x407   :  { %4130 = vmatpush.msrb.mxu2 %v12802_v18  ;;  %4105 = vmatpush.msra.mxu1 %v12716_v55 }
 0x408   :  { %4028 = vmatpush.msrb.mxu0 %v12819_v29  ;;  %4079 = vmatpush.msra.mxu3 %v12810_v12 }
 0x409   :  { %4131 = vmatpush.msrb.mxu2 %v12810_v12  ;;  %3985 = vmatmul.f32.gmra.mxu1 %v3545_v8 }
 0x40a   :  { %4029 = vmatpush.msrb.mxu0 %v12828_v39  ;;  %4080 = vmatpush.msra.mxu3 %v12819_v29  ;;  %v3594_v3 = vpop.f32.mrf.mxu2 }
 0x40b   :  { %4132 = vmatpush.msrb.mxu2 %v12819_v29  ;;  %4106 = vmatpush.msra.mxu1 %v12733_v63 }
 0x40c   :  { %4030 = vmatpush.msrb.mxu0 %v12837_v22  ;;  %4081 = vmatpush.msra.mxu3 %v12828_v39 }
 0x40d   :  { %v3620_v30 = vpop.f32.mrf.mxu3  ;;  %4107 = vmatpush.msra.mxu1 %v12751_v57  ;;  %4133 = vmatpush.msrb.mxu2 %v12828_v39 }
 0x40e   :  { %9020 = vmatmul.msk.f32.gmra.mxu2 %vm3852_vm8, %v3620_v30  ;;  %4031 = vmatpush.msrb.mxu0 %v12846_v47 }
 0x40f   :  { %4082 = vmatpush.msra.mxu3 %v12837_v22  ;;  %4108 = vmatpush.msra.mxu1 %v12767_v28 }
 0x410   :  { %4032 = vmatpush.msrb.mxu0 %v12854_v35  ;;  %4134 = vmatpush.msrb.mxu2 %v12837_v22 }
 0x411   :  { %4083 = vmatpush.msra.mxu3 %v12846_v47  ;;  %4174 = vmatpush.msrb.mxu1 %v12696_v61 }
 0x412   :  { %4033 = vmatpush.msrb.mxu0 %v12862_v32  ;;  %4135 = vmatpush.msrb.mxu2 %v12846_v47  ;;  %v3597_v9 = vpop.f32.mrf.mxu2 }
 0x413   :  { %4034 = vmatmul.f32.vlgmr.msrb.gmra.mxu0 %v3594_v3  ;;  %4084 = vmatpush.msra.mxu3 %v12854_v35 }
 0x414   :  { %4136 = vmatpush.msrb.mxu2 %v12854_v35  ;;  %9024 = vmatpush.msk.msra.mxu0 %vm1188_vm2, %v12701_v15 }
 0x415   :  { %4085 = vmatpush.msra.mxu3 %v12862_v32  ;;  %4175 = vmatpush.msrb.mxu1 %v12709_v42 }
 0x416   :  { %4137 = vmatpush.msrb.mxu2 %v12862_v32  ;;  %4157 = vmatpush.msra.mxu0 %v12716_v55 }
 0x417   :  { %4176 = vmatpush.msrb.mxu1 %v12727_v23  ;;  %9027 = vmatpush.msk.msrb.mxu3 %vm1188_vm2, %v12701_v15 }
 0x418   :  { %9030 = vmatpush.msk.msra.mxu2 %vm1188_vm2, %v12701_v15  ;;  %4158 = vmatpush.msra.mxu0 %v12733_v63 }
 0x419   :  { %4177 = vmatpush.msrb.mxu1 %v12744_v53  ;;  %4209 = vmatpush.msrb.mxu3 %v12716_v55 }
 0x41a   :  { %4261 = vmatpush.msra.mxu2 %v12716_v55  ;;  %4159 = vmatpush.msra.mxu0 %v12751_v57  ;;  %v13040_v55 = vor.u32 %v9684_v38, %v9062_v36 }
 0x41b   :  { %4037 = vmatmul.f32.gmra.mxu0 %v3597_v9  ;;  %4178 = vmatpush.msrb.mxu1 %v12760_v11 }
 0x41c   :  { %4160 = vmatpush.msra.mxu0 %v12767_v28  ;;  %4262 = vmatpush.msra.mxu2 %v12733_v63 }
 0x41d   :  { %4179 = vmatpush.msrb.mxu1 %v12772_v54  ;;  %4210 = vmatpush.msrb.mxu3 %v12733_v63  ;;  %v9682_v63 = vld [vmem:[%s15680_s3 + $0x6c] sm:$0xf0] }
 0x41e   :  { %4226 = vmatpush.msrb.mxu0 %v12696_v61  ;;  %4263 = vmatpush.msra.mxu2 %v12751_v57  ;;  %v4355_v61 = vunpack.c.h.b16 %v9043_v60 }
 0x41f   :  { %4180 = vmatpush.msrb.mxu1 %v12781_v58  ;;  %4211 = vmatpush.msrb.mxu3 %v12751_v57  ;;  %v9080_v57 = vld [vmem:[%s15680_s3 + $0xa0] sm:$0xf0] }
 0x420   :  { %4227 = vmatpush.msrb.mxu0 %v12709_v42  ;;  %4264 = vmatpush.msra.mxu2 %v12767_v28  ;;  %v4367_v42 = vpack.c.b16 %v4355_v61, %v4355_v61 }
 0x421   :  { %4181 = vmatpush.msrb.mxu1 %v12790_v59  ;;  %4212 = vmatpush.msrb.mxu3 %v12767_v28  ;;  %v13064_v28 = vor.u32 %v9687_v33, %v9080_v57 }
 0x422   :  { %4228 = vmatpush.msrb.mxu0 %v12727_v23  ;;  %v3669_v26 = vpop.f32.mrf.mxu1  ;;  %v13043_v41 = vsel %vm4382_vm9, %v4367_v42, 0  ;;  %v9054_v23 = vld [vmem:[%s15680_s3 + $0x68] sm:$0xf] }
 0x423   :  { %v3646_v1 = vpop.f32.mrf.mxu0  ;;  %v3698_v31 = vpop.f32.mrf.mxu2  ;;  %9022 = vmatmul.msk.f32.vlgmr.msra.gmra.mxu1 %vm3852_vm8, %v3669_v26 }
 0x424   :  { %4229 = vmatpush.msrb.mxu0 %v12744_v53  ;;  %4086 = vmatmul.f32.vlgmr.msra.gmra.mxu3 %v3646_v1  ;;  %v3721_v44 = vpop.f32.mrf.mxu3  ;;  %v13057_v53 = vor.u32 %v9682_v63, %v9054_v23 }
 0x425   :  { %4138 = vmatmul.f32.vlgmr.msrb.gmra.mxu2 %v3698_v31  ;;  %9025 = vmatmul.msk.f32.vlgmr.msra.gmra.mxu0 %vm3852_vm8, %v3721_v44 }
 0x426   :  { %4182 = vmatpush.msrb.mxu1 %v12802_v18  ;;  %4230 = vmatpush.msrb.mxu0 %v12760_v11 }
 0x427   :  { %4391 = vmatpush.bf16.msra.mxu3 %v13010_v50  ;;  %4434 = vmatpush.bf16.msrb.mxu2 %v13010_v50 }
 0x428   :  { %4183 = vmatpush.msrb.mxu1 %v12810_v12  ;;  %4231 = vmatpush.msrb.mxu0 %v12772_v54  ;;  %v9046_v54 = vld [vmem:[%s15680_s3 + $0x58] sm:$0xf] }
 0x42a   :  { %4184 = vmatpush.msrb.mxu1 %v12819_v29  ;;  %v3672_v45 = vpop.f32.mrf.mxu1  ;;  %4232 = vmatpush.msrb.mxu0 %v12781_v58  ;;  %v9680_v58 = vld [vmem:[%s15680_s3 + $0x5c] sm:$0xf0] }
 0x42b   :  { %v3649_v37 = vpop.f32.mrf.mxu0  ;;  %v3701_v34 = vpop.f32.mrf.mxu2  ;;  %9023 = vmatmul.msk.f32.gmra.mxu1 %vm3852_vm8, %v3672_v45  ;;  %4392 = vmatpush.bf16.msra.mxu3 %v13013_v20 }
 0x42c   :  { %4089 = vmatmul.f32.gmra.mxu3 %v3649_v37  ;;  %v3724_v0 = vpop.f32.mrf.mxu3  ;;  %4185 = vmatpush.msrb.mxu1 %v12828_v39 }
 0x42d   :  { %4141 = vmatmul.f32.gmra.mxu2 %v3701_v34  ;;  %9026 = vmatmul.msk.f32.gmra.mxu0 %vm3852_vm8, %v3724_v0 }
 0x42e   :  { %4233 = vmatpush.msrb.mxu0 %v12790_v59  ;;  %4186 = vmatpush.msrb.mxu1 %v12837_v22  ;;  %v9685_v59 = vld [vmem:[%s15680_s3 + $0x8c] sm:$0xf] }
 0x42f   :  { %4435 = vmatpush.bf16.msrb.mxu2 %v13013_v20  ;;  %4393 = vmatpush.bf16.msra.mxu3 %v13024_v4 }
 0x430   :  { %4234 = vmatpush.msrb.mxu0 %v12802_v18  ;;  %4187 = vmatpush.msrb.mxu1 %v12846_v47  ;;  %v13077_v18 = vor.u32 %v9680_v58, %v9046_v54 }
 0x432   :  { %4235 = vmatpush.msrb.mxu0 %v12810_v12  ;;  %4188 = vmatpush.msrb.mxu1 %v12854_v35  ;;  %v9072_v12 = vld [vmem:[%s15680_s3 + $0x90] sm:$0xf0] }
 0x433   :  { %4436 = vmatpush.bf16.msrb.mxu2 %v13024_v4  ;;  %4394 = vmatpush.bf16.msra.mxu3 %v13040_v55 }
 0x434   :  { %4236 = vmatpush.msrb.mxu0 %v12819_v29  ;;  %4189 = vmatpush.msrb.mxu1 %v12862_v32  ;;  %v13084_v29 = vor.u32 %v9685_v59, %v9072_v12 }
 0x436   :  { %4237 = vmatpush.msrb.mxu0 %v12828_v39  ;;  %4405 = vmatpush.bf16.msra.mxu1 %v13043_v41  ;;  %v9683_v39 = vld [vmem:[%s15680_s3 + $0x7c] sm:$0xf] }
 0x437   :  { %4437 = vmatpush.bf16.msrb.mxu2 %v13040_v55  ;;  %4395 = vmatpush.bf16.msra.mxu3 %v13057_v53 }
 0x438   :  { %4238 = vmatpush.msrb.mxu0 %v12837_v22  ;;  %v13095_v22 = vor.u32 %v9683_v39, %v9064_v40 }
 0x43a   :  { %4239 = vmatpush.msrb.mxu0 %v12846_v47  ;;  %4406 = vmatpush.bf16.msra.mxu1 %v13064_v28  ;;  %v9681_v47 = vld [vmem:[%s15680_s3 + $0x6c] sm:$0xf] }
 0x43b   :  { %4438 = vmatpush.bf16.msrb.mxu2 %v13057_v53  ;;  %4396 = vmatpush.bf16.msra.mxu3 %v13077_v18 }
 0x43c   :  { %4240 = vmatpush.msrb.mxu0 %v12854_v35  ;;  %v9056_v35 = vld [vmem:[%s15680_s3 + $0x70] sm:$0xf0] }
 0x43d   :  { %v13109_v52 = vor.u32 %v9681_v47, %v9056_v35 }
 0x43e   :  { %4241 = vmatpush.msrb.mxu0 %v12862_v32  ;;  %4407 = vmatpush.bf16.msra.mxu1 %v13084_v29  ;;  %v9679_v32 = vld [vmem:[%s15680_s3 + $0x5c] sm:$0xf] }
 0x43f   :  { %4439 = vmatpush.bf16.msrb.mxu2 %v13077_v18  ;;  %v13120_v49 = vor.u32 %v9679_v32, %v9048_v6 }
 0x440   :  { %4477 = vmatpush.bf16.msra.mxu0 %v13010_v50 }
 0x442   :  { %4408 = vmatpush.bf16.msra.mxu1 %v13095_v22 }
 0x443   :  { %v3825_v56 = vpop.f32.mrf.mxu3 }
 0x444   :  { %9031 = vmatmul.msk.f32.vlgmr.msra.gmra.mxu2 %vm3852_vm8, %v3825_v56  ;;  %4478 = vmatpush.bf16.msra.mxu0 %v13013_v20 }
 0x445   :  { %4520 = vmatpush.bf16.msra.mxu2 %v13010_v50 }
 0x446   :  { %4409 = vmatpush.bf16.msra.mxu1 %v13109_v52 }
 0x448   :  { %v3773_v24 = vpop.f32.mrf.mxu1  ;;  %4479 = vmatpush.bf16.msra.mxu0 %v13024_v4 }
 0x449   :  { %9028 = vmatmul.msk.f32.vlgmr.msrb.gmra.mxu3 %vm3852_vm8, %v3773_v24  ;;  %4521 = vmatpush.bf16.msra.mxu2 %v13013_v20 }
 0x44a   :  { %4448 = vmatpush.bf16.msrb.mxu3 %v13043_v41  ;;  %4410 = vmatpush.bf16.msra.mxu1 %v13120_v49 }
 0x44c   :  { %v3802_v10 = vpop.f32.mrf.mxu2  ;;  %4480 = vmatpush.bf16.msra.mxu0 %v13040_v55 }
 0x44d   :  { %4242 = vmatmul.f32.vlgmr.msrb.gmra.mxu0 %v3802_v10  ;;  %v3828_v15 = vpop.f32.mrf.mxu3  ;;  %4522 = vmatpush.bf16.msra.mxu2 %v13024_v4 }
 0x44e   :  { %9032 = vmatmul.msk.f32.gmra.mxu2 %vm3852_vm8, %v3828_v15  ;;  %4449 = vmatpush.bf16.msrb.mxu3 %v13064_v28 }
 0x450   :  { %v3750_v16 = vpop.f32.mrf.mxu0  ;;  %v3776_v2 = vpop.f32.mrf.mxu1  ;;  %4481 = vmatpush.bf16.msra.mxu0 %v13057_v53 }
 0x451   :  { %4190 = vmatmul.f32.vlgmr.msrb.gmra.mxu1 %v3750_v16  ;;  %9029 = vmatmul.msk.f32.gmra.mxu3 %vm3852_vm8, %v3776_v2 }
 0x452   :  { %4450 = vmatpush.bf16.msrb.mxu3 %v13084_v29  ;;  %4491 = vmatpush.bf16.msrb.mxu1 %v13043_v41 }
 0x453   :  { %4523 = vmatpush.bf16.msra.mxu2 %v13040_v55 }
 0x454   :  { %v3805_v11 = vpop.f32.mrf.mxu2  ;;  %4482 = vmatpush.bf16.msra.mxu0 %v13077_v18 }
 0x455   :  { %4245 = vmatmul.f32.gmra.mxu0 %v3805_v11 }
 0x456   :  { %4451 = vmatpush.bf16.msrb.mxu3 %v13095_v22  ;;  %4492 = vmatpush.bf16.msrb.mxu1 %v13064_v28 }
 0x457   :  { %4524 = vmatpush.bf16.msra.mxu2 %v13057_v53 }
 0x458   :  { %v3753_v46 = vpop.f32.mrf.mxu0  ;;  %4563 = vmatpush.bf16.msrb.mxu0 %v13010_v50 }
 0x459   :  { %4193 = vmatmul.f32.gmra.mxu1 %v3753_v46 }
 0x45a   :  { %4452 = vmatpush.bf16.msrb.mxu3 %v13109_v52  ;;  %4493 = vmatpush.bf16.msrb.mxu1 %v13084_v29 }
 0x45b   :  { %4525 = vmatpush.bf16.msra.mxu2 %v13077_v18 }
 0x45c   :  { %4564 = vmatpush.bf16.msrb.mxu0 %v13013_v20  ;;  %v3902_v51 = vpop.f32.mrf.mxu1 }
 0x45e   :  { %4453 = vmatpush.bf16.msrb.mxu3 %v13120_v49  ;;  %4494 = vmatpush.bf16.msrb.mxu1 %v13095_v22 }
 0x460   :  { %4565 = vmatpush.bf16.msrb.mxu0 %v13024_v4 }
 0x462   :  { %4495 = vmatpush.bf16.msrb.mxu1 %v13109_v52 }
 0x464   :  { %4566 = vmatpush.bf16.msrb.mxu0 %v13040_v55  ;;  %v3905_v27 = vpop.f32.mrf.mxu1 }
 0x466   :  { %4496 = vmatpush.bf16.msrb.mxu1 %v13120_v49 }
 0x468   :  { %4567 = vmatpush.bf16.msrb.mxu0 %v13057_v53 }
 0x46c   :  { %4568 = vmatpush.bf16.msrb.mxu0 %v13077_v18 }
 0x46e   :  { %v3931_v21 = vpop.f32.mrf.mxu2  ;;  %v3954_v13 = vpop.f32.mrf.mxu3 }
 0x46f   :  { %v3955_v62 = vadd.f32 %v3954_v13, %v3931_v21 }
 0x470   :  { %v3879_v19 = vpop.f32.mrf.mxu0 }
 0x471   :  { %v3903_v25 = vadd.f32 %v3902_v51, %v3879_v19  ;;  %v4274_v8 = vpack.c.bf16 %v3955_v62, %v3955_v62 }
 0x473   :  { %v4272_v3 = vpack.c.bf16 %v3903_v25, %v3903_v25  ;;  %v4419_v44 = vunpack.c.l.b16 %v4274_v8 }
 0x475   :  { %v4313_v37 = vunpack.c.l.b16 %v4272_v3 }
 0x476   :  { %v3934_v30 = vpop.f32.mrf.mxu2 }
 0x477   :  { %v3957_v9 = vpop.f32.mrf.mxu3 }
 0x478   :  { %v3882_v26 = vpop.f32.mrf.mxu0  ;;  %v3958_v1 = vadd.f32 %v3957_v9, %v3934_v30 }
 0x479   :  { %v3906_v31 = vadd.f32 %v3905_v27, %v3882_v26 }
 0x47a   :  { %v4275_v45 = vpack.c.bf16 %v3958_v1, %v3958_v1 }
 0x47b   :  { %v4273_v34 = vpack.c.bf16 %v3906_v31, %v3906_v31 }
 0x47c   :  { %v4420_v0 = vunpack.c.l.b16 %v4275_v45 }
 0x47d   :  { %v4314_v60 = vunpack.c.l.b16 %v4273_v34 }
 0x47e   :  { %v13141_v7 = vpack.c.b16 %v4420_v0, %v4419_v44  ;;  %v3983_v43 = vpop.f32.mrf.mxu1 }
 0x47f   :  { %v13143_v14 = vpack.c.b16 %v4314_v60, %v4313_v37 }
 0x480   :  { %v4006_v5 = vpop.f32.mrf.mxu3  ;;  %v4423_v48 = vshrl.u32 %v13141_v7, 16  ;;  %v4425_v17 = vshll.u32 %v13141_v7, 16 }
 0x481   :  { %v4317_v56 = vshrl.u32 %v13143_v14, 16  ;;  %v4319_v24 = vshll.u32 %v13143_v14, 16  ;;  %v4007_v63 = vadd.f32 %v4006_v5, %v3983_v43 }
 0x482   :  { %v4427_v10 = vrot.slane %v4425_v17, 1  ;;  %v5487_v61 = vrot.slane %v4423_v48, 1  ;;  %v5488_v15 = vrot.slane %v4425_v17, 2 }
 0x483   :  { %v4321_v36 = vrot.slane %v4319_v24, 1  ;;  %v5392_v38 = vrot.slane %v4317_v56, 1  ;;  %v5393_v42 = vrot.slane %v4319_v24, 2  ;;  %v4276_v11 = vpack.c.bf16 %v4007_v63, %v4007_v63 }
 0x484   :  { %v4428_v16 = vor.u32 %v4427_v10, %v4423_v48  ;;  %v13149_v2 = vor.u32 %v5488_v15, %v5487_v61 }
 0x485   :  { %v4322_v23 = vor.u32 %v4321_v36, %v4317_v56  ;;  %v13151_v33 = vor.u32 %v5393_v42, %v5392_v38  ;;  %v4462_v12 = vunpack.c.l.b16 %v4276_v11  ;;  %v4298_v11 = vld [vmem:[%s15680_s3 + $0x50] sm:$0x33] }
 0x486   :  { %9086 = vmatmul.msk.bf16.vlgmr.msrb.gmra.mxu2 %vm4378_vm10, %v4428_v16  ;;  %v3986_v57 = vpop.f32.mrf.mxu1 }
 0x487   :  { %9084 = vmatmul.msk.bf16.vlgmr.msra.gmra.mxu3 %vm4378_vm10, %v4322_v23  ;;  %9085 = vmatmul.msk.bf16.vlgmr.msra.gmra.mxu1 %vm4378_vm10, %v4322_v23 }
 0x488   :  { %4534 = vmatpush.bf16.msra.mxu3 %v13043_v41  ;;  %4606 = vmatpush.bf16.msrb.mxu2 %v13010_v50  ;;  %v4009_v54 = vpop.f32.mrf.mxu3 }
 0x489   :  { %4577 = vmatpush.bf16.msra.mxu1 %v13043_v41  ;;  %v4010_v58 = vadd.f32 %v4009_v54, %v3986_v57  ;;  %v4058_v59 = vpop.f32.mrf.mxu2 }
 0x48b   :  { %v4277_v46 = vpack.c.bf16 %v4010_v58, %v4010_v58 }
 0x48c   :  { %4535 = vmatpush.bf16.msra.mxu3 %v13064_v28  ;;  %4607 = vmatpush.bf16.msrb.mxu2 %v13013_v20 }
 0x48d   :  { %4578 = vmatpush.bf16.msra.mxu1 %v13064_v28  ;;  %v4463_v39 = vunpack.c.l.b16 %v4277_v46  ;;  %v4750_v46 = vunpack.c.h.b16 %v4298_v11 }
 0x48f   :  { %v13164_v47 = vpack.c.b16 %v4463_v39, %v4462_v12 }
 0x490   :  { %v4035_v40 = vpop.f32.mrf.mxu0  ;;  %4536 = vmatpush.bf16.msra.mxu3 %v13084_v29  ;;  %4608 = vmatpush.bf16.msrb.mxu2 %v13024_v4 }
 0x491   :  { %4579 = vmatpush.bf16.msra.mxu1 %v13084_v29  ;;  %v4059_v35 = vadd.f32 %v4058_v59, %v4035_v40  ;;  %v4466_v32 = vshrl.u32 %v13164_v47, 16  ;;  %v4468_v6 = vshll.u32 %v13164_v47, 16  ;;  %v4061_v21 = vpop.f32.mrf.mxu2 }
 0x493   :  { %v4470_v51 = vrot.slane %v4468_v6, 1  ;;  %v4278_v13 = vpack.c.bf16 %v4059_v35, %v4059_v35  ;;  %v5521_v27 = vrot.slane %v4466_v32, 1  ;;  %v5522_v8 = vrot.slane %v4468_v6, 2 }
 0x494   :  { %4537 = vmatpush.bf16.msra.mxu3 %v13095_v22  ;;  %4609 = vmatpush.bf16.msrb.mxu2 %v13040_v55 }
 0x495   :  { %4580 = vmatpush.bf16.msra.mxu1 %v13095_v22  ;;  %v4471_v19 = vor.u32 %v4470_v51, %v4466_v32  ;;  %v4505_v30 = vunpack.c.l.b16 %v4278_v13  ;;  %v13181_v9 = vor.u32 %v5522_v8, %v5521_v27 }
 0x497   :  { %9087 = vmatmul.msk.bf16.vlgmr.msrb.gmra.mxu3 %vm4378_vm10, %v4428_v16  ;;  %9088 = vmatmul.msk.bf16.vlgmr.msra.gmra.mxu0 %vm4378_vm10, %v4471_v19 }
 0x498   :  { %v4038_v62 = vpop.f32.mrf.mxu0  ;;  %4538 = vmatpush.bf16.msra.mxu3 %v13109_v52  ;;  %4610 = vmatpush.bf16.msrb.mxu2 %v13057_v53 }
 0x499   :  { %v4062_v25 = vadd.f32 %v4061_v21, %v4038_v62  ;;  %9089 = vmatmul.msk.bf16.vlgmr.msrb.gmra.mxu1 %vm4378_vm10, %v4471_v19  ;;  %4649 = vmatpush.bf16.msra.mxu0 %v13010_v50  ;;  %v4762_v19 = vpack.c.b16 %v4750_v46, %v4750_v46 }
 0x49a   :  { %4581 = vmatpush.bf16.msra.mxu1 %v13109_v52 }
 0x49b   :  { %v4279_v3 = vpack.c.bf16 %v4062_v25, %v4062_v25  ;;  %v13247_v8 = vsel %vm4382_vm9, %v4762_v19, 0 }
 0x49c   :  { %4539 = vmatpush.bf16.msra.mxu3 %v13120_v49  ;;  %4611 = vmatpush.bf16.msrb.mxu2 %v13077_v18 }
 0x49d   :  { %v4506_v26 = vunpack.c.l.b16 %v4279_v3  ;;  %4650 = vmatpush.bf16.msra.mxu0 %v13013_v20  ;;  %v9677_v3 = vld [vmem:[%s15680_s3 + $0x44] sm:$0xf] }
 0x49e   :  { %4582 = vmatpush.bf16.msra.mxu1 %v13120_v49 }
 0x49f   :  { %v13186_v1 = vpack.c.b16 %v4506_v26, %v4505_v30  ;;  %v9136_v26 = vld [vmem:[%s15680_s3 + $0x48] sm:$0xf0] }
 0x4a0   :  { %4620 = vmatpush.bf16.msrb.mxu3 %v13043_v41  ;;  %v4110_v37 = vpop.f32.mrf.mxu1 }
 0x4a1   :  { %v4509_v31 = vshrl.u32 %v13186_v1, 16  ;;  %v4511_v44 = vshll.u32 %v13186_v1, 16  ;;  %4651 = vmatpush.bf16.msra.mxu0 %v13024_v4 }
 0x4a2   :  { %4663 = vmatpush.bf16.msrb.mxu1 %v13043_v41  ;;  %v4162_v34 = vpop.f32.mrf.mxu0 }
 0x4a3   :  { %v4513_v45 = vrot.slane %v4511_v44, 1  ;;  %v5555_v0 = vrot.slane %v4509_v31, 1  ;;  %v5556_v60 = vrot.slane %v4511_v44, 2  ;;  %v9676_v44 = vld [vmem:[%s15680_s3 + $0x34] sm:$0xf0] }
 0x4a4   :  { %4621 = vmatpush.bf16.msrb.mxu3 %v13064_v28 }
 0x4a5   :  { %v4514_v43 = vor.u32 %v4513_v45, %v4509_v31  ;;  %v13195_v5 = vor.u32 %v5556_v60, %v5555_v0  ;;  %4652 = vmatpush.bf16.msra.mxu0 %v13040_v55  ;;  %v13267_v45 = vor.u32 %v9677_v3, %v9136_v26  ;;  %v9128_v0 = vld [vmem:[%s15680_s3 + $0x38] sm:$0xf0]  ;;  %v9674_v60 = vld [vmem:[%s15680_s3 + $0x24] sm:$0xf0] }
 0x4a6   :  { %4664 = vmatpush.bf16.msrb.mxu1 %v13064_v28 }
 0x4a7   :  { %9090 = vmatmul.msk.bf16.vlgmr.msra.gmra.mxu2 %vm4378_vm10, %v4514_v43  ;;  %9091 = vmatmul.msk.bf16.vlgmr.msra.gmra.mxu3 %vm4378_vm10, %v4514_v43  ;;  %v4087_v48 = vpop.f32.mrf.mxu3 }
 0x4a8   :  { %4622 = vmatpush.bf16.msrb.mxu3 %v13084_v29  ;;  %v4139_v17 = vpop.f32.mrf.mxu2  ;;  %4692 = vmatpush.bf16.msra.mxu2 %v13010_v50  ;;  %v4111_v56 = vadd.f32 %v4110_v37, %v4087_v48  ;;  %v4113_v10 = vpop.f32.mrf.mxu1 }
 0x4a9   :  { %v4163_v24 = vadd.f32 %v4162_v34, %v4139_v17  ;;  %4653 = vmatpush.bf16.msra.mxu0 %v13057_v53  ;;  %v9675_v34 = vld [vmem:[%s15680_s3 + $0x34] sm:$0xf] }
 0x4aa   :  { %4665 = vmatpush.bf16.msrb.mxu1 %v13084_v29  ;;  %v4165_v61 = vpop.f32.mrf.mxu0  ;;  %v4280_v15 = vpack.c.bf16 %v4111_v56, %v4111_v56  ;;  %v13289_v48 = vor.u32 %v9675_v34, %v9128_v0  ;;  %v9673_v56 = vld [vmem:[%s15680_s3 + $0x24] sm:$0xf] }
 0x4ab   :  { %v4282_v36 = vpack.c.bf16 %v4163_v24, %v4163_v24  ;;  %v9120_v24 = vld [vmem:[%s15680_s3 + $0x28] sm:$0xf0] }
 0x4ac   :  { %4623 = vmatpush.bf16.msrb.mxu3 %v13095_v22  ;;  %4693 = vmatpush.bf16.msra.mxu2 %v13013_v20  ;;  %v4548_v20 = vunpack.c.l.b16 %v4280_v15 }
 0x4ad   :  { %4654 = vmatpush.bf16.msra.mxu0 %v13077_v18  ;;  %v4591_v23 = vunpack.c.l.b16 %v4282_v36  ;;  %v13309_v36 = vor.u32 %v9673_v56, %v9120_v24 }
 0x4ae   :  { %4666 = vmatpush.bf16.msrb.mxu1 %v13095_v22 }
 0x4af   :  { %v4090_v50 = vpop.f32.mrf.mxu3 }
 0x4b0   :  { %4624 = vmatpush.bf16.msrb.mxu3 %v13109_v52  ;;  %v4142_v38 = vpop.f32.mrf.mxu2  ;;  %v4114_v42 = vadd.f32 %v4113_v10, %v4090_v50  ;;  %4694 = vmatpush.bf16.msra.mxu2 %v13024_v4  ;;  %v4749_v4 = vunpack.c.l.b16 %v4298_v11  ;;  %v9672_v10 = vld [vmem:[%s15680_s3 + $0x14] sm:$0xf0] }
 0x4b1   :  { %v4166_v16 = vadd.f32 %v4165_v61, %v4142_v38  ;;  %v9671_v38 = vld [vmem:[%s15680_s3 + $0x14] sm:$0xf] }
 0x4b2   :  { %4667 = vmatpush.bf16.msrb.mxu1 %v13109_v52  ;;  %v4281_v63 = vpack.c.bf16 %v4114_v42, %v4114_v42  ;;  %v9112_v42 = vld [vmem:[%s15680_s3 + $0x18] sm:$0xf0] }
 0x4b3   :  { %v4283_v57 = vpack.c.bf16 %v4166_v16, %v4166_v16  ;;  %v9102_v16 = vld [vmem:[%s15680_s3] sm:$0xf] }
 0x4b4   :  { %4625 = vmatpush.bf16.msrb.mxu3 %v13120_v49  ;;  %v4549_v54 = vunpack.c.l.b16 %v4281_v63  ;;  %4695 = vmatpush.bf16.msra.mxu2 %v13040_v55  ;;  %v4761_v55 = vpack.c.b16 %v4749_v4, %v4749_v4  ;;  %v9104_v4 = vld [vmem:[%s15680_s3 + $0x8] sm:$0xf0] }
 0x4b5   :  { %v4592_v58 = vunpack.c.l.b16 %v4283_v57  ;;  %v13329_v57 = vor.u32 %v9671_v38, %v9112_v42 }
 0x4b6   :  { %4668 = vmatpush.bf16.msrb.mxu1 %v13120_v49  ;;  %v13217_v59 = vpack.c.b16 %v4549_v54, %v4548_v20  ;;  %v13232_v25 = vsel %vm4382_vm9, %v4761_v55, 0  ;;  %v9670_v20 = vld [vmem:[%s15680_s3 + $0x4] sm:$0xf0] }
 0x4b7   :  { %v13219_v12 = vpack.c.b16 %v4592_v58, %v4591_v23  ;;  %v13331_v11 = vor.u32 %v9670_v20, %v9102_v16  ;;  %v9669_v58 = vld [vmem:[%s15680_s3 + $0x4] sm:$0xf]  ;;  %v9203_v16 = vld [vmem:[%s15680_s3 + $0xf8] sm:$0xf0] }
 0x4b8   :  { %4706 = vmatpush.bf16.msra.mxu3 %v13043_v41  ;;  %v4552_v41 = vshrl.u32 %v13217_v59, 16  ;;  %v4554_v39 = vshll.u32 %v13217_v59, 16  ;;  %4696 = vmatpush.bf16.msra.mxu2 %v13057_v53  ;;  %v9134_v53 = vld [vmem:[%s15680_s3 + $0x40] sm:$0xf]  ;;  %v13343_v55 = vor.u32 %v9669_v58, %v9104_v4  ;;  %v9195_v58 = vld [vmem:[%s15680_s3 + $0xe8] sm:$0xf0] }
 0x4b9   :  { %v4595_v40 = vshrl.u32 %v13219_v12, 16  ;;  %v4597_v35 = vshll.u32 %v13219_v12, 16 }
 0x4ba   :  { %v4556_v32 = vrot.slane %v4554_v39, 1  ;;  %v5589_v27 = vrot.slane %v4552_v41, 1 }
 0x4bb   :  { %v4599_v6 = vrot.slane %v4597_v35, 1  ;;  %v5623_v51 = vrot.slane %v4595_v40, 1  ;;  %v5624_v21 = vrot.slane %v4597_v35, 2 }
 0x4bc   :  { %4707 = vmatpush.bf16.msra.mxu3 %v13064_v28  ;;  %v4557_v13 = vor.u32 %v4556_v32, %v4552_v41  ;;  %4697 = vmatpush.bf16.msra.mxu2 %v13077_v18  ;;  %v5590_v18 = vrot.slane %v4554_v39, 2 }
 0x4bd   :  { %v4600_v28 = vor.u32 %v4599_v6, %v4595_v40  ;;  %v13229_v62 = vor.u32 %v5624_v21, %v5623_v51 }
 0x4be   :  { %9092 = vmatmul.msk.bf16.vlgmr.msrb.gmra.mxu0 %vm4378_vm10, %v4557_v13  ;;  %9093 = vmatmul.msk.bf16.vlgmr.msra.gmra.mxu1 %vm4378_vm10, %v4557_v13  ;;  %v13257_v31 = vor.u32 %v5590_v18, %v5589_v27 }
 0x4bf   :  { %9094 = vmatmul.msk.bf16.vlgmr.msrb.gmra.mxu2 %vm4378_vm10, %v4600_v28  ;;  %9095 = vmatmul.msk.bf16.vlgmr.msrb.gmra.mxu3 %vm4378_vm10, %v4600_v28 }
 0x4c0   :  { %4708 = vmatpush.bf16.msra.mxu3 %v13084_v29  ;;  %v9678_v29 = vld [vmem:[%s15680_s3 + $0x44] sm:$0xf0]  ;;  %4813 = vmatpush.bf16.msrb.mxu2 %v13232_v25 }
 0x4c1   :  { %v13249_v30 = vor.u32 %v9678_v29, %v9134_v53  ;;  %4783 = vmatpush.bf16.msrb.mxu0 %v13232_v25  ;;  %4797 = vmatpush.bf16.msra.mxu1 %v13247_v8 }
 0x4c4   :  { %4709 = vmatpush.bf16.msra.mxu3 %v13095_v22  ;;  %v9126_v22 = vld [vmem:[%s15680_s3 + $0x30] sm:$0xf]  ;;  %4814 = vmatpush.bf16.msrb.mxu2 %v13249_v30 }
 0x4c5   :  { %v13271_v37 = vor.u32 %v9676_v44, %v9126_v22  ;;  %4784 = vmatpush.bf16.msrb.mxu0 %v13249_v30  ;;  %4798 = vmatpush.bf16.msra.mxu1 %v13267_v45 }
 0x4c7   :  { %v4266_v43 = vpop.f32.mrf.mxu2 }
 0x4c8   :  { %4710 = vmatpush.bf16.msra.mxu3 %v13109_v52  ;;  %v9118_v52 = vld [vmem:[%s15680_s3 + $0x20] sm:$0xf]  ;;  %4815 = vmatpush.bf16.msrb.mxu2 %v13271_v37 }
 0x4c9   :  { %v13291_v17 = vor.u32 %v9674_v60, %v9118_v52  ;;  %4785 = vmatpush.bf16.msrb.mxu0 %v13271_v37  ;;  %4799 = vmatpush.bf16.msra.mxu1 %v13289_v48 }
 0x4ca   :  { %v4243_v61 = vpop.f32.mrf.mxu0 }
 0x4cb   :  { %v4267_v63 = vadd.f32 %v4266_v43, %v4243_v61 }
 0x4cc   :  { %4711 = vmatpush.bf16.msra.mxu3 %v13120_v49  ;;  %v9110_v49 = vld [vmem:[%s15680_s3 + $0x10] sm:$0xf]  ;;  %v4214_v15 = vpop.f32.mrf.mxu3  ;;  %4816 = vmatpush.bf16.msrb.mxu2 %v13291_v17 }
 0x4cd   :  { %v13311_v50 = vor.u32 %v9672_v10, %v9110_v49  ;;  %4786 = vmatpush.bf16.msrb.mxu0 %v13291_v17  ;;  %4800 = vmatpush.bf16.msra.mxu1 %v13309_v36  ;;  %v4286_v41 = vpack.c.bf16 %v4267_v63, %v4267_v63  ;;  %v9193_v63 = vld [vmem:[%s15680_s3 + $0xe0] sm:$0xf] }
 0x4ce   :  { %v4191_v23 = vpop.f32.mrf.mxu1 }
 0x4cf   :  { %v4215_v39 = vadd.f32 %v4214_v15, %v4191_v23  ;;  %v4677_v51 = vunpack.c.l.b16 %v4286_v41  ;;  %v9185_v41 = vld [vmem:[%s15680_s3 + $0xd0] sm:$0xf] }
 0x4d0   :  { %4827 = vmatpush.bf16.msrb.mxu3 %v13247_v8  ;;  %4817 = vmatpush.bf16.msrb.mxu2 %v13311_v50 }
 0x4d1   :  { %v4269_v54 = vpop.f32.mrf.mxu2  ;;  %4787 = vmatpush.bf16.msrb.mxu0 %v13311_v50  ;;  %4801 = vmatpush.bf16.msra.mxu1 %v13329_v57  ;;  %v4284_v21 = vpack.c.bf16 %v4215_v39, %v4215_v39  ;;  %v9693_v39 = vld [vmem:[%s15680_s3 + $0xd4] sm:$0xf] }
 0x4d2   :  { %v4246_v46 = vpop.f32.mrf.mxu0 }
 0x4d3   :  { %v4270_v40 = vadd.f32 %v4269_v54, %v4246_v46  ;;  %v4634_v29 = vunpack.c.l.b16 %v4284_v21  ;;  %v9695_v54 = vld [vmem:[%s15680_s3 + $0xe4] sm:$0xf]  ;;  %v9692_v21 = vld [vmem:[%s15680_s3 + $0xc4] sm:$0xf0] }
 0x4d4   :  { %4828 = vmatpush.bf16.msrb.mxu3 %v13267_v45  ;;  %v4217_v35 = vpop.f32.mrf.mxu3  ;;  %4818 = vmatpush.bf16.msrb.mxu2 %v13331_v11  ;;  %v13515_v46 = vor.u32 %v9695_v54, %v9195_v58  ;;  %v5156_v58 = vrot.slane %v13164_v47, 1 }
 0x4d5   :  { %v4287_v32 = vpack.c.bf16 %v4270_v40, %v4270_v40  ;;  %4788 = vmatpush.bf16.msrb.mxu0 %v13331_v11  ;;  %4802 = vmatpush.bf16.msra.mxu1 %v13343_v55  ;;  %v9187_v40 = vld [vmem:[%s15680_s3 + $0xd8] sm:$0xf0] }
 0x4d6   :  { %v4194_v6 = vpop.f32.mrf.mxu1 }
 0x4d7   :  { %v4678_v13 = vunpack.c.l.b16 %v4287_v32  ;;  %v4218_v28 = vadd.f32 %v4217_v35, %v4194_v6  ;;  %v9177_v32 = vld [vmem:[%s15680_s3 + $0xc0] sm:$0xf] }
 0x4d8   :  { %4829 = vmatpush.bf16.msrb.mxu3 %v13289_v48 }
 0x4d9   :  { %v13348_v19 = vpack.c.b16 %v4678_v13, %v4677_v51  ;;  %v4285_v53 = vpack.c.bf16 %v4218_v28, %v4218_v28  ;;  %v9691_v13 = vld [vmem:[%s15680_s3 + $0xc4] sm:$0xf]  ;;  %v9179_v28 = vld [vmem:[%s15680_s3 + $0xc8] sm:$0xf0] }
 0x4db   :  { %v4635_v27 = vunpack.c.l.b16 %v4285_v53  ;;  %v4681_v18 = vshrl.u32 %v13348_v19, 16  ;;  %v4683_v3 = vshll.u32 %v13348_v19, 16 }
 0x4dc   :  { %4830 = vmatpush.bf16.msrb.mxu3 %v13309_v36 }
 0x4dd   :  { %v13353_v26 = vpack.c.b16 %v4635_v27, %v4634_v29  ;;  %v4685_v22 = vrot.slane %v4683_v3, 1  ;;  %v5691_v44 = vrot.slane %v4681_v18, 1  ;;  %v5692_v34 = vrot.slane %v4683_v3, 2  ;;  %v9690_v3 = vld [vmem:[%s15680_s3 + $0xb4] sm:$0xf0] }
 0x4de   :  { %v13563_v29 = vor.u32 %v9692_v21, %v9177_v32  ;;  %v13565_v27 = vor.u32 %v9691_v13, %v9179_v28  ;;  %v5252_v13 = vrot.slane %v13219_v12, 1 }
 0x4df   :  { %v4686_v0 = vor.u32 %v4685_v22, %v4681_v18  ;;  %v4638_v52 = vshrl.u32 %v13353_v26, 16  ;;  %v4640_v60 = vshll.u32 %v13353_v26, 16  ;;  %v13358_v43 = vor.u32 %v5692_v34, %v5691_v44  ;;  %v9169_v18 = vld [vmem:[%s15680_s3 + $0xb0] sm:$0xf]  ;;  %v9689_v22 = vld [vmem:[%s15680_s3 + $0xb4] sm:$0xf] }
 0x4e0   :  { %4831 = vmatpush.bf16.msrb.mxu3 %v13329_v57  ;;  %v9171_v44 = vld [vmem:[%s15680_s3 + $0xb8] sm:$0xf0]  ;;  %v13583_v34 = vor.u32 %v9690_v3, %v9169_v18  ;;  %v5220_v3 = vrot.slane %v13217_v59, 1 }
 0x4e1   :  { %9098 = vmatmul.msk.bf16.vlgmr.msra.gmra.mxu2 %vm4378_vm10, %v4686_v0  ;;  %9099 = vmatmul.msk.bf16.vlgmr.msra.gmra.mxu3 %vm4378_vm10, %v4686_v0  ;;  %v4642_v56 = vrot.slane %v4640_v60, 1  ;;  %v5657_v24 = vrot.slane %v4638_v52, 1  ;;  %v5658_v49 = vrot.slane %v4640_v60, 2  ;;  %v13585_v0 = vor.u32 %v9689_v22, %v9171_v44 }
 0x4e2   :  { %4873 = vmatpush.bf16.msra.mxu2 %v13232_v25 }
 0x4e3   :  { %v4643_v10 = vor.u32 %v4642_v56, %v4638_v52  ;;  %v13364_v61 = vor.u32 %v5658_v49, %v5657_v24  ;;  %v5124_v24 = vrot.slane %v13141_v7, 1  ;;  %v5031_v49 = vrot.slane %v13143_v14, 1 }
 0x4e4   :  { %4832 = vmatpush.bf16.msrb.mxu3 %v13343_v55 }
 0x4e5   :  { %9096 = vmatmul.msk.bf16.vlgmr.msra.gmra.mxu0 %vm4378_vm10, %v4643_v10  ;;  %9097 = vmatmul.msk.bf16.vlgmr.msrb.gmra.mxu1 %vm4378_vm10, %v4643_v10 }
 0x4e6   :  { %4843 = vmatpush.bf16.msra.mxu0 %v13232_v25  ;;  %4857 = vmatpush.bf16.msrb.mxu1 %v13247_v8 }
 0x4e7   :  { %4874 = vmatpush.bf16.msra.mxu2 %v13249_v30 }
 0x4e8   :  { %4887 = vmatpush.bf16.msra.mxu3 %v13247_v8 }
 0x4ea   :  { %4844 = vmatpush.bf16.msra.mxu0 %v13249_v30  ;;  %4858 = vmatpush.bf16.msrb.mxu1 %v13267_v45 }
 0x4eb   :  { %4875 = vmatpush.bf16.msra.mxu2 %v13271_v37 }
 0x4ec   :  { %4888 = vmatpush.bf16.msra.mxu3 %v13267_v45 }
 0x4ee   :  { %4845 = vmatpush.bf16.msra.mxu0 %v13271_v37  ;;  %4859 = vmatpush.bf16.msrb.mxu1 %v13289_v48 }
 0x4ef   :  { %4876 = vmatpush.bf16.msra.mxu2 %v13291_v17 }
 0x4f0   :  { %4889 = vmatpush.bf16.msra.mxu3 %v13289_v48 }
 0x4f1   :  { %9142 = vmatmul.msk.bf16.vlgmr.msrb.gmra.mxu2 %vm4378_vm10, %v13141_v7  ;;  %9143 = vmatmul.msk.bf16.vlgmr.msrb.gmra.mxu3 %vm4378_vm10, %v13141_v7 }
 0x4f2   :  { %4846 = vmatpush.bf16.msra.mxu0 %v13291_v17  ;;  %4860 = vmatpush.bf16.msrb.mxu1 %v13309_v36 }
 0x4f3   :  { %4877 = vmatpush.bf16.msra.mxu2 %v13311_v50 }
 0x4f4   :  { %4890 = vmatpush.bf16.msra.mxu3 %v13309_v36 }
 0x4f5   :  { %9140 = vmatmul.msk.bf16.vlgmr.msrb.gmra.mxu0 %vm4378_vm10, %v13143_v14  ;;  %9141 = vmatmul.msk.bf16.vlgmr.msra.gmra.mxu1 %vm4378_vm10, %v13143_v14 }
 0x4f6   :  { %4847 = vmatpush.bf16.msra.mxu0 %v13311_v50  ;;  %4861 = vmatpush.bf16.msrb.mxu1 %v13329_v57 }
 0x4f7   :  { %4878 = vmatpush.bf16.msra.mxu2 %v13331_v11 }
 0x4f8   :  { %4891 = vmatpush.bf16.msra.mxu3 %v13329_v57 }
 0x4fa   :  { %4848 = vmatpush.bf16.msra.mxu0 %v13331_v11  ;;  %4862 = vmatpush.bf16.msrb.mxu1 %v13343_v55 }
 0x4fb   :  { %4933 = vmatpush.bf16.msrb.mxu2 %v13232_v25 }
 0x4fc   :  { %4892 = vmatpush.bf16.msra.mxu3 %v13343_v55 }
 0x4fe   :  { %4903 = vmatpush.bf16.msrb.mxu0 %v13232_v25  ;;  %4917 = vmatpush.bf16.msra.mxu1 %v13247_v8 }
 0x4ff   :  { %4934 = vmatpush.bf16.msrb.mxu2 %v13249_v30 }
 0x500   :  { %4947 = vmatpush.bf16.msrb.mxu3 %v13247_v8 }
 0x501   :  { %9146 = vmatmul.msk.bf16.vlgmr.msra.gmra.mxu2 %vm4378_vm10, %v13186_v1  ;;  %9147 = vmatmul.msk.bf16.vlgmr.msra.gmra.mxu3 %vm4378_vm10, %v13186_v1 }
 0x502   :  { %4904 = vmatpush.bf16.msrb.mxu0 %v13249_v30  ;;  %4918 = vmatpush.bf16.msra.mxu1 %v13267_v45 }
 0x503   :  { %4935 = vmatpush.bf16.msrb.mxu2 %v13271_v37 }
 0x504   :  { %4948 = vmatpush.bf16.msrb.mxu3 %v13267_v45  ;;  %v13544_v6 = vpop.f32.mrf.mxu1 }
 0x505   :  { %9144 = vmatmul.msk.bf16.vlgmr.msra.gmra.mxu0 %vm4378_vm10, %v13164_v47  ;;  %9145 = vmatmul.msk.bf16.vlgmr.msrb.gmra.mxu1 %vm4378_vm10, %v13164_v47 }
 0x506   :  { %4905 = vmatpush.bf16.msrb.mxu0 %v13271_v37  ;;  %4919 = vmatpush.bf16.msra.mxu1 %v13289_v48 }
 0x507   :  { %4936 = vmatpush.bf16.msrb.mxu2 %v13291_v17 }
 0x508   :  { %4949 = vmatpush.bf16.msrb.mxu3 %v13289_v48 }
 0x509   :  { %v13557_v53 = vpop.f32.mrf.mxu2 }
 0x50a   :  { %4906 = vmatpush.bf16.msrb.mxu0 %v13291_v17  ;;  %4920 = vmatpush.bf16.msra.mxu1 %v13309_v36  ;;  %v13451_v38 = vpop.f32.mrf.mxu3 }
 0x50b   :  { %4937 = vmatpush.bf16.msrb.mxu2 %v13311_v50 }
 0x50c   :  { %4950 = vmatpush.bf16.msrb.mxu3 %v13309_v36  ;;  %v13587_v52 = vpop.f32.mrf.mxu1 }
 0x50e   :  { %4907 = vmatpush.bf16.msrb.mxu0 %v13311_v50  ;;  %4921 = vmatpush.bf16.msra.mxu1 %v13329_v57 }
 0x50f   :  { %4938 = vmatpush.bf16.msrb.mxu2 %v13331_v11 }
 0x510   :  { %4951 = vmatpush.bf16.msrb.mxu3 %v13329_v57 }
 0x511   :  { %v13595_v56 = vpop.f32.mrf.mxu2 }
 0x512   :  { %4908 = vmatpush.bf16.msrb.mxu0 %v13331_v11  ;;  %4922 = vmatpush.bf16.msra.mxu1 %v13343_v55  ;;  %v13483_v20 = vpop.f32.mrf.mxu3 }
 0x513   :  { %4993 = vmatpush.bf16.msra.mxu2 %v13232_v25 }
 0x514   :  { %4952 = vmatpush.bf16.msrb.mxu3 %v13343_v55  ;;  %9150 = vmatmul.msk.bf16.vlgmr.msrb.gmra.mxu2 %vm4378_vm10, %v13219_v12  ;;  %v13609_v10 = vpop.f32.mrf.mxu0 }
 0x515   :  { %9148 = vmatmul.msk.bf16.vlgmr.msrb.gmra.mxu0 %vm4378_vm10, %v13217_v59  ;;  %9149 = vmatmul.msk.bf16.vlgmr.msra.gmra.mxu1 %vm4378_vm10, %v13217_v59 }
 0x516   :  { %4963 = vmatpush.bf16.msra.mxu0 %v13232_v25  ;;  %4977 = vmatpush.bf16.msrb.mxu1 %v13247_v8  ;;  %v9166_v25 = vld [vmem:[%s15680_s3 + $0x100] sm:$0x33] }
 0x517   :  { %4994 = vmatpush.bf16.msra.mxu2 %v13249_v30  ;;  %9151 = vmatmul.msk.bf16.vlgmr.msrb.gmra.mxu3 %vm4378_vm10, %v13219_v12  ;;  %v5064_v15 = vunpack.c.h.b16 %v9166_v25 }
 0x518   :  { %5007 = vmatpush.bf16.msra.mxu3 %v13247_v8  ;;  %v5063_v8 = vunpack.c.l.b16 %v9166_v25  ;;  %v13611_v25 = vpop.f32.mrf.mxu1 }
 0x51a   :  { %4964 = vmatpush.bf16.msra.mxu0 %v13249_v30  ;;  %4978 = vmatpush.bf16.msrb.mxu1 %v13267_v45  ;;  %v5075_v30 = vpack.c.b16 %v5063_v8, %v5063_v8  ;;  %v13546_v51 = vpop.f32.mrf.mxu3 }
 0x51b   :  { %4995 = vmatpush.bf16.msra.mxu2 %v13271_v37 }
 0x51c   :  { %5008 = vmatpush.bf16.msra.mxu3 %v13267_v45  ;;  %v5076_v45 = vpack.c.b16 %v5064_v15, %v5064_v15  ;;  %v13462_v42 = vsel %vm4382_vm9, %v5075_v30, 0  ;;  %v13627_v30 = vpop.f32.mrf.mxu0 }
 0x51d   :  { %16170 = vst [vmem:[#allocation83_spill] sm:$0xff] %v13627_v30  ;;  %v9699_v30 = vld [vmem:[%s15680_s3 + $0x10c] sm:$0xf] }
 0x51e   :  { %4965 = vmatpush.bf16.msra.mxu0 %v13271_v37  ;;  %4979 = vmatpush.bf16.msrb.mxu1 %v13289_v48  ;;  %v13465_v37 = vsel %vm4382_vm9, %v5076_v45, 0 }
 0x51f   :  { %4996 = vmatpush.bf16.msra.mxu2 %v13291_v17 }
 0x520   :  { %5009 = vmatpush.bf16.msra.mxu3 %v13289_v48  ;;  %v9201_v48 = vld [vmem:[%s15680_s3 + $0xf0] sm:$0xf]  ;;  %v13629_v45 = vpop.f32.mrf.mxu1 }
 0x521   :  { %16171 = vst [vmem:[#allocation127_spill] sm:$0xff] %v13629_v45  ;;  %v9700_v45 = vld [vmem:[%s15680_s3 + $0x10c] sm:$0xf0] }
 0x522   :  { %4966 = vmatpush.bf16.msra.mxu0 %v13291_v17  ;;  %4980 = vmatpush.bf16.msrb.mxu1 %v13309_v36  ;;  %v9698_v17 = vld [vmem:[%s15680_s3 + $0xf4] sm:$0xf0]  ;;  %v13589_v60 = vpop.f32.mrf.mxu3 }
 0x523   :  { %4997 = vmatpush.bf16.msra.mxu2 %v13311_v50 }
 0x524   :  { %5010 = vmatpush.bf16.msra.mxu3 %v13309_v36  ;;  %v9697_v36 = vld [vmem:[%s15680_s3 + $0xf4] sm:$0xf] }
 0x525   :  { %v13489_v23 = vor.u32 %v9697_v36, %v9203_v16  ;;  %v5188_v36 = vrot.slane %v13186_v1, 1 }
 0x526   :  { %4967 = vmatpush.bf16.msra.mxu0 %v13311_v50  ;;  %4981 = vmatpush.bf16.msrb.mxu1 %v13329_v57  ;;  %v13487_v50 = vor.u32 %v9698_v17, %v9201_v48 }
 0x527   :  { %4998 = vmatpush.bf16.msra.mxu2 %v13331_v11 }
 0x528   :  { %5011 = vmatpush.bf16.msra.mxu3 %v13329_v57  ;;  %v9696_v57 = vld [vmem:[%s15680_s3 + $0xe4] sm:$0xf0] }
 0x529   :  { %v13513_v4 = vor.u32 %v9696_v57, %v9193_v63 }
 0x52a   :  { %9154 = vmatmul.msk.bf16.vlgmr.msra.gmra.mxu2 %vm4378_vm10, %v13348_v19  ;;  %4968 = vmatpush.bf16.msra.mxu0 %v13331_v11  ;;  %v9694_v11 = vld [vmem:[%s15680_s3 + $0xd4] sm:$0xf0]  ;;  %v13615_v8 = vpop.f32.mrf.mxu2  ;;  %v13617_v15 = vpop.f32.mrf.mxu3 }
 0x52b   :  { %5130 = vmatpush.bf16.msrb.mxu2 %v13462_v42  ;;  %4982 = vmatpush.bf16.msrb.mxu1 %v13343_v55  ;;  %v13537_v35 = vor.u32 %v9694_v11, %v9185_v41  ;;  %16169 = vst [vmem:[#allocation126_spill] sm:$0xff] %v13617_v15 }
 0x52c   :  { %5012 = vmatpush.bf16.msra.mxu3 %v13343_v55  ;;  %v13539_v55 = vor.u32 %v9693_v39, %v9187_v40 }
 0x52d   :  { %9152 = vmatmul.msk.bf16.vlgmr.msra.gmra.mxu0 %vm4378_vm10, %v13353_v26 }
 0x52e   :  { %5098 = vmatpush.bf16.msrb.mxu0 %v13462_v42  ;;  %9153 = vmatmul.msk.bf16.vlgmr.msrb.gmra.mxu1 %vm4378_vm10, %v13353_v26 }
 0x52f   :  { %9155 = vmatmul.msk.bf16.vlgmr.msra.gmra.mxu3 %vm4378_vm10, %v13348_v19  ;;  %5112 = vmatpush.bf16.msra.mxu1 %v13465_v37 }
 0x530   :  { %5144 = vmatpush.bf16.msrb.mxu3 %v13465_v37  ;;  %5131 = vmatpush.bf16.msrb.mxu2 %v13487_v50 }
 0x532   :  { %5099 = vmatpush.bf16.msrb.mxu0 %v13487_v50  ;;  %v13635_v48 = vpop.f32.mrf.mxu2  ;;  %v13637_v17 = vpop.f32.mrf.mxu3 }
 0x533   :  { %5113 = vmatpush.bf16.msra.mxu1 %v13489_v23  ;;  %16172 = vst [vmem:[#allocation84_spill] sm:$0xff] %v13635_v48  ;;  %v9701_v48 = vld [vmem:[%s15680_s3 + $0x11c] sm:$0xf] }
 0x534   :  { %5145 = vmatpush.bf16.msrb.mxu3 %v13489_v23  ;;  %5132 = vmatpush.bf16.msrb.mxu2 %v13513_v4  ;;  %16173 = vst [vmem:[#allocation128_spill] sm:$0xff] %v13637_v17  ;;  %v9702_v17 = vld [vmem:[%s15680_s3 + $0x11c] sm:$0xf0] }
 0x536   :  { %5100 = vmatpush.bf16.msrb.mxu0 %v13513_v4 }
 0x537   :  { %5114 = vmatpush.bf16.msra.mxu1 %v13515_v46 }
 0x538   :  { %5146 = vmatpush.bf16.msrb.mxu3 %v13515_v46  ;;  %5133 = vmatpush.bf16.msrb.mxu2 %v13537_v35 }
 0x53a   :  { %5101 = vmatpush.bf16.msrb.mxu0 %v13537_v35 }
 0x53b   :  { %5115 = vmatpush.bf16.msra.mxu1 %v13539_v55  ;;  %v13646_v16 = vpop.f32.mrf.mxu0  ;;  %v13648_v63 = vpop.f32.mrf.mxu1 }
 0x53c   :  { %5147 = vmatpush.bf16.msrb.mxu3 %v13539_v55  ;;  %5134 = vmatpush.bf16.msrb.mxu2 %v13563_v29  ;;  %16174 = vst [vmem:[#allocation85_spill] sm:$0xff] %v13646_v16 }
 0x53d   :  { %16175 = vst [vmem:[#allocation129_spill] sm:$0xff] %v13648_v63 }
 0x53e   :  { %5102 = vmatpush.bf16.msrb.mxu0 %v13563_v29 }
 0x53f   :  { %5116 = vmatpush.bf16.msra.mxu1 %v13565_v27 }
 0x540   :  { %5148 = vmatpush.bf16.msrb.mxu3 %v13565_v27  ;;  %5135 = vmatpush.bf16.msrb.mxu2 %v13583_v34 }
 0x542   :  { %5103 = vmatpush.bf16.msrb.mxu0 %v13583_v34  ;;  %v13654_v57 = vpop.f32.mrf.mxu2  ;;  %v13656_v54 = vpop.f32.mrf.mxu3 }
 0x543   :  { %9209 = vmatmul.msk.bf16.vlgmr.msrb.gmra.mxu2 %vm4378_vm10, %v5124_v24  ;;  %5117 = vmatpush.bf16.msra.mxu1 %v13585_v0  ;;  %16176 = vst [vmem:[#allocation86_spill] sm:$0xff] %v13654_v57  ;;  %v13669_v41 = vpop.f32.mrf.mxu0  ;;  %v13671_v11 = vpop.f32.mrf.mxu1  ;;  %v9703_v57 = vld [vmem:[%s15680_s3 + $0x12c] sm:$0xf] }
 0x544   :  { %5149 = vmatpush.bf16.msrb.mxu3 %v13585_v0  ;;  %5194 = vmatpush.bf16.msra.mxu2 %v13462_v42  ;;  %16177 = vst [vmem:[#allocation130_spill] sm:$0xff] %v13656_v54  ;;  %v9244_v54 = vld [vmem:[%s15680_s3 + $0x118] sm:$0xf] }
 0x545   :  { %9207 = vmatmul.msk.bf16.vlgmr.msrb.gmra.mxu0 %vm4378_vm10, %v5031_v49  ;;  %16178 = vst [vmem:[#allocation87_spill] sm:$0xff] %v13669_v41  ;;  %v9706_v41 = vld [vmem:[%s15680_s3 + $0x13c] sm:$0xf0] }
 0x546   :  { %5162 = vmatpush.bf16.msra.mxu0 %v13462_v42  ;;  %9208 = vmatmul.msk.bf16.vlgmr.msra.gmra.mxu1 %vm4378_vm10, %v5031_v49  ;;  %16179 = vst [vmem:[#allocation131_spill] sm:$0xff] %v13671_v11 }
 0x547   :  { %9210 = vmatmul.msk.bf16.vlgmr.msrb.gmra.mxu3 %vm4378_vm10, %v5124_v24  ;;  %5176 = vmatpush.bf16.msrb.mxu1 %v13465_v37  ;;  %v9233_v24 = vld [vmem:[%s15680_s3 + $0x158] sm:$0x33] }
 0x548   :  { %5208 = vmatpush.bf16.msra.mxu3 %v13465_v37  ;;  %5195 = vmatpush.bf16.msra.mxu2 %v13487_v50  ;;  %v5426_v49 = vunpack.c.l.b16 %v9233_v24 }
 0x54a   :  { %5163 = vmatpush.bf16.msra.mxu0 %v13487_v50  ;;  %v13677_v39 = vpop.f32.mrf.mxu2  ;;  %v13679_v40 = vpop.f32.mrf.mxu3 }
 0x54b   :  { %5177 = vmatpush.bf16.msrb.mxu1 %v13489_v23  ;;  %16180 = vst [vmem:[#allocation24_spill] sm:$0xff] %v13677_v39 }
 0x54c   :  { %5209 = vmatpush.bf16.msra.mxu3 %v13489_v23  ;;  %5196 = vmatpush.bf16.msra.mxu2 %v13513_v4  ;;  %16181 = vst [vmem:[#allocation25_spill] sm:$0xff] %v13679_v40  ;;  %v9260_v40 = vld [vmem:[%s15680_s3 + $0x138] sm:$0xf] }
 0x54e   :  { %5164 = vmatpush.bf16.msra.mxu0 %v13513_v4 }
 0x54f   :  { %5178 = vmatpush.bf16.msrb.mxu1 %v13515_v46 }
 0x550   :  { %5210 = vmatpush.bf16.msra.mxu3 %v13515_v46  ;;  %5197 = vmatpush.bf16.msra.mxu2 %v13537_v35 }
 0x552   :  { %5165 = vmatpush.bf16.msra.mxu0 %v13537_v35 }
 0x553   :  { %5179 = vmatpush.bf16.msrb.mxu1 %v13539_v55 }
 0x554   :  { %5211 = vmatpush.bf16.msra.mxu3 %v13539_v55  ;;  %5198 = vmatpush.bf16.msra.mxu2 %v13563_v29 }
 0x556   :  { %5166 = vmatpush.bf16.msra.mxu0 %v13563_v29 }
 0x557   :  { %5180 = vmatpush.bf16.msrb.mxu1 %v13565_v27 }
 0x558   :  { %5212 = vmatpush.bf16.msra.mxu3 %v13565_v27  ;;  %5199 = vmatpush.bf16.msra.mxu2 %v13583_v34 }
 0x55a   :  { %5167 = vmatpush.bf16.msra.mxu0 %v13583_v34 }
 0x55b   :  { %9213 = vmatmul.msk.bf16.vlgmr.msra.gmra.mxu2 %vm4378_vm10, %v5188_v36  ;;  %5181 = vmatpush.bf16.msrb.mxu1 %v13585_v0 }
 0x55c   :  { %5213 = vmatpush.bf16.msra.mxu3 %v13585_v0  ;;  %5258 = vmatpush.bf16.msrb.mxu2 %v13462_v42 }
 0x55d   :  { %9211 = vmatmul.msk.bf16.vlgmr.msra.gmra.mxu0 %vm4378_vm10, %v5156_v58 }
 0x55e   :  { %5226 = vmatpush.bf16.msrb.mxu0 %v13462_v42  ;;  %9212 = vmatmul.msk.bf16.vlgmr.msrb.gmra.mxu1 %vm4378_vm10, %v5156_v58  ;;  %v5438_v58 = vpack.c.b16 %v5426_v49, %v5426_v49  ;;  %v9707_v49 = vld [vmem:[%s15680_s3 + $0x14c] sm:$0xf] }
 0x55f   :  { %9214 = vmatmul.msk.bf16.vlgmr.msra.gmra.mxu3 %vm4378_vm10, %v5188_v36  ;;  %5240 = vmatpush.bf16.msra.mxu1 %v13465_v37  ;;  %v5427_v36 = vunpack.c.h.b16 %v9233_v24 }
 0x560   :  { %5272 = vmatpush.bf16.msrb.mxu3 %v13465_v37  ;;  %5259 = vmatpush.bf16.msrb.mxu2 %v13487_v50 }
 0x562   :  { %5227 = vmatpush.bf16.msrb.mxu0 %v13487_v50  ;;  %v13687_v32 = vpop.f32.mrf.mxu0  ;;  %v13689_v21 = vpop.f32.mrf.mxu1 }
 0x563   :  { %5241 = vmatpush.bf16.msra.mxu1 %v13489_v23 }
 0x564   :  { %5273 = vmatpush.bf16.msrb.mxu3 %v13489_v23  ;;  %5260 = vmatpush.bf16.msrb.mxu2 %v13513_v4  ;;  %v13696_v28 = vpop.f32.mrf.mxu2  ;;  %v13698_v18 = vpop.f32.mrf.mxu3 }
 0x566   :  { %5228 = vmatpush.bf16.msrb.mxu0 %v13513_v4 }
 0x567   :  { %5242 = vmatpush.bf16.msra.mxu1 %v13515_v46 }
 0x568   :  { %5274 = vmatpush.bf16.msrb.mxu3 %v13515_v46  ;;  %5261 = vmatpush.bf16.msrb.mxu2 %v13537_v35 }
 0x56a   :  { %5229 = vmatpush.bf16.msrb.mxu0 %v13537_v35  ;;  %v13711_v22 = vpop.f32.mrf.mxu0  ;;  %v13713_v44 = vpop.f32.mrf.mxu1 }
 0x56b   :  { %5243 = vmatpush.bf16.msra.mxu1 %v13539_v55  ;;  %16182 = vst [vmem:[#allocation26_spill] sm:$0xff] %v13711_v22 }
 0x56c   :  { %5275 = vmatpush.bf16.msrb.mxu3 %v13539_v55  ;;  %5262 = vmatpush.bf16.msrb.mxu2 %v13563_v29 }
 0x56e   :  { %5230 = vmatpush.bf16.msrb.mxu0 %v13563_v29 }
 0x56f   :  { %5244 = vmatpush.bf16.msra.mxu1 %v13565_v27 }
 0x570   :  { %5276 = vmatpush.bf16.msrb.mxu3 %v13565_v27  ;;  %5263 = vmatpush.bf16.msrb.mxu2 %v13583_v34 }
 0x572   :  { %5231 = vmatpush.bf16.msrb.mxu0 %v13583_v34 }
 0x573   :  { %9217 = vmatmul.msk.bf16.vlgmr.msrb.gmra.mxu2 %vm4378_vm10, %v5252_v13  ;;  %5245 = vmatpush.bf16.msra.mxu1 %v13585_v0 }
 0x574   :  { %5277 = vmatpush.bf16.msrb.mxu3 %v13585_v0  ;;  %5322 = vmatpush.bf16.msra.mxu2 %v13462_v42 }
 0x575   :  { %9215 = vmatmul.msk.bf16.vlgmr.msrb.gmra.mxu0 %vm4378_vm10, %v5220_v3 }
 0x576   :  { %5290 = vmatpush.bf16.msra.mxu0 %v13462_v42  ;;  %9216 = vmatmul.msk.bf16.vlgmr.msra.gmra.mxu1 %vm4378_vm10, %v5220_v3  ;;  %v13717_v42 = vpop.f32.mrf.mxu2 }
 0x577   :  { %9218 = vmatmul.msk.bf16.vlgmr.msrb.gmra.mxu3 %vm4378_vm10, %v5252_v13  ;;  %5304 = vmatpush.bf16.msrb.mxu1 %v13465_v37  ;;  %v5439_v13 = vpack.c.b16 %v5427_v36, %v5427_v36  ;;  %v9270_v36 = vld [vmem:[%s15680_s3 + $0x150] sm:$0xf0] }
 0x578   :  { %5336 = vmatpush.bf16.msra.mxu3 %v13465_v37  ;;  %5323 = vmatpush.bf16.msra.mxu2 %v13487_v50  ;;  %v13719_v37 = vpop.f32.mrf.mxu3  ;;  %v13773_v22 = vor.u32 %v9707_v49, %v9270_v36  ;;  %v5284_v49 = vrot.slane %v13353_v26, 1  ;;  %v13800_v36 = vor.u32 %v9706_v41, %v9260_v40  ;;  %v9254_v41 = vld [vmem:[%s15680_s3 + $0x130] sm:$0xf0] }
 0x57a   :  { %5291 = vmatpush.bf16.msra.mxu0 %v13487_v50  ;;  %v13730_v50 = vpop.f32.mrf.mxu0 }
 0x57b   :  { %5305 = vmatpush.bf16.msrb.mxu1 %v13489_v23 }
 0x57c   :  { %5337 = vmatpush.bf16.msra.mxu3 %v13489_v23  ;;  %5324 = vmatpush.bf16.msra.mxu2 %v13513_v4  ;;  %v13732_v23 = vpop.f32.mrf.mxu1 }
 0x57e   :  { %5292 = vmatpush.bf16.msra.mxu0 %v13513_v4  ;;  %v13736_v3 = vpop.f32.mrf.mxu2  ;;  %v13743_v4 = vsel %vm4382_vm9, %v5438_v58, 0 }
 0x57f   :  { %5306 = vmatpush.bf16.msrb.mxu1 %v13515_v46 }
 0x580   :  { %5338 = vmatpush.bf16.msra.mxu3 %v13515_v46  ;;  %5325 = vmatpush.bf16.msra.mxu2 %v13537_v35  ;;  %v13738_v24 = vpop.f32.mrf.mxu3  ;;  %v13746_v46 = vsel %vm4382_vm9, %v5439_v13, 0 }
 0x582   :  { %5293 = vmatpush.bf16.msra.mxu0 %v13537_v35  ;;  %v9268_v35 = vld [vmem:[%s15680_s3 + $0x148] sm:$0xf] }
 0x583   :  { %5307 = vmatpush.bf16.msrb.mxu1 %v13539_v55 }
 0x584   :  { %5339 = vmatpush.bf16.msra.mxu3 %v13539_v55  ;;  %5326 = vmatpush.bf16.msra.mxu2 %v13563_v29  ;;  %v9708_v55 = vld [vmem:[%s15680_s3 + $0x14c] sm:$0xf0]  ;;  %v13769_v58 = vpop.f32.mrf.mxu1 }
 0x585   :  { %v13771_v13 = vor.u32 %v9708_v55, %v9268_v35  ;;  %v9705_v35 = vld [vmem:[%s15680_s3 + $0x13c] sm:$0xf]  ;;  %v9262_v55 = vld [vmem:[%s15680_s3 + $0x140] sm:$0xf0] }
 0x586   :  { %5294 = vmatpush.bf16.msra.mxu0 %v13563_v29  ;;  %v5316_v29 = vrot.slane %v13348_v19, 1  ;;  %v13780_v39 = vpop.f32.mrf.mxu2 }
 0x587   :  { %5308 = vmatpush.bf16.msrb.mxu1 %v13565_v27 }
 0x588   :  { %5340 = vmatpush.bf16.msra.mxu3 %v13565_v27  ;;  %5327 = vmatpush.bf16.msra.mxu2 %v13583_v34  ;;  %v13767_v27 = vpop.f32.mrf.mxu0  ;;  %v13782_v11 = vpop.f32.mrf.mxu3 }
 0x58a   :  { %5295 = vmatpush.bf16.msra.mxu0 %v13583_v34  ;;  %v9252_v34 = vld [vmem:[%s15680_s3 + $0x128] sm:$0xf] }
 0x58b   :  { %9221 = vmatmul.msk.bf16.vlgmr.msra.gmra.mxu2 %vm4378_vm10, %v5316_v29  ;;  %5309 = vmatpush.bf16.msrb.mxu1 %v13585_v0 }
 0x58c   :  { %5341 = vmatpush.bf16.msra.mxu3 %v13585_v0  ;;  %5495 = vmatpush.bf16.msrb.mxu2 %v13743_v4  ;;  %v9704_v0 = vld [vmem:[%s15680_s3 + $0x12c] sm:$0xf0] }
 0x58d   :  { %9219 = vmatmul.msk.bf16.vlgmr.msra.gmra.mxu0 %vm4378_vm10, %v5284_v49 }
 0x58e   :  { %5461 = vmatpush.bf16.msrb.mxu0 %v13743_v4  ;;  %9220 = vmatmul.msk.bf16.vlgmr.msrb.gmra.mxu1 %vm4378_vm10, %v5284_v49  ;;  %v13828_v49 = vor.u32 %v9703_v57, %v9254_v41  ;;  %v13833_v16 = vpop.f32.mrf.mxu2  ;;  %v9246_v57 = vld [vmem:[%s15680_s3 + $0x120] sm:$0xf0]  ;;  %v9236_v41 = vld [vmem:[%s15680_s3 + $0x108] sm:$0xf] }
 0x58f   :  { %9222 = vmatmul.msk.bf16.vlgmr.msra.gmra.mxu3 %vm4378_vm10, %v5316_v29  ;;  %5475 = vmatpush.bf16.msra.mxu1 %v13746_v46  ;;  %v13802_v29 = vor.u32 %v9705_v35, %v9262_v55  ;;  %v13822_v35 = vpop.f32.mrf.mxu1  ;;  %v13826_v55 = vor.u32 %v9704_v0, %v9252_v34  ;;  %16183 = vst [vmem:[#allocation27_spill] sm:$0xff] %v13833_v16 }
 0x590   :  { %5509 = vmatpush.bf16.msrb.mxu3 %v13746_v46  ;;  %5496 = vmatpush.bf16.msrb.mxu2 %v13771_v13  ;;  %v13820_v40 = vpop.f32.mrf.mxu0  ;;  %v13835_v63 = vpop.f32.mrf.mxu3  ;;  %v13850_v34 = vor.u32 %v9702_v17, %v9244_v54  ;;  %v13852_v0 = vor.u32 %v9701_v48, %v9246_v57  ;;  %v13874_v54 = vor.u32 %v9700_v45, %v9236_v41 }
 0x591   :  { %16184 = vst [vmem:[#allocation88_spill] sm:$0xff] %v13835_v63  ;;  %v9238_v63 = vld [vmem:[%s15680_s3 + $0x110] sm:$0xf0] }
 0x592   :  { %5462 = vmatpush.bf16.msrb.mxu0 %v13771_v13  ;;  %v13876_v57 = vor.u32 %v9699_v30, %v9238_v63 }
 0x593   :  { %5476 = vmatpush.bf16.msra.mxu1 %v13773_v22 }
 0x594   :  { %5510 = vmatpush.bf16.msrb.mxu3 %v13773_v22  ;;  %5497 = vmatpush.bf16.msrb.mxu2 %v13800_v36 }
 0x596   :  { %5463 = vmatpush.bf16.msrb.mxu0 %v13800_v36  ;;  %v13878_v15 = vpop.f32.mrf.mxu2 }
 0x597   :  { %5477 = vmatpush.bf16.msra.mxu1 %v13802_v29  ;;  %v13870_v17 = vpop.f32.mrf.mxu1  ;;  %16187 = vst [vmem:[#allocation28_spill] sm:$0xff] %v13878_v15 }
 0x598   :  { %5511 = vmatpush.bf16.msrb.mxu3 %v13802_v29  ;;  %5498 = vmatpush.bf16.msrb.mxu2 %v13826_v55  ;;  %v13868_v48 = vpop.f32.mrf.mxu0  ;;  %16186 = vst [vmem:[#allocation30_spill] sm:$0xff] %v13870_v17  ;;  %v13880_v16 = vpop.f32.mrf.mxu3 }
 0x599   :  { %16185 = vst [vmem:[#allocation89_spill] sm:$0xff] %v13868_v48 }
 0x59a   :  { %5464 = vmatpush.bf16.msrb.mxu0 %v13826_v55  ;;  %16188 = vst [vmem:[#allocation29_spill] sm:$0xff] %v13880_v16 }
 0x59b   :  { %5478 = vmatpush.bf16.msra.mxu1 %v13828_v49 }
 0x59c   :  { %5512 = vmatpush.bf16.msrb.mxu3 %v13828_v49  ;;  %5499 = vmatpush.bf16.msrb.mxu2 %v13850_v34 }
 0x59e   :  { %5465 = vmatpush.bf16.msrb.mxu0 %v13850_v34  ;;  %v13902_v63 = vpop.f32.mrf.mxu2 }
 0x59f   :  { %5479 = vmatpush.bf16.msra.mxu1 %v13852_v0  ;;  %v13896_v45 = vpop.f32.mrf.mxu1  ;;  %16191 = vst [vmem:[#allocation32_spill] sm:$0xff] %v13902_v63 }
 0x5a0   :  { %5513 = vmatpush.bf16.msrb.mxu3 %v13852_v0  ;;  %5500 = vmatpush.bf16.msrb.mxu2 %v13874_v54  ;;  %v13894_v30 = vpop.f32.mrf.mxu0  ;;  %16190 = vst [vmem:[#allocation33_spill] sm:$0xff] %v13896_v45  ;;  %v13904_v41 = vpop.f32.mrf.mxu3 }
 0x5a1   :  { %16189 = vst [vmem:[#allocation31_spill] sm:$0xff] %v13894_v30 }
 0x5a2   :  { %5466 = vmatpush.bf16.msrb.mxu0 %v13874_v54  ;;  %16192 = vst [vmem:[#allocation42_spill] sm:$0xff] %v13904_v41 }
 0x5a3   :  { %9276 = vmatmul.msk.bf16.vlgmr.msrb.gmra.mxu2 %vm4378_vm10, %v13149_v2  ;;  %5480 = vmatpush.bf16.msra.mxu1 %v13876_v57 }
 0x5a4   :  { %5514 = vmatpush.bf16.msrb.mxu3 %v13876_v57  ;;  %5563 = vmatpush.bf16.msra.mxu2 %v13743_v4 }
 0x5a5   :  { %9274 = vmatmul.msk.bf16.vlgmr.msrb.gmra.mxu0 %vm4378_vm10, %v13151_v33 }
 0x5a6   :  { %5529 = vmatpush.bf16.msra.mxu0 %v13743_v4  ;;  %9275 = vmatmul.msk.bf16.vlgmr.msra.gmra.mxu1 %vm4378_vm10, %v13151_v33  ;;  %v13922_v33 = vpop.f32.mrf.mxu2 }
 0x5a7   :  { %9277 = vmatmul.msk.bf16.vlgmr.msrb.gmra.mxu3 %vm4378_vm10, %v13149_v2  ;;  %5543 = vmatpush.bf16.msrb.mxu1 %v13746_v46  ;;  %v13916_v30 = vpop.f32.mrf.mxu1  ;;  %16195 = vst [vmem:[#allocation36_spill] sm:$0xff] %v13922_v33 }
 0x5a8   :  { %5577 = vmatpush.bf16.msra.mxu3 %v13746_v46  ;;  %5564 = vmatpush.bf16.msra.mxu2 %v13771_v13  ;;  %v13914_v2 = vpop.f32.mrf.mxu0  ;;  %16194 = vst [vmem:[#allocation38_spill] sm:$0xff] %v13916_v30  ;;  %v13924_v63 = vpop.f32.mrf.mxu3 }
 0x5a9   :  { %16193 = vst [vmem:[#allocation43_spill] sm:$0xff] %v13914_v2 }
 0x5aa   :  { %5530 = vmatpush.bf16.msra.mxu0 %v13771_v13  ;;  %16196 = vst [vmem:[#allocation39_spill] sm:$0xff] %v13924_v63 }
 0x5ab   :  { %5544 = vmatpush.bf16.msrb.mxu1 %v13773_v22 }
 0x5ac   :  { %5578 = vmatpush.bf16.msra.mxu3 %v13773_v22  ;;  %5565 = vmatpush.bf16.msra.mxu2 %v13800_v36 }
 0x5ae   :  { %5531 = vmatpush.bf16.msra.mxu0 %v13800_v36  ;;  %v5000_v41 = vpop.f32.mrf.mxu2 }
 0x5af   :  { %5545 = vmatpush.bf16.msrb.mxu1 %v13802_v29  ;;  %v4984_v33 = vpop.f32.mrf.mxu1  ;;  %v13947_v16 = vadd.f32 %v5000_v41, %v13696_v28  ;;  %v9329_v41 = vld [vmem:[%s15680_s3 + $0x198] sm:$0xf0] }
 0x5b0   :  { %5579 = vmatpush.bf16.msra.mxu3 %v13802_v29  ;;  %5566 = vmatpush.bf16.msra.mxu2 %v13826_v55  ;;  %v4970_v30 = vpop.f32.mrf.mxu0  ;;  %v13940_v2 = vadd.f32 %v4984_v33, %v13689_v21 }
 0x5b1   :  { %v13937_v63 = vadd.f32 %v4970_v30, %v13687_v32  ;;  %16199 = vst [vmem:[#allocation35_spill] sm:$0xff] %v13947_v16  ;;  %v9716_v30 = vld [vmem:[%s15680_s3 + $0x194] sm:$0xf0] }
 0x5b2   :  { %5532 = vmatpush.bf16.msra.mxu0 %v13826_v55  ;;  %16198 = vst [vmem:[#allocation34_spill] sm:$0xff] %v13940_v2  ;;  %v5014_v45 = vpop.f32.mrf.mxu3 }
 0x5b3   :  { %5546 = vmatpush.bf16.msrb.mxu1 %v13828_v49  ;;  %16197 = vst [vmem:[#allocation37_spill] sm:$0xff] %v13937_v63  ;;  %v13950_v15 = vadd.f32 %v5014_v45, %v13698_v18  ;;  %v9715_v45 = vld [vmem:[%s15680_s3 + $0x194] sm:$0xf] }
 0x5b4   :  { %5580 = vmatpush.bf16.msra.mxu3 %v13828_v49  ;;  %5567 = vmatpush.bf16.msra.mxu2 %v13850_v34 }
 0x5b5   :  { %16200 = vst [vmem:[#allocation44_spill] sm:$0xff] %v13950_v15  ;;  %v5862_v15 = vrot.slane %v13141_v7, 2  ;;  %v5769_v7 = vrot.slane %v13143_v14, 2 }
 0x5b6   :  { %5533 = vmatpush.bf16.msra.mxu0 %v13850_v34 }
 0x5b7   :  { %5547 = vmatpush.bf16.msrb.mxu1 %v13852_v0  ;;  %v14009_v21 = vpop.f32.mrf.mxu1 }
 0x5b8   :  { %5581 = vmatpush.bf16.msra.mxu3 %v13852_v0  ;;  %5568 = vmatpush.bf16.msra.mxu2 %v13874_v54 }
 0x5ba   :  { %5534 = vmatpush.bf16.msra.mxu0 %v13874_v54 }
 0x5bb   :  { %9280 = vmatmul.msk.bf16.vlgmr.msra.gmra.mxu2 %vm4378_vm10, %v13195_v5  ;;  %5548 = vmatpush.bf16.msrb.mxu1 %v13876_v57 }
 0x5bc   :  { %5582 = vmatpush.bf16.msra.mxu3 %v13876_v57  ;;  %5631 = vmatpush.bf16.msrb.mxu2 %v13743_v4 }
 0x5bd   :  { %9278 = vmatmul.msk.bf16.vlgmr.msra.gmra.mxu0 %vm4378_vm10, %v13181_v9 }
 0x5be   :  { %5597 = vmatpush.bf16.msrb.mxu0 %v13743_v4  ;;  %9279 = vmatmul.msk.bf16.vlgmr.msrb.gmra.mxu1 %vm4378_vm10, %v13181_v9  ;;  %v9300_v9 = vld [vmem:[%s15680_s3 + $0x1b0] sm:$0x33] }
 0x5bf   :  { %9281 = vmatmul.msk.bf16.vlgmr.msra.gmra.mxu3 %vm4378_vm10, %v13195_v5  ;;  %5611 = vmatpush.bf16.msra.mxu1 %v13746_v46  ;;  %v5801_v5 = vunpack.c.l.b16 %v9300_v9 }
 0x5c0   :  { %5645 = vmatpush.bf16.msrb.mxu3 %v13746_v46  ;;  %5632 = vmatpush.bf16.msrb.mxu2 %v13771_v13 }
 0x5c2   :  { %5598 = vmatpush.bf16.msrb.mxu0 %v13771_v13 }
 0x5c3   :  { %5612 = vmatpush.bf16.msra.mxu1 %v13773_v22 }
 0x5c4   :  { %5646 = vmatpush.bf16.msrb.mxu3 %v13773_v22  ;;  %5633 = vmatpush.bf16.msrb.mxu2 %v13800_v36 }
 0x5c6   :  { %5599 = vmatpush.bf16.msrb.mxu0 %v13800_v36 }
 0x5c7   :  { %5613 = vmatpush.bf16.msra.mxu1 %v13802_v29 }
 0x5c8   :  { %5647 = vmatpush.bf16.msrb.mxu3 %v13802_v29  ;;  %5634 = vmatpush.bf16.msrb.mxu2 %v13826_v55 }
 0x5ca   :  { %5600 = vmatpush.bf16.msrb.mxu0 %v13826_v55 }
 0x5cb   :  { %5614 = vmatpush.bf16.msra.mxu1 %v13828_v49 }
 0x5cc   :  { %5648 = vmatpush.bf16.msrb.mxu3 %v13828_v49  ;;  %5635 = vmatpush.bf16.msrb.mxu2 %v13850_v34 }
 0x5ce   :  { %5601 = vmatpush.bf16.msrb.mxu0 %v13850_v34 }
 0x5cf   :  { %5615 = vmatpush.bf16.msra.mxu1 %v13852_v0 }
 0x5d0   :  { %5649 = vmatpush.bf16.msrb.mxu3 %v13852_v0  ;;  %5636 = vmatpush.bf16.msrb.mxu2 %v13874_v54 }
 0x5d2   :  { %5602 = vmatpush.bf16.msrb.mxu0 %v13874_v54 }
 0x5d3   :  { %9284 = vmatmul.msk.bf16.vlgmr.msrb.gmra.mxu2 %vm4378_vm10, %v13229_v62  ;;  %5616 = vmatpush.bf16.msra.mxu1 %v13876_v57 }
 0x5d4   :  { %5650 = vmatpush.bf16.msrb.mxu3 %v13876_v57  ;;  %5699 = vmatpush.bf16.msra.mxu2 %v13743_v4 }
 0x5d5   :  { %9282 = vmatmul.msk.bf16.vlgmr.msrb.gmra.mxu0 %vm4378_vm10, %v13257_v31 }
 0x5d6   :  { %5665 = vmatpush.bf16.msra.mxu0 %v13743_v4  ;;  %9283 = vmatmul.msk.bf16.vlgmr.msra.gmra.mxu1 %vm4378_vm10, %v13257_v31  ;;  %v5813_v31 = vpack.c.b16 %v5801_v5, %v5801_v5  ;;  %v9718_v4 = vld [vmem:[%s15680_s3 + $0x1a4] sm:$0xf0]  ;;  %v9713_v5 = vld [vmem:[%s15680_s3 + $0x184] sm:$0xf] }
 0x5d7   :  { %9285 = vmatmul.msk.bf16.vlgmr.msrb.gmra.mxu3 %vm4378_vm10, %v13229_v62  ;;  %5679 = vmatpush.bf16.msrb.mxu1 %v13746_v46  ;;  %v5802_v62 = vunpack.c.h.b16 %v9300_v9  ;;  %v14071_v9 = vor.u32 %v9715_v45, %v9329_v41 }
 0x5d8   :  { %5713 = vmatpush.bf16.msra.mxu3 %v13746_v46  ;;  %5700 = vmatpush.bf16.msra.mxu2 %v13771_v13  ;;  %v14012_v28 = vsel %vm4382_vm9, %v5813_v31, 0  ;;  %v9717_v46 = vld [vmem:[%s15680_s3 + $0x1a4] sm:$0xf] }
 0x5d9   :  { %v5814_v32 = vpack.c.b16 %v5802_v62, %v5802_v62  ;;  %v9321_v62 = vld [vmem:[%s15680_s3 + $0x188] sm:$0xf0] }
 0x5da   :  { %5666 = vmatpush.bf16.msra.mxu0 %v13771_v13  ;;  %v9337_v13 = vld [vmem:[%s15680_s3 + $0x1a8] sm:$0xf0] }
 0x5db   :  { %5680 = vmatpush.bf16.msrb.mxu1 %v13773_v22  ;;  %v14015_v18 = vsel %vm4382_vm9, %v5814_v32, 0 }
 0x5dc   :  { %5714 = vmatpush.bf16.msra.mxu3 %v13773_v22  ;;  %5701 = vmatpush.bf16.msra.mxu2 %v13800_v36  ;;  %v9335_v22 = vld [vmem:[%s15680_s3 + $0x1a0] sm:$0xf] }
 0x5de   :  { %5667 = vmatpush.bf16.msra.mxu0 %v13800_v36  ;;  %v14031_v36 = vpop.f32.mrf.mxu2 }
 0x5df   :  { %5681 = vmatpush.bf16.msrb.mxu1 %v13802_v29 }
 0x5e0   :  { %5715 = vmatpush.bf16.msra.mxu3 %v13802_v29  ;;  %5702 = vmatpush.bf16.msra.mxu2 %v13826_v55  ;;  %v14033_v29 = vpop.f32.mrf.mxu3 }
 0x5e2   :  { %5668 = vmatpush.bf16.msra.mxu0 %v13826_v55  ;;  %v14039_v55 = vpop.f32.mrf.mxu0 }
 0x5e3   :  { %5682 = vmatpush.bf16.msrb.mxu1 %v13828_v49  ;;  %16201 = vst [vmem:[#allocation90_spill] sm:$0xff] %v14039_v55 }
 0x5e4   :  { %5716 = vmatpush.bf16.msra.mxu3 %v13828_v49  ;;  %5703 = vmatpush.bf16.msra.mxu2 %v13850_v34  ;;  %v14041_v49 = vor.u32 %v9718_v4, %v9335_v22  ;;  %v14101_v4 = vor.u32 %v9713_v5, %v9321_v62  ;;  %v9709_v5 = vld [vmem:[%s15680_s3 + $0x164] sm:$0xf]  ;;  %v9305_v62 = vld [vmem:[%s15680_s3 + $0x168] sm:$0xf0] }
 0x5e5   :  { %v14147_v55 = vor.u32 %v9709_v5, %v9305_v62 }
 0x5e6   :  { %5669 = vmatpush.bf16.msra.mxu0 %v13850_v34  ;;  %v14043_v34 = vor.u32 %v9717_v46, %v9337_v13  ;;  %v14089_v31 = vpop.f32.mrf.mxu2  ;;  %v9311_v46 = vld [vmem:[%s15680_s3 + $0x170] sm:$0xf]  ;;  %v9712_v13 = vld [vmem:[%s15680_s3 + $0x174] sm:$0xf0] }
 0x5e7   :  { %5683 = vmatpush.bf16.msrb.mxu1 %v13852_v0  ;;  %v14119_v45 = vor.u32 %v9712_v13, %v9311_v46 }
 0x5e8   :  { %5717 = vmatpush.bf16.msra.mxu3 %v13852_v0  ;;  %5704 = vmatpush.bf16.msra.mxu2 %v13874_v54  ;;  %v9327_v0 = vld [vmem:[%s15680_s3 + $0x190] sm:$0xf]  ;;  %v14091_v32 = vpop.f32.mrf.mxu3 }
 0x5e9   :  { %v14069_v33 = vor.u32 %v9716_v30, %v9327_v0  ;;  %v9711_v0 = vld [vmem:[%s15680_s3 + $0x174] sm:$0xf]  ;;  %v9313_v30 = vld [vmem:[%s15680_s3 + $0x178] sm:$0xf0] }
 0x5ea   :  { %5670 = vmatpush.bf16.msra.mxu0 %v13874_v54  ;;  %v9319_v54 = vld [vmem:[%s15680_s3 + $0x180] sm:$0xf]  ;;  %v14121_v41 = vor.u32 %v9711_v0, %v9313_v30 }
 0x5eb   :  { %9288 = vmatmul.msk.bf16.vlgmr.msra.gmra.mxu2 %vm4378_vm10, %v13358_v43  ;;  %5684 = vmatpush.bf16.msrb.mxu1 %v13876_v57 }
 0x5ec   :  { %5718 = vmatpush.bf16.msra.mxu3 %v13876_v57  ;;  %5868 = vmatpush.bf16.msrb.mxu2 %v14012_v28  ;;  %v9714_v57 = vld [vmem:[%s15680_s3 + $0x184] sm:$0xf0] }
 0x5ed   :  { %9286 = vmatmul.msk.bf16.vlgmr.msra.gmra.mxu0 %vm4378_vm10, %v13364_v61  ;;  %v14099_v22 = vor.u32 %v9714_v57, %v9319_v54  ;;  %v9303_v54 = vld [vmem:[%s15680_s3 + $0x160] sm:$0xf]  ;;  %v9710_v57 = vld [vmem:[%s15680_s3 + $0x164] sm:$0xf0] }
 0x5ee   :  { %5836 = vmatpush.bf16.msrb.mxu0 %v14012_v28  ;;  %9287 = vmatmul.msk.bf16.vlgmr.msrb.gmra.mxu1 %vm4378_vm10, %v13364_v61  ;;  %v14095_v61 = vpop.f32.mrf.mxu0  ;;  %v14139_v13 = vpop.f32.mrf.mxu2  ;;  %v14145_v30 = vor.u32 %v9710_v57, %v9303_v54 }
 0x5ef   :  { %9289 = vmatmul.msk.bf16.vlgmr.msra.gmra.mxu3 %vm4378_vm10, %v13358_v43  ;;  %5850 = vmatpush.bf16.msra.mxu1 %v14015_v18  ;;  %v14065_v43 = vpop.f32.mrf.mxu1 }
 0x5f0   :  { %5882 = vmatpush.bf16.msrb.mxu3 %v14015_v18  ;;  %5869 = vmatpush.bf16.msrb.mxu2 %v14041_v49  ;;  %v14141_v0 = vpop.f32.mrf.mxu3 }
 0x5f2   :  { %5837 = vmatpush.bf16.msrb.mxu0 %v14041_v49 }
 0x5f3   :  { %5851 = vmatpush.bf16.msra.mxu1 %v14043_v34 }
 0x5f4   :  { %5883 = vmatpush.bf16.msrb.mxu3 %v14043_v34  ;;  %5870 = vmatpush.bf16.msrb.mxu2 %v14069_v33 }
 0x5f6   :  { %5838 = vmatpush.bf16.msrb.mxu0 %v14069_v33  ;;  %v14149_v16 = vpop.f32.mrf.mxu0  ;;  %v14162_v57 = vpop.f32.mrf.mxu2 }
 0x5f7   :  { %5852 = vmatpush.bf16.msra.mxu1 %v14071_v9  ;;  %v14135_v46 = vpop.f32.mrf.mxu1 }
 0x5f8   :  { %5884 = vmatpush.bf16.msrb.mxu3 %v14071_v9  ;;  %5871 = vmatpush.bf16.msrb.mxu2 %v14099_v22  ;;  %v14164_v5 = vpop.f32.mrf.mxu3 }
 0x5fa   :  { %5839 = vmatpush.bf16.msrb.mxu0 %v14099_v22 }
 0x5fb   :  { %5853 = vmatpush.bf16.msra.mxu1 %v14101_v4 }
 0x5fc   :  { %5885 = vmatpush.bf16.msrb.mxu3 %v14101_v4  ;;  %5872 = vmatpush.bf16.msrb.mxu2 %v14119_v45 }
 0x5fe   :  { %5840 = vmatpush.bf16.msrb.mxu0 %v14119_v45  ;;  %v14171_v62 = vpop.f32.mrf.mxu0  ;;  %v14185_v14 = vpop.f32.mrf.mxu2 }
 0x5ff   :  { %5854 = vmatpush.bf16.msra.mxu1 %v14121_v41  ;;  %v14158_v54 = vpop.f32.mrf.mxu1  ;;  %16203 = vst [vmem:[#allocation45_spill] sm:$0xff] %v14185_v14 }
 0x600   :  { %5886 = vmatpush.bf16.msrb.mxu3 %v14121_v41  ;;  %5873 = vmatpush.bf16.msrb.mxu2 %v14145_v30  ;;  %v14187_v2 = vpop.f32.mrf.mxu3 }
 0x601   :  { %16204 = vst [vmem:[#allocation58_spill] sm:$0xff] %v14187_v2 }
 0x602   :  { %5841 = vmatpush.bf16.msrb.mxu0 %v14145_v30 }
 0x603   :  { %9343 = vmatmul.msk.bf16.vlgmr.msrb.gmra.mxu2 %vm4378_vm10, %v5862_v15  ;;  %5855 = vmatpush.bf16.msra.mxu1 %v14147_v55 }
 0x604   :  { %5887 = vmatpush.bf16.msrb.mxu3 %v14147_v55  ;;  %5932 = vmatpush.bf16.msra.mxu2 %v14012_v28 }
 0x605   :  { %9341 = vmatmul.msk.bf16.vlgmr.msrb.gmra.mxu0 %vm4378_vm10, %v5769_v7 }
 0x606   :  { %5900 = vmatpush.bf16.msra.mxu0 %v14012_v28  ;;  %9342 = vmatmul.msk.bf16.vlgmr.msra.gmra.mxu1 %vm4378_vm10, %v5769_v7  ;;  %v14191_v7 = vpop.f32.mrf.mxu0  ;;  %v14201_v2 = vpop.f32.mrf.mxu2 }
 0x607   :  { %9344 = vmatmul.msk.bf16.vlgmr.msrb.gmra.mxu3 %vm4378_vm10, %v5862_v15  ;;  %5914 = vmatpush.bf16.msrb.mxu1 %v14015_v18  ;;  %v14181_v15 = vpop.f32.mrf.mxu1  ;;  %16205 = vst [vmem:[#allocation91_spill] sm:$0xff] %v14191_v7 }
 0x608   :  { %5946 = vmatpush.bf16.msra.mxu3 %v14015_v18  ;;  %5933 = vmatpush.bf16.msra.mxu2 %v14041_v49  ;;  %16202 = vst [vmem:[#allocation103_spill] sm:$0xff] %v14181_v15  ;;  %v14203_v14 = vpop.f32.mrf.mxu3  ;;  %v5926_v15 = vrot.slane %v13186_v1, 2 }
 0x609   :  { %16207 = vst [vmem:[#allocation46_spill] sm:$0xff] %v14201_v2  ;;  %v5894_v2 = vrot.slane %v13164_v47, 2 }
 0x60a   :  { %5901 = vmatpush.bf16.msra.mxu0 %v14041_v49  ;;  %16208 = vst [vmem:[#allocation59_spill] sm:$0xff] %v14203_v14 }
 0x60b   :  { %5915 = vmatpush.bf16.msrb.mxu1 %v14043_v34 }
 0x60c   :  { %5947 = vmatpush.bf16.msra.mxu3 %v14043_v34  ;;  %5934 = vmatpush.bf16.msra.mxu2 %v14069_v33 }
 0x60e   :  { %5902 = vmatpush.bf16.msra.mxu0 %v14069_v33  ;;  %v14210_v7 = vpop.f32.mrf.mxu0 }
 0x60f   :  { %5916 = vmatpush.bf16.msrb.mxu1 %v14071_v9  ;;  %v14197_v63 = vpop.f32.mrf.mxu1  ;;  %16209 = vst [vmem:[#allocation92_spill] sm:$0xff] %v14210_v7 }
 0x610   :  { %5948 = vmatpush.bf16.msra.mxu3 %v14071_v9  ;;  %5935 = vmatpush.bf16.msra.mxu2 %v14099_v22  ;;  %16206 = vst [vmem:[#allocation104_spill] sm:$0xff] %v14197_v63  ;;  %v14229_v14 = vpop.f32.mrf.mxu3 }
 0x611   :  { %16212 = vst [vmem:[#allocation40_spill] sm:$0xff] %v14229_v14 }
 0x612   :  { %5903 = vmatpush.bf16.msra.mxu0 %v14099_v22 }
 0x613   :  { %5917 = vmatpush.bf16.msrb.mxu1 %v14101_v4 }
 0x614   :  { %5949 = vmatpush.bf16.msra.mxu3 %v14101_v4  ;;  %5936 = vmatpush.bf16.msra.mxu2 %v14119_v45 }
 0x616   :  { %5904 = vmatpush.bf16.msra.mxu0 %v14119_v45  ;;  %v14233_v47 = vpop.f32.mrf.mxu0 }
 0x617   :  { %5918 = vmatpush.bf16.msrb.mxu1 %v14121_v41  ;;  %v14223_v1 = vpop.f32.mrf.mxu1  ;;  %16213 = vst [vmem:[#allocation93_spill] sm:$0xff] %v14233_v47 }
 0x618   :  { %5950 = vmatpush.bf16.msra.mxu3 %v14121_v41  ;;  %5937 = vmatpush.bf16.msra.mxu2 %v14145_v30  ;;  %16210 = vst [vmem:[#allocation105_spill] sm:$0xff] %v14223_v1 }
 0x61a   :  { %5905 = vmatpush.bf16.msra.mxu0 %v14145_v30 }
 0x61b   :  { %9347 = vmatmul.msk.bf16.vlgmr.msra.gmra.mxu2 %vm4378_vm10, %v5926_v15  ;;  %5919 = vmatpush.bf16.msrb.mxu1 %v14147_v55 }
 0x61c   :  { %5951 = vmatpush.bf16.msra.mxu3 %v14147_v55  ;;  %5996 = vmatpush.bf16.msrb.mxu2 %v14012_v28 }
 0x61d   :  { %9345 = vmatmul.msk.bf16.vlgmr.msra.gmra.mxu0 %vm4378_vm10, %v5894_v2 }
 0x61e   :  { %5964 = vmatpush.bf16.msrb.mxu0 %v14012_v28  ;;  %9346 = vmatmul.msk.bf16.vlgmr.msrb.gmra.mxu1 %vm4378_vm10, %v5894_v2  ;;  %v14249_v1 = vpop.f32.mrf.mxu0 }
 0x61f   :  { %9348 = vmatmul.msk.bf16.vlgmr.msra.gmra.mxu3 %vm4378_vm10, %v5926_v15  ;;  %5978 = vmatpush.bf16.msra.mxu1 %v14015_v18  ;;  %v14227_v15 = vpop.f32.mrf.mxu2  ;;  %v14239_v2 = vpop.f32.mrf.mxu1  ;;  %16217 = vst [vmem:[#allocation94_spill] sm:$0xff] %v14249_v1 }
 0x620   :  { %6010 = vmatpush.bf16.msrb.mxu3 %v14015_v18  ;;  %5997 = vmatpush.bf16.msrb.mxu2 %v14041_v49  ;;  %16211 = vst [vmem:[#allocation47_spill] sm:$0xff] %v14227_v15  ;;  %v14245_v15 = vpop.f32.mrf.mxu3 }
 0x621   :  { %16214 = vst [vmem:[#allocation41_spill] sm:$0xff] %v14239_v2  ;;  %v5958_v2 = vrot.slane %v13217_v59, 2 }
 0x622   :  { %5965 = vmatpush.bf16.msrb.mxu0 %v14041_v49  ;;  %16216 = vst [vmem:[#allocation60_spill] sm:$0xff] %v14245_v15 }
 0x623   :  { %5979 = vmatpush.bf16.msra.mxu1 %v14043_v34 }
 0x624   :  { %6011 = vmatpush.bf16.msrb.mxu3 %v14043_v34  ;;  %5998 = vmatpush.bf16.msrb.mxu2 %v14069_v33 }
 0x626   :  { %5966 = vmatpush.bf16.msrb.mxu0 %v14069_v33 }
 0x627   :  { %5980 = vmatpush.bf16.msra.mxu1 %v14071_v9  ;;  %v14243_v14 = vpop.f32.mrf.mxu2  ;;  %v14260_v15 = vpop.f32.mrf.mxu1 }
 0x628   :  { %6012 = vmatpush.bf16.msrb.mxu3 %v14071_v9  ;;  %5999 = vmatpush.bf16.msrb.mxu2 %v14099_v22  ;;  %16215 = vst [vmem:[#allocation48_spill] sm:$0xff] %v14243_v14  ;;  %v5990_v14 = vrot.slane %v13219_v12, 2  ;;  %v14269_v47 = vpop.f32.mrf.mxu3  ;;  %v14275_v12 = vpop.f32.mrf.mxu0 }
 0x629   :  { %16218 = vst [vmem:[#allocation106_spill] sm:$0xff] %v14275_v12 }
 0x62a   :  { %5967 = vmatpush.bf16.msrb.mxu0 %v14099_v22 }
 0x62b   :  { %5981 = vmatpush.bf16.msra.mxu1 %v14101_v4 }
 0x62c   :  { %6013 = vmatpush.bf16.msrb.mxu3 %v14101_v4  ;;  %6000 = vmatpush.bf16.msrb.mxu2 %v14119_v45 }
 0x62e   :  { %5968 = vmatpush.bf16.msrb.mxu0 %v14119_v45 }
 0x62f   :  { %5982 = vmatpush.bf16.msra.mxu1 %v14121_v41  ;;  %v14267_v1 = vpop.f32.mrf.mxu2  ;;  %v14281_v59 = vpop.f32.mrf.mxu1 }
 0x630   :  { %6014 = vmatpush.bf16.msrb.mxu3 %v14121_v41  ;;  %6001 = vmatpush.bf16.msrb.mxu2 %v14145_v30 }
 0x632   :  { %5969 = vmatpush.bf16.msrb.mxu0 %v14145_v30 }
 0x633   :  { %9351 = vmatmul.msk.bf16.vlgmr.msrb.gmra.mxu2 %vm4378_vm10, %v5990_v14  ;;  %5983 = vmatpush.bf16.msra.mxu1 %v14147_v55 }
 0x634   :  { %6015 = vmatpush.bf16.msrb.mxu3 %v14147_v55  ;;  %6060 = vmatpush.bf16.msra.mxu2 %v14012_v28 }
 0x635   :  { %9349 = vmatmul.msk.bf16.vlgmr.msrb.gmra.mxu0 %vm4378_vm10, %v5958_v2 }
 0x636   :  { %6028 = vmatpush.bf16.msra.mxu0 %v14012_v28  ;;  %9350 = vmatmul.msk.bf16.vlgmr.msra.gmra.mxu1 %vm4378_vm10, %v5958_v2 }
 0x637   :  { %9352 = vmatmul.msk.bf16.vlgmr.msrb.gmra.mxu3 %vm4378_vm10, %v5990_v14  ;;  %6042 = vmatpush.bf16.msrb.mxu1 %v14015_v18  ;;  %v14285_v28 = vpop.f32.mrf.mxu2 }
 0x638   :  { %6074 = vmatpush.bf16.msra.mxu3 %v14015_v18  ;;  %6061 = vmatpush.bf16.msra.mxu2 %v14041_v49  ;;  %v14287_v18 = vpop.f32.mrf.mxu3 }
 0x63a   :  { %6029 = vmatpush.bf16.msra.mxu0 %v14041_v49  ;;  %v14291_v49 = vpop.f32.mrf.mxu0 }
 0x63b   :  { %6043 = vmatpush.bf16.msrb.mxu1 %v14043_v34 }
 0x63c   :  { %6075 = vmatpush.bf16.msra.mxu3 %v14043_v34  ;;  %6062 = vmatpush.bf16.msra.mxu2 %v14069_v33  ;;  %v14299_v34 = vpop.f32.mrf.mxu1 }
 0x63e   :  { %6030 = vmatpush.bf16.msra.mxu0 %v14069_v33  ;;  %v6054_v33 = vrot.slane %v13348_v19, 2 }
 0x63f   :  { %6044 = vmatpush.bf16.msrb.mxu1 %v14071_v9 }
 0x640   :  { %6076 = vmatpush.bf16.msra.mxu3 %v14071_v9  ;;  %6063 = vmatpush.bf16.msra.mxu2 %v14099_v22  ;;  %v14304_v9 = vpop.f32.mrf.mxu2 }
 0x642   :  { %6031 = vmatpush.bf16.msra.mxu0 %v14099_v22  ;;  %v14306_v22 = vpop.f32.mrf.mxu3 }
 0x643   :  { %6045 = vmatpush.bf16.msrb.mxu1 %v14101_v4 }
 0x644   :  { %6077 = vmatpush.bf16.msra.mxu3 %v14101_v4  ;;  %6064 = vmatpush.bf16.msra.mxu2 %v14119_v45  ;;  %v14310_v4 = vpop.f32.mrf.mxu0  ;;  %v14317_v19 = vpop.f32.mrf.mxu1 }
 0x646   :  { %6032 = vmatpush.bf16.msra.mxu0 %v14119_v45  ;;  %v6022_v45 = vrot.slane %v13353_v26, 2 }
 0x647   :  { %6046 = vmatpush.bf16.msrb.mxu1 %v14121_v41 }
 0x648   :  { %6078 = vmatpush.bf16.msra.mxu3 %v14121_v41  ;;  %6065 = vmatpush.bf16.msra.mxu2 %v14145_v30  ;;  %v14319_v41 = vpop.f32.mrf.mxu2 }
 0x64a   :  { %6033 = vmatpush.bf16.msra.mxu0 %v14145_v30  ;;  %v14321_v14 = vpop.f32.mrf.mxu3 }
 0x64b   :  { %9355 = vmatmul.msk.bf16.vlgmr.msra.gmra.mxu2 %vm4378_vm10, %v6054_v33  ;;  %6047 = vmatpush.bf16.msrb.mxu1 %v14147_v55  ;;  %16219 = vst [vmem:[#allocation49_spill] sm:$0xff] %v14321_v14 }
 0x64c   :  { %6079 = vmatpush.bf16.msra.mxu3 %v14147_v55  ;;  %v14323_v2 = vpop.f32.mrf.mxu0 }
 0x64d   :  { %9353 = vmatmul.msk.bf16.vlgmr.msra.gmra.mxu0 %vm4378_vm10, %v6022_v45 }
 0x64e   :  { %9354 = vmatmul.msk.bf16.vlgmr.msrb.gmra.mxu1 %vm4378_vm10, %v6022_v45 }
 0x64f   :  { %9356 = vmatmul.msk.bf16.vlgmr.msra.gmra.mxu3 %vm4378_vm10, %v6054_v33  ;;  %v14325_v33 = vpop.f32.mrf.mxu1 }
 0x650   :  { %16220 = vst [vmem:[#allocation61_spill] sm:$0xff] %v14325_v33  ;;  %v14327_v12 = vpop.f32.mrf.mxu2 }
 0x651   :  { %16221 = vst [vmem:[#allocation95_spill] sm:$0xff] %v14327_v12 }
 0x652   :  { %v14329_v30 = vpop.f32.mrf.mxu3 }
 0x653   :  { %16222 = vst [vmem:[#allocation107_spill] sm:$0xff] %v14329_v30 }
 0x654   :  { %v14331_v55 = vpop.f32.mrf.mxu0 }
 0x655   :  { %16223 = vst [vmem:[#allocation50_spill] sm:$0xff] %v14331_v55 }
 0x657   :  { %v14333_v26 = vpop.f32.mrf.mxu1 }
 0x658   :  { %16224 = vst [vmem:[#allocation62_spill] sm:$0xff] %v14333_v26  ;;  %v14335_v7 = vpop.f32.mrf.mxu2 }
 0x659   :  { %16225 = vst [vmem:[#allocation96_spill] sm:$0xff] %v14335_v7  ;;  %v4987_v7 = vadd.f32 %v14009_v21, %v13713_v44 }
 0x65a   :  { %v14337_v45 = vpop.f32.mrf.mxu3 }
 0x65b   :  { %16226 = vst [vmem:[#allocation108_spill] sm:$0xff] %v14337_v45 }
 0x65c   :  { %v14339_v63 = vpop.f32.mrf.mxu0 }
 0x65d   :  { %16227 = vst [vmem:[#allocation51_spill] sm:$0xff] %v14339_v63 }
 0x65f   :  { %v14341_v17 = vpop.f32.mrf.mxu1 }
 0x660   :  { %16228 = vst [vmem:[#allocation63_spill] sm:$0xff] %v14341_v17  ;;  %v14343_v48 = vpop.f32.mrf.mxu2  ;;  %v5003_v17 = vadd.f32 %v14031_v36, %v13717_v42  ;;  %v4821_v42 = vadd.f32 %v13736_v3, %v13557_v53 }
 0x661   :  { %16229 = vst [vmem:[#allocation97_spill] sm:$0xff] %v14343_v48  ;;  %v5017_v48 = vadd.f32 %v14033_v29, %v13719_v37  ;;  %v4835_v37 = vadd.f32 %v13738_v24, %v13546_v51 }
 0x662   :  { %v14345_v14 = vpop.f32.mrf.mxu3  ;;  %v5352_v36 = vadd.f32 %v14089_v31, %v4821_v42 }
 0x663   :  { %16230 = vst [vmem:[#allocation109_spill] sm:$0xff] %v14345_v14  ;;  %v5375_v14 = vadd.f32 %v14260_v15, %v4987_v7  ;;  %v5353_v29 = vadd.f32 %v14091_v32, %v4835_v37 }
 0x664   :  { %v14347_v33 = vpop.f32.mrf.mxu0  ;;  %v5729_v53 = vadd.f32 %v14285_v28, %v5352_v36 }
 0x665   :  { %16231 = vst [vmem:[#allocation52_spill] sm:$0xff] %v14347_v33  ;;  %v5730_v51 = vadd.f32 %v14287_v18, %v5353_v29 }
 0x66b   :  { %v14349_v12 = vpop.f32.mrf.mxu1 }
 0x66c   :  { %16232 = vst [vmem:[#allocation64_spill] sm:$0xff] %v14349_v12  ;;  %v14355_v26 = vpop.f32.mrf.mxu0  ;;  %v5378_v12 = vadd.f32 %v14267_v1, %v5003_v17  ;;  %v4791_v17 = vadd.f32 %v13730_v50, %v13451_v38  ;;  %v4793_v38 = vadd.f32 %v13767_v27, %v13483_v20  ;;  %v6118_v50 = vld [vmem:[#allocation5] sm:$0x3] }
 0x66d   :  { %16235 = vst [vmem:[#allocation53_spill] sm:$0xff] %v14355_v26  ;;  %v14400_v18 = vperm.slane %v6118_v50, 0 }
 0x66e   :  { %v14351_v30 = vpop.f32.mrf.mxu2  ;;  %v5348_v15 = vadd.f32 %v14095_v61, %v4791_v17  ;;  %v5350_v28 = vadd.f32 %v14149_v16, %v4793_v38 }
 0x66f   :  { %16233 = vst [vmem:[#allocation98_spill] sm:$0xff] %v14351_v30  ;;  %v5379_v30 = vadd.f32 %v14269_v47, %v5017_v48  ;;  %v4805_v48 = vadd.f32 %v13732_v23, %v13544_v6  ;;  %v4807_v6 = vadd.f32 %v13769_v58, %v13587_v52  ;;  %v14402_v58 = vperm.slane %v6118_v50, 1 }
 0x670   :  { %v5725_v23 = vadd.f32 %v14291_v49, %v5348_v15 }
 0x671   :  { %v5349_v47 = vadd.f32 %v14065_v43, %v4805_v48  ;;  %v4823_v43 = vadd.f32 %v13780_v39, %v13595_v56  ;;  %v5351_v20 = vadd.f32 %v14135_v46, %v4807_v6 }
 0x672   :  { %v14353_v55 = vpop.f32.mrf.mxu3 }
 0x673   :  { %16234 = vst [vmem:[#allocation110_spill] sm:$0xff] %v14353_v55  ;;  %v5688_v33 = vpop.f32.mrf.mxu1  ;;  %v5726_v31 = vadd.f32 %v14281_v59, %v5349_v47  ;;  %v5354_v59 = vadd.f32 %v14139_v13, %v4823_v43  ;;  %v5728_v56 = vadd.f32 %v14299_v34, %v5351_v20  ;;  %v4851_v47 = vadd.f32 %v13820_v40, %v13609_v10  ;;  %v16237_v43 = vld [vmem:[#allocation126_spill] sm:$0xff] }
 0x674   :  { %v14366_v45 = vadd.f32 %v5688_v33, %v5375_v14  ;;  %v14372_v21 = vpop.f32.mrf.mxu0  ;;  %v5727_v14 = vadd.f32 %v14310_v4, %v5350_v28 }
 0x675   :  { %v5731_v46 = vadd.f32 %v14304_v9, %v5354_v59 }
 0x676   :  { %v5708_v55 = vpop.f32.mrf.mxu2 }
 0x677   :  { %v14368_v63 = vadd.f32 %v5708_v55, %v5378_v12  ;;  %v4837_v12 = vadd.f32 %v13782_v11, %v13589_v60 }
 0x679   :  { %v5355_v49 = vadd.f32 %v14141_v0, %v4837_v12  ;;  %v16238_v12 = vld [vmem:[#allocation88_spill] sm:$0xff] }
 0x67a   :  { %v5722_v26 = vpop.f32.mrf.mxu3  ;;  %v4895_v28 = vadd.f32 %v16238_v12, %v16237_v43  ;;  %v16251_v12 = vld [vmem:[#allocation58_spill] sm:$0xff] }
 0x67b   :  { %v14370_v44 = vadd.f32 %v5722_v26, %v5379_v30  ;;  %v5732_v33 = vadd.f32 %v14306_v22, %v5355_v49 }
 0x682   :  { %v5843_v7 = vpop.f32.mrf.mxu0 }
 0x683   :  { %v5857_v1 = vpop.f32.mrf.mxu1  ;;  %v6086_v27 = vadd.f32 %v5843_v7, %v5725_v23 }
 0x684   :  { %v6087_v52 = vadd.f32 %v5857_v1, %v5726_v31 }
 0x685   :  { %v6124_v13 = vadd.f32 %v14400_v18, %v6086_v27 }
 0x686   :  { %v5875_v3 = vpop.f32.mrf.mxu2  ;;  %v6125_v0 = vadd.f32 %v14402_v58, %v6087_v52 }
 0x687   :  { %v6090_v32 = vadd.f32 %v5875_v3, %v5729_v53  ;;  %v6156_v1 = vmax.f32 %v6124_v13, 0.0  ;;  %v4865_v3 = vadd.f32 %v13822_v35, %v13611_v25  ;;  %v16239_v13 = vld [vmem:[#allocation49_spill] sm:$0xff] }
 0x688   :  { %v6157_v15 = vmax.f32 %v6125_v0, 0.0 }
 0x689   :  { %v6128_v60 = vadd.f32 %v14400_v18, %v6090_v32  ;;  %v5357_v10 = vadd.f32 %v14158_v54, %v4865_v3  ;;  %v6220_v40 = vrot.slane %v6156_v1, 1  ;;  %v5356_v54 = vadd.f32 %v14171_v62, %v4851_v47 }
 0x68a   :  { %v5889_v24 = vpop.f32.mrf.mxu3  ;;  %v5845_v11 = vpop.f32.mrf.mxu0  ;;  %v6223_v20 = vrot.slane %v6157_v15, 1 }
 0x68b   :  { %v6091_v61 = vadd.f32 %v5889_v24, %v5730_v51  ;;  %v5859_v39 = vpop.f32.mrf.mxu1  ;;  %v6088_v30 = vadd.f32 %v5845_v11, %v5727_v14  ;;  %v6160_v48 = vmax.f32 %v6128_v60, 0.0  ;;  %v16236_v24 = vld [vmem:[#allocation27_spill] sm:$0xff]  ;;  %v5361_v60 = vadd.f32 %v14164_v5, %v4895_v28 }
 0x68c   :  { %v6089_v55 = vadd.f32 %v5859_v39, %v5728_v56  ;;  %v4881_v38 = vadd.f32 %v16236_v24, %v13615_v8  ;;  %v16249_v24 = vld [vmem:[#allocation103_spill] sm:$0xff] }
 0x68d   :  { %v6129_v16 = vadd.f32 %v14402_v58, %v6091_v61  ;;  %v14415_v34 = vadd.f32 %v14400_v18, %v6088_v30  ;;  %v6226_v23 = vrot.slane %v6160_v48, 1  ;;  %v5733_v30 = vadd.f32 %v14323_v2, %v5356_v54  ;;  %v16247_v2 = vld [vmem:[#allocation29_spill] sm:$0xff] }
 0x68e   :  { %v5877_v26 = vpop.f32.mrf.mxu2  ;;  %v14418_v42 = vadd.f32 %v14402_v58, %v6089_v55  ;;  %v5360_v56 = vadd.f32 %v14162_v57, %v4881_v38  ;;  %v5738_v0 = vadd.f32 %v16239_v13, %v5361_v60 }
 0x68f   :  { %v6092_v37 = vadd.f32 %v5877_v26, %v5731_v46  ;;  %v6161_v9 = vmax.f32 %v6129_v16, 0.0  ;;  %v6158_v22 = vmax.f32 %v14415_v34, 0.0  ;;  %v5734_v16 = vadd.f32 %v14317_v19, %v5357_v10  ;;  %v16240_v19 = vld [vmem:[#allocation83_spill] sm:$0xff]  ;;  %v16252_v10 = vld [vmem:[#allocation50_spill] sm:$0xff] }
 0x690   :  { %v6159_v36 = vmax.f32 %v14418_v42, 0.0  ;;  %v5737_v55 = vadd.f32 %v14319_v41, %v5360_v56  ;;  %v16254_v56 = vld [vmem:[#allocation95_spill] sm:$0xff] }
 0x691   :  { %v6130_v29 = vadd.f32 %v14400_v18, %v6092_v37  ;;  %v6221_v6 = vrot.slane %v6158_v22, 1  ;;  %v6229_v31 = vrot.slane %v6161_v9, 1  ;;  %v16242_v37 = vld [vmem:[#allocation127_spill] sm:$0xff] }
 0x692   :  { %v5891_v4 = vpop.f32.mrf.mxu3  ;;  %v6224_v50 = vrot.slane %v6159_v36, 1 }
 0x693   :  { %v6093_v17 = vadd.f32 %v5891_v4, %v5732_v33  ;;  %v6162_v53 = vmax.f32 %v6130_v29, 0.0  ;;  %v6222_v49 = vsel %vm1188_vm2, %v6220_v40, %v6221_v6  ;;  %v16241_v4 = vld [vmem:[#allocation89_spill] sm:$0xff]  ;;  %v16245_v29 = vld [vmem:[#allocation28_spill] sm:$0xff] }
 0x694   :  { %v6225_v14 = vsel %vm1188_vm2, %v6223_v20, %v6224_v50  ;;  %v14457_v33 = vmax.f32 %v6156_v1, %v6222_v49  ;;  %v4853_v34 = vadd.f32 %v16241_v4, %v16240_v19  ;;  %v16246_v1 = vld [vmem:[#allocation128_spill] sm:$0xff]  ;;  %v16253_v20 = vld [vmem:[#allocation61_spill] sm:$0xff]  ;;  %v14492_v54 = vmax.f32 %v6159_v36, %v6224_v50 }
 0x695   :  { %v6131_v7 = vadd.f32 %v14402_v58, %v6093_v17  ;;  %v6227_v32 = vrot.slane %v6162_v53, 1  ;;  %v14459_v62 = vmax.f32 %v6157_v15, %v6225_v14  ;;  %v16243_v17 = vld [vmem:[#allocation30_spill] sm:$0xff]  ;;  %v4897_v15 = vadd.f32 %v16247_v2, %v16246_v1  ;;  %v16256_v1 = vld [vmem:[#allocation129_spill] sm:$0xff] }
 0x696   :  { %v16257_v2 = vld [vmem:[#allocation33_spill] sm:$0xff] }
 0x697   :  { %v6163_v51 = vmax.f32 %v6131_v7, 0.0  ;;  %v14435_v27 = vmax.f32 %v6162_v53, %v6227_v32  ;;  %v6228_v8 = vsel %vm1188_vm2, %v6226_v23, %v6227_v32  ;;  %v9906_v23 = vpack.i.bf16 %v14459_v62, %v14457_v33  ;;  %v16250_v32 = vld [vmem:[#allocation45_spill] sm:$0xff] }
 0x698   :  { %v14441_v52 = vmax.f32 %v6160_v48, %v6228_v8  ;;  %v4867_v48 = vadd.f32 %v16243_v17, %v16242_v37  ;;  %v5363_v28 = vadd.f32 %v16251_v12, %v4897_v15  ;;  %v4925_v15 = vadd.f32 %v16257_v2, %v16256_v1  ;;  %v16261_v12 = vld [vmem:[#allocation42_spill] sm:$0xff]  ;;  %v16271_v1 = vld [vmem:[#allocation87_spill] sm:$0xff] }
 0x699   :  { %v6230_v61 = vrot.slane %v6163_v51, 1  ;;  %6376 = vrot.lane.b32.xlu0 %v14435_v27, %s10233_s1  ;;  %v16272_v2 = vld [vmem:[#allocation43_spill] sm:$0xff] }
 0x69a   :  { %v5907_v11 = vpop.f32.mrf.mxu0  ;;  %v5359_v38 = vadd.f32 %v16249_v24, %v4867_v48 }
 0x69b   :  { %v14437_v25 = vmax.f32 %v6163_v51, %v6230_v61  ;;  %v6231_v35 = vsel %vm1188_vm2, %v6229_v31, %v6230_v61  ;;  %v5921_v39 = vpop.f32.mrf.mxu1  ;;  %v6094_v41 = vadd.f32 %v5907_v11, %v5733_v30  ;;  %v16248_v51 = vld [vmem:[#allocation91_spill] sm:$0xff]  ;;  %v14477_v31 = vmax.f32 %v6158_v22, %v6221_v6 }
 0x69c   :  { %v14443_v59 = vmax.f32 %v6161_v9, %v6231_v35  ;;  %v6095_v57 = vadd.f32 %v5921_v39, %v5734_v16  ;;  %v16244_v9 = vld [vmem:[#allocation84_spill] sm:$0xff]  ;;  %v5358_v3 = vadd.f32 %v16248_v51, %v4853_v34  ;;  %v5736_v8 = vadd.f32 %v16253_v20, %v5359_v38  ;;  %v16255_v16 = vld [vmem:[#allocation107_spill] sm:$0xff] }
 0x69d   :  { %6378 = vrot.lane.b32.xlu1 %v14437_v25, %s10233_s1  ;;  %v4883_v7 = vadd.f32 %v16245_v29, %v16244_v9  ;;  %v6132_v35 = vadd.f32 %v14400_v18, %v6094_v41  ;;  %v5740_v11 = vadd.f32 %v16255_v16, %v5363_v28  ;;  %v16264_v16 = vld [vmem:[#allocation32_spill] sm:$0xff] }
 0x69e   :  { %v9901_v46 = vpack.i.bf16 %v14441_v52, %v14443_v59  ;;  %v5939_v26 = vpop.f32.mrf.mxu2  ;;  %v6133_v43 = vadd.f32 %v14402_v58, %v6095_v57  ;;  %v5735_v40 = vadd.f32 %v16252_v10, %v5358_v3 }
 0x69f   :  { %v6098_v47 = vadd.f32 %v5939_v26, %v5737_v55  ;;  %v5362_v61 = vadd.f32 %v16250_v32, %v4883_v7  ;;  %v6164_v36 = vmax.f32 %v6132_v35, 0.0  ;;  %v16259_v32 = vld [vmem:[#allocation31_spill] sm:$0xff] }
 0x6a0   :  { %9902 = vrot.lane.b32.xlu2 %v9901_v46, %s10233_s1  ;;  %v6165_v30 = vmax.f32 %v6133_v43, 0.0  ;;  %v16260_v43 = vld [vmem:[#allocation130_spill] sm:$0xff] }
 0x6a1   :  { %9907 = vrot.lane.b32.xlu0 %v9906_v23, %s10233_s1  ;;  %v6136_v22 = vadd.f32 %v14400_v18, %v6098_v47  ;;  %v5739_v60 = vadd.f32 %v16254_v56, %v5362_v61  ;;  %v6232_v41 = vrot.slane %v6164_v36, 1  ;;  %v16258_v23 = vld [vmem:[#allocation85_spill] sm:$0xff]  ;;  %v4955_v28 = vadd.f32 %v16261_v12, %v16260_v43 }
 0x6a2   :  { %v5953_v5 = vpop.f32.mrf.mxu3  ;;  %v5909_v49 = vpop.f32.mrf.mxu0  ;;  %v6235_v17 = vrot.slane %v6165_v30, 1  ;;  %v4911_v61 = vadd.f32 %v16259_v32, %v16258_v23  ;;  %v16276_v23 = vld [vmem:[#allocation36_spill] sm:$0xff] }
 0x6a3   :  { %v6099_v53 = vadd.f32 %v5953_v5, %v5738_v0  ;;  %v5923_v14 = vpop.f32.mrf.mxu1  ;;  %v6096_v39 = vadd.f32 %v5909_v49, %v5735_v40  ;;  %v6168_v50 = vmax.f32 %v6136_v22, 0.0  ;;  %v16262_v40 = vld [vmem:[#allocation104_spill] sm:$0xff] }
 0x6a4   :  { %v6097_v46 = vadd.f32 %v5923_v14, %v5736_v8  ;;  %v5365_v20 = vadd.f32 %v16262_v40, %v4925_v15  ;;  %v4913_v15 = vadd.f32 %v16272_v2, %v16271_v1  ;;  %v16279_v40 = vld [vmem:[#allocation39_spill] sm:$0xff] }
 0x6a5   :  { %6368 = vrot.lane.b32.xlu1 %v14477_v31, %s10233_s1  ;;  %v6137_v6 = vadd.f32 %v14402_v58, %v6099_v53  ;;  %v6134_v0 = vadd.f32 %v14400_v18, %v6096_v39  ;;  %v6238_v47 = vrot.slane %v6168_v50, 1  ;;  %v16265_v39 = vld [vmem:[#allocation92_spill] sm:$0xff] }
 0x6a6   :  { %v5941_v55 = vpop.f32.mrf.mxu2  ;;  %v6135_v57 = vadd.f32 %v14402_v58, %v6097_v46  ;;  %v5364_v46 = vadd.f32 %v16265_v39, %v4911_v61  ;;  %v16277_v61 = vld [vmem:[#allocation96_spill] sm:$0xff]  ;;  %v16282_v39 = vld [vmem:[#allocation47_spill] sm:$0xff] }
 0x6a7   :  { %v6100_v26 = vadd.f32 %v5941_v55, %v5739_v60  ;;  %v6169_v5 = vmax.f32 %v6137_v6, 0.0  ;;  %v6166_v19 = vmax.f32 %v6134_v0, 0.0  ;;  %v16263_v60 = vld [vmem:[#allocation86_spill] sm:$0xff]  ;;  %v16266_v55 = vld [vmem:[#allocation59_spill] sm:$0xff] }
 0x6a8   :  { %6370 = vrot.lane.b32.xlu2 %v14492_v54, %s10233_s1  ;;  %v6167_v4 = vmax.f32 %v6135_v57, 0.0  ;;  %v16267_v0 = vld [vmem:[#allocation62_spill] sm:$0xff] }
 0x6a9   :  { %v6138_v34 = vadd.f32 %v14400_v18, %v6100_v26  ;;  %v6233_v48 = vrot.slane %v6166_v19, 1  ;;  %v6241_v53 = vrot.slane %v6169_v5, 1  ;;  %v5742_v57 = vadd.f32 %v16267_v0, %v5365_v20  ;;  %v16284_v0 = vld [vmem:[#allocation52_spill] sm:$0xff] }
 0x6aa   :  { %v5955_v13 = vpop.f32.mrf.mxu3  ;;  %v6236_v9 = vrot.slane %v6167_v4, 1 }
 0x6ab   :  { %v6101_v42 = vadd.f32 %v5955_v13, %v5740_v11  ;;  %v6170_v29 = vmax.f32 %v6138_v34, 0.0  ;;  %v6234_v10 = vsel %vm1188_vm2, %v6232_v41, %v6233_v48  ;;  %v4941_v11 = vadd.f32 %v16264_v16, %v16263_v60  ;;  %v16270_v34 = vld [vmem:[#allocation108_spill] sm:$0xff]  ;;  %v16273_v41 = vld [vmem:[#allocation131_spill] sm:$0xff]  ;;  %v16281_v60 = vld [vmem:[#allocation105_spill] sm:$0xff] }
 0x6ac   :  { %v14504_v24 = vmax.f32 %v6167_v4, %v6236_v9  ;;  %v6237_v38 = vsel %vm1188_vm2, %v6235_v17, %v6236_v9  ;;  %v14523_v14 = vmax.f32 %v6164_v36, %v6234_v10  ;;  %v5369_v13 = vadd.f32 %v16266_v55, %v4955_v28  ;;  %v16268_v36 = vld [vmem:[#allocation46_spill] sm:$0xff]  ;;  %v16278_v10 = vld [vmem:[#allocation25_spill] sm:$0xff]  ;;  %v16283_v55 = vld [vmem:[#allocation40_spill] sm:$0xff] }
 0x6ad   :  { %v6139_v37 = vadd.f32 %v14402_v58, %v6101_v42  ;;  %v6239_v51 = vrot.slane %v6170_v29, 1  ;;  %v14519_v6 = vmax.f32 %v6165_v30, %v6237_v38  ;;  %v16275_v38 = vld [vmem:[#allocation24_spill] sm:$0xff]  ;;  %v4957_v20 = vadd.f32 %v16279_v40, %v16278_v10 }
 0x6ae   :  { %6386 = vrot.lane.b32.xlu1 %v14504_v24, %s10233_s1  ;;  %v4943_v32 = vadd.f32 %v16276_v23, %v16275_v38 }
 0x6af   :  { %v6171_v7 = vmax.f32 %v6139_v37, 0.0  ;;  %v6240_v22 = vsel %vm1188_vm2, %v6238_v47, %v6239_v51  ;;  %v5746_v37 = vadd.f32 %v16270_v34, %v5369_v13  ;;  %v16274_v47 = vld [vmem:[#allocation38_spill] sm:$0xff]  ;;  %v5371_v13 = vadd.f32 %v16283_v55, %v4957_v20  ;;  %v16287_v34 = vld [vmem:[#allocation109_spill] sm:$0xff] }
 0x6b0   :  { %v14525_v56 = vmax.f32 %v6168_v50, %v6240_v22  ;;  %v5368_v50 = vadd.f32 %v16268_v36, %v4941_v11  ;;  %v14555_v11 = vmax.f32 %v6170_v29, %v6239_v51 }
 0x6b1   :  { %v6242_v3 = vrot.slane %v6171_v7, 1 }
 0x6b2   :  { %v5971_v30 = vpop.f32.mrf.mxu0  ;;  %v5745_v43 = vadd.f32 %v16277_v61, %v5368_v50  ;;  %v9916_v50 = vpack.i.bf16 %v14525_v56, %v14523_v14 }
 0x6b3   :  { %v14515_v8 = vmax.f32 %v6171_v7, %v6242_v3  ;;  %v6243_v35 = vsel %vm1188_vm2, %v6241_v53, %v6242_v3  ;;  %v5985_v26 = vpop.f32.mrf.mxu1  ;;  %v4927_v53 = vadd.f32 %v16274_v47, %v16273_v41  ;;  %v14544_v3 = vmax.f32 %v6166_v19, %v6233_v48 }
 0x6b4   :  { %v14521_v49 = vmax.f32 %v6169_v5, %v6243_v35  ;;  %v16269_v5 = vld [vmem:[#allocation51_spill] sm:$0xff]  ;;  %v6103_v17 = vadd.f32 %v5985_v26, %v5742_v57  ;;  %v16280_v35 = vld [vmem:[#allocation93_spill] sm:$0xff] }
 0x6b5   :  { %6394 = vrot.lane.b32.xlu0 %v14515_v8, %s10233_s1  ;;  %v5741_v4 = vadd.f32 %v16269_v5, %v5364_v46  ;;  %v5366_v22 = vadd.f32 %v16280_v35, %v4913_v15  ;;  %v5367_v16 = vadd.f32 %v16281_v60, %v4927_v53  ;;  %v5370_v46 = vadd.f32 %v16282_v39, %v4943_v32  ;;  %v16286_v5 = vld [vmem:[#allocation97_spill] sm:$0xff] }
 0x6b6   :  { %v9911_v42 = vpack.i.bf16 %v14521_v49, %v14519_v6  ;;  %v6003_v9 = vpop.f32.mrf.mxu2  ;;  %6384 = vrot.lane.b32.xlu1 %v14544_v3, %s10233_s1  ;;  %v6141_v19 = vadd.f32 %v14402_v58, %v6103_v17 }
 0x6b7   :  { %v6102_v12 = vadd.f32 %v5971_v30, %v5741_v4  ;;  %v6106_v48 = vadd.f32 %v6003_v9, %v5745_v43  ;;  %v5743_v57 = vadd.f32 %v16284_v0, %v5366_v22  ;;  %v16285_v30 = vld [vmem:[#allocation63_spill] sm:$0xff]  ;;  %v5747_v4 = vadd.f32 %v16286_v5, %v5370_v46  ;;  %v16289_v5 = vld [vmem:[#allocation94_spill] sm:$0xff] }
 0x6b8   :  { %9912 = vrot.lane.b32.xlu2 %v9911_v42, %s10233_s1  ;;  %v5744_v26 = vadd.f32 %v16285_v30, %v5367_v16 }
 0x6b9   :  { %v6140_v42 = vadd.f32 %v14400_v18, %v6102_v12  ;;  %v6144_v1 = vadd.f32 %v14400_v18, %v6106_v48 }
 0x6ba   :  { %v6017_v7 = vpop.f32.mrf.mxu3  ;;  %v5973_v29 = vpop.f32.mrf.mxu0 }
 0x6bb   :  { %v6107_v28 = vadd.f32 %v6017_v7, %v5746_v37  ;;  %v5987_v51 = vpop.f32.mrf.mxu1  ;;  %v5748_v37 = vadd.f32 %v16287_v34, %v5371_v13  ;;  %v6104_v17 = vadd.f32 %v5973_v29, %v5743_v57  ;;  %v6173_v7 = vmax.f32 %v6141_v19, 0.0  ;;  %v16290_v34 = vld [vmem:[#allocation34_spill] sm:$0xff] }
 0x6bc   :  { %v6105_v9 = vadd.f32 %v5987_v51, %v5744_v26  ;;  %v6172_v23 = vmax.f32 %v6140_v42, 0.0  ;;  %v6176_v40 = vmax.f32 %v6144_v1, 0.0 }
 0x6bd   :  { %6392 = vrot.lane.b32.xlu0 %v14555_v11, %s10233_s1  ;;  %v6145_v36 = vadd.f32 %v14402_v58, %v6107_v28  ;;  %v6142_v41 = vadd.f32 %v14400_v18, %v6104_v17  ;;  %v6247_v10 = vrot.slane %v6173_v7, 1 }
 0x6be   :  { %v6005_v2 = vpop.f32.mrf.mxu2  ;;  %v6143_v47 = vadd.f32 %v14402_v58, %v6105_v9  ;;  %v6244_v16 = vrot.slane %v6172_v23, 1  ;;  %v6250_v13 = vrot.slane %v6176_v40, 1  ;;  %v16292_v9 = vld [vmem:[#allocation44_spill] sm:$0xff] }
 0x6bf   :  { %v6108_v53 = vadd.f32 %v6005_v2, %v5747_v4  ;;  %v6177_v32 = vmax.f32 %v6145_v36, 0.0  ;;  %v6174_v61 = vmax.f32 %v6142_v41, 0.0 }
 0x6c0   :  { %9917 = vrot.lane.b32.xlu2 %v9916_v50, %s10233_s1  ;;  %v6175_v43 = vmax.f32 %v6143_v47, 0.0  ;;  %v16288_v50 = vld [vmem:[#allocation37_spill] sm:$0xff]  ;;  %v16294_v47 = vld [vmem:[#allocation35_spill] sm:$0xff] }
 0x6c1   :  { %v14575_v12 = vadd.f32 %v14400_v18, %v6108_v53  ;;  %v6245_v20 = vrot.slane %v6174_v61, 1  ;;  %v6253_v19 = vrot.slane %v6177_v32, 1  ;;  %v5372_v4 = vadd.f32 %v16289_v5, %v16288_v50  ;;  %v16295_v53 = vld [vmem:[#allocation48_spill] sm:$0xff]  ;;  %v16302_v5 = vld [vmem:[#allocation106_spill] sm:$0xff] }
 0x6c2   :  { %v6019_v15 = vpop.f32.mrf.mxu3  ;;  %v6248_v35 = vrot.slane %v6175_v43, 1 }
 0x6c3   :  { %v6109_v38 = vadd.f32 %v6019_v15, %v5748_v37  ;;  %v6178_v22 = vmax.f32 %v14575_v12, 0.0  ;;  %v6246_v57 = vsel %vm1188_vm2, %v6244_v16, %v6245_v20  ;;  %v16291_v37 = vld [vmem:[#allocation41_spill] sm:$0xff]  ;;  %v16299_v16 = vld [vmem:[#allocation26_spill] sm:$0xff] }
 0x6c4   :  { %v14583_v46 = vmax.f32 %v6175_v43, %v6248_v35  ;;  %v6249_v55 = vsel %vm1188_vm2, %v6247_v10, %v6248_v35  ;;  %v14594_v42 = vmax.f32 %v6172_v23, %v6246_v57  ;;  %v5373_v17 = vadd.f32 %v16291_v37, %v16290_v34  ;;  %v16296_v23 = vld [vmem:[#allocation53_spill] sm:$0xff]  ;;  %v16297_v43 = vld [vmem:[#allocation64_spill] sm:$0xff]  ;;  %v16298_v10 = vld [vmem:[#allocation110_spill] sm:$0xff] }
 0x6c5   :  { %v6147_v28 = vadd.f32 %v14402_v58, %v6109_v38  ;;  %v14581_v48 = vrot.slane %v6178_v22, 1  ;;  %v14586_v0 = vmax.f32 %v6173_v7, %v6249_v55  ;;  %v16293_v7 = vld [vmem:[#allocation60_spill] sm:$0xff]  ;;  %v5376_v38 = vadd.f32 %v16295_v53, %v16294_v47 }
 0x6c6   :  { %6402 = vrot.lane.b32.xlu1 %v14583_v46, %s10233_s1  ;;  %v5377_v1 = vadd.f32 %v16293_v7, %v16292_v9  ;;  %v14620_v55 = vmax.f32 %v6174_v61, %v6245_v20 }
 0x6c7   :  { %v6179_v60 = vmax.f32 %v6147_v28, 0.0  ;;  %v6252_v29 = vsel %vm1188_vm2, %v6250_v13, %v14581_v48  ;;  %v5750_v28 = vadd.f32 %v16297_v43, %v5373_v17  ;;  %v16301_v13 = vld [vmem:[#allocation98_spill] sm:$0xff] }
 0x6c8   :  { %v14602_v51 = vmax.f32 %v6176_v40, %v6252_v29  ;;  %v5754_v40 = vadd.f32 %v16298_v10, %v5377_v1  ;;  %v5753_v57 = vadd.f32 %v16301_v13, %v5376_v38 }
 0x6c9   :  { %v6254_v39 = vrot.slane %v6179_v60, 1 }
 0x6ca   :  { %v6035_v2 = vpop.f32.mrf.mxu0 }
 0x6cb   :  { %v14591_v30 = vmax.f32 %v6179_v60, %v6254_v39  ;;  %v6255_v26 = vsel %vm1188_vm2, %v6253_v19, %v6254_v39  ;;  %v6049_v15 = vpop.f32.mrf.mxu1  ;;  %v16300_v19 = vld [vmem:[#allocation90_spill] sm:$0xff] }
 0x6cc   :  { %v14596_v36 = vmax.f32 %v6177_v32, %v6255_v26  ;;  %v5749_v32 = vadd.f32 %v16296_v23, %v5372_v4  ;;  %v4973_v39 = vadd.f32 %v16300_v19, %v16299_v16  ;;  %v6111_v29 = vadd.f32 %v6049_v15, %v5750_v28 }
 0x6cd   :  { %6410 = vrot.lane.b32.xlu0 %v14591_v30, %s10233_s1 }
 0x6ce   :  { %v9921_v41 = vpack.i.bf16 %v14596_v36, %v14586_v0  ;;  %v6067_v35 = vpop.f32.mrf.mxu2  ;;  %v6110_v26 = vadd.f32 %v6035_v2, %v5749_v32  ;;  %v5374_v4 = vadd.f32 %v16302_v5, %v4973_v39  ;;  %6400 = vrot.lane.b32.xlu1 %v14620_v55, %s10233_s1  ;;  %v6149_v9 = vadd.f32 %v14402_v58, %v6111_v29 }
 0x6cf   :  { %v6114_v34 = vadd.f32 %v6067_v35, %v5753_v57 }
 0x6d0   :  { %9922 = vrot.lane.b32.xlu2 %v9921_v41, %s10233_s1  ;;  %v5751_v37 = vadd.f32 %v14372_v21, %v5374_v4  ;;  %v6148_v17 = vadd.f32 %v14400_v18, %v6110_v26  ;;  %v6181_v43 = vmax.f32 %v6149_v9, 0.0 }
 0x6d1   :  { %v6152_v15 = vadd.f32 %v14400_v18, %v6114_v34 }
 0x6d2   :  { %v6081_v60 = vpop.f32.mrf.mxu3  ;;  %v6037_v20 = vpop.f32.mrf.mxu0  ;;  %v6180_v32 = vmax.f32 %v6148_v17, 0.0  ;;  %v6259_v26 = vrot.slane %v6181_v43, 1 }
 0x6d3   :  { %v6115_v50 = vadd.f32 %v6081_v60, %v5754_v40  ;;  %v6051_v7 = vpop.f32.mrf.mxu1  ;;  %v6112_v1 = vadd.f32 %v6037_v20, %v5751_v37  ;;  %v6184_v60 = vmax.f32 %v6152_v15, 0.0 }
 0x6d4   :  { %v6113_v2 = vadd.f32 %v6051_v7, %v14366_v45  ;;  %v6256_v57 = vrot.slane %v6180_v32, 1 }
 0x6d5   :  { %v6153_v61 = vadd.f32 %v14402_v58, %v6115_v50  ;;  %v6150_v21 = vadd.f32 %v14400_v18, %v6112_v1  ;;  %v6262_v4 = vrot.slane %v6184_v60, 1  ;;  %v14666_v1 = vmax.f32 %v6178_v22, %v14581_v48 }
 0x6d6   :  { %v6069_v41 = vpop.f32.mrf.mxu2  ;;  %v6151_v53 = vadd.f32 %v14402_v58, %v6113_v2 }
 0x6d7   :  { %v6116_v38 = vadd.f32 %v6069_v41, %v14368_v63  ;;  %v6185_v28 = vmax.f32 %v6153_v61, 0.0  ;;  %v6182_v10 = vmax.f32 %v6150_v21, 0.0 }
 0x6d8   :  { %6396 = vrot.lane.b32.xlu2 %v14594_v42, %s10233_s1  ;;  %v6183_v45 = vmax.f32 %v6151_v53, 0.0 }
 0x6d9   :  { %v6154_v40 = vadd.f32 %v14400_v18, %v6116_v38  ;;  %v6257_v16 = vrot.slane %v6182_v10, 1  ;;  %v6265_v29 = vrot.slane %v6185_v28, 1 }
 0x6da   :  { %v6083_v47 = vpop.f32.mrf.mxu3  ;;  %v6260_v19 = vrot.slane %v6183_v45, 1 }
 0x6db   :  { %v6117_v23 = vadd.f32 %v6083_v47, %v14370_v44  ;;  %v6186_v39 = vmax.f32 %v6154_v40, 0.0  ;;  %v14640_v44 = vmax.f32 %v6182_v10, %v6257_v16  ;;  %v6258_v34 = vsel %vm1188_vm2, %v6256_v57, %v6257_v16  ;;  %v14689_v10 = vld [vmem:[#allocation8] sm:$0x1f] }
 0x6dc   :  { %v14642_v5 = vmax.f32 %v6183_v45, %v6260_v19  ;;  %v6261_v18 = vsel %vm1188_vm2, %v6259_v26, %v6260_v19 }
 0x6dd   :  { %v6155_v35 = vadd.f32 %v14402_v58, %v6117_v23  ;;  %v6263_v63 = vrot.slane %v6186_v39, 1  ;;  %6416 = vrot.lane.b32.xlu0 %v14640_v44, %s10233_s1  ;;  %v14650_v58 = vmax.f32 %v6180_v32, %v6258_v34  ;;  %v14652_v37 = vmax.f32 %v6181_v43, %v6261_v18 }
 0x6de   :  { %6418 = vrot.lane.b32.xlu1 %v14642_v5, %s10233_s1 }
 0x6df   :  { %v6187_v13 = vmax.f32 %v6155_v35, 0.0  ;;  %v6264_v61 = vsel %vm1188_vm2, %v6262_v4, %v6263_v63  ;;  %v9926_v20 = vpack.i.bf16 %v14652_v37, %v14650_v58  ;;  %v14677_v41 = vmax.f32 %v6186_v39, %v6263_v63 }
 0x6e0   :  { %v14660_v7 = vmax.f32 %v6184_v60, %v6264_v61 }
 0x6e1   :  { %v6266_v50 = vrot.slane %v6187_v13, 1  ;;  %9927 = vrot.lane.b32.xlu2 %v9926_v20, %s10233_s1 }
 0x6e3   :  { %v6267_v17 = vsel %vm1188_vm2, %v6265_v29, %v6266_v50  ;;  %v14673_v15 = vmax.f32 %v6187_v13, %v6266_v50 }
 0x6e4   :  { %v14655_v9 = vmax.f32 %v6185_v28, %v6267_v17 }
 0x6e5   :  { %6408 = vrot.lane.b32.xlu0 %v14666_v1, %s10233_s1 }
 0x6e6   :  { %v9931_v2 = vpack.i.bf16 %v14655_v9, %v14602_v51 }
 0x6e8   :  { %9932 = vrot.lane.b32.xlu1 %v9931_v2, %s10233_s1 }
 0x6e9   :  { %6426 = vrot.lane.b32.xlu2 %v14673_v15, %s10233_s1 }
 0x6ed   :  { %6424 = vrot.lane.b32.xlu0 %v14677_v41, %s10233_s1 }
 0x6f0   :  { %6420 = vrot.lane.b32.xlu1 %v14660_v7, %s10233_s1 }
 0x6fa   :  { %v9903_v12 = vpop.permute.xlu2 %9902 }
 0x6fb   :  { %v9905_v22 = vunpack.i.h.bf16 %v9903_v12  ;;  %v9904_v48 = vunpack.i.l.bf16 %v9903_v12 }
 0x6fd   :  { %v6430_v32 = vsel %vm3244_vm5, %v9905_v22, %v9904_v48  ;;  %v6481_v28 = vmax.f32 %v14443_v59, %v9904_v48 }
 0x6fe   :  { %v6480_v45 = vmax.f32 %v14441_v52, %v6430_v32 }
 0x702   :  { %v6371_v47 = vpop.permute.xlu2 %6370 }
 0x703   :  { %v6479_v39 = vmax.f32 %v14492_v54, %v6371_v47 }
 0x70b   :  { %v6377_v21 = vpop.permute.xlu0 %6376 }
 0x70f   :  { %v6379_v53 = vpop.permute.xlu1 %6378 }
 0x710   :  { %v6431_v38 = vsel %vm3244_vm5, %v6377_v21, %v6379_v53  ;;  %v6483_v23 = vmax.f32 %v14437_v25, %v6379_v53 }
 0x711   :  { %v6482_v43 = vmax.f32 %v14435_v27, %v6431_v38 }
 0x712   :  { %9363 = vmatpush.msk.msrb.mxu2 %vm6513_vm11, %v6483_v23  ;;  %v9913_v25 = vpop.permute.xlu2 %9912 }
 0x713   :  { %9361 = vmatpush.msk.msra.mxu1 %vm6513_vm11, %v6482_v43  ;;  %v9908_v27 = vpop.permute.xlu0 %9907  ;;  %v9914_v26 = vunpack.i.l.bf16 %v9913_v25  ;;  %v9915_v29 = vunpack.i.h.bf16 %v9913_v25 }
 0x714   :  { %6601 = vmatpush.msrb.mxu2 %v6481_v28  ;;  %v9910_v40 = vunpack.i.h.bf16 %v9908_v27  ;;  %v9909_v35 = vunpack.i.l.bf16 %v9908_v27 }
 0x715   :  { %6581 = vmatpush.msra.mxu1 %v6480_v45  ;;  %9364 = vmatmul.msk.f32.vlgmr.msrb.gmra.mxu2 %vm6509_vm12, %v14689_v10 }
 0x716   :  { %9362 = vmatmul.msk.f32.vlgmr.msra.gmra.mxu1 %vm6509_vm12, %v14689_v10  ;;  %v6428_v19 = vsel %vm3244_vm5, %v9909_v35, %v9910_v40  ;;  %v6477_v13 = vmax.f32 %v14459_v62, %v9910_v40  ;;  %v6489_v62 = vmax.f32 %v14521_v49, %v9915_v29 }
 0x717   :  { %v6369_v59 = vpop.permute.xlu1 %6368  ;;  %v6476_v52 = vmax.f32 %v14457_v33, %v6428_v19  ;;  %v6485_v33 = vmax.f32 %v14519_v6, %v9914_v26 }
 0x718   :  { %v6429_v60 = vsel %vm3244_vm5, %v6369_v59, %v6371_v47 }
 0x719   :  { %v6478_v16 = vmax.f32 %v14477_v31, %v6429_v60 }
 0x71a   :  { %v9918_v57 = vpop.permute.xlu2 %9917 }
 0x71b   :  { %9357 = vmatpush.msk.msrb.mxu0 %vm6513_vm11, %v6478_v16  ;;  %v9919_v4 = vunpack.i.l.bf16 %v9918_v57 }
 0x71d   :  { %6535 = vmatpush.msrb.mxu0 %v6476_v52  ;;  %v6432_v18 = vsel %vm3244_vm5, %v9919_v4, %v9914_v26  ;;  %v14807_v4 = vld [vmem:[#allocation10 + $0x58] sm:$0xff] }
 0x71e   :  { %9358 = vmatmul.msk.f32.vlgmr.msrb.gmra.mxu0 %vm6509_vm12, %v14689_v10  ;;  %v6484_v12 = vmax.f32 %v14523_v14, %v6432_v18  ;;  %v14848_v18 = vld [vmem:[#allocation10 + $0x28] sm:$0xff] }
 0x71f   :  { %9359 = vmatpush.msk.msra.mxu0 %vm6513_vm11, %v6479_v39  ;;  %v14774_v39 = vld [vmem:[#allocation10 + $0x70] sm:$0xff] }
 0x720   :  { %v6387_v31 = vpop.permute.xlu1 %6386 }
 0x721   :  { %6555 = vmatpush.msra.mxu0 %v6477_v13  ;;  %v6487_v63 = vmax.f32 %v14504_v24, %v6387_v31  ;;  %v9920_v24 = vunpack.i.h.bf16 %v9918_v57  ;;  %v14780_v57 = vld [vmem:[#allocation10 + $0x90] sm:$0xff] }
 0x723   :  { %9367 = vmatpush.msk.msrb.mxu1 %vm6513_vm11, %v6487_v63  ;;  %v6434_v20 = vsel %vm3244_vm5, %v9920_v24, %v9915_v29  ;;  %v14784_v29 = vld [vmem:[#allocation10 + $0x68] sm:$0xff]  ;;  %v14813_v24 = vld [vmem:[#allocation10 + $0x50] sm:$0xff] }
 0x724   :  { %v6488_v22 = vmax.f32 %v14525_v56, %v6434_v20  ;;  %v14868_v20 = vld [vmem:[#allocation10 + $0x8] sm:$0xff] }
 0x725   :  { %6647 = vmatpush.msrb.mxu1 %v6485_v33 }
 0x726   :  { %9360 = vmatmul.msk.f32.vlgmr.msra.gmra.mxu0 %vm6509_vm12, %v14689_v10  ;;  %9368 = vmatmul.msk.f32.vlgmr.msrb.gmra.mxu1 %vm6509_vm12, %v14689_v10 }
 0x727   :  { %v6395_v50 = vpop.permute.xlu0 %6394 }
 0x728   :  { %v6491_v54 = vmax.f32 %v14515_v8, %v6395_v50  ;;  %v6385_v6 = vpop.permute.xlu1 %6384 }
 0x729   :  { %v6433_v8 = vsel %vm3244_vm5, %v6385_v6, %v6387_v31 }
 0x72a   :  { %9371 = vmatpush.msk.msrb.mxu3 %vm6513_vm11, %v6491_v54  ;;  %v14715_v34 = vpop.permute.xlu2 %9922  ;;  %v6486_v49 = vmax.f32 %v14544_v3, %v6433_v8  ;;  %v14836_v8 = vld [vmem:[#allocation10 + $0x38] sm:$0xff] }
 0x72b   :  { %v9924_v48 = vunpack.i.l.bf16 %v14715_v34  ;;  %v9925_v47 = vunpack.i.h.bf16 %v14715_v34 }
 0x72c   :  { %6693 = vmatpush.msrb.mxu3 %v6489_v62  ;;  %9365 = vmatpush.msk.msrb.mxu0 %vm6513_vm11, %v6486_v49  ;;  %v14853_v49 = vld [vmem:[#allocation10 + $0x20] sm:$0xff] }
 0x72d   :  { %9372 = vmatmul.msk.f32.vlgmr.msrb.gmra.mxu3 %vm6509_vm12, %v14689_v10  ;;  %v6493_v38 = vmax.f32 %v14586_v0, %v9924_v48  ;;  %v6497_v23 = vmax.f32 %v14596_v36, %v9925_v47 }
 0x72e   :  { %6627 = vmatpush.msrb.mxu0 %v6484_v12 }
 0x72f   :  { %v6393_v17 = vpop.permute.xlu0 %6392  ;;  %9366 = vmatmul.msk.f32.vlgmr.msrb.gmra.mxu0 %vm6509_vm12, %v14689_v10 }
 0x730   :  { %v6435_v61 = vsel %vm3244_vm5, %v6393_v17, %v6395_v50  ;;  %v14790_v50 = vld [vmem:[#allocation10 + $0x88] sm:$0xff]  ;;  %v14858_v17 = vld [vmem:[#allocation10 + $0x18] sm:$0xff] }
 0x731   :  { %v6490_v2 = vmax.f32 %v14555_v11, %v6435_v61  ;;  %v14863_v61 = vld [vmem:[#allocation10 + $0x10] sm:$0xff] }
 0x732   :  { %v6397_v3 = vpop.permute.xlu2 %6396 }
 0x733   :  { %9369 = vmatpush.msk.msra.mxu2 %vm6513_vm11, %v6490_v2  ;;  %v14873_v2 = vld [vmem:[#allocation10] sm:$0xff] }
 0x735   :  { %6673 = vmatpush.msra.mxu2 %v6488_v22 }
 0x736   :  { %9370 = vmatmul.msk.f32.vlgmr.msra.gmra.mxu2 %vm6509_vm12, %v14689_v10 }
 0x738   :  { %v6403_v11 = vpop.permute.xlu1 %6402 }
 0x739   :  { %v6495_v14 = vmax.f32 %v14583_v46, %v6403_v11  ;;  %v6436_v46 = vsel %vm3244_vm5, %v6397_v3, %v9924_v48 }
 0x73a   :  { %v6492_v28 = vmax.f32 %v14594_v42, %v6436_v46 }
 0x73b   :  { %v9928_v21 = vpop.permute.xlu2 %9927  ;;  %9375 = vmatpush.msk.msra.mxu1 %vm6513_vm11, %v6495_v14 }
 0x73c   :  { %v9930_v45 = vunpack.i.h.bf16 %v9928_v21  ;;  %v9929_v25 = vunpack.i.l.bf16 %v9928_v21 }
 0x73d   :  { %6739 = vmatpush.msra.mxu1 %v6493_v38 }
 0x73e   :  { %9376 = vmatmul.msk.f32.vlgmr.msra.gmra.mxu1 %vm6509_vm12, %v14689_v10  ;;  %v6501_v35 = vmax.f32 %v14652_v37, %v9930_v45  ;;  %v14771_v37 = vld [vmem:[#allocation10 + $0x98] sm:$0x7f] }
 0x73f   :  { %v6411_v53 = vpop.permute.xlu0 %6410 }
 0x740   :  { %v6499_v56 = vmax.f32 %v14591_v30, %v6411_v53  ;;  %v6401_v32 = vpop.permute.xlu1 %6400 }
 0x741   :  { %v6437_v0 = vsel %vm3244_vm5, %v6401_v32, %v6403_v11  ;;  %v14989_v32 = vld [vmem:[%s15686_s9 + $0x40] sm:$0xff] }
 0x742   :  { %9379 = vmatpush.msk.msra.mxu3 %vm6513_vm11, %v6499_v56  ;;  %v6494_v30 = vmax.f32 %v14620_v55, %v6437_v0 }
 0x743   :  { %v6427_v43 = vpop.permute.xlu2 %6426 }
 0x744   :  { %6785 = vmatpush.msra.mxu3 %v6497_v23  ;;  %v6507_v36 = vmax.f32 %v14673_v15, %v6427_v43  ;;  %9373 = vmatpush.msk.msra.mxu0 %vm6513_vm11, %v6494_v30  ;;  %v6440_v15 = vsel %vm3244_vm5, %v9929_v25, %v9930_v45  ;;  %v14981_v23 = vld [vmem:[%s15686_s9 + $0x48] sm:$0xff]  ;;  %v15031_v45 = vld [vmem:[%s15686_s9 + $0x30] sm:$0xff] }
 0x745   :  { %9380 = vmatmul.msk.f32.vlgmr.msra.gmra.mxu3 %vm6509_vm12, %v14689_v10  ;;  %v6500_v60 = vmax.f32 %v14650_v58, %v6440_v15  ;;  %v15040_v25 = vld [vmem:[%s15686_s9 + $0x28] sm:$0xff] }
 0x746   :  { %9387 = vmatpush.msk.msrb.mxu3 %vm6513_vm11, %v6507_v36  ;;  %6719 = vmatpush.msra.mxu0 %v6492_v28  ;;  %v15022_v28 = vld [vmem:[%s15686_s9 + $0x38] sm:$0xff] }
 0x747   :  { %9374 = vmatmul.msk.f32.vlgmr.msra.gmra.mxu0 %vm6509_vm12, %v14689_v10 }
 0x74f   :  { %v6417_v27 = vpop.permute.xlu0 %6416 }
 0x750   :  { %v6419_v59 = vpop.permute.xlu1 %6418 }
 0x751   :  { %v6441_v40 = vsel %vm3244_vm5, %v6417_v27, %v6419_v59  ;;  %v6503_v55 = vmax.f32 %v14642_v5, %v6419_v59  ;;  %v14768_v5 = vld [vmem:[#allocation10 + $0x78] sm:$0xff] }
 0x752   :  { %v6502_v42 = vmax.f32 %v14640_v44, %v6441_v40 }
 0x753   :  { %9383 = vmatpush.msk.msrb.mxu1 %vm6513_vm11, %v6503_v55 }
 0x754   :  { %9381 = vmatpush.msk.msrb.mxu0 %vm6513_vm11, %v6502_v42 }
 0x755   :  { %6831 = vmatpush.msrb.mxu1 %v6501_v35 }
 0x756   :  { %6811 = vmatpush.msrb.mxu0 %v6500_v60  ;;  %9384 = vmatmul.msk.f32.vlgmr.msrb.gmra.mxu1 %vm6509_vm12, %v14689_v10 }
 0x757   :  { %9382 = vmatmul.msk.f32.vlgmr.msrb.gmra.mxu0 %vm6509_vm12, %v14689_v10  ;;  %v6409_v16 = vpop.permute.xlu0 %6408  ;;  %9389 = vmatpush.msk.msra.mxu1 %vm1188_vm2, %v14771_v37 }
 0x758   :  { %6909 = vmatpush.msra.mxu0 %v14768_v5  ;;  %v6439_v19 = vsel %vm3244_vm5, %v6409_v16, %v6411_v53 }
 0x759   :  { %v6498_v13 = vmax.f32 %v14666_v1, %v6439_v19  ;;  %6942 = vmatpush.msra.mxu1 %v14780_v57 }
 0x75a   :  { %v9933_v44 = vpop.permute.xlu1 %9932  ;;  %6910 = vmatpush.msra.mxu0 %v14774_v39 }
 0x75b   :  { %v9935_v52 = vunpack.i.h.bf16 %v9933_v44  ;;  %v9934_v58 = vunpack.i.l.bf16 %v9933_v44  ;;  %9377 = vmatpush.msk.msrb.mxu2 %vm6513_vm11, %v6498_v13  ;;  %6943 = vmatpush.msra.mxu1 %v14790_v50 }
 0x75c   :  { %6911 = vmatpush.msra.mxu0 %v14784_v29 }
 0x75d   :  { %v6505_v26 = vmax.f32 %v14655_v9, %v9935_v52  ;;  %v6438_v31 = vsel %vm3244_vm5, %v9934_v58, %v9925_v47  ;;  %v14797_v9 = vld [vmem:[#allocation10 + $0x60] sm:$0xff] }
 0x75e   :  { %v6496_v63 = vmax.f32 %v14602_v51, %v6438_v31  ;;  %v14801_v51 = vld [vmem:[#allocation10 + $0x80] sm:$0xff]  ;;  %6912 = vmatpush.msra.mxu0 %v14797_v9 }
 0x75f   :  { %6877 = vmatpush.msrb.mxu3 %v6505_v26  ;;  %v6425_v1 = vpop.permute.xlu0 %6424  ;;  %6944 = vmatpush.msra.mxu1 %v14801_v51  ;;  %v15089_v26 = vld [vmem:[%s15686_s9 + $0x18] sm:$0xff] }
 0x760   :  { %6765 = vmatpush.msrb.mxu2 %v6496_v63  ;;  %9388 = vmatmul.msk.f32.vlgmr.msrb.gmra.mxu3 %vm6509_vm12, %v14689_v10  ;;  %v6443_v54 = vsel %vm3244_vm5, %v6425_v1, %v6427_v43  ;;  %v15100_v63 = vld [vmem:[%s15686_s9 + $0x10] sm:$0xff]  ;;  %v15121_v1 = vld [vmem:[%s15686_s9] sm:$0xff] }
 0x761   :  { %9378 = vmatmul.msk.f32.vlgmr.msrb.gmra.mxu2 %vm6509_vm12, %v14689_v10  ;;  %9391 = vmatpush.msk.msra.mxu3 %vm1188_vm2, %v14771_v37  ;;  %v6506_v34 = vmax.f32 %v14677_v41, %v6443_v54  ;;  %v14822_v41 = vld [vmem:[#allocation10 + $0x48] sm:$0xff] }
 0x762   :  { %v6421_v33 = vpop.permute.xlu1 %6420  ;;  %6995 = vmatpush.msrb.mxu1 %v14768_v5  ;;  %6913 = vmatpush.msra.mxu0 %v14807_v4 }
 0x763   :  { %v6442_v62 = vsel %vm3244_vm5, %v6421_v33, %v9935_v52  ;;  %6985 = vmatpush.msra.mxu3 %v14780_v57  ;;  %9385 = vmatpush.msk.msra.mxu2 %vm6513_vm11, %v6506_v34  ;;  %v15078_v52 = vld [vmem:[%s15686_s9 + $0x20] sm:$0xff] }
 0x764   :  { %6996 = vmatpush.msrb.mxu1 %v14774_v39  ;;  %v6504_v6 = vmax.f32 %v14660_v7, %v6442_v62  ;;  %6914 = vmatpush.msra.mxu0 %v14813_v24  ;;  %v14830_v7 = vld [vmem:[#allocation10 + $0x40] sm:$0xff] }
 0x765   :  { %6986 = vmatpush.msra.mxu3 %v14790_v50 }
 0x766   :  { %6997 = vmatpush.msrb.mxu1 %v14784_v29  ;;  %6857 = vmatpush.msra.mxu2 %v6504_v6 }
 0x767   :  { %6987 = vmatpush.msra.mxu3 %v14801_v51  ;;  %6915 = vmatpush.msra.mxu0 %v14822_v41 }
 0x768   :  { %6952 = vmatpush.msrb.mxu2 %v14768_v5  ;;  %6998 = vmatpush.msrb.mxu1 %v14797_v9 }
 0x769   :  { %9393 = vmatpush.msk.msrb.mxu3 %vm1188_vm2, %v14771_v37  ;;  %9386 = vmatmul.msk.f32.vlgmr.msra.gmra.mxu2 %vm6509_vm12, %v14689_v10  ;;  %v14842_v10 = vld [vmem:[#allocation10 + $0x30] sm:$0xff] }
 0x76a   :  { %6916 = vmatpush.msra.mxu0 %v14830_v7  ;;  %6953 = vmatpush.msrb.mxu2 %v14774_v39 }
 0x76b   :  { %7028 = vmatpush.msrb.mxu3 %v14780_v57  ;;  %6999 = vmatpush.msrb.mxu1 %v14807_v4 }
 0x76c   :  { %6917 = vmatpush.msra.mxu0 %v14836_v8  ;;  %6954 = vmatpush.msrb.mxu2 %v14784_v29 }
 0x76d   :  { %7029 = vmatpush.msrb.mxu3 %v14790_v50  ;;  %7000 = vmatpush.msrb.mxu1 %v14813_v24 }
 0x76e   :  { %6918 = vmatpush.msra.mxu0 %v14842_v10  ;;  %6955 = vmatpush.msrb.mxu2 %v14797_v9 }
 0x76f   :  { %7030 = vmatpush.msrb.mxu3 %v14801_v51  ;;  %7001 = vmatpush.msrb.mxu1 %v14822_v41 }
 0x770   :  { %6919 = vmatpush.msra.mxu0 %v14848_v18  ;;  %6956 = vmatpush.msrb.mxu2 %v14807_v4 }
 0x771   :  { %7002 = vmatpush.msrb.mxu1 %v14830_v7 }
 0x772   :  { %6920 = vmatpush.msra.mxu0 %v14853_v49  ;;  %6957 = vmatpush.msrb.mxu2 %v14813_v24 }
 0x773   :  { %7003 = vmatpush.msrb.mxu1 %v14836_v8 }
 0x774   :  { %6921 = vmatpush.msra.mxu0 %v14858_v17  ;;  %6958 = vmatpush.msrb.mxu2 %v14822_v41 }
 0x775   :  { %7004 = vmatpush.msrb.mxu1 %v14842_v10 }
 0x776   :  { %6922 = vmatpush.msra.mxu0 %v14863_v61  ;;  %6959 = vmatpush.msrb.mxu2 %v14830_v7 }
 0x777   :  { %7005 = vmatpush.msrb.mxu1 %v14848_v18 }
 0x778   :  { %6923 = vmatpush.msra.mxu0 %v14868_v20  ;;  %6960 = vmatpush.msrb.mxu2 %v14836_v8 }
 0x779   :  { %7006 = vmatpush.msrb.mxu1 %v14853_v49 }
 0x77a   :  { %6961 = vmatpush.msrb.mxu2 %v14842_v10  ;;  %6924 = vmatpush.msra.mxu0 %v14873_v2 }
 0x77b   :  { %7007 = vmatpush.msrb.mxu1 %v14858_v17 }
 0x77c   :  { %9395 = vmatpush.msk.msrb.mxu0 %vm1188_vm2, %v14771_v37  ;;  %6962 = vmatpush.msrb.mxu2 %v14848_v18 }
 0x77d   :  { %7008 = vmatpush.msrb.mxu1 %v14863_v61 }
 0x77e   :  { %7071 = vmatpush.msrb.mxu0 %v14780_v57  ;;  %6963 = vmatpush.msrb.mxu2 %v14853_v49 }
 0x77f   :  { %7009 = vmatpush.msrb.mxu1 %v14868_v20 }
 0x780   :  { %7072 = vmatpush.msrb.mxu0 %v14790_v50  ;;  %6964 = vmatpush.msrb.mxu2 %v14858_v17 }
 0x781   :  { %7010 = vmatpush.msrb.mxu1 %v14873_v2 }
 0x782   :  { %7073 = vmatpush.msrb.mxu0 %v14801_v51  ;;  %6965 = vmatpush.msrb.mxu2 %v14863_v61 }
 0x784   :  { %6966 = vmatpush.msrb.mxu2 %v14868_v20 }
 0x786   :  { %6967 = vmatpush.msrb.mxu2 %v14873_v2 }
 0x788   :  { %7081 = vmatpush.msra.mxu2 %v14768_v5 }
 0x78a   :  { %7082 = vmatpush.msra.mxu2 %v14774_v39 }
 0x78c   :  { %7083 = vmatpush.msra.mxu2 %v14784_v29 }
 0x78e   :  { %7084 = vmatpush.msra.mxu2 %v14797_v9 }
 0x790   :  { %7085 = vmatpush.msra.mxu2 %v14807_v4 }
 0x792   :  { %7086 = vmatpush.msra.mxu2 %v14813_v24 }
 0x793   :  { %v6583_v12 = vpop.f32.mrf.mxu1 }
 0x794   :  { %7087 = vmatpush.msra.mxu2 %v14822_v41 }
 0x795   :  { %6968 = vmatmul.f32.vlgmr.msrb.gmra.mxu2 %v6583_v12 }
 0x796   :  { %7088 = vmatpush.msra.mxu2 %v14830_v7 }
 0x798   :  { %7089 = vmatpush.msra.mxu2 %v14836_v8  ;;  %v6603_v22 = vpop.f32.mrf.mxu2 }
 0x799   :  { %9392 = vmatmul.msk.f32.vlgmr.msra.gmra.mxu3 %vm6902_vm13, %v6603_v22 }
 0x79a   :  { %7090 = vmatpush.msra.mxu2 %v14842_v10  ;;  %7038 = vmatpush.msra.mxu3 %v14768_v5 }
 0x79b   :  { %v6537_v3 = vpop.f32.mrf.mxu0 }
 0x79c   :  { %7091 = vmatpush.msra.mxu2 %v14848_v18  ;;  %7039 = vmatpush.msra.mxu3 %v14774_v39 }
 0x79d   :  { %6925 = vmatmul.f32.vlgmr.msra.gmra.mxu0 %v6537_v3 }
 0x79e   :  { %7092 = vmatpush.msra.mxu2 %v14853_v49  ;;  %7040 = vmatpush.msra.mxu3 %v14784_v29 }
 0x79f   :  { %9397 = vmatpush.msk.msra.mxu0 %vm1188_vm2, %v14771_v37 }
 0x7a0   :  { %7093 = vmatpush.msra.mxu2 %v14858_v17  ;;  %7041 = vmatpush.msra.mxu3 %v14797_v9 }
 0x7a1   :  { %7114 = vmatpush.msra.mxu0 %v14780_v57 }
 0x7a2   :  { %7094 = vmatpush.msra.mxu2 %v14863_v61  ;;  %7042 = vmatpush.msra.mxu3 %v14807_v4 }
 0x7a3   :  { %7115 = vmatpush.msra.mxu0 %v14790_v50  ;;  %v6557_v48 = vpop.f32.mrf.mxu0  ;;  %v6649_v11 = vpop.f32.mrf.mxu1 }
 0x7a4   :  { %7095 = vmatpush.msra.mxu2 %v14868_v20  ;;  %7043 = vmatpush.msra.mxu3 %v14813_v24 }
 0x7a5   :  { %7116 = vmatpush.msra.mxu0 %v14801_v51  ;;  %9390 = vmatmul.msk.f32.vlgmr.msra.gmra.mxu1 %vm6902_vm13, %v6557_v48 }
 0x7a6   :  { %7096 = vmatpush.msra.mxu2 %v14873_v2  ;;  %7044 = vmatpush.msra.mxu3 %v14822_v41 }
 0x7a7   :  { %7124 = vmatpush.msra.mxu1 %v14768_v5  ;;  %9394 = vmatmul.msk.f32.vlgmr.msrb.gmra.mxu3 %vm6902_vm13, %v6649_v11 }
 0x7a8   :  { %9403 = vmatpush.msk.msrb.mxu2 %vm1188_vm2, %v14771_v37  ;;  %7045 = vmatpush.msra.mxu3 %v14830_v7 }
 0x7a9   :  { %7125 = vmatpush.msra.mxu1 %v14774_v39 }
 0x7aa   :  { %7243 = vmatpush.msrb.mxu2 %v14780_v57  ;;  %7046 = vmatpush.msra.mxu3 %v14836_v8 }
 0x7ab   :  { %7126 = vmatpush.msra.mxu1 %v14784_v29 }
 0x7ac   :  { %7244 = vmatpush.msrb.mxu2 %v14790_v50  ;;  %7047 = vmatpush.msra.mxu3 %v14842_v10  ;;  %v6629_v14 = vpop.f32.mrf.mxu0 }
 0x7ad   :  { %7127 = vmatpush.msra.mxu1 %v14797_v9 }
 0x7ae   :  { %7245 = vmatpush.msrb.mxu2 %v14801_v51  ;;  %7048 = vmatpush.msra.mxu3 %v14848_v18 }
 0x7af   :  { %7128 = vmatpush.msra.mxu1 %v14807_v4 }
 0x7b0   :  { %v6695_v47 = vpop.f32.mrf.mxu3  ;;  %7049 = vmatpush.msra.mxu3 %v14853_v49  ;;  %7011 = vmatmul.f32.vlgmr.msrb.gmra.mxu1 %v6629_v14  ;;  %v15165_v14 = vld [vmem:[%s15686_s9 + $0x70] sm:$0xff] }
 0x7b1   :  { %9396 = vmatmul.msk.f32.vlgmr.msrb.gmra.mxu0 %vm6902_vm13, %v6695_v47  ;;  %7129 = vmatpush.msra.mxu1 %v14813_v24 }
 0x7b2   :  { %9399 = vmatpush.msk.msrb.mxu0 %vm1188_vm2, %v14771_v37  ;;  %7050 = vmatpush.msra.mxu3 %v14858_v17 }
 0x7b3   :  { %7130 = vmatpush.msra.mxu1 %v14822_v41 }
 0x7b4   :  { %7157 = vmatpush.msrb.mxu0 %v14780_v57  ;;  %7051 = vmatpush.msra.mxu3 %v14863_v61 }
 0x7b5   :  { %7131 = vmatpush.msra.mxu1 %v14830_v7 }
 0x7b6   :  { %7158 = vmatpush.msrb.mxu0 %v14790_v50  ;;  %7052 = vmatpush.msra.mxu3 %v14868_v20 }
 0x7b7   :  { %7132 = vmatpush.msra.mxu1 %v14836_v8 }
 0x7b8   :  { %7159 = vmatpush.msrb.mxu0 %v14801_v51  ;;  %7053 = vmatpush.msra.mxu3 %v14873_v2 }
 0x7b9   :  { %v6675_v21 = vpop.f32.mrf.mxu2  ;;  %7133 = vmatpush.msra.mxu1 %v14842_v10 }
 0x7ba   :  { %7054 = vmatmul.f32.vlgmr.msra.gmra.mxu3 %v6675_v21 }
 0x7bb   :  { %7167 = vmatpush.msrb.mxu3 %v14768_v5  ;;  %7134 = vmatpush.msra.mxu1 %v14848_v18  ;;  %v6741_v53 = vpop.f32.mrf.mxu1 }
 0x7bc   :  { %9398 = vmatmul.msk.f32.vlgmr.msra.gmra.mxu0 %vm6902_vm13, %v6741_v53 }
 0x7bd   :  { %7168 = vmatpush.msrb.mxu3 %v14774_v39  ;;  %7135 = vmatpush.msra.mxu1 %v14853_v49 }
 0x7be   :  { %9401 = vmatpush.msk.msra.mxu0 %vm1188_vm2, %v14771_v37 }
 0x7bf   :  { %7169 = vmatpush.msrb.mxu3 %v14784_v29  ;;  %7136 = vmatpush.msra.mxu1 %v14858_v17 }
 0x7c0   :  { %7200 = vmatpush.msra.mxu0 %v14780_v57 }
 0x7c1   :  { %7170 = vmatpush.msrb.mxu3 %v14797_v9  ;;  %7137 = vmatpush.msra.mxu1 %v14863_v61 }
 0x7c2   :  { %7201 = vmatpush.msra.mxu0 %v14790_v50 }
 0x7c3   :  { %7171 = vmatpush.msrb.mxu3 %v14807_v4  ;;  %7138 = vmatpush.msra.mxu1 %v14868_v20 }
 0x7c4   :  { %7202 = vmatpush.msra.mxu0 %v14801_v51  ;;  %v6721_v56 = vpop.f32.mrf.mxu0 }
 0x7c5   :  { %7172 = vmatpush.msrb.mxu3 %v14813_v24  ;;  %7139 = vmatpush.msra.mxu1 %v14873_v2 }
 0x7c6   :  { %7097 = vmatmul.f32.vlgmr.msra.gmra.mxu2 %v6721_v56 }
 0x7c7   :  { %7173 = vmatpush.msrb.mxu3 %v14822_v41  ;;  %7344 = vmatpush.bf16.msra.mxu2 %v14981_v23 }
 0x7c8   :  { %v6787_v38 = vpop.f32.mrf.mxu3  ;;  %7322 = vmatpush.bf16.msrb.mxu1 %v14981_v23 }
 0x7c9   :  { %9400 = vmatmul.msk.f32.vlgmr.msrb.gmra.mxu0 %vm6902_vm13, %v6787_v38  ;;  %7174 = vmatpush.msrb.mxu3 %v14830_v7 }
 0x7ca   :  { %7210 = vmatpush.msrb.mxu0 %v14768_v5 }
 0x7cb   :  { %7175 = vmatpush.msrb.mxu3 %v14836_v8  ;;  %7345 = vmatpush.bf16.msra.mxu2 %v14989_v32 }
 0x7cc   :  { %7211 = vmatpush.msrb.mxu0 %v14774_v39  ;;  %7323 = vmatpush.bf16.msrb.mxu1 %v14989_v32 }
 0x7cd   :  { %7176 = vmatpush.msrb.mxu3 %v14842_v10 }
 0x7ce   :  { %7212 = vmatpush.msrb.mxu0 %v14784_v29 }
 0x7cf   :  { %7177 = vmatpush.msrb.mxu3 %v14848_v18  ;;  %7346 = vmatpush.bf16.msra.mxu2 %v15022_v28 }
 0x7d0   :  { %7213 = vmatpush.msrb.mxu0 %v14797_v9  ;;  %7324 = vmatpush.bf16.msrb.mxu1 %v15022_v28  ;;  %v15109_v9 = vld [vmem:[%s15686_s9 + $0x8] sm:$0xff] }
 0x7d1   :  { %7178 = vmatpush.msrb.mxu3 %v14853_v49 }
 0x7d2   :  { %7214 = vmatpush.msrb.mxu0 %v14807_v4 }
 0x7d3   :  { %7179 = vmatpush.msrb.mxu3 %v14858_v17  ;;  %v6833_v46 = vpop.f32.mrf.mxu1  ;;  %7347 = vmatpush.bf16.msra.mxu2 %v15031_v45 }
 0x7d4   :  { %7215 = vmatpush.msrb.mxu0 %v14813_v24  ;;  %v6813_v0 = vpop.f32.mrf.mxu0  ;;  %7325 = vmatpush.bf16.msrb.mxu1 %v15031_v45 }
 0x7d5   :  { %7180 = vmatpush.msrb.mxu3 %v14863_v61  ;;  %9402 = vmatmul.msk.f32.vlgmr.msra.gmra.mxu0 %vm6902_vm13, %v6833_v46 }
 0x7d6   :  { %7216 = vmatpush.msrb.mxu0 %v14822_v41 }
 0x7d7   :  { %7181 = vmatpush.msrb.mxu3 %v14868_v20  ;;  %7348 = vmatpush.bf16.msra.mxu2 %v15040_v25 }
 0x7d8   :  { %7217 = vmatpush.msrb.mxu0 %v14830_v7  ;;  %7326 = vmatpush.bf16.msrb.mxu1 %v15040_v25 }
 0x7d9   :  { %7182 = vmatpush.msrb.mxu3 %v14873_v2 }
 0x7da   :  { %7218 = vmatpush.msrb.mxu0 %v14836_v8  ;;  %7183 = vmatmul.f32.vlgmr.msrb.gmra.mxu3 %v6813_v0 }
 0x7db   :  { %7366 = vmatpush.bf16.msra.mxu3 %v14981_v23 }
 0x7dc   :  { %7219 = vmatpush.msrb.mxu0 %v14842_v10 }
 0x7de   :  { %7220 = vmatpush.msrb.mxu0 %v14848_v18 }
 0x7df   :  { %7367 = vmatpush.bf16.msra.mxu3 %v14989_v32 }
 0x7e0   :  { %7221 = vmatpush.msrb.mxu0 %v14853_v49 }
 0x7e2   :  { %7222 = vmatpush.msrb.mxu0 %v14858_v17 }
 0x7e3   :  { %v6879_v30 = vpop.f32.mrf.mxu3  ;;  %7368 = vmatpush.bf16.msra.mxu3 %v15022_v28 }
 0x7e4   :  { %v6767_v43 = vpop.f32.mrf.mxu2  ;;  %9404 = vmatmul.msk.f32.vlgmr.msrb.gmra.mxu2 %vm6902_vm13, %v6879_v30  ;;  %7223 = vmatpush.msrb.mxu0 %v14863_v61 }
 0x7e5   :  { %7140 = vmatmul.f32.vlgmr.msra.gmra.mxu1 %v6767_v43  ;;  %7410 = vmatpush.bf16.msrb.mxu2 %v14981_v23 }
 0x7e6   :  { %7224 = vmatpush.msrb.mxu0 %v14868_v20  ;;  %7388 = vmatpush.bf16.msra.mxu1 %v14981_v23 }
 0x7e7   :  { %7369 = vmatpush.bf16.msra.mxu3 %v15031_v45 }
 0x7e8   :  { %7225 = vmatpush.msrb.mxu0 %v14873_v2 }
 0x7e9   :  { %7411 = vmatpush.bf16.msrb.mxu2 %v14989_v32 }
 0x7ea   :  { %7432 = vmatpush.bf16.msra.mxu0 %v14981_v23  ;;  %7389 = vmatpush.bf16.msra.mxu1 %v14989_v32 }
 0x7eb   :  { %7370 = vmatpush.bf16.msra.mxu3 %v15040_v25 }
 0x7ec   :  { %v6859_v36 = vpop.f32.mrf.mxu2 }
 0x7ed   :  { %7226 = vmatmul.f32.vlgmr.msrb.gmra.mxu0 %v6859_v36  ;;  %7412 = vmatpush.bf16.msrb.mxu2 %v15022_v28  ;;  %v15196_v36 = vld [vmem:[%s15686_s9 + $0x60] sm:$0xff] }
 0x7ee   :  { %7433 = vmatpush.bf16.msra.mxu0 %v14989_v32  ;;  %7390 = vmatpush.bf16.msra.mxu1 %v15022_v28 }
 0x7ef   :  { %7454 = vmatpush.bf16.msrb.mxu3 %v14981_v23 }
 0x7f1   :  { %7413 = vmatpush.bf16.msrb.mxu2 %v15031_v45 }
 0x7f2   :  { %7434 = vmatpush.bf16.msra.mxu0 %v15022_v28  ;;  %7391 = vmatpush.bf16.msra.mxu1 %v15031_v45 }
 0x7f3   :  { %7455 = vmatpush.bf16.msrb.mxu3 %v14989_v32 }
 0x7f5   :  { %7414 = vmatpush.bf16.msrb.mxu2 %v15040_v25 }
 0x7f6   :  { %7435 = vmatpush.bf16.msra.mxu0 %v15031_v45  ;;  %7392 = vmatpush.bf16.msra.mxu1 %v15040_v25 }
 0x7f7   :  { %7456 = vmatpush.bf16.msrb.mxu3 %v15022_v28 }
 0x7fa   :  { %7436 = vmatpush.bf16.msra.mxu0 %v15040_v25 }
 0x7fb   :  { %7457 = vmatpush.bf16.msrb.mxu3 %v15031_v45 }
 0x7fe   :  { %7538 = vmatpush.bf16.msrb.mxu0 %v15078_v52 }
 0x7ff   :  { %7458 = vmatpush.bf16.msrb.mxu3 %v15040_v25 }
 0x802   :  { %7539 = vmatpush.bf16.msrb.mxu0 %v15089_v26 }
 0x806   :  { %7540 = vmatpush.bf16.msrb.mxu0 %v15100_v63 }
 0x80a   :  { %7541 = vmatpush.bf16.msrb.mxu0 %v15109_v9 }
 0x80e   :  { %7542 = vmatpush.bf16.msrb.mxu0 %v15121_v1 }
 0x818   :  { %v6969_v27 = vpop.f32.mrf.mxu2 }
 0x81a   :  { %v6926_v15 = vpop.f32.mrf.mxu0 }
 0x81c   :  { %v6989_v59 = vpop.f32.mrf.mxu3 }
 0x81d   :  { %v6990_v40 = vadd.f32 %v6989_v59, %v6969_v27  ;;  %v15219_v59 = vld [vmem:[%s15686_s9 + $0x50] sm:$0xff] }
 0x81f   :  { %v15061_v55 = vpack.c.bf16 %v6990_v40, %v6990_v40 }
 0x821   :  { %v7333_v42 = vunpack.c.l.b16 %v15061_v55 }
 0x822   :  { %v6946_v35 = vpop.f32.mrf.mxu1 }
 0x823   :  { %v15064_v60 = vpack.c.b16 %v7333_v42, %v7333_v42  ;;  %v6947_v5 = vadd.f32 %v6946_v35, %v6926_v15  ;;  %v15270_v15 = vld [vmem:[%s15686_s9 + $0x90] sm:$0xff]  ;;  %v15280_v42 = vld [vmem:[%s15686_s9 + $0x88] sm:$0xff] }
 0x825   :  { %v7336_v16 = vshrl.u32 %v15064_v60, 16  ;;  %v15067_v44 = vpack.c.bf16 %v6947_v5, %v6947_v5  ;;  %v15292_v5 = vld [vmem:[%s15686_s9 + $0x80] sm:$0xff] }
 0x827   :  { %v7280_v37 = vunpack.c.l.b16 %v15067_v44  ;;  %9436 = vmatmul.msk.bf16.vlgmr.msra.gmra.mxu2 %vm7315_vm14, %v7336_v16 }
 0x828   :  { %7522 = vmatpush.bf16.msra.mxu2 %v15078_v52 }
 0x829   :  { %v15073_v19 = vpack.c.b16 %v7280_v37, %v7280_v37  ;;  %v15305_v37 = vld [vmem:[%s15686_s9 + $0x78] sm:$0xff] }
 0x82a   :  { %v7032_v39 = vpop.f32.mrf.mxu3 }
 0x82b   :  { %v7283_v58 = vshrl.u32 %v15073_v19, 16  ;;  %v7655_v40 = vrot.slane %v15073_v19, 1 }
 0x82c   :  { %7523 = vmatpush.bf16.msra.mxu2 %v15089_v26 }
 0x82d   :  { %9435 = vmatmul.msk.bf16.vlgmr.msrb.gmra.mxu1 %vm7315_vm14, %v7283_v58  ;;  %v7012_v13 = vpop.f32.mrf.mxu1 }
 0x82e   :  { %v7033_v57 = vadd.f32 %v7032_v39, %v7012_v13  ;;  %7476 = vmatpush.bf16.msrb.mxu1 %v14981_v23  ;;  %v7075_v33 = vpop.f32.mrf.mxu0  ;;  %v7840_v13 = vrot.slane %v7283_v58, 1 }
 0x830   :  { %v15092_v31 = vpack.c.bf16 %v7033_v57, %v7033_v57  ;;  %7524 = vmatpush.bf16.msra.mxu2 %v15100_v63 }
 0x832   :  { %v7355_v29 = vunpack.c.l.b16 %v15092_v31  ;;  %7477 = vmatpush.bf16.msrb.mxu1 %v14989_v32  ;;  %v15180_v32 = vld [vmem:[%s15686_s9 + $0x68] sm:$0xff] }
 0x834   :  { %v15103_v50 = vpack.c.b16 %v7355_v29, %v7355_v29  ;;  %7525 = vmatpush.bf16.msra.mxu2 %v15109_v9  ;;  %v15346_v29 = vld [vmem:[%s15686_s9 + $0xc0] sm:$0xff] }
 0x836   :  { %v7358_v51 = vshrl.u32 %v15103_v50, 16  ;;  %7478 = vmatpush.bf16.msrb.mxu1 %v15022_v28 }
 0x838   :  { %9437 = vmatmul.msk.bf16.vlgmr.msra.gmra.mxu3 %vm7315_vm14, %v7358_v51  ;;  %7526 = vmatpush.bf16.msra.mxu2 %v15121_v1 }
 0x839   :  { %7554 = vmatpush.bf16.msra.mxu3 %v15078_v52  ;;  %v7118_v41 = vpop.f32.mrf.mxu0 }
 0x83a   :  { %7479 = vmatpush.bf16.msrb.mxu1 %v15031_v45 }
 0x83d   :  { %v7055_v54 = vpop.f32.mrf.mxu3  ;;  %7555 = vmatpush.bf16.msra.mxu3 %v15089_v26 }
 0x83e   :  { %v7076_v62 = vadd.f32 %v7075_v33, %v7055_v54  ;;  %7480 = vmatpush.bf16.msrb.mxu1 %v15040_v25  ;;  %v15207_v25 = vld [vmem:[%s15686_s9 + $0x58] sm:$0xff] }
 0x840   :  { %v15130_v4 = vpack.c.bf16 %v7076_v62, %v7076_v62  ;;  %v15370_v62 = vld [vmem:[%s15686_s9 + $0xb0] sm:$0xff] }
 0x841   :  { %7556 = vmatpush.bf16.msra.mxu3 %v15100_v63 }
 0x842   :  { %v7377_v34 = vunpack.c.l.b16 %v15130_v4 }
 0x844   :  { %v15134_v24 = vpack.c.b16 %v7377_v34, %v7377_v34  ;;  %v15382_v34 = vld [vmem:[%s15686_s9 + $0xa8] sm:$0xff] }
 0x845   :  { %7557 = vmatpush.bf16.msra.mxu3 %v15109_v9 }
 0x846   :  { %v7380_v6 = vshrl.u32 %v15134_v24, 16  ;;  %v7161_v61 = vpop.f32.mrf.mxu0  ;;  %v7736_v39 = vrot.slane %v15134_v24, 1 }
 0x848   :  { %9438 = vmatmul.msk.bf16.vlgmr.msra.gmra.mxu1 %vm7315_vm14, %v7380_v6 }
 0x849   :  { %7570 = vmatpush.bf16.msra.mxu1 %v15078_v52  ;;  %v7098_v7 = vpop.f32.mrf.mxu2  ;;  %7558 = vmatpush.bf16.msra.mxu3 %v15121_v1 }
 0x84a   :  { %v7119_v8 = vadd.f32 %v7118_v41, %v7098_v7  ;;  %v7887_v41 = vrot.slane %v7336_v16, 1  ;;  %v7921_v16 = vrot.slane %v7380_v6, 1 }
 0x84c   :  { %v7254_v10 = vpack.c.bf16 %v7119_v8, %v7119_v8  ;;  %v8025_v8 = vrot.slane %v15073_v19, 2 }
 0x84d   :  { %7571 = vmatpush.bf16.msra.mxu1 %v15089_v26 }
 0x84e   :  { %v7399_v18 = vunpack.c.l.b16 %v7254_v10 }
 0x850   :  { %v15144_v49 = vpack.c.b16 %v7399_v18, %v7399_v18 }
 0x851   :  { %7572 = vmatpush.bf16.msra.mxu1 %v15100_v63 }
 0x852   :  { %v7402_v17 = vshrl.u32 %v15144_v49, 16  ;;  %v7204_v20 = vpop.f32.mrf.mxu0  ;;  %v7753_v35 = vrot.slane %v15144_v49, 1 }
 0x854   :  { %9439 = vmatmul.msk.bf16.vlgmr.msrb.gmra.mxu2 %vm7315_vm14, %v7402_v17 }
 0x855   :  { %7573 = vmatpush.bf16.msra.mxu1 %v15109_v9  ;;  %7586 = vmatpush.bf16.msrb.mxu2 %v15078_v52 }
 0x859   :  { %7574 = vmatpush.bf16.msra.mxu1 %v15121_v1  ;;  %7587 = vmatpush.bf16.msrb.mxu2 %v15089_v26 }
 0x85d   :  { %v7184_v2 = vpop.f32.mrf.mxu3  ;;  %7588 = vmatpush.bf16.msrb.mxu2 %v15100_v63 }
 0x85e   :  { %v7205_v12 = vadd.f32 %v7204_v20, %v7184_v2  ;;  %v8123_v20 = vrot.slane %v15144_v49, 2  ;;  %v8089_v2 = vrot.slane %v15103_v50, 2  ;;  %v8072_v49 = vrot.slane %v15064_v60, 2 }
 0x860   :  { %v15156_v22 = vpack.c.bf16 %v7205_v12, %v7205_v12 }
 0x861   :  { %7589 = vmatpush.bf16.msrb.mxu2 %v15109_v9 }
 0x862   :  { %v7141_v3 = vpop.f32.mrf.mxu1  ;;  %v7443_v11 = vunpack.c.l.b16 %v15156_v22 }
 0x863   :  { %v7162_v48 = vadd.f32 %v7161_v61, %v7141_v3 }
 0x864   :  { %v15167_v21 = vpack.c.b16 %v7443_v11, %v7443_v11  ;;  %9463 = vmatmul.msk.bf16.vlgmr.msra.gmra.mxu2 %vm7315_vm14, %v15067_v44  ;;  %v7719_v44 = vrot.slane %v15103_v50, 1 }
 0x865   :  { %v15160_v47 = vpack.c.bf16 %v7162_v48, %v7162_v48  ;;  %7590 = vmatpush.bf16.msrb.mxu2 %v15121_v1 }
 0x866   :  { %v7446_v38 = vshrl.u32 %v15167_v21, 16  ;;  %v7787_v57 = vrot.slane %v15167_v21, 1 }
 0x867   :  { %v7421_v53 = vunpack.c.l.b16 %v15160_v47  ;;  %v7247_v56 = vpop.f32.mrf.mxu2 }
 0x868   :  { %9441 = vmatmul.msk.bf16.vlgmr.msrb.gmra.mxu3 %vm7315_vm14, %v7446_v38  ;;  %v7972_v18 = vrot.slane %v7446_v38, 1 }
 0x869   :  { %v15174_v23 = vpack.c.b16 %v7421_v53, %v7421_v53  ;;  %7692 = vmatpush.bf16.msra.mxu2 %v15165_v14  ;;  %7618 = vmatpush.bf16.msrb.mxu3 %v15078_v52 }
 0x86a   :  { %v7227_v46 = vpop.f32.mrf.mxu0 }
 0x86b   :  { %v7424_v0 = vshrl.u32 %v15174_v23, 16  ;;  %v7248_v30 = vadd.f32 %v7247_v56, %v7227_v46  ;;  %v7770_v58 = vrot.slane %v15174_v23, 1 }
 0x86d   :  { %v15187_v43 = vpack.c.bf16 %v7248_v30, %v7248_v30  ;;  %9440 = vmatmul.msk.bf16.vlgmr.msra.gmra.mxu0 %vm7315_vm14, %v7424_v0  ;;  %7693 = vmatpush.bf16.msra.mxu2 %v15180_v32  ;;  %v7955_v19 = vrot.slane %v7424_v0, 1 }
 0x86e   :  { %7602 = vmatpush.bf16.msra.mxu0 %v15078_v52  ;;  %7619 = vmatpush.bf16.msrb.mxu3 %v15089_v26 }
 0x86f   :  { %v7465_v28 = vunpack.c.l.b16 %v15187_v43 }
 0x871   :  { %v15201_v45 = vpack.c.b16 %v7465_v28, %v7465_v28  ;;  %7694 = vmatpush.bf16.msra.mxu2 %v15196_v36 }
 0x872   :  { %7603 = vmatpush.bf16.msra.mxu0 %v15089_v26  ;;  %7620 = vmatpush.bf16.msrb.mxu3 %v15100_v63 }
 0x873   :  { %v7468_v27 = vshrl.u32 %v15201_v45, 16  ;;  %v8174_v53 = vrot.slane %v15201_v45, 2 }
 0x874   :  { %9467 = vmatmul.msk.bf16.vlgmr.msrb.gmra.mxu2 %vm7315_vm14, %v7254_v10 }
 0x875   :  { %9442 = vmatmul.msk.bf16.vlgmr.msrb.gmra.mxu1 %vm7315_vm14, %v7468_v27  ;;  %7695 = vmatpush.bf16.msra.mxu2 %v15207_v25  ;;  %v7989_v61 = vrot.slane %v7468_v27, 1 }
 0x876   :  { %7604 = vmatpush.bf16.msra.mxu0 %v15100_v63  ;;  %7634 = vmatpush.bf16.msrb.mxu1 %v15078_v52  ;;  %v7702_v52 = vrot.slane %v15064_v60, 1  ;;  %v8157_v60 = vrot.slane %v15167_v21, 2 }
 0x877   :  { %7621 = vmatpush.bf16.msrb.mxu3 %v15109_v9 }
 0x878   :  { %9465 = vmatmul.msk.bf16.vlgmr.msra.gmra.mxu3 %vm7315_vm14, %v15092_v31 }
 0x879   :  { %7696 = vmatpush.bf16.msra.mxu2 %v15219_v59 }
 0x87a   :  { %7605 = vmatpush.bf16.msra.mxu0 %v15109_v9  ;;  %7635 = vmatpush.bf16.msrb.mxu1 %v15089_v26 }
 0x87b   :  { %7622 = vmatpush.bf16.msrb.mxu3 %v15121_v1 }
 0x87d   :  { %7760 = vmatpush.bf16.msrb.mxu2 %v15165_v14  ;;  %9464 = vmatmul.msk.bf16.vlgmr.msrb.gmra.mxu0 %vm7315_vm14, %v15061_v55  ;;  %v15258_v55 = vld [vmem:[%s15686_s9 + $0x98] sm:$0xff] }
 0x87e   :  { %7606 = vmatpush.bf16.msra.mxu0 %v15121_v1  ;;  %7636 = vmatpush.bf16.msrb.mxu1 %v15100_v63  ;;  %v15357_v63 = vld [vmem:[%s15686_s9 + $0xb8] sm:$0xff] }
 0x87f   :  { %7726 = vmatpush.bf16.msra.mxu3 %v15165_v14 }
 0x881   :  { %7761 = vmatpush.bf16.msrb.mxu2 %v15180_v32 }
 0x882   :  { %7709 = vmatpush.bf16.msrb.mxu0 %v15165_v14  ;;  %7637 = vmatpush.bf16.msrb.mxu1 %v15109_v9  ;;  %v7804_v9 = vrot.slane %v15201_v45, 1 }
 0x883   :  { %7727 = vmatpush.bf16.msra.mxu3 %v15180_v32 }
 0x884   :  { %9501 = vmatmul.msk.bf16.vlgmr.msra.gmra.mxu2 %vm7315_vm14, %v7655_v40 }
 0x885   :  { %7762 = vmatpush.bf16.msrb.mxu2 %v15196_v36  ;;  %9466 = vmatmul.msk.bf16.vlgmr.msra.gmra.mxu1 %vm7315_vm14, %v15130_v4  ;;  %v7904_v4 = vrot.slane %v7358_v51, 1  ;;  %v15396_v51 = vld [vmem:[%s15686_s9 + $0xa0] sm:$0xff] }
 0x886   :  { %7710 = vmatpush.bf16.msrb.mxu0 %v15180_v32  ;;  %7638 = vmatpush.bf16.msrb.mxu1 %v15121_v1  ;;  %v7938_v1 = vrot.slane %v7402_v17, 1 }
 0x887   :  { %7728 = vmatpush.bf16.msra.mxu3 %v15196_v36 }
 0x888   :  { %9469 = vmatmul.msk.bf16.vlgmr.msrb.gmra.mxu3 %vm7315_vm14, %v15156_v22  ;;  %v8106_v22 = vrot.slane %v15134_v24, 2  ;;  %v8140_v24 = vrot.slane %v15174_v23, 2 }
 0x889   :  { %7763 = vmatpush.bf16.msrb.mxu2 %v15207_v25 }
 0x88a   :  { %7711 = vmatpush.bf16.msrb.mxu0 %v15196_v36  ;;  %7743 = vmatpush.bf16.msra.mxu1 %v15165_v14 }
 0x88b   :  { %7729 = vmatpush.bf16.msra.mxu3 %v15207_v25 }
 0x88d   :  { %9468 = vmatmul.msk.bf16.vlgmr.msra.gmra.mxu0 %vm7315_vm14, %v15160_v47  ;;  %7764 = vmatpush.bf16.msrb.mxu2 %v15219_v59 }
 0x88e   :  { %7712 = vmatpush.bf16.msrb.mxu0 %v15207_v25  ;;  %7744 = vmatpush.bf16.msra.mxu1 %v15180_v32 }
 0x88f   :  { %7730 = vmatpush.bf16.msra.mxu3 %v15219_v59 }
 0x891   :  { %7877 = vmatpush.bf16.msra.mxu2 %v15258_v55 }
 0x892   :  { %7713 = vmatpush.bf16.msrb.mxu0 %v15219_v59  ;;  %7745 = vmatpush.bf16.msra.mxu1 %v15196_v36 }
 0x893   :  { %7794 = vmatpush.bf16.msrb.mxu3 %v15165_v14 }
 0x894   :  { %9505 = vmatmul.msk.bf16.vlgmr.msrb.gmra.mxu2 %vm7315_vm14, %v7753_v35  ;;  %v9750_v35 = vld [vmem:[%s15688_s11 + $0x30] sm:$0xff] }
 0x895   :  { %7878 = vmatpush.bf16.msra.mxu2 %v15270_v15  ;;  %9470 = vmatmul.msk.bf16.vlgmr.msrb.gmra.mxu1 %vm7315_vm14, %v15187_v43 }
 0x896   :  { %7777 = vmatpush.bf16.msra.mxu0 %v15165_v14  ;;  %7746 = vmatpush.bf16.msra.mxu1 %v15207_v25 }
 0x897   :  { %7795 = vmatpush.bf16.msrb.mxu3 %v15180_v32 }
 0x898   :  { %9503 = vmatmul.msk.bf16.vlgmr.msra.gmra.mxu3 %vm7315_vm14, %v7719_v44 }
 0x899   :  { %7879 = vmatpush.bf16.msra.mxu2 %v15280_v42 }
 0x89a   :  { %7778 = vmatpush.bf16.msra.mxu0 %v15180_v32  ;;  %7747 = vmatpush.bf16.msra.mxu1 %v15219_v59 }
 0x89b   :  { %7796 = vmatpush.bf16.msrb.mxu3 %v15196_v36 }
 0x89d   :  { %7880 = vmatpush.bf16.msra.mxu2 %v15292_v5  ;;  %9502 = vmatmul.msk.bf16.vlgmr.msrb.gmra.mxu0 %vm7315_vm14, %v7702_v52 }
 0x89e   :  { %7779 = vmatpush.bf16.msra.mxu0 %v15196_v36  ;;  %7811 = vmatpush.bf16.msrb.mxu1 %v15165_v14 }
 0x89f   :  { %7797 = vmatpush.bf16.msrb.mxu3 %v15207_v25 }
 0x8a1   :  { %7881 = vmatpush.bf16.msra.mxu2 %v15305_v37 }
 0x8a2   :  { %7812 = vmatpush.bf16.msrb.mxu1 %v15180_v32  ;;  %7780 = vmatpush.bf16.msra.mxu0 %v15207_v25 }
 0x8a3   :  { %7798 = vmatpush.bf16.msrb.mxu3 %v15219_v59 }
 0x8a4   :  { %9539 = vmatmul.msk.bf16.vlgmr.msra.gmra.mxu2 %vm7315_vm14, %v7840_v13 }
 0x8a5   :  { %7945 = vmatpush.bf16.msrb.mxu2 %v15258_v55  ;;  %9504 = vmatmul.msk.bf16.vlgmr.msra.gmra.mxu1 %vm7315_vm14, %v7736_v39 }
 0x8a6   :  { %7813 = vmatpush.bf16.msrb.mxu1 %v15196_v36  ;;  %7781 = vmatpush.bf16.msra.mxu0 %v15219_v59 }
 0x8a7   :  { %7911 = vmatpush.bf16.msra.mxu3 %v15258_v55 }
 0x8a8   :  { %9507 = vmatmul.msk.bf16.vlgmr.msrb.gmra.mxu3 %vm7315_vm14, %v7787_v57 }
 0x8a9   :  { %7946 = vmatpush.bf16.msrb.mxu2 %v15270_v15 }
 0x8aa   :  { %7894 = vmatpush.bf16.msrb.mxu0 %v15258_v55  ;;  %7814 = vmatpush.bf16.msrb.mxu1 %v15207_v25  ;;  %v15339_v26 = vpop.f32.mrf.mxu2  ;;  %v15341_v31 = vpop.f32.mrf.mxu1 }
 0x8ab   :  { %7912 = vmatpush.bf16.msra.mxu3 %v15270_v15 }
 0x8ad   :  { %7947 = vmatpush.bf16.msrb.mxu2 %v15280_v42  ;;  %9506 = vmatmul.msk.bf16.vlgmr.msra.gmra.mxu0 %vm7315_vm14, %v7770_v58  ;;  %v9748_v58 = vld [vmem:[%s15688_s11 + $0x20] sm:$0xff] }
 0x8ae   :  { %7895 = vmatpush.bf16.msrb.mxu0 %v15270_v15  ;;  %7815 = vmatpush.bf16.msrb.mxu1 %v15219_v59  ;;  %v9751_v59 = vld [vmem:[%s15688_s11 + $0x38] sm:$0xff] }
 0x8af   :  { %7913 = vmatpush.bf16.msra.mxu3 %v15280_v42 }
 0x8b1   :  { %7948 = vmatpush.bf16.msrb.mxu2 %v15292_v5 }
 0x8b2   :  { %7896 = vmatpush.bf16.msrb.mxu0 %v15280_v42  ;;  %7928 = vmatpush.bf16.msra.mxu1 %v15258_v55  ;;  %v7352_v33 = vpop.f32.mrf.mxu2  ;;  %v7330_v54 = vpop.f32.mrf.mxu1 }
 0x8b3   :  { %7914 = vmatpush.bf16.msra.mxu3 %v15292_v5  ;;  %v9746_v33 = vld [vmem:[%s15688_s11 + $0x10] sm:$0xff] }
 0x8b5   :  { %7949 = vmatpush.bf16.msrb.mxu2 %v15305_v37  ;;  %9508 = vmatmul.msk.bf16.vlgmr.msrb.gmra.mxu1 %vm7315_vm14, %v7804_v9 }
 0x8b6   :  { %7897 = vmatpush.bf16.msrb.mxu0 %v15292_v5  ;;  %7929 = vmatpush.bf16.msra.mxu1 %v15270_v15 }
 0x8b7   :  { %7915 = vmatpush.bf16.msra.mxu3 %v15305_v37 }
 0x8b8   :  { %9543 = vmatmul.msk.bf16.vlgmr.msrb.gmra.mxu2 %vm7315_vm14, %v7938_v1 }
 0x8b9   :  { %8062 = vmatpush.bf16.msra.mxu2 %v15346_v29 }
 0x8ba   :  { %7898 = vmatpush.bf16.msrb.mxu0 %v15305_v37  ;;  %7930 = vmatpush.bf16.msra.mxu1 %v15280_v42 }
 0x8bb   :  { %7979 = vmatpush.bf16.msrb.mxu3 %v15258_v55  ;;  %v15398_v7 = vpop.f32.mrf.mxu3 }
 0x8bc   :  { %9541 = vmatmul.msk.bf16.vlgmr.msra.gmra.mxu3 %vm7315_vm14, %v7904_v4 }
 0x8bd   :  { %8063 = vmatpush.bf16.msra.mxu2 %v15357_v63  ;;  %9540 = vmatmul.msk.bf16.vlgmr.msrb.gmra.mxu0 %vm7315_vm14, %v7887_v41 }
 0x8be   :  { %7962 = vmatpush.bf16.msra.mxu0 %v15258_v55  ;;  %7931 = vmatpush.bf16.msra.mxu1 %v15292_v5 }
 0x8bf   :  { %7980 = vmatpush.bf16.msrb.mxu3 %v15270_v15 }
 0x8c1   :  { %8064 = vmatpush.bf16.msra.mxu2 %v15370_v62 }
 0x8c2   :  { %7963 = vmatpush.bf16.msra.mxu0 %v15270_v15  ;;  %7932 = vmatpush.bf16.msra.mxu1 %v15305_v37 }
 0x8c3   :  { %7981 = vmatpush.bf16.msrb.mxu3 %v15280_v42  ;;  %v7374_v10 = vpop.f32.mrf.mxu3 }
 0x8c5   :  { %8065 = vmatpush.bf16.msra.mxu2 %v15382_v34  ;;  %9542 = vmatmul.msk.bf16.vlgmr.msra.gmra.mxu1 %vm7315_vm14, %v7921_v16  ;;  %v15416_v6 = vpop.f32.mrf.mxu1 }
 0x8c6   :  { %7964 = vmatpush.bf16.msra.mxu0 %v15280_v42  ;;  %7996 = vmatpush.bf16.msrb.mxu1 %v15258_v55 }
 0x8c7   :  { %7982 = vmatpush.bf16.msrb.mxu3 %v15292_v5 }
 0x8c9   :  { %8066 = vmatpush.bf16.msra.mxu2 %v15396_v51 }
 0x8ca   :  { %7965 = vmatpush.bf16.msra.mxu0 %v15292_v5  ;;  %7997 = vmatpush.bf16.msrb.mxu1 %v15270_v15 }
 0x8cb   :  { %7983 = vmatpush.bf16.msrb.mxu3 %v15305_v37 }
 0x8cc   :  { %9577 = vmatmul.msk.bf16.vlgmr.msra.gmra.mxu2 %vm7315_vm14, %v8025_v8 }
 0x8cd   :  { %8130 = vmatpush.bf16.msrb.mxu2 %v15346_v29  ;;  %v7396_v17 = vpop.f32.mrf.mxu1 }
 0x8ce   :  { %7966 = vmatpush.bf16.msra.mxu0 %v15305_v37  ;;  %7998 = vmatpush.bf16.msrb.mxu1 %v15280_v42 }
 0x8cf   :  { %8096 = vmatpush.bf16.msra.mxu3 %v15346_v29 }
 0x8d0   :  { %9545 = vmatmul.msk.bf16.vlgmr.msrb.gmra.mxu3 %vm7315_vm14, %v7972_v18 }
 0x8d1   :  { %8131 = vmatpush.bf16.msrb.mxu2 %v15357_v63  ;;  %9544 = vmatmul.msk.bf16.vlgmr.msra.gmra.mxu0 %vm7315_vm14, %v7955_v19 }
 0x8d2   :  { %8079 = vmatpush.bf16.msrb.mxu0 %v15346_v29  ;;  %7999 = vmatpush.bf16.msrb.mxu1 %v15292_v5 }
 0x8d3   :  { %8097 = vmatpush.bf16.msra.mxu3 %v15357_v63 }
 0x8d5   :  { %8132 = vmatpush.bf16.msrb.mxu2 %v15370_v62 }
 0x8d6   :  { %8080 = vmatpush.bf16.msrb.mxu0 %v15357_v63  ;;  %8000 = vmatpush.bf16.msrb.mxu1 %v15305_v37  ;;  %v9749_v37 = vld [vmem:[%s15688_s11 + $0x28] sm:$0xff] }
 0x8d7   :  { %8098 = vmatpush.bf16.msra.mxu3 %v15370_v62  ;;  %v7416_v12 = vpop.f32.mrf.mxu2 }
 0x8d9   :  { %8133 = vmatpush.bf16.msrb.mxu2 %v15382_v34  ;;  %9546 = vmatmul.msk.bf16.vlgmr.msrb.gmra.mxu1 %vm7315_vm14, %v7989_v61 }
 0x8da   :  { %8081 = vmatpush.bf16.msrb.mxu0 %v15370_v62  ;;  %8113 = vmatpush.bf16.msra.mxu1 %v15346_v29 }
 0x8db   :  { %8099 = vmatpush.bf16.msra.mxu3 %v15382_v34 }
 0x8dd   :  { %8134 = vmatpush.bf16.msrb.mxu2 %v15396_v51 }
 0x8de   :  { %8082 = vmatpush.bf16.msrb.mxu0 %v15382_v34  ;;  %8114 = vmatpush.bf16.msra.mxu1 %v15357_v63 }
 0x8df   :  { %8100 = vmatpush.bf16.msra.mxu3 %v15396_v51  ;;  %v7418_v50 = vpop.f32.mrf.mxu2 }
 0x8e0   :  { %9581 = vmatmul.msk.bf16.vlgmr.msrb.gmra.mxu2 %vm7315_vm14, %v8123_v20 }
 0x8e1   :  { %8289 = vmatpush.bf16.msra.mxu2 %v9751_v59 }
 0x8e2   :  { %8083 = vmatpush.bf16.msrb.mxu0 %v15396_v51  ;;  %8115 = vmatpush.bf16.msra.mxu1 %v15370_v62 }
 0x8e3   :  { %8164 = vmatpush.bf16.msrb.mxu3 %v15346_v29 }
 0x8e4   :  { %9579 = vmatmul.msk.bf16.vlgmr.msra.gmra.mxu3 %vm7315_vm14, %v8089_v2 }
 0x8e5   :  { %9578 = vmatmul.msk.bf16.vlgmr.msrb.gmra.mxu0 %vm7315_vm14, %v8072_v49  ;;  %8290 = vmatpush.bf16.msra.mxu2 %v9750_v35 }
 0x8e6   :  { %8147 = vmatpush.bf16.msra.mxu0 %v15346_v29  ;;  %8116 = vmatpush.bf16.msra.mxu1 %v15382_v34 }
 0x8e7   :  { %8165 = vmatpush.bf16.msrb.mxu3 %v15357_v63  ;;  %v7528_v48 = vpop.f32.mrf.mxu2 }
 0x8e8   :  { %v15470_v11 = vadd.f32 %v7528_v48, %v15341_v31 }
 0x8e9   :  { %8291 = vmatpush.bf16.msra.mxu2 %v9749_v37 }
 0x8ea   :  { %8148 = vmatpush.bf16.msra.mxu0 %v15357_v63  ;;  %8117 = vmatpush.bf16.msra.mxu1 %v15396_v51  ;;  %v7438_v3 = vpop.f32.mrf.mxu0 }
 0x8eb   :  { %8166 = vmatpush.bf16.msrb.mxu3 %v15370_v62  ;;  %v7460_v47 = vpop.f32.mrf.mxu3 }
 0x8ed   :  { %9580 = vmatmul.msk.bf16.vlgmr.msra.gmra.mxu1 %vm7315_vm14, %v8106_v22  ;;  %8292 = vmatpush.bf16.msra.mxu2 %v9748_v58 }
 0x8ee   :  { %8149 = vmatpush.bf16.msra.mxu0 %v15370_v62  ;;  %8181 = vmatpush.bf16.msrb.mxu1 %v15346_v29  ;;  %v9747_v29 = vld [vmem:[%s15688_s11 + $0x18] sm:$0xff] }
 0x8ef   :  { %8167 = vmatpush.bf16.msrb.mxu3 %v15382_v34  ;;  %v7530_v38 = vpop.f32.mrf.mxu2 }
 0x8f1   :  { %8293 = vmatpush.bf16.msra.mxu2 %v9747_v29 }
 0x8f2   :  { %8150 = vmatpush.bf16.msra.mxu0 %v15382_v34  ;;  %8182 = vmatpush.bf16.msrb.mxu1 %v15357_v63  ;;  %v7440_v14 = vpop.f32.mrf.mxu0  ;;  %v7482_v21 = vpop.f32.mrf.mxu1 }
 0x8f3   :  { %8168 = vmatpush.bf16.msrb.mxu3 %v15396_v51  ;;  %v7462_v56 = vpop.f32.mrf.mxu3 }
 0x8f5   :  { %8294 = vmatpush.bf16.msra.mxu2 %v9746_v33 }
 0x8f6   :  { %8151 = vmatpush.bf16.msra.mxu0 %v15396_v51  ;;  %8183 = vmatpush.bf16.msrb.mxu1 %v15370_v62  ;;  %v9745_v62 = vld [vmem:[%s15688_s11 + $0x8] sm:$0xff] }
 0x8f7   :  { %9583 = vmatmul.msk.bf16.vlgmr.msrb.gmra.mxu3 %vm7315_vm14, %v8157_v60  ;;  %v7592_v46 = vpop.f32.mrf.mxu2 }
 0x8f8   :  { %v15479_v0 = vadd.f32 %v7592_v46, %v7416_v12  ;;  %8315 = vmatpush.bf16.msra.mxu3 %v9751_v59 }
 0x8f9   :  { %9582 = vmatmul.msk.bf16.vlgmr.msra.gmra.mxu0 %vm7315_vm14, %v8140_v24  ;;  %8295 = vmatpush.bf16.msra.mxu2 %v9745_v62 }
 0x8fa   :  { %8184 = vmatpush.bf16.msrb.mxu1 %v15382_v34  ;;  %v7484_v32 = vpop.f32.mrf.mxu1  ;;  %v15477_v23 = vpop.f32.mrf.mxu0  ;;  %8302 = vmatpush.bf16.msrb.mxu0 %v9751_v59 }
 0x8fb   :  { %v7560_v30 = vpop.f32.mrf.mxu3 }
 0x8fc   :  { %v15482_v43 = vadd.f32 %v7560_v30, %v15398_v7  ;;  %8316 = vmatpush.bf16.msra.mxu3 %v9750_v35 }
 0x8fe   :  { %8185 = vmatpush.bf16.msrb.mxu1 %v15396_v51  ;;  %8303 = vmatpush.bf16.msrb.mxu0 %v9750_v35  ;;  %v9744_v51 = vld [vmem:[%s15688_s11] sm:$0xff]  ;;  %s10234_s11 = smov [#allocation17]  }
 0x8ff   :  { %v7594_v45 = vpop.f32.mrf.mxu2  ;;  %8296 = vmatpush.bf16.msra.mxu2 %v9744_v51  ;;  %s8686_s25 = sshll.u32 %s10234_s11, 4  ;;  %s8687_s25 = int_to_ptr.vmem [resolvable:$true] %s8686_s25 }
 0x900   :  { %8317 = vmatpush.bf16.msra.mxu3 %v9749_v37 }
 0x901   :  { %9584 = vmatmul.msk.bf16.vlgmr.msrb.gmra.mxu1 %vm7315_vm14, %v8174_v53  ;;  %v15535_v53 = vld [vmem:[#allocation11] sm:$0x1] }
 0x902   :  { %v7546_v36 = vpop.f32.mrf.mxu0  ;;  %v7576_v28 = vpop.f32.mrf.mxu1  ;;  %8328 = vmatpush.bf16.msra.mxu1 %v9751_v59  ;;  %8304 = vmatpush.bf16.msrb.mxu0 %v9749_v37 }
 0x903   :  { %v15485_v25 = vadd.f32 %v7576_v28, %v15416_v6  ;;  %v7562_v27 = vpop.f32.mrf.mxu3  ;;  %8341 = vmatpush.bf16.msrb.mxu2 %v9751_v59 }
 0x904   :  { %8318 = vmatpush.bf16.msra.mxu3 %v9748_v58 }
 0x906   :  { %8329 = vmatpush.bf16.msra.mxu1 %v9750_v35  ;;  %8305 = vmatpush.bf16.msrb.mxu0 %v9748_v58 }
 0x907   :  { %v15492_v42 = vpop.f32.mrf.mxu2  ;;  %8342 = vmatpush.bf16.msrb.mxu2 %v9750_v35 }
 0x908   :  { %8319 = vmatpush.bf16.msra.mxu3 %v9747_v29  ;;  %v7821_v48 = vadd.f32 %v15492_v42, %v15470_v11  ;;  %v7545_v11 = vadd.f32 %v15477_v23, %v15339_v26 }
 0x90a   :  { %v7578_v40 = vpop.f32.mrf.mxu1  ;;  %v7608_v55 = vpop.f32.mrf.mxu0  ;;  %8330 = vmatpush.bf16.msra.mxu1 %v9749_v37  ;;  %8306 = vmatpush.bf16.msrb.mxu0 %v9747_v29 }
 0x90b   :  { %v15490_v15 = vadd.f32 %v7608_v55, %v7438_v3  ;;  %v7624_v5 = vpop.f32.mrf.mxu3  ;;  %8343 = vmatpush.bf16.msrb.mxu2 %v9749_v37 }
 0x90c   :  { %v15497_v44 = vadd.f32 %v7624_v5, %v7460_v47  ;;  %8320 = vmatpush.bf16.msra.mxu3 %v9746_v33 }
 0x90e   :  { %8331 = vmatpush.bf16.msra.mxu1 %v9748_v58  ;;  %8307 = vmatpush.bf16.msrb.mxu0 %v9746_v33 }
 0x90f   :  { %v7700_v57 = vpop.f32.mrf.mxu2  ;;  %8344 = vmatpush.bf16.msrb.mxu2 %v9748_v58 }
 0x910   :  { %8321 = vmatpush.bf16.msra.mxu3 %v9745_v62  ;;  %v15549_v57 = vld [vmem:[#allocation14 + $0x38] sm:$0xff] }
 0x912   :  { %v7610_v52 = vpop.f32.mrf.mxu0  ;;  %v7640_v39 = vpop.f32.mrf.mxu1  ;;  %8332 = vmatpush.bf16.msra.mxu1 %v9747_v29  ;;  %8308 = vmatpush.bf16.msrb.mxu0 %v9745_v62 }
 0x913   :  { %v15502_v13 = vadd.f32 %v7640_v39, %v7482_v21  ;;  %v7626_v31 = vpop.f32.mrf.mxu3  ;;  %8345 = vmatpush.bf16.msrb.mxu2 %v9747_v29 }
 0x914   :  { %8322 = vmatpush.bf16.msra.mxu3 %v9744_v51 }
 0x916   :  { %8333 = vmatpush.bf16.msra.mxu1 %v9746_v33  ;;  %8309 = vmatpush.bf16.msrb.mxu0 %v9744_v51 }
 0x917   :  { %v15512_v1 = vpop.f32.mrf.mxu2  ;;  %8346 = vmatpush.bf16.msrb.mxu2 %v9746_v33 }
 0x918   :  { %8367 = vmatpush.bf16.msrb.mxu3 %v9751_v59  ;;  %v7825_v40 = vadd.f32 %v15512_v1, %v15479_v0 }
 0x91a   :  { %v7642_v63 = vpop.f32.mrf.mxu1  ;;  %v15510_v9 = vpop.f32.mrf.mxu0  ;;  %8334 = vmatpush.bf16.msra.mxu1 %v9745_v62  ;;  %8354 = vmatpush.bf16.msra.mxu0 %v9751_v59 }
 0x91b   :  { %v15517_v54 = vpop.f32.mrf.mxu3  ;;  %8347 = vmatpush.bf16.msrb.mxu2 %v9745_v62 }
 0x91c   :  { %8368 = vmatpush.bf16.msrb.mxu3 %v9750_v35  ;;  %v7823_v42 = vadd.f32 %v15517_v54, %v15482_v43 }
 0x91e   :  { %8335 = vmatpush.bf16.msra.mxu1 %v9744_v51  ;;  %8355 = vmatpush.bf16.msra.mxu0 %v9750_v35 }
 0x91f   :  { %v7768_v41 = vpop.f32.mrf.mxu2  ;;  %8348 = vmatpush.bf16.msrb.mxu2 %v9744_v51 }
 0x920   :  { %8369 = vmatpush.bf16.msrb.mxu3 %v9749_v37 }
 0x922   :  { %v7717_v4 = vpop.f32.mrf.mxu0  ;;  %v15522_v34 = vpop.f32.mrf.mxu1  ;;  %8380 = vmatpush.bf16.msrb.mxu1 %v9751_v59  ;;  %8356 = vmatpush.bf16.msra.mxu0 %v9749_v37  ;;  %v7822_v59 = vadd.f32 %v15510_v9, %v7545_v11 }
 0x923   :  { %v7734_v7 = vpop.f32.mrf.mxu3  ;;  %v7824_v43 = vadd.f32 %v15522_v34, %v15485_v25  ;;  %v15560_v4 = vld [vmem:[#allocation14 + $0x28] sm:$0xff] }
 0x924   :  { %8370 = vmatpush.bf16.msrb.mxu3 %v9748_v58 }
 0x926   :  { %8381 = vmatpush.bf16.msrb.mxu1 %v9750_v35  ;;  %8357 = vmatpush.bf16.msra.mxu0 %v9748_v58 }
 0x927   :  { %v7883_v10 = vpop.f32.mrf.mxu2 }
 0x928   :  { %8371 = vmatpush.bf16.msrb.mxu3 %v9747_v29  ;;  %v8006_v24 = vadd.f32 %v7883_v10, %v7821_v48 }
 0x92a   :  { %v7751_v16 = vpop.f32.mrf.mxu1  ;;  %v15527_v8 = vpop.f32.mrf.mxu0  ;;  %8382 = vmatpush.bf16.msrb.mxu1 %v9749_v37  ;;  %8358 = vmatpush.bf16.msra.mxu0 %v9747_v29 }
 0x92b   :  { %v15529_v6 = vpop.f32.mrf.mxu3 }
 0x92c   :  { %8372 = vmatpush.bf16.msrb.mxu3 %v9746_v33 }
 0x92e   :  { %8383 = vmatpush.bf16.msrb.mxu1 %v9748_v58  ;;  %8359 = vmatpush.bf16.msra.mxu0 %v9746_v33 }
 0x92f   :  { %v7885_v17 = vpop.f32.mrf.mxu2 }
 0x930   :  { %8373 = vmatpush.bf16.msrb.mxu3 %v9745_v62 }
 0x932   :  { %v7785_v18 = vpop.f32.mrf.mxu0  ;;  %v15531_v19 = vpop.f32.mrf.mxu1  ;;  %8384 = vmatpush.bf16.msrb.mxu1 %v9747_v29  ;;  %8360 = vmatpush.bf16.msra.mxu0 %v9745_v62  ;;  %v15553_v29 = vld [vmem:[#allocation14 + $0x30] sm:$0xff] }
 0x933   :  { %v7802_v61 = vpop.f32.mrf.mxu3 }
 0x934   :  { %8374 = vmatpush.bf16.msrb.mxu3 %v9744_v51  ;;  %v15565_v61 = vld [vmem:[#allocation14 + $0x20] sm:$0xff] }
 0x936   :  { %8385 = vmatpush.bf16.msrb.mxu1 %v9746_v33  ;;  %8361 = vmatpush.bf16.msra.mxu0 %v9744_v51 }
 0x93a   :  { %v7819_v20 = vpop.f32.mrf.mxu1  ;;  %v7900_v2 = vpop.f32.mrf.mxu0  ;;  %8386 = vmatpush.bf16.msrb.mxu1 %v9745_v62 }
 0x93b   :  { %v7951_v12 = vpop.f32.mrf.mxu2  ;;  %v8007_v55 = vadd.f32 %v7900_v2, %v7822_v59  ;;  %v7826_v20 = vadd.f32 %v15527_v8, %v15490_v15 }
 0x93c   :  { %v8010_v35 = vadd.f32 %v7951_v12, %v7825_v40 }
 0x93e   :  { %8387 = vmatpush.bf16.msrb.mxu1 %v9744_v51 }
 0x93f   :  { %v7917_v49 = vpop.f32.mrf.mxu3 }
 0x940   :  { %v8008_v58 = vadd.f32 %v7917_v49, %v7823_v42 }
 0x942   :  { %v7902_v50 = vpop.f32.mrf.mxu0  ;;  %v7934_v22 = vpop.f32.mrf.mxu1 }
 0x943   :  { %v7953_v60 = vpop.f32.mrf.mxu2  ;;  %v8009_v54 = vadd.f32 %v7934_v22, %v7824_v43  ;;  %v15572_v50 = vld [vmem:[#allocation14 + $0x18] sm:$0xff]  ;;  %v7827_v22 = vadd.f32 %v15529_v6, %v15497_v44  ;;  %v7828_v6 = vadd.f32 %v15531_v19, %v15502_v13 }
 0x947   :  { %v7919_v3 = vpop.f32.mrf.mxu3 }
 0x94a   :  { %v7936_v47 = vpop.f32.mrf.mxu1 }
 0x94b   :  { %v15582_v47 = vld [vmem:[#allocation14 + $0x10] sm:$0xff] }
 0x94e   :  { %v7968_v14 = vpop.f32.mrf.mxu0 }
 0x94f   :  { %v8068_v21 = vpop.f32.mrf.mxu2  ;;  %v8011_v12 = vadd.f32 %v7968_v14, %v7826_v20 }
 0x950   :  { %v8191_v38 = vadd.f32 %v8068_v21, %v8006_v24 }
 0x952   :  { %v8200_v32 = vadd.f32 %v15535_v53, %v8191_v38 }
 0x953   :  { %v15537_v56 = vpop.f32.mrf.mxu3 }
 0x954   :  { %v8208_v46 = vmax.f32 %v8200_v32, 0.0  ;;  %v8012_v15 = vadd.f32 %v15537_v56, %v7827_v22  ;;  %v9753_v32 = vld [vmem:[#allocation14 + $0x8] sm:$0xff] }
 0x956   :  { %v8216_v30 = vpack.c.bf16 %v8208_v46, %v8208_v46  ;;  %v7970_v36 = vpop.f32.mrf.mxu0  ;;  %v15540_v28 = vpop.f32.mrf.mxu1 }
 0x957   :  { %v8070_v45 = vpop.f32.mrf.mxu2  ;;  %v8013_v38 = vadd.f32 %v15540_v28, %v7828_v6  ;;  %v9752_v28 = vld [vmem:[#allocation14] sm:$0xff] }
 0x958   :  { %8297 = vmatmul.bf16.vlgmr.msra.gmra.mxu2 %v8216_v30 }
 0x959   :  { %8474 = vmatpush.bf16.msra.mxu2 %v15549_v57 }
 0x95b   :  { %v7987_v27 = vpop.f32.mrf.mxu3 }
 0x95d   :  { %8475 = vmatpush.bf16.msra.mxu2 %v15553_v29 }
 0x95e   :  { %v8004_v5 = vpop.f32.mrf.mxu1 }
 0x961   :  { %8476 = vmatpush.bf16.msra.mxu2 %v15560_v4 }
 0x962   :  { %v8085_v37 = vpop.f32.mrf.mxu0 }
 0x963   :  { %v8192_v52 = vadd.f32 %v8085_v37, %v8007_v55  ;;  %v8136_v39 = vpop.f32.mrf.mxu2 }
 0x964   :  { %v8195_v31 = vadd.f32 %v8136_v39, %v8010_v35 }
 0x965   :  { %v8201_v26 = vadd.f32 %v15535_v53, %v8192_v52  ;;  %8477 = vmatpush.bf16.msra.mxu2 %v15565_v61 }
 0x966   :  { %v8204_v0 = vadd.f32 %v15535_v53, %v8195_v31 }
 0x967   :  { %v8102_v23 = vpop.f32.mrf.mxu3  ;;  %v8209_v9 = vmax.f32 %v8201_v26, 0.0 }
 0x968   :  { %v8193_v63 = vadd.f32 %v8102_v23, %v8008_v58  ;;  %v8212_v1 = vmax.f32 %v8204_v0, 0.0 }
 0x969   :  { %v8217_v62 = vpack.c.bf16 %v8209_v9, %v8209_v9  ;;  %8478 = vmatpush.bf16.msra.mxu2 %v15572_v50 }
 0x96a   :  { %v8202_v33 = vadd.f32 %v15535_v53, %v8193_v63  ;;  %v8220_v41 = vpack.c.bf16 %v8212_v1, %v8212_v1  ;;  %v8087_v7 = vpop.f32.mrf.mxu0  ;;  %v8119_v16 = vpop.f32.mrf.mxu1 }
 0x96b   :  { %v8194_v10 = vadd.f32 %v8119_v16, %v8009_v54  ;;  %v8138_v18 = vpop.f32.mrf.mxu2  ;;  %8310 = vmatmul.bf16.vlgmr.msrb.gmra.mxu0 %v8217_v62 }
 0x96c   :  { %v8210_v51 = vmax.f32 %v8202_v33, 0.0  ;;  %8349 = vmatmul.bf16.vlgmr.msrb.gmra.mxu2 %v8220_v41  ;;  %8487 = vmatpush.bf16.msrb.mxu0 %v15549_v57 }
 0x96d   :  { %v8203_v25 = vadd.f32 %v15535_v53, %v8194_v10  ;;  %8479 = vmatpush.bf16.msra.mxu2 %v15582_v47 }
 0x96e   :  { %v8218_v17 = vpack.c.bf16 %v8210_v51, %v8210_v51 }
 0x96f   :  { %v8104_v34 = vpop.f32.mrf.mxu3  ;;  %v8211_v2 = vmax.f32 %v8203_v25, 0.0 }
 0x970   :  { %8323 = vmatmul.bf16.vlgmr.msra.gmra.mxu3 %v8218_v17  ;;  %8488 = vmatpush.bf16.msrb.mxu0 %v15553_v29 }
 0x971   :  { %8500 = vmatpush.bf16.msra.mxu3 %v15549_v57  ;;  %v8219_v49 = vpack.c.bf16 %v8211_v2, %v8211_v2  ;;  %8480 = vmatpush.bf16.msra.mxu2 %v9753_v32 }
 0x972   :  { %v8121_v60 = vpop.f32.mrf.mxu1 }
 0x973   :  { %8336 = vmatmul.bf16.vlgmr.msra.gmra.mxu1 %v8219_v49 }
 0x974   :  { %8489 = vmatpush.bf16.msrb.mxu0 %v15560_v4  ;;  %8513 = vmatpush.bf16.msra.mxu1 %v15549_v57 }
 0x975   :  { %8501 = vmatpush.bf16.msra.mxu3 %v15553_v29  ;;  %8481 = vmatpush.bf16.msra.mxu2 %v9752_v28 }
 0x976   :  { %v8153_v3 = vpop.f32.mrf.mxu0 }
 0x977   :  { %v8196_v48 = vadd.f32 %v8153_v3, %v8011_v12 }
 0x978   :  { %8490 = vmatpush.bf16.msrb.mxu0 %v15565_v61  ;;  %8514 = vmatpush.bf16.msra.mxu1 %v15553_v29 }
 0x979   :  { %v8205_v8 = vadd.f32 %v15535_v53, %v8196_v48  ;;  %8502 = vmatpush.bf16.msra.mxu3 %v15560_v4  ;;  %8526 = vmatpush.bf16.msrb.mxu2 %v15549_v57  ;;  %v8425_v48 = vld [vmem:[#allocation16] sm:$0x1] }
 0x97a   :  { %v8170_v24 = vpop.f32.mrf.mxu3 }
 0x97b   :  { %v8197_v44 = vadd.f32 %v8170_v24, %v8012_v15  ;;  %v8213_v14 = vmax.f32 %v8205_v8, 0.0 }
 0x97c   :  { %8491 = vmatpush.bf16.msrb.mxu0 %v15572_v50  ;;  %8515 = vmatpush.bf16.msra.mxu1 %v15560_v4 }
 0x97d   :  { %v8206_v21 = vadd.f32 %v15535_v53, %v8197_v44  ;;  %v8221_v56 = vpack.c.bf16 %v8213_v14, %v8213_v14  ;;  %8503 = vmatpush.bf16.msra.mxu3 %v15565_v61  ;;  %8527 = vmatpush.bf16.msrb.mxu2 %v15553_v29 }
 0x97e   :  { %v8155_v30 = vpop.f32.mrf.mxu0  ;;  %v8187_v36 = vpop.f32.mrf.mxu1 }
 0x97f   :  { %v8214_v46 = vmax.f32 %v8206_v21, 0.0  ;;  %v8198_v45 = vadd.f32 %v8187_v36, %v8013_v38  ;;  %8362 = vmatmul.bf16.vlgmr.msra.gmra.mxu0 %v8221_v56 }
 0x980   :  { %8492 = vmatpush.bf16.msrb.mxu0 %v15582_v47  ;;  %8516 = vmatpush.bf16.msra.mxu1 %v15565_v61 }
 0x981   :  { %v8222_v13 = vpack.c.bf16 %v8214_v46, %v8214_v46  ;;  %v8207_v19 = vadd.f32 %v15535_v53, %v8198_v45  ;;  %8504 = vmatpush.bf16.msra.mxu3 %v15572_v50  ;;  %8528 = vmatpush.bf16.msrb.mxu2 %v15560_v4  ;;  %v8240_v53 = vld [vmem:[#allocation13] sm:$0x1] }
 0x982   :  { %v8172_v11 = vpop.f32.mrf.mxu3 }
 0x983   :  { %8375 = vmatmul.bf16.vlgmr.msrb.gmra.mxu3 %v8222_v13  ;;  %v8215_v27 = vmax.f32 %v8207_v19, 0.0 }
 0x984   :  { %8493 = vmatpush.bf16.msrb.mxu0 %v9753_v32  ;;  %8517 = vmatpush.bf16.msra.mxu1 %v15572_v50 }
 0x985   :  { %v8223_v59 = vpack.c.bf16 %v8215_v27, %v8215_v27  ;;  %8505 = vmatpush.bf16.msra.mxu3 %v15582_v47  ;;  %8529 = vmatpush.bf16.msrb.mxu2 %v15565_v61 }
 0x986   :  { %v8189_v40 = vpop.f32.mrf.mxu1 }
 0x987   :  { %8388 = vmatmul.bf16.vlgmr.msrb.gmra.mxu1 %v8223_v59 }
 0x988   :  { %8494 = vmatpush.bf16.msrb.mxu0 %v9752_v28  ;;  %8518 = vmatpush.bf16.msra.mxu1 %v15582_v47 }
 0x989   :  { %8506 = vmatpush.bf16.msra.mxu3 %v9753_v32  ;;  %8530 = vmatpush.bf16.msrb.mxu2 %v15572_v50 }
 0x98c   :  { %8539 = vmatpush.bf16.msra.mxu0 %v15549_v57  ;;  %8519 = vmatpush.bf16.msra.mxu1 %v9753_v32 }
 0x98d   :  { %8507 = vmatpush.bf16.msra.mxu3 %v9752_v28  ;;  %8531 = vmatpush.bf16.msrb.mxu2 %v15582_v47 }
 0x990   :  { %8540 = vmatpush.bf16.msra.mxu0 %v15553_v29  ;;  %8520 = vmatpush.bf16.msra.mxu1 %v9752_v28 }
 0x991   :  { %8552 = vmatpush.bf16.msrb.mxu3 %v15549_v57  ;;  %8532 = vmatpush.bf16.msrb.mxu2 %v9753_v32 }
 0x994   :  { %8541 = vmatpush.bf16.msra.mxu0 %v15560_v4  ;;  %8565 = vmatpush.bf16.msrb.mxu1 %v15549_v57 }
 0x995   :  { %8553 = vmatpush.bf16.msrb.mxu3 %v15553_v29  ;;  %8533 = vmatpush.bf16.msrb.mxu2 %v9752_v28 }
 0x998   :  { %8542 = vmatpush.bf16.msra.mxu0 %v15565_v61  ;;  %8566 = vmatpush.bf16.msrb.mxu1 %v15553_v29 }
 0x999   :  { %8554 = vmatpush.bf16.msrb.mxu3 %v15560_v4 }
 0x99c   :  { %8543 = vmatpush.bf16.msra.mxu0 %v15572_v50  ;;  %8567 = vmatpush.bf16.msrb.mxu1 %v15560_v4 }
 0x99d   :  { %8555 = vmatpush.bf16.msrb.mxu3 %v15565_v61 }
 0x9a0   :  { %8544 = vmatpush.bf16.msra.mxu0 %v15582_v47  ;;  %8568 = vmatpush.bf16.msrb.mxu1 %v15565_v61 }
 0x9a1   :  { %8556 = vmatpush.bf16.msrb.mxu3 %v15572_v50 }
 0x9a4   :  { %8545 = vmatpush.bf16.msra.mxu0 %v9753_v32  ;;  %8569 = vmatpush.bf16.msrb.mxu1 %v15572_v50 }
 0x9a5   :  { %8557 = vmatpush.bf16.msrb.mxu3 %v15582_v47 }
 0x9a8   :  { %8546 = vmatpush.bf16.msra.mxu0 %v9752_v28  ;;  %8570 = vmatpush.bf16.msrb.mxu1 %v15582_v47 }
 0x9a9   :  { %8558 = vmatpush.bf16.msrb.mxu3 %v9753_v32 }
 0x9ac   :  { %8571 = vmatpush.bf16.msrb.mxu1 %v9753_v32 }
 0x9ad   :  { %8559 = vmatpush.bf16.msrb.mxu3 %v9752_v28 }
 0x9b0   :  { %8572 = vmatpush.bf16.msrb.mxu1 %v9752_v28 }
 0x9db   :  { %v8298_v55 = vpop.f32.mrf.mxu2 }
 0x9dc   :  { %v8299_v42 = vadd.f32 %v8298_v55, %v8240_v53 }
 0x9de   :  { %v8393_v35 = vmax.f32 %v8299_v42, 0.0 }
 0x9e0   :  { %v8401_v5 = vpack.c.bf16 %v8393_v35, %v8393_v35 }
 0x9e2   :  { %8482 = vmatmul.bf16.vlgmr.msra.gmra.mxu2 %v8401_v5 }
 0x9e3   :  { %v8300_v37 = vpop.f32.mrf.mxu2 }
 0x9e8   :  { %v8311_v52 = vpop.f32.mrf.mxu0 }
 0x9e9   :  { %v8312_v39 = vadd.f32 %v8311_v52, %v8240_v53 }
 0x9eb   :  { %v8394_v57 = vmax.f32 %v8312_v39, 0.0 }
 0x9ed   :  { %v8402_v58 = vpack.c.bf16 %v8394_v57, %v8394_v57 }
 0x9ef   :  { %v8350_v31 = vpop.f32.mrf.mxu2  ;;  %8495 = vmatmul.bf16.vlgmr.msrb.gmra.mxu0 %v8402_v58 }
 0x9f0   :  { %v8351_v26 = vadd.f32 %v8350_v31, %v8240_v53  ;;  %v8313_v23 = vpop.f32.mrf.mxu0  ;;  %v8337_v29 = vpop.f32.mrf.mxu1 }
 0x9f1   :  { %v8338_v0 = vadd.f32 %v8337_v29, %v8240_v53 }
 0x9f2   :  { %v8397_v43 = vmax.f32 %v8351_v26, 0.0 }
 0x9f3   :  { %v8324_v63 = vpop.f32.mrf.mxu3  ;;  %v8396_v1 = vmax.f32 %v8338_v0, 0.0 }
 0x9f4   :  { %v8325_v9 = vadd.f32 %v8324_v63, %v8240_v53  ;;  %v8405_v33 = vpack.c.bf16 %v8397_v43, %v8397_v43 }
 0x9f5   :  { %v8404_v62 = vpack.c.bf16 %v8396_v1, %v8396_v1 }
 0x9f6   :  { %v8395_v54 = vmax.f32 %v8325_v9, 0.0  ;;  %8534 = vmatmul.bf16.vlgmr.msrb.gmra.mxu2 %v8405_v33 }
 0x9f7   :  { %v8352_v41 = vpop.f32.mrf.mxu2  ;;  %8521 = vmatmul.bf16.vlgmr.msra.gmra.mxu1 %v8404_v62 }
 0x9f8   :  { %v8403_v4 = vpack.c.bf16 %v8395_v54, %v8395_v54  ;;  %v8339_v51 = vpop.f32.mrf.mxu1 }
 0x9fa   :  { %8508 = vmatmul.bf16.vlgmr.msra.gmra.mxu3 %v8403_v4 }
 0x9fb   :  { %v8326_v10 = vpop.f32.mrf.mxu3 }
 0x9fc   :  { %v8363_v7 = vpop.f32.mrf.mxu0 }
 0x9fd   :  { %v8364_v16 = vadd.f32 %v8363_v7, %v8240_v53 }
 0x9ff   :  { %v8398_v18 = vmax.f32 %v8364_v16, 0.0 }
 0xa01   :  { %v8406_v17 = vpack.c.bf16 %v8398_v18, %v8398_v18 }
 0xa03   :  { %8547 = vmatmul.bf16.vlgmr.msra.gmra.mxu0 %v8406_v17 }
 0xa04   :  { %v8365_v25 = vpop.f32.mrf.mxu0  ;;  %v8389_v34 = vpop.f32.mrf.mxu1 }
 0xa05   :  { %v8390_v61 = vadd.f32 %v8389_v34, %v8240_v53 }
 0xa06   :  { %v8376_v20 = vpop.f32.mrf.mxu3 }
 0xa07   :  { %v8377_v2 = vadd.f32 %v8376_v20, %v8240_v53  ;;  %v8400_v12 = vmax.f32 %v8390_v61, 0.0 }
 0xa09   :  { %v8399_v49 = vmax.f32 %v8377_v2, 0.0  ;;  %v8408_v50 = vpack.c.bf16 %v8400_v12, %v8400_v12 }
 0xa0b   :  { %v8407_v22 = vpack.c.bf16 %v8399_v49, %v8399_v49  ;;  %8573 = vmatmul.bf16.vlgmr.msrb.gmra.mxu1 %v8408_v50 }
 0xa0c   :  { %v8391_v60 = vpop.f32.mrf.mxu1 }
 0xa0d   :  { %8560 = vmatmul.bf16.vlgmr.msrb.gmra.mxu3 %v8407_v22 }
 0xa0e   :  { %v8378_v3 = vpop.f32.mrf.mxu3 }
 0xa65   :  { %v8483_v15 = vpop.f32.mrf.mxu2 }
 0xa66   :  { %v8484_v8 = vadd.f32 %v8483_v15, %v8425_v48 }
 0xa68   :  { %v8578_v47 = vsel %vm6513_vm11, %v8484_v8, -inf }
 0xa69   :  { %8579 = vmax.xlane.f32.xlu2 %v8578_v47 }
 0xa6c   :  { %v8496_v24 = vpop.f32.mrf.mxu0 }
 0xa6d   :  { %v8497_v44 = vadd.f32 %v8496_v24, %v8425_v48  ;;  %v8485_v14 = vpop.f32.mrf.mxu2 }
 0xa6f   :  { %v8581_v6 = vsel %vm6513_vm11, %v8497_v44, -inf }
 0xa70   :  { %8582 = vmax.xlane.f32.xlu0 %v8581_v6 }
 0xa74   :  { %v8498_v21 = vpop.f32.mrf.mxu0  ;;  %v8522_v38 = vpop.f32.mrf.mxu1 }
 0xa75   :  { %v8523_v27 = vadd.f32 %v8522_v38, %v8425_v48 }
 0xa77   :  { %v8587_v42 = vsel %vm6513_vm11, %v8523_v27, -inf }
 0xa79   :  { %v8535_v56 = vpop.f32.mrf.mxu2 }
 0xa7a   :  { %v8536_v32 = vadd.f32 %v8535_v56, %v8425_v48 }
 0xa7c   :  { %v8524_v36 = vpop.f32.mrf.mxu1  ;;  %v8590_v13 = vsel %vm6513_vm11, %v8536_v32, -inf }
 0xa7d   :  { %v8509_v46 = vpop.f32.mrf.mxu3  ;;  %8591 = vmax.xlane.f32.xlu2 %v8590_v13 }
 0xa7e   :  { %v8510_v30 = vadd.f32 %v8509_v46, %v8425_v48 }
 0xa80   :  { %v8548_v45 = vpop.f32.mrf.mxu0  ;;  %v8584_v11 = vsel %vm6513_vm11, %v8510_v30, -inf }
 0xa81   :  { %v8549_v19 = vadd.f32 %v8548_v45, %v8425_v48  ;;  %8585 = vmax.xlane.f32.xlu1 %v8584_v11  ;;  %v8537_v59 = vpop.f32.mrf.mxu2 }
 0xa83   :  { %v8593_v28 = vsel %vm6513_vm11, %v8549_v19, -inf }
 0xa84   :  { %8594 = vmax.xlane.f32.xlu0 %v8593_v28 }
 0xa85   :  { %v8511_v40 = vpop.f32.mrf.mxu3  ;;  %8588 = vmax.xlane.f32.xlu2 %v8587_v42 }
 0xa88   :  { %v8550_v53 = vpop.f32.mrf.mxu0  ;;  %v8574_v55 = vpop.f32.mrf.mxu1 }
 0xa89   :  { %v8575_v35 = vadd.f32 %v8574_v55, %v8425_v48 }
 0xa8b   :  { %v8599_v39 = vsel %vm6513_vm11, %v8575_v35, -inf }
 0xa8d   :  { %8600 = vmax.xlane.f32.xlu2 %v8599_v39 }
 0xa90   :  { %v8561_v5 = vpop.f32.mrf.mxu3  ;;  %v8576_v52 = vpop.f32.mrf.mxu1 }
 0xa91   :  { %v8562_v37 = vadd.f32 %v8561_v5, %v8425_v48 }
 0xa93   :  { %v8596_v57 = vsel %vm6513_vm11, %v8562_v37, -inf }
 0xa94   :  { %8597 = vmax.xlane.f32.xlu1 %v8596_v57 }
 0xa98   :  { %v8563_v58 = vpop.f32.mrf.mxu3 }
 0xadc   :  { %v8580_v31 = vpop.xlane.xlu2 %8579 }
 0xadd   :  { %v15634_v26 = vsub.f32 %v8484_v8, %v8580_v31 }
 0xadf   :  { %v8610_v23 = vmul.f32 1.442695, %v15634_v26 }
 0xae1   :  { %9936 = vpow2.f32 %v8610_v23 }
 0xae3   :  { %v8583_v29 = vpop.xlane.xlu0 %8582 }
 0xae4   :  { %v15637_v0 = vsub.f32 %v8497_v44, %v8583_v29 }
 0xae6   :  { %v8612_v63 = vmul.f32 1.442695, %v15637_v0 }
 0xae7   :  { %v9937_v43 = vpop.eup %9936 }
 0xae8   :  { %9938 = vpow2.f32 %v8612_v63  ;;  %v8626_v9 = vsel %vm6513_vm11, %v9937_v43, 0.0 }
 0xae9   :  { %8627 = vadd.xlane.f32.xlu0 %v8626_v9 }
 0xaee   :  { %v9939_v1 = vpop.eup %9938 }
 0xaef   :  { %v8629_v33 = vsel %vm6513_vm11, %v9939_v1, 0.0 }
 0xaf0   :  { %8630 = vadd.xlane.f32.xlu1 %v8629_v33  ;;  %v8592_v54 = vpop.xlane.xlu2 %8591 }
 0xaf1   :  { %v15642_v62 = vsub.f32 %v8536_v32, %v8592_v54 }
 0xaf3   :  { %v8618_v41 = vmul.f32 1.442695, %v15642_v62 }
 0xaf4   :  { %v8586_v4 = vpop.xlane.xlu1 %8585 }
 0xaf5   :  { %v15645_v7 = vsub.f32 %v8510_v30, %v8586_v4  ;;  %9940 = vpow2.f32 %v8618_v41 }
 0xaf7   :  { %v8595_v51 = vpop.xlane.xlu0 %8594  ;;  %v8614_v10 = vmul.f32 1.442695, %v15645_v7 }
 0xaf8   :  { %v15647_v16 = vsub.f32 %v8549_v19, %v8595_v51  ;;  %v8589_v17 = vpop.xlane.xlu2 %8588 }
 0xaf9   :  { %9942 = vpow2.f32 %v8614_v10  ;;  %v15651_v25 = vsub.f32 %v8523_v27, %v8589_v17 }
 0xafa   :  { %v8620_v18 = vmul.f32 1.442695, %v15647_v16 }
 0xafb   :  { %v9941_v34 = vpop.eup %9940  ;;  %v8616_v61 = vmul.f32 1.442695, %v15651_v25 }
 0xafc   :  { %9944 = vpow2.f32 %v8620_v18  ;;  %v8638_v20 = vsel %vm6513_vm11, %v9941_v34, 0.0 }
 0xafd   :  { %9946 = vpow2.f32 %v8616_v61  ;;  %8639 = vadd.xlane.f32.xlu1 %v8638_v20 }
 0xaff   :  { %v9943_v2 = vpop.eup %9942 }
 0xb00   :  { %v8632_v12 = vsel %vm6513_vm11, %v9943_v2, 0.0  ;;  %v8601_v49 = vpop.xlane.xlu2 %8600 }
 0xb01   :  { %8633 = vadd.xlane.f32.xlu2 %v8632_v12  ;;  %v15656_v50 = vsub.f32 %v8575_v35, %v8601_v49 }
 0xb02   :  { %v9945_v22 = vpop.eup %9944 }
 0xb03   :  { %v9947_v3 = vpop.eup %9946  ;;  %v8624_v48 = vmul.f32 1.442695, %v15656_v50  ;;  %v8641_v47 = vsel %vm6513_vm11, %v9945_v22, 0.0 }
 0xb04   :  { %v8635_v8 = vsel %vm6513_vm11, %v9947_v3, 0.0 }
 0xb05   :  { %9948 = vpow2.f32 %v8624_v48  ;;  %8636 = vadd.xlane.f32.xlu0 %v8635_v8 }
 0xb07   :  { %v8598_v60 = vpop.xlane.xlu1 %8597 }
 0xb08   :  { %v15659_v15 = vsub.f32 %v8562_v37, %v8598_v60 }
 0xb09   :  { %8642 = vadd.xlane.f32.xlu2 %v8641_v47 }
 0xb0a   :  { %v8622_v24 = vmul.f32 1.442695, %v15659_v15 }
 0xb0b   :  { %v9949_v44 = vpop.eup %9948 }
 0xb0c   :  { %9950 = vpow2.f32 %v8622_v24  ;;  %v8647_v6 = vsel %vm6513_vm11, %v9949_v44, 0.0 }
 0xb0d   :  { %8648 = vadd.xlane.f32.xlu1 %v8647_v6 }
 0xb12   :  { %v9951_v14 = vpop.eup %9950 }
 0xb13   :  { %v8644_v21 = vsel %vm6513_vm11, %v9951_v14, 0.0 }
 0xb14   :  { %8645 = vadd.xlane.f32.xlu0 %v8644_v21 }
 0xb5c   :  { %v8628_v38 = vpop.xlane.xlu0 %8627 }
 0xb5d   :  { %9952 = vlog2.f32 %v8628_v38 }
 0xb63   :  { %v8631_v56 = vpop.xlane.xlu1 %8630  ;;  %v9953_v32 = vpop.eup %9952 }
 0xb64   :  { %9954 = vlog2.f32 %v8631_v56  ;;  %v8651_v46 = vmul.f32 0.6931472, %v9953_v32 }
 0xb66   :  { %v8666_v36 = vsub.f32 %v15634_v26, %v8651_v46 }
 0xb68   :  { %8674 = vst [vmem:[#allocation17] sm:$0x1] %v8666_v36 }
 0xb6a   :  { %v9955_v30 = vpop.eup %9954 }
 0xb6b   :  { %v8653_v45 = vmul.f32 0.6931472, %v9955_v30 }
 0xb6d   :  { %v8667_v13 = vsub.f32 %v15637_v0, %v8653_v45 }
 0xb6f   :  { %8675 = vst [vmem:[#allocation17 + $0x1] sm:$0x1] %v8667_v13 }
 0xb70   :  { %v8640_v19 = vpop.xlane.xlu1 %8639 }
 0xb71   :  { %9956 = vlog2.f32 %v8640_v19 }
 0xb74   :  { %v8634_v11 = vpop.xlane.xlu2 %8633 }
 0xb75   :  { %9958 = vlog2.f32 %v8634_v11 }
 0xb77   :  { %v9957_v28 = vpop.eup %9956 }
 0xb78   :  { %v8659_v27 = vmul.f32 0.6931472, %v9957_v28  ;;  %v8637_v59 = vpop.xlane.xlu0 %8636 }
 0xb79   :  { %9960 = vlog2.f32 %v8637_v59 }
 0xb7a   :  { %v8670_v53 = vsub.f32 %v15642_v62, %v8659_v27 }
 0xb7b   :  { %v9959_v40 = vpop.eup %9958 }
 0xb7c   :  { %v8655_v55 = vmul.f32 0.6931472, %v9959_v40  ;;  %v8643_v42 = vpop.xlane.xlu2 %8642  ;;  %8678 = vst [vmem:[#allocation17 + $0x4] sm:$0x1] %v8670_v53 }
 0xb7d   :  { %9962 = vlog2.f32 %v8643_v42 }
 0xb7e   :  { %v8668_v35 = vsub.f32 %v15645_v7, %v8655_v55 }
 0xb7f   :  { %v9961_v5 = vpop.eup %9960 }
 0xb80   :  { %8676 = vst [vmem:[#allocation17 + $0x2] sm:$0x1] %v8668_v35  ;;  %v8657_v37 = vmul.f32 0.6931472, %v9961_v5  ;;  %v8649_v52 = vpop.xlane.xlu1 %8648 }
 0xb81   :  { %9964 = vlog2.f32 %v8649_v52 }
 0xb82   :  { %v8669_v57 = vsub.f32 %v15651_v25, %v8657_v37 }
 0xb83   :  { %v9963_v39 = vpop.eup %9962 }
 0xb84   :  { %v8661_v58 = vmul.f32 0.6931472, %v9963_v39  ;;  %8677 = vst [vmem:[#allocation17 + $0x3] sm:$0x1] %v8669_v57 }
 0xb86   :  { %v8671_v26 = vsub.f32 %v15647_v16, %v8661_v58 }
 0xb87   :  { %v8646_v31 = vpop.xlane.xlu0 %8645  ;;  %v9965_v23 = vpop.eup %9964 }
 0xb88   :  { %9966 = vlog2.f32 %v8646_v31  ;;  %8679 = vst [vmem:[#allocation17 + $0x5] sm:$0x1] %v8671_v26  ;;  %v8665_v29 = vmul.f32 0.6931472, %v9965_v23 }
 0xb8a   :  { %v8673_v63 = vsub.f32 %v15656_v50, %v8665_v29 }
 0xb8c   :  { %8681 = vst [vmem:[#allocation17 + $0x7] sm:$0x1] %v8673_v63 }
 0xb8e   :  { %v9967_v0 = vpop.eup %9966 }
 0xb8f   :  { %v8663_v43 = vmul.f32 0.6931472, %v9967_v0 }
 0xb91   :  { %v8672_v9 = vsub.f32 %v15659_v15, %v8663_v43 }
 0xb93   :  { %8680 = vst [vmem:[#allocation17 + $0x6] sm:$0x1] %v8672_v9 }
 0xb94   :  { %8694 = dma.vmem_to_hbm [thread:$0]  %s8687_s25, 128, %s8689_s12, [#allocation4], %s10235_s13, %s10235_s13, %s10236_s14  }
 0xb95   :  { %10218 = dma.done.wait [#allocation4], 128  }
 0xb96   :  { %10219 = vsyncadd [#allocation4], 4294967168 }
 0xb97   :  { %8699 = vsyncpa [#allocation3], 1 }
 0xb98   :  { %8700 = vsyncpa [#allocation6], 1 }
 0xb99   :  { %8701 = vsyncpa [#allocation9], 1 }
 0xb9a   :  { %8702 = vsyncpa [#allocation12], 1 }
 0xb9b   :  { %8703 = vsyncpa [#allocation15], 1 }
 0xb9c   :  { %8704 = vsyncpa [#allocation4], 1 }

</bundles_post_ra>
